<compile_context>
chip_gen: v6e
topology: v6e:2x2x1
jax: 0.10.0
libtpu: 0.0.40
codegen_flags: <defaults>
</compile_context>

<pallas_src>
import jax
import jax.numpy as jnp
from jax.experimental import pallas as pl
from jax.experimental.pallas import tpu as pltpu

# ---------------------------------------------------------------------------
# Config (stand-in for the PyTorch `args`)
# ---------------------------------------------------------------------------
EMB_DIM = 32
GNN_HIDDEN = 32
GNN_LAYERS = 2
MLP_LAYERS = 2
CODE_DIM = 32
NODAL_ATT_TYPE = None      # attentive_node_features(None) == identity
B_TILE = 8                 # batch tile per grid step (fills the 8 sublanes)
EXACT_SOFTMAX = False      # True -> exact division (for tight torch allclose)


# ---------------------------------------------------------------------------
# Fused single-call encoder kernel
# ---------------------------------------------------------------------------
def _make_encoder_kernel(N, BT, De, Dh, n_layers, n_mid):
    """Fused forward for static (N utterances, BT batch tile, dims, layers)."""
    NEG_FILL = -1e37   # much more negative than the -(1-adj)*1e30 adjacency
    #                    mask so masked keys underflow to exactly 0 after
    #                    exp(), yet stay finite in f32.  Do NOT use -inf.
    n_gat = 6          # per-layer refs: wq, wk, gb, wr(stacked), wg, bg

    def kernel(*refs):
        idx = 0
        feat_ref, adj_ref, sm_ref, fc1w_ref, fc1b_ref = refs[idx:idx + 5]
        idx += 5
        layer_refs = []
        for _ in range(n_layers):
            layer_refs.append(refs[idx:idx + n_gat])
            idx += n_gat
        w0_refs = refs[idx:idx + n_layers + 1]
        idx += n_layers + 1
        b0_ref = refs[idx]
        idx += 1
        mid_refs = refs[idx:idx + 2 * n_mid]
        idx += 2 * n_mid
        wout_ref, bout_ref = refs[idx], refs[idx + 1]
        idx += 2
        logits_ref = refs[idx]
        idx += 1
        adjb_refs = refs[idx:idx + n_layers]
        idx += n_layers
        h_scr = refs[idx:idx + n_layers + 1]
        idx += n_layers + 1
        kw_ref = refs[idx]
        idx += 1
        assert idx == len(refs)

        f32 = jnp.float32

        # ---- bulk fc1 + relu -> H0, one MXU matmul over all N*BT rows -----
        x2 = feat_ref[...].reshape(N * BT, De)
        h0 = jnp.maximum(
            jnp.dot(x2, fc1w_ref[...], preferred_element_type=f32)
            + fc1b_ref[...], 0.0)
        h_scr[0][...] = h0.reshape(N, BT, Dh)

        # hoisted loop invariant: key index along the lane axis
        iota_keys = jax.lax.broadcasted_iota(jnp.int32, (BT, N), 1)

        # statically padded causal prefix lengths (sublane multiples)
        ip_list = [min(N, max(8, 8 * ((max(i, 1) + 7) // 8))) for i in range(N)]

        for l in range(n_layers):
            wq_ref, wk_ref, gb_ref, wr_ref, wg_ref, bg_ref = layer_refs[l]
            # hoist this layer's weights out of the utterance loop
            wq, wk, gb = wq_ref[...], wk_ref[...], gb_ref[...]
            wr, wg, bg = wr_ref[...], wg_ref[...], bg_ref[...]

            hp = h_scr[l]          # previous layer H        (N, BT, Dh)
            hc = h_scr[l + 1]      # this layer's H1 state   (N, BT, Dh)
            adjb = adjb_refs[l]    # attention rows          (N_q, BT, N_k)

            # rows >= i must read as zero inside the recurrence; this also
            # makes M == 0 and adjB row 0 == 0 at i == 0, as in torch.
            hc[...] = jnp.zeros_like(hc)
            kw_ref[...] = jnp.zeros_like(kw_ref)
            if min(ip_list) < N:
                adjb[...] = jnp.zeros_like(adjb)   # only needed when prefixes
                #                                    don't cover all N lanes

            # TODO(synk): at realistic N (>~32) switch to a bounded-unroll
            # fori_loop and stream adj/s_mask/adjB rows HBM<->VMEM with
            # make_async_copy double-buffering instead of keeping the N^2*B
            # slabs VMEM-resident (v7x: 64 MiB VMEM).
            for i in range(N):
                ip = ip_list[i]
                h_i = hp[i]                                        # (BT, Dh)

                # ---- attention logits: incremental key logits + query ----
                q_i = jnp.sum(h_i * wq, axis=-1, keepdims=True) + gb  # (BT,1)
                alpha = kw_ref[:, :ip] + q_i                       # (BT, ip)
                alpha = alpha - (1.0 - adj_ref[i][:, :ip]) * 1e30
                valid = iota_keys[:, :ip] < i
                alpha = jnp.where(valid, alpha, NEG_FILL)
                mx = jnp.max(alpha, axis=-1, keepdims=True)
                p = jnp.exp(alpha - mx)
                denom = jnp.sum(p, axis=-1, keepdims=True)
                if EXACT_SOFTMAX:
                    attn = p / denom
                else:
                    attn = p * pl.reciprocal(denom, approx=True)   # (BT, ip)

                # ---- relation-gated value mix over the causal prefix -----
                sm_row = sm_ref[i][:, :ip]                         # (BT, ip)
                w_same = attn * sm_row
                w_diff = attn - w_same
                w_same_t = w_same.T                                # (ip, BT)
                w_diff_t = w_diff.T
                K = hc[0:ip]                                       # (ip,BT,Dh)
                a0 = jnp.sum(w_same_t[:, :, None] * K, axis=0)     # (BT, Dh)
                a1 = jnp.sum(w_diff_t[:, :, None] * K, axis=0)
                # reduce-then-project: M = a0 @ Wr0 + a1 @ Wr1, one matmul
                M = jnp.dot(jnp.concatenate([a0, a1], axis=-1), wr,
                            preferred_element_type=f32)            # (BT, Dh)

                # ---- both GRU cells with ONE fused matmul ----------------
                G = jnp.dot(jnp.concatenate([h_i, M], axis=-1), wg,
                            preferred_element_type=f32) + bg       # (BT, 8Dh)
                rz = jax.nn.sigmoid(G[:, 0:4 * Dh])
                r_c, z_c = rz[:, 0:Dh], rz[:, Dh:2 * Dh]
                r_p, z_p = rz[:, 2 * Dh:3 * Dh], rz[:, 3 * Dh:4 * Dh]
                n_c = jnp.tanh(G[:, 4 * Dh:5 * Dh] + r_c * G[:, 5 * Dh:6 * Dh])
                n_p = jnp.tanh(G[:, 6 * Dh:7 * Dh] + r_p * G[:, 7 * Dh:8 * Dh])
                new_row = ((1.0 - z_c) * n_c + z_c * M            # grus_c(h_i, M)
                           + (1.0 - z_p) * n_p + z_p * h_i)       # grus_p(M, h_i)

                hc[i] = new_row
                # incremental key-side logit for future queries
                kw_ref[:, i:i + 1] = jnp.sum(new_row * wk, axis=-1,
                                             keepdims=True)
                # key-lane-dense zero-padded attention row (row 0 -> zeros)
                attn_row = jnp.where(valid, attn, 0.0)             # (BT, ip)
                if ip == N:
                    adjb[i] = attn_row
                else:
                    adjb[i, :, :ip] = attn_row

        # ---- fused out_mlp on all N*BT rows at once ------------------------
        # First MLP layer acts on concat(H0..HL) via per-block weights, so no
        # in-kernel concat; Dropout before the final Linear: identity (eval).
        t = b0_ref[...] + jnp.dot(h_scr[0][...].reshape(N * BT, Dh),
                                  w0_refs[0][...], preferred_element_type=f32)
        for k in range(1, n_layers + 1):
            t = t + jnp.dot(h_scr[k][...].reshape(N * BT, Dh),
                            w0_refs[k][...], preferred_element_type=f32)
        t = jnp.maximum(t, 0.0)
        for m in range(n_mid):
            t = jnp.maximum(
                jnp.dot(t, mid_refs[2 * m][...], preferred_element_type=f32)
                + mid_refs[2 * m + 1][...], 0.0)
        out2 = (jnp.dot(t, wout_ref[...], preferred_element_type=f32)
                + bout_ref[...])
        logits_ref[...] = out2.reshape(N, BT, -1)

    return kernel


# ---------------------------------------------------------------------------
# Parameters (deterministic synthetic init, PyTorch-shaped) + kernel re-layout
# ---------------------------------------------------------------------------
def init_params(key):
    keys = iter(jax.random.split(key, 64))

    def rnd(shape, scale=0.1):
        return scale * jax.random.normal(next(keys), shape, dtype=jnp.float32)

    params = {
        'fc1_w': rnd((EMB_DIM, GNN_HIDDEN)),   # torch fc1.weight.T
        'fc1_b': rnd((1, GNN_HIDDEN)),
        'layers': [],
    }
    for _ in range(GNN_LAYERS):
        params['layers'].append({
            'wq': rnd((1, 1, GNN_HIDDEN)),       # GAT Linear(2Dh,1): Q half
            'wk': rnd((1, 1, GNN_HIDDEN)),       # GAT Linear(2Dh,1): K half
            'gb': rnd((1, 1)),                   # GAT Linear bias
            'wr0': rnd((GNN_HIDDEN, GNN_HIDDEN)),     # Wr0.weight.T (no bias)
            'wr1': rnd((GNN_HIDDEN, GNN_HIDDEN)),     # Wr1.weight.T (no bias)
            'c_wih': rnd((GNN_HIDDEN, 3 * GNN_HIDDEN)),  # grus_c (r,z,n)
            'c_whh': rnd((GNN_HIDDEN, 3 * GNN_HIDDEN)),
            'c_bih': rnd((1, 3 * GNN_HIDDEN)),
            'c_bhh': rnd((1, 3 * GNN_HIDDEN)),
            'p_wih': rnd((GNN_HIDDEN, 3 * GNN_HIDDEN)),  # grus_p
            'p_whh': rnd((GNN_HIDDEN, 3 * GNN_HIDDEN)),
            'p_bih': rnd((1, 3 * GNN_HIDDEN)),
            'p_bhh': rnd((1, 3 * GNN_HIDDEN)),
        })
    in_dim = GNN_HIDDEN * (GNN_LAYERS + 1)
    params['mlp_w0'] = rnd((in_dim, GNN_HIDDEN))
    params['mlp_b0'] = rnd((1, GNN_HIDDEN))
    params['mlp_mid'] = [(rnd((GNN_HIDDEN, GNN_HIDDEN)), rnd((1, GNN_HIDDEN)))
                         for _ in range(MLP_LAYERS - 1)]
    params['mlp_out_w'] = rnd((GNN_HIDDEN, CODE_DIM))
    params['mlp_out_b'] = rnd((1, CODE_DIM))
    return params


def prepare_kernel_params(params):
    """One-time re-layout: stack Wr0/Wr1, fuse the two GRUCells into one gate
    matrix Wg (column Dh-blocks: r_c, z_c, r_p, z_p, n_in_c, n_hid_c, n_in_p,
    n_hid_p; rows 0:Dh multiply h_i, rows Dh:2Dh multiply M), split mlp w0."""
    Dh = GNN_HIDDEN
    layers = []
    for lp in params['layers']:
        c_wih, c_whh = lp['c_wih'], lp['c_whh']
        p_wih, p_whh = lp['p_wih'], lp['p_whh']
        c_bih, c_bhh = lp['c_bih'], lp['c_bhh']
        p_bih, p_bhh = lp['p_bih'], lp['p_bhh']
        z = jnp.zeros((Dh, Dh), jnp.float32)
        top = jnp.concatenate(
            [c_wih[:, 0:Dh], c_wih[:, Dh:2 * Dh],
             p_whh[:, 0:Dh], p_whh[:, Dh:2 * Dh],
             c_wih[:, 2 * Dh:3 * Dh], z, z, p_whh[:, 2 * Dh:3 * Dh]], axis=1)
        bot = jnp.concatenate(
            [c_whh[:, 0:Dh], c_whh[:, Dh:2 * Dh],
             p_wih[:, 0:Dh], p_wih[:, Dh:2 * Dh],
             z, c_whh[:, 2 * Dh:3 * Dh], p_wih[:, 2 * Dh:3 * Dh], z], axis=1)
        wg = jnp.concatenate([top, bot], axis=0)                  # (2Dh, 8Dh)
        bg = jnp.concatenate(
            [c_bih[:, 0:Dh] + c_bhh[:, 0:Dh],
             c_bih[:, Dh:2 * Dh] + c_bhh[:, Dh:2 * Dh],
             p_bih[:, 0:Dh] + p_bhh[:, 0:Dh],
             p_bih[:, Dh:2 * Dh] + p_bhh[:, Dh:2 * Dh],
             c_bih[:, 2 * Dh:3 * Dh], c_bhh[:, 2 * Dh:3 * Dh],
             p_bih[:, 2 * Dh:3 * Dh], p_bhh[:, 2 * Dh:3 * Dh]], axis=1)
        layers.append({
            'wq': lp['wq'].reshape(1, Dh),
            'wk': lp['wk'].reshape(1, Dh),
            'gb': lp['gb'],
            'wr': jnp.concatenate([lp['wr0'], lp['wr1']], axis=0),  # (2Dh, Dh)
            'wg': wg, 'bg': bg,
        })
    w0 = params['mlp_w0']
    w0_blocks = [w0[k * Dh:(k + 1) * Dh, :] for k in range(GNN_LAYERS + 1)]
    return {
        'fc1_w': params['fc1_w'], 'fc1_b': params['fc1_b'],
        'layers': layers,
        'mlp_w0_blocks': w0_blocks, 'mlp_b0': params['mlp_b0'],
        'mlp_mid': params['mlp_mid'],
        'mlp_out_w': params['mlp_out_w'], 'mlp_out_b': params['mlp_out_b'],
    }


# ---------------------------------------------------------------------------
# Full forward pass (one pallas_call, batch-parallel grid)
# ---------------------------------------------------------------------------
def dagnn_encoder_forward(features, adj, s_mask, lengths, params):
    del lengths  # only used when nodal_att_type != None (identity here)
    kp = prepare_kernel_params(params)
    B, N, De = features.shape
    Dh = GNN_HIDDEN
    L = GNN_LAYERS
    n_mid = len(kp['mlp_mid'])

    # pad batch to a sublane-filling tile so every vreg row is used
    BT = B_TILE
    Bp = ((B + BT - 1) // BT) * BT
    if Bp != B:
        features = jnp.pad(features, ((0, Bp - B), (0, 0), (0, 0)))
        adj = jnp.pad(adj, ((0, Bp - B), (0, 0), (0, 0)))
        s_mask = jnp.pad(s_mask, ((0, Bp - B), (0, 0), (0, 0)))

    # kernel layout: utterance axis leading (recurrence indexes ref[i]),
    # batch on sublanes, keys / features on lanes.
    feat_t = jnp.transpose(features, (1, 0, 2))   # (N, Bp, De)
    adj_t = jnp.transpose(adj, (1, 0, 2))         # (N_q, Bp, N_k)
    sm_t = jnp.transpose(s_mask, (1, 0, 2))       # (N_q, Bp, N_k)

    inputs = [feat_t, adj_t, sm_t, kp['fc1_w'], kp['fc1_b']]
    for lp in kp['layers']:
        inputs += [lp['wq'], lp['wk'], lp['gb'], lp['wr'], lp['wg'], lp['bg']]
    inputs += list(kp['mlp_w0_blocks']) + [kp['mlp_b0']]
    for (w, b) in kp['mlp_mid']:
        inputs += [w, b]
    inputs += [kp['mlp_out_w'], kp['mlp_out_b']]

    kernel = _make_encoder_kernel(N, BT, De, Dh, L, n_mid)

    n_btiles = Bp // BT

    def btile(shape, axis):      # tile `axis` (the batch dim) over the grid
        blk = list(shape)
        blk[axis] = BT
        nd = len(shape)
        return pl.BlockSpec(tuple(blk),
                            lambda b, a=axis, n=nd: tuple(b if d == a else 0
                                                          for d in range(n)))

    def whole(x):                # whole array, re-used every grid step
        nd = x.ndim
        return pl.BlockSpec(x.shape, lambda b, n=nd: (0,) * n)

    in_specs = [btile(feat_t.shape, 1), btile(adj_t.shape, 1),
                btile(sm_t.shape, 1)]
    in_specs += [whole(x) for x in inputs[3:]]

    out_shape = tuple([jax.ShapeDtypeStruct((N, Bp, CODE_DIM), jnp.float32)]
                      + [jax.ShapeDtypeStruct((N, Bp, N), jnp.float32)
                         for _ in range(L)])
    out_specs = tuple([btile((N, Bp, CODE_DIM), 1)]
                      + [btile((N, Bp, N), 1) for _ in range(L)])

    outs = pl.pallas_call(
        kernel,
        grid=(n_btiles,),
        out_shape=out_shape,
        in_specs=in_specs,
        out_specs=out_specs,
        scratch_shapes=[pltpu.VMEM((N, BT, Dh), jnp.float32)
                        for _ in range(L + 1)]
                       + [pltpu.VMEM((BT, N), jnp.float32)],
        compiler_params=pltpu.CompilerParams(
            dimension_semantics=("parallel",)),
    )(*inputs)

    logits = jnp.transpose(outs[0], (1, 0, 2))[:B]               # (B,N,code)
    adjB_list = [jnp.zeros((B, 1, N), jnp.float32)]              # pre-loop row
    adjB_list += [jnp.transpose(a, (1, 0, 2))[:B] for a in outs[1:]]
    return logits, adjB_list


if __name__ == "__main__":
    key = jax.random.PRNGKey(0)
    kp_, kf, ka, ks = jax.random.split(key, 4)
    B, N = 2, 8
    params = init_params(kp_)

    features = jax.random.normal(kf, (B, N, EMB_DIM), dtype=jnp.float32)
    strict_lower = jnp.tril(jnp.ones((N, N), jnp.float32), k=-1)
    adj = (jax.random.uniform(ka, (B, N, N)) < 0.7).astype(jnp.float32) * strict_lower
    s_mask = (jax.random.uniform(ks, (B, N, N)) < 0.5).astype(jnp.float32)
    lengths = jnp.full((B,), N, dtype=jnp.int32)

    forward = jax.jit(dagnn_encoder_forward)
    logits, adjB_list = forward(features, adj, s_mask, lengths, params)
    jax.block_until_ready(logits)
    jax.block_until_ready(adjB_list)

    assert logits.shape == (B, N, CODE_DIM)
    assert adjB_list[0].shape == (B, 1, N)
    assert all(a.shape == (B, N, N) for a in adjB_list[1:])
    assert bool(jnp.all(jnp.isfinite(logits)))
    print("KERNEL_OK")
</pallas_src>

<mosaic_0001>
module attributes {stable_mosaic.version = 11 : i64} {
  func.func @kernel(%arg0: i32, %arg1: memref<8x8x32xf32, #tpu.memory_space<vmem>>, %arg2: memref<8x8x8xf32, #tpu.memory_space<vmem>>, %arg3: memref<8x8x8xf32, #tpu.memory_space<vmem>>, %arg4: memref<32x32xf32, #tpu.memory_space<vmem>>, %arg5: memref<1x32xf32, #tpu.memory_space<vmem>>, %arg6: memref<1x32xf32, #tpu.memory_space<vmem>>, %arg7: memref<1x32xf32, #tpu.memory_space<vmem>>, %arg8: memref<1x1xf32, #tpu.memory_space<vmem>>, %arg9: memref<64x32xf32, #tpu.memory_space<vmem>>, %arg10: memref<64x256xf32, #tpu.memory_space<vmem>>, %arg11: memref<1x256xf32, #tpu.memory_space<vmem>>, %arg12: memref<1x32xf32, #tpu.memory_space<vmem>>, %arg13: memref<1x32xf32, #tpu.memory_space<vmem>>, %arg14: memref<1x1xf32, #tpu.memory_space<vmem>>, %arg15: memref<64x32xf32, #tpu.memory_space<vmem>>, %arg16: memref<64x256xf32, #tpu.memory_space<vmem>>, %arg17: memref<1x256xf32, #tpu.memory_space<vmem>>, %arg18: memref<32x32xf32, #tpu.memory_space<vmem>>, %arg19: memref<32x32xf32, #tpu.memory_space<vmem>>, %arg20: memref<32x32xf32, #tpu.memory_space<vmem>>, %arg21: memref<1x32xf32, #tpu.memory_space<vmem>>, %arg22: memref<32x32xf32, #tpu.memory_space<vmem>>, %arg23: memref<1x32xf32, #tpu.memory_space<vmem>>, %arg24: memref<32x32xf32, #tpu.memory_space<vmem>>, %arg25: memref<1x32xf32, #tpu.memory_space<vmem>>, %arg26: memref<8x8x32xf32, #tpu.memory_space<vmem>>, %arg27: memref<8x8x8xf32, #tpu.memory_space<vmem>>, %arg28: memref<8x8x8xf32, #tpu.memory_space<vmem>>, %arg29: memref<8x8x32xf32, #tpu.memory_space<vmem>>, %arg30: memref<8x8x32xf32, #tpu.memory_space<vmem>>, %arg31: memref<8x8x32xf32, #tpu.memory_space<vmem>>, %arg32: memref<8x8xf32, #tpu.memory_space<vmem>>) attributes {dimension_semantics = [#tpu.dimension_semantics<parallel>], iteration_bounds = array<i64: 1>, scalar_prefetch = 0 : i64, scratch_operands = 4 : i64, tpu.core_type = #tpu.core_type<tc>, window_params = [{transform_indices = @transform_0, window_bounds = array<i64: 8, 8, 32>}, {transform_indices = @transform_1, window_bounds = array<i64: 8, 8, 8>}, {transform_indices = @transform_2, window_bounds = array<i64: 8, 8, 8>}, {pipeline_mode = #tpu.pipeline_mode<synchronous>, transform_indices = @transform_3, window_bounds = array<i64: 32, 32>}, {pipeline_mode = #tpu.pipeline_mode<synchronous>, transform_indices = @transform_4, window_bounds = array<i64: 1, 32>}, {pipeline_mode = #tpu.pipeline_mode<synchronous>, transform_indices = @transform_5, window_bounds = array<i64: 1, 32>}, {pipeline_mode = #tpu.pipeline_mode<synchronous>, transform_indices = @transform_6, window_bounds = array<i64: 1, 32>}, {pipeline_mode = #tpu.pipeline_mode<synchronous>, transform_indices = @transform_7, window_bounds = array<i64: 1, 1>}, {pipeline_mode = #tpu.pipeline_mode<synchronous>, transform_indices = @transform_8, window_bounds = array<i64: 64, 32>}, {pipeline_mode = #tpu.pipeline_mode<synchronous>, transform_indices = @transform_9, window_bounds = array<i64: 64, 256>}, {pipeline_mode = #tpu.pipeline_mode<synchronous>, transform_indices = @transform_10, window_bounds = array<i64: 1, 256>}, {pipeline_mode = #tpu.pipeline_mode<synchronous>, transform_indices = @transform_11, window_bounds = array<i64: 1, 32>}, {pipeline_mode = #tpu.pipeline_mode<synchronous>, transform_indices = @transform_12, window_bounds = array<i64: 1, 32>}, {pipeline_mode = #tpu.pipeline_mode<synchronous>, transform_indices = @transform_13, window_bounds = array<i64: 1, 1>}, {pipeline_mode = #tpu.pipeline_mode<synchronous>, transform_indices = @transform_14, window_bounds = array<i64: 64, 32>}, {pipeline_mode = #tpu.pipeline_mode<synchronous>, transform_indices = @transform_15, window_bounds = array<i64: 64, 256>}, {pipeline_mode = #tpu.pipeline_mode<synchronous>, transform_indices = @transform_16, window_bounds = array<i64: 1, 256>}, {pipeline_mode = #tpu.pipeline_mode<synchronous>, transform_indices = @transform_17, window_bounds = array<i64: 32, 32>}, {pipeline_mode = #tpu.pipeline_mode<synchronous>, transform_indices = @transform_18, window_bounds = array<i64: 32, 32>}, {pipeline_mode = #tpu.pipeline_mode<synchronous>, transform_indices = @transform_19, window_bounds = array<i64: 32, 32>}, {pipeline_mode = #tpu.pipeline_mode<synchronous>, transform_indices = @transform_20, window_bounds = array<i64: 1, 32>}, {pipeline_mode = #tpu.pipeline_mode<synchronous>, transform_indices = @transform_21, window_bounds = array<i64: 32, 32>}, {pipeline_mode = #tpu.pipeline_mode<synchronous>, transform_indices = @transform_22, window_bounds = array<i64: 1, 32>}, {pipeline_mode = #tpu.pipeline_mode<synchronous>, transform_indices = @transform_23, window_bounds = array<i64: 32, 32>}, {pipeline_mode = #tpu.pipeline_mode<synchronous>, transform_indices = @transform_24, window_bounds = array<i64: 1, 32>}, {transform_indices = @transform_25, window_bounds = array<i64: 8, 8, 32>}, {transform_indices = @transform_26, window_bounds = array<i64: 8, 8, 8>}, {transform_indices = @transform_27, window_bounds = array<i64: 8, 8, 8>}]} {
    %c0 = arith.constant 0 : index
    %c0_0 = arith.constant 0 : index
    %c0_1 = arith.constant 0 : index
    %0 = vector.load %arg1[%c0, %c0_0, %c0_1] : memref<8x8x32xf32, #tpu.memory_space<vmem>>, vector<8x8x32xf32>
    %1 = vector.shape_cast %0 : vector<8x8x32xf32> to vector<64x32xf32>
    %c0_2 = arith.constant 0 : index
    %c0_3 = arith.constant 0 : index
    %2 = vector.load %arg4[%c0_2, %c0_3] : memref<32x32xf32, #tpu.memory_space<vmem>>, vector<32x32xf32>
    %cst = arith.constant dense<0.000000e+00> : vector<64x32xf32>
    %3 = tpu.matmul %1, %2, %cst {dimension_numbers = #tpu.dot_dimension_numbers<[1], [0], [0], [1], [0, 0, 1, 1], [], []>} : vector<64x32xf32>, vector<32x32xf32>, vector<64x32xf32> -> vector<64x32xf32>
    %c0_4 = arith.constant 0 : index
    %c0_5 = arith.constant 0 : index
    %4 = vector.load %arg5[%c0_4, %c0_5] : memref<1x32xf32, #tpu.memory_space<vmem>>, vector<1x32xf32>
    %5 = vector.broadcast %4 : vector<1x32xf32> to vector<64x32xf32>
    %6 = arith.addf %3, %5 : vector<64x32xf32>
    %cst_6 = arith.constant 0.000000e+00 : f32
    %7 = vector.broadcast %cst_6 : f32 to vector<64x32xf32>
    %8 = arith.maximumf %6, %7 : vector<64x32xf32>
    %9 = vector.shape_cast %8 : vector<64x32xf32> to vector<8x8x32xf32>
    %c0_7 = arith.constant 0 : index
    %c0_8 = arith.constant 0 : index
    %c0_9 = arith.constant 0 : index
    %10 = vector.load %arg29[%c0_7, %c0_8, %c0_9] : memref<8x8x32xf32, #tpu.memory_space<vmem>>, vector<8x8x32xf32>
    tpu.vector_store %arg29[%c0_7, %c0_8, %c0_9], %9 {strides = array<i32>} : memref<8x8x32xf32, #tpu.memory_space<vmem>>, vector<8x8x32xf32>,
    %11 = tpu.iota {dimensions = array<i32: 1>} : vector<8x8xi32>
    %c0_10 = arith.constant 0 : index
    %c0_11 = arith.constant 0 : index
    %12 = vector.load %arg6[%c0_10, %c0_11] : memref<1x32xf32, #tpu.memory_space<vmem>>, vector<1x32xf32>
    %c0_12 = arith.constant 0 : index
    %c0_13 = arith.constant 0 : index
    %13 = vector.load %arg7[%c0_12, %c0_13] : memref<1x32xf32, #tpu.memory_space<vmem>>, vector<1x32xf32>
    %c0_14 = arith.constant 0 : index
    %c0_15 = arith.constant 0 : index
    %14 = vector.load %arg8[%c0_14, %c0_15] : memref<1x1xf32, #tpu.memory_space<vmem>>, vector<1x1xf32>
    %c0_16 = arith.constant 0 : index
    %c0_17 = arith.constant 0 : index
    %15 = vector.load %arg9[%c0_16, %c0_17] : memref<64x32xf32, #tpu.memory_space<vmem>>, vector<64x32xf32>
    %c0_18 = arith.constant 0 : index
    %c0_19 = arith.constant 0 : index
    %16 = vector.load %arg10[%c0_18, %c0_19] : memref<64x256xf32, #tpu.memory_space<vmem>>, vector<64x256xf32>
    %c0_20 = arith.constant 0 : index
    %c0_21 = arith.constant 0 : index
    %17 = vector.load %arg11[%c0_20, %c0_21] : memref<1x256xf32, #tpu.memory_space<vmem>>, vector<1x256xf32>
    %cst_22 = arith.constant 0.000000e+00 : f32
    %18 = vector.broadcast %cst_22 : f32 to vector<8x8x32xf32>
    %c0_23 = arith.constant 0 : index
    %c0_24 = arith.constant 0 : index
    %c0_25 = arith.constant 0 : index
    %19 = vector.load %arg30[%c0_23, %c0_24, %c0_25] : memref<8x8x32xf32, #tpu.memory_space<vmem>>, vector<8x8x32xf32>
    tpu.vector_store %arg30[%c0_23, %c0_24, %c0_25], %18 {strides = array<i32>} : memref<8x8x32xf32, #tpu.memory_space<vmem>>, vector<8x8x32xf32>,
    %cst_26 = arith.constant 0.000000e+00 : f32
    %20 = vector.broadcast %cst_26 : f32 to vector<8x8xf32>
    %c0_27 = arith.constant 0 : index
    %c0_28 = arith.constant 0 : index
    %21 = vector.load %arg32[%c0_27, %c0_28] : memref<8x8xf32, #tpu.memory_space<vmem>>, vector<8x8xf32>
    tpu.vector_store %arg32[%c0_27, %c0_28], %20 {strides = array<i32>} : memref<8x8xf32, #tpu.memory_space<vmem>>, vector<8x8xf32>,
    %c0_29 = arith.constant 0 : index
    %c0_30 = arith.constant 0 : index
    %c0_31 = arith.constant 0 : index
    %22 = vector.load %arg29[%c0_29, %c0_30, %c0_31] : memref<8x8x32xf32, #tpu.memory_space<vmem>>, vector<1x8x32xf32>
    %23 = vector.shape_cast %22 : vector<1x8x32xf32> to vector<8x32xf32>
    %24 = vector.broadcast %12 : vector<1x32xf32> to vector<8x32xf32>
    %25 = arith.mulf %23, %24 : vector<8x32xf32>
    %cst_32 = arith.constant dense<0.000000e+00> : vector<8xf32>
    %26 = vector.multi_reduction <add>, %25, %cst_32 [1] : vector<8x32xf32> to vector<8xf32>
    %27 = vector.shape_cast %26 : vector<8xf32> to vector<8x1xf32>
    %28 = vector.broadcast %14 : vector<1x1xf32> to vector<8x1xf32>
    %29 = arith.addf %27, %28 : vector<8x1xf32>
    %c0_33 = arith.constant 0 : index
    %c0_34 = arith.constant 0 : index
    %30 = vector.load %arg32[%c0_33, %c0_34] : memref<8x8xf32, #tpu.memory_space<vmem>>, vector<8x8xf32>
    %31 = vector.broadcast %29 : vector<8x1xf32> to vector<8x8xf32>
    %32 = arith.addf %30, %31 : vector<8x8xf32>
    %c0_35 = arith.constant 0 : index
    %c0_36 = arith.constant 0 : index
    %c0_37 = arith.constant 0 : index
    %33 = vector.load %arg2[%c0_35, %c0_36, %c0_37] : memref<8x8x8xf32, #tpu.memory_space<vmem>>, vector<1x8x8xf32>
    %34 = vector.shape_cast %33 : vector<1x8x8xf32> to vector<8x8xf32>
    %cst_38 = arith.constant 1.000000e+00 : f32
    %35 = vector.broadcast %cst_38 : f32 to vector<8x8xf32>
    %36 = arith.subf %35, %34 : vector<8x8xf32>
    %cst_39 = arith.constant 1.000000e+30 : f32
    %37 = vector.broadcast %cst_39 : f32 to vector<8x8xf32>
    %38 = arith.mulf %36, %37 : vector<8x8xf32>
    %39 = arith.subf %32, %38 : vector<8x8xf32>
    %c0_i32 = arith.constant 0 : i32
    %40 = vector.broadcast %c0_i32 : i32 to vector<8x8xi32>
    %41 = arith.cmpi slt, %11, %40 : vector<8x8xi32>
    %cst_40 = arith.constant -9.99999993E+36 : f32
    %42 = vector.broadcast %cst_40 : f32 to vector<8x8xf32>
    %43 = arith.select %41, %39, %42 : vector<8x8xi1>, vector<8x8xf32>
    %cst_41 = arith.constant dense<0xFF800000> : vector<8xf32>
    %44 = vector.multi_reduction <maximumf>, %43, %cst_41 [1] : vector<8x8xf32> to vector<8xf32>
    %45 = vector.shape_cast %44 : vector<8xf32> to vector<8x1xf32>
    %46 = vector.broadcast %45 : vector<8x1xf32> to vector<8x8xf32>
    %47 = arith.subf %43, %46 : vector<8x8xf32>
    %48 = math.exp %47 : vector<8x8xf32>
    %cst_42 = arith.constant dense<0.000000e+00> : vector<8xf32>
    %49 = vector.multi_reduction <add>, %48, %cst_42 [1] : vector<8x8xf32> to vector<8xf32>
    %50 = vector.shape_cast %49 : vector<8xf32> to vector<8x1xf32>
    %51 = tpu.reciprocal %50 {approx = true} : vector<8x1xf32> -> vector<8x1xf32>
    %52 = vector.broadcast %51 : vector<8x1xf32> to vector<8x8xf32>
    %53 = arith.mulf %48, %52 : vector<8x8xf32>
    %c0_43 = arith.constant 0 : index
    %c0_44 = arith.constant 0 : index
    %c0_45 = arith.constant 0 : index
    %54 = vector.load %arg3[%c0_43, %c0_44, %c0_45] : memref<8x8x8xf32, #tpu.memory_space<vmem>>, vector<1x8x8xf32>
    %55 = vector.shape_cast %54 : vector<1x8x8xf32> to vector<8x8xf32>
    %56 = arith.mulf %53, %55 : vector<8x8xf32>
    %57 = arith.subf %53, %56 : vector<8x8xf32>
    %58 = tpu.transpose %56, [1, 0] : vector<8x8xf32> -> vector<8x8xf32>
    %59 = tpu.transpose %57, [1, 0] : vector<8x8xf32> -> vector<8x8xf32>
    %c0_46 = arith.constant 0 : index
    %c0_47 = arith.constant 0 : index
    %c0_48 = arith.constant 0 : index
    %60 = vector.load %arg30[%c0_46, %c0_47, %c0_48] : memref<8x8x32xf32, #tpu.memory_space<vmem>>, vector<8x8x32xf32>
    %61 = vector.shape_cast %58 : vector<8x8xf32> to vector<8x8x1xf32>
    %62 = vector.broadcast %61 : vector<8x8x1xf32> to vector<8x8x32xf32>
    %63 = arith.mulf %62, %60 : vector<8x8x32xf32>
    %cst_49 = arith.constant dense<0.000000e+00> : vector<8x32xf32>
    %64 = vector.multi_reduction <add>, %63, %cst_49 [0] : vector<8x8x32xf32> to vector<8x32xf32>
    %65 = vector.shape_cast %59 : vector<8x8xf32> to vector<8x8x1xf32>
    %66 = vector.broadcast %65 : vector<8x8x1xf32> to vector<8x8x32xf32>
    %67 = arith.mulf %66, %60 : vector<8x8x32xf32>
    %cst_50 = arith.constant dense<0.000000e+00> : vector<8x32xf32>
    %68 = vector.multi_reduction <add>, %67, %cst_50 [0] : vector<8x8x32xf32> to vector<8x32xf32>
    %69 = tpu.concatenate %64, %68 in 1 : vector<8x32xf32>, vector<8x32xf32> -> vector<8x64xf32>
    %cst_51 = arith.constant dense<0.000000e+00> : vector<8x32xf32>
    %70 = tpu.matmul %69, %15, %cst_51 {dimension_numbers = #tpu.dot_dimension_numbers<[1], [0], [0], [1], [0, 0, 1, 1], [], []>} : vector<8x64xf32>, vector<64x32xf32>, vector<8x32xf32> -> vector<8x32xf32>
    %71 = tpu.concatenate %23, %70 in 1 : vector<8x32xf32>, vector<8x32xf32> -> vector<8x64xf32>
    %cst_52 = arith.constant dense<0.000000e+00> : vector<8x256xf32>
    %72 = tpu.matmul %71, %16, %cst_52 {dimension_numbers = #tpu.dot_dimension_numbers<[1], [0], [0], [1], [0, 0, 1, 1], [], []>} : vector<8x64xf32>, vector<64x256xf32>, vector<8x256xf32> -> vector<8x256xf32>
    %73 = vector.broadcast %17 : vector<1x256xf32> to vector<8x256xf32>
    %74 = arith.addf %72, %73 : vector<8x256xf32>
    %75 = vector.extract_strided_slice %74 {offsets = [0, 0], sizes = [8, 128], strides = [1, 1]} : vector<8x256xf32> to vector<8x128xf32>
    %76 = arith.negf %75 : vector<8x128xf32>
    %77 = math.exp %76 : vector<8x128xf32>
    %cst_53 = arith.constant 1.000000e+00 : f32
    %78 = vector.broadcast %cst_53 : f32 to vector<8x128xf32>
    %79 = arith.addf %78, %77 : vector<8x128xf32>
    %80 = arith.divf %78, %79 : vector<8x128xf32>
    %81 = vector.extract_strided_slice %80 {offsets = [0, 0], sizes = [8, 32], strides = [1, 1]} : vector<8x128xf32> to vector<8x32xf32>
    %82 = vector.extract_strided_slice %80 {offsets = [0, 32], sizes = [8, 32], strides = [1, 1]} : vector<8x128xf32> to vector<8x32xf32>
    %83 = vector.extract_strided_slice %80 {offsets = [0, 64], sizes = [8, 32], strides = [1, 1]} : vector<8x128xf32> to vector<8x32xf32>
    %84 = vector.extract_strided_slice %80 {offsets = [0, 96], sizes = [8, 32], strides = [1, 1]} : vector<8x128xf32> to vector<8x32xf32>
    %85 = vector.extract_strided_slice %74 {offsets = [0, 128], sizes = [8, 32], strides = [1, 1]} : vector<8x256xf32> to vector<8x32xf32>
    %86 = vector.extract_strided_slice %74 {offsets = [0, 160], sizes = [8, 32], strides = [1, 1]} : vector<8x256xf32> to vector<8x32xf32>
    %87 = arith.mulf %81, %86 : vector<8x32xf32>
    %88 = arith.addf %85, %87 : vector<8x32xf32>
    %89 = math.tanh %88 : vector<8x32xf32>
    %90 = vector.extract_strided_slice %74 {offsets = [0, 192], sizes = [8, 32], strides = [1, 1]} : vector<8x256xf32> to vector<8x32xf32>
    %91 = vector.extract_strided_slice %74 {offsets = [0, 224], sizes = [8, 32], strides = [1, 1]} : vector<8x256xf32> to vector<8x32xf32>
    %92 = arith.mulf %83, %91 : vector<8x32xf32>
    %93 = arith.addf %90, %92 : vector<8x32xf32>
    %94 = math.tanh %93 : vector<8x32xf32>
    %cst_54 = arith.constant 1.000000e+00 : f32
    %95 = vector.broadcast %cst_54 : f32 to vector<8x32xf32>
    %96 = arith.subf %95, %82 : vector<8x32xf32>
    %97 = arith.mulf %96, %89 : vector<8x32xf32>
    %98 = arith.mulf %82, %70 : vector<8x32xf32>
    %99 = arith.addf %97, %98 : vector<8x32xf32>
    %cst_55 = arith.constant 1.000000e+00 : f32
    %100 = vector.broadcast %cst_55 : f32 to vector<8x32xf32>
    %101 = arith.subf %100, %84 : vector<8x32xf32>
    %102 = arith.mulf %101, %94 : vector<8x32xf32>
    %103 = arith.addf %99, %102 : vector<8x32xf32>
    %104 = arith.mulf %84, %23 : vector<8x32xf32>
    %105 = arith.addf %103, %104 : vector<8x32xf32>
    %c0_56 = arith.constant 0 : index
    %c0_57 = arith.constant 0 : index
    %c0_58 = arith.constant 0 : index
    %106 = vector.load %arg30[%c0_56, %c0_57, %c0_58] : memref<8x8x32xf32, #tpu.memory_space<vmem>>, vector<1x8x32xf32>
    %107 = vector.shape_cast %106 : vector<1x8x32xf32> to vector<8x32xf32>
    %108 = vector.shape_cast %105 : vector<8x32xf32> to vector<1x8x32xf32>
    tpu.vector_store %arg30[%c0_56, %c0_57, %c0_58], %108 {strides = array<i32>} : memref<8x8x32xf32, #tpu.memory_space<vmem>>, vector<1x8x32xf32>,
    %109 = vector.broadcast %13 : vector<1x32xf32> to vector<8x32xf32>
    %110 = arith.mulf %105, %109 : vector<8x32xf32>
    %cst_59 = arith.constant dense<0.000000e+00> : vector<8xf32>
    %111 = vector.multi_reduction <add>, %110, %cst_59 [1] : vector<8x32xf32> to vector<8xf32>
    %112 = vector.shape_cast %111 : vector<8xf32> to vector<8x1xf32>
    %c0_60 = arith.constant 0 : index
    %c0_61 = arith.constant 0 : index
    %113 = vector.load %arg32[%c0_60, %c0_61] : memref<8x8xf32, #tpu.memory_space<vmem>>, vector<8x1xf32>
    tpu.vector_store %arg32[%c0_60, %c0_61], %112 {strides = array<i32>} : memref<8x8xf32, #tpu.memory_space<vmem>>, vector<8x1xf32>,
    %cst_62 = arith.constant 0.000000e+00 : f32
    %114 = vector.broadcast %cst_62 : f32 to vector<8x8xf32>
    %115 = arith.select %41, %53, %114 : vector<8x8xi1>, vector<8x8xf32>
    %c0_63 = arith.constant 0 : index
    %c0_64 = arith.constant 0 : index
    %c0_65 = arith.constant 0 : index
    %116 = vector.load %arg27[%c0_63, %c0_64, %c0_65] : memref<8x8x8xf32, #tpu.memory_space<vmem>>, vector<1x8x8xf32>
    %117 = vector.shape_cast %116 : vector<1x8x8xf32> to vector<8x8xf32>
    %118 = vector.shape_cast %115 : vector<8x8xf32> to vector<1x8x8xf32>
    tpu.vector_store %arg27[%c0_63, %c0_64, %c0_65], %118 {strides = array<i32>} : memref<8x8x8xf32, #tpu.memory_space<vmem>>, vector<1x8x8xf32>,
    %c1 = arith.constant 1 : index
    %c0_66 = arith.constant 0 : index
    %c0_67 = arith.constant 0 : index
    %119 = vector.load %arg29[%c1, %c0_66, %c0_67] : memref<8x8x32xf32, #tpu.memory_space<vmem>>, vector<1x8x32xf32>
    %120 = vector.shape_cast %119 : vector<1x8x32xf32> to vector<8x32xf32>
    %121 = vector.broadcast %12 : vector<1x32xf32> to vector<8x32xf32>
    %122 = arith.mulf %120, %121 : vector<8x32xf32>
    %cst_68 = arith.constant dense<0.000000e+00> : vector<8xf32>
    %123 = vector.multi_reduction <add>, %122, %cst_68 [1] : vector<8x32xf32> to vector<8xf32>
    %124 = vector.shape_cast %123 : vector<8xf32> to vector<8x1xf32>
    %125 = vector.broadcast %14 : vector<1x1xf32> to vector<8x1xf32>
    %126 = arith.addf %124, %125 : vector<8x1xf32>
    %c0_69 = arith.constant 0 : index
    %c0_70 = arith.constant 0 : index
    %127 = vector.load %arg32[%c0_69, %c0_70] : memref<8x8xf32, #tpu.memory_space<vmem>>, vector<8x8xf32>
    %128 = vector.broadcast %126 : vector<8x1xf32> to vector<8x8xf32>
    %129 = arith.addf %127, %128 : vector<8x8xf32>
    %c1_71 = arith.constant 1 : index
    %c0_72 = arith.constant 0 : index
    %c0_73 = arith.constant 0 : index
    %130 = vector.load %arg2[%c1_71, %c0_72, %c0_73] : memref<8x8x8xf32, #tpu.memory_space<vmem>>, vector<1x8x8xf32>
    %131 = vector.shape_cast %130 : vector<1x8x8xf32> to vector<8x8xf32>
    %cst_74 = arith.constant 1.000000e+00 : f32
    %132 = vector.broadcast %cst_74 : f32 to vector<8x8xf32>
    %133 = arith.subf %132, %131 : vector<8x8xf32>
    %cst_75 = arith.constant 1.000000e+30 : f32
    %134 = vector.broadcast %cst_75 : f32 to vector<8x8xf32>
    %135 = arith.mulf %133, %134 : vector<8x8xf32>
    %136 = arith.subf %129, %135 : vector<8x8xf32>
    %c1_i32 = arith.constant 1 : i32
    %137 = vector.broadcast %c1_i32 : i32 to vector<8x8xi32>
    %138 = arith.cmpi slt, %11, %137 : vector<8x8xi32>
    %cst_76 = arith.constant -9.99999993E+36 : f32
    %139 = vector.broadcast %cst_76 : f32 to vector<8x8xf32>
    %140 = arith.select %138, %136, %139 : vector<8x8xi1>, vector<8x8xf32>
    %cst_77 = arith.constant dense<0xFF800000> : vector<8xf32>
    %141 = vector.multi_reduction <maximumf>, %140, %cst_77 [1] : vector<8x8xf32> to vector<8xf32>
    %142 = vector.shape_cast %141 : vector<8xf32> to vector<8x1xf32>
    %143 = vector.broadcast %142 : vector<8x1xf32> to vector<8x8xf32>
    %144 = arith.subf %140, %143 : vector<8x8xf32>
    %145 = math.exp %144 : vector<8x8xf32>
    %cst_78 = arith.constant dense<0.000000e+00> : vector<8xf32>
    %146 = vector.multi_reduction <add>, %145, %cst_78 [1] : vector<8x8xf32> to vector<8xf32>
    %147 = vector.shape_cast %146 : vector<8xf32> to vector<8x1xf32>
    %148 = tpu.reciprocal %147 {approx = true} : vector<8x1xf32> -> vector<8x1xf32>
    %149 = vector.broadcast %148 : vector<8x1xf32> to vector<8x8xf32>
    %150 = arith.mulf %145, %149 : vector<8x8xf32>
    %c1_79 = arith.constant 1 : index
    %c0_80 = arith.constant 0 : index
    %c0_81 = arith.constant 0 : index
    %151 = vector.load %arg3[%c1_79, %c0_80, %c0_81] : memref<8x8x8xf32, #tpu.memory_space<vmem>>, vector<1x8x8xf32>
    %152 = vector.shape_cast %151 : vector<1x8x8xf32> to vector<8x8xf32>
    %153 = arith.mulf %150, %152 : vector<8x8xf32>
    %154 = arith.subf %150, %153 : vector<8x8xf32>
    %155 = tpu.transpose %153, [1, 0] : vector<8x8xf32> -> vector<8x8xf32>
    %156 = tpu.transpose %154, [1, 0] : vector<8x8xf32> -> vector<8x8xf32>
    %c0_82 = arith.constant 0 : index
    %c0_83 = arith.constant 0 : index
    %c0_84 = arith.constant 0 : index
    %157 = vector.load %arg30[%c0_82, %c0_83, %c0_84] : memref<8x8x32xf32, #tpu.memory_space<vmem>>, vector<8x8x32xf32>
    %158 = vector.shape_cast %155 : vector<8x8xf32> to vector<8x8x1xf32>
    %159 = vector.broadcast %158 : vector<8x8x1xf32> to vector<8x8x32xf32>
    %160 = arith.mulf %159, %157 : vector<8x8x32xf32>
    %cst_85 = arith.constant dense<0.000000e+00> : vector<8x32xf32>
    %161 = vector.multi_reduction <add>, %160, %cst_85 [0] : vector<8x8x32xf32> to vector<8x32xf32>
    %162 = vector.shape_cast %156 : vector<8x8xf32> to vector<8x8x1xf32>
    %163 = vector.broadcast %162 : vector<8x8x1xf32> to vector<8x8x32xf32>
    %164 = arith.mulf %163, %157 : vector<8x8x32xf32>
    %cst_86 = arith.constant dense<0.000000e+00> : vector<8x32xf32>
    %165 = vector.multi_reduction <add>, %164, %cst_86 [0] : vector<8x8x32xf32> to vector<8x32xf32>
    %166 = tpu.concatenate %161, %165 in 1 : vector<8x32xf32>, vector<8x32xf32> -> vector<8x64xf32>
    %cst_87 = arith.constant dense<0.000000e+00> : vector<8x32xf32>
    %167 = tpu.matmul %166, %15, %cst_87 {dimension_numbers = #tpu.dot_dimension_numbers<[1], [0], [0], [1], [0, 0, 1, 1], [], []>} : vector<8x64xf32>, vector<64x32xf32>, vector<8x32xf32> -> vector<8x32xf32>
    %168 = tpu.concatenate %120, %167 in 1 : vector<8x32xf32>, vector<8x32xf32> -> vector<8x64xf32>
    %cst_88 = arith.constant dense<0.000000e+00> : vector<8x256xf32>
    %169 = tpu.matmul %168, %16, %cst_88 {dimension_numbers = #tpu.dot_dimension_numbers<[1], [0], [0], [1], [0, 0, 1, 1], [], []>} : vector<8x64xf32>, vector<64x256xf32>, vector<8x256xf32> -> vector<8x256xf32>
    %170 = vector.broadcast %17 : vector<1x256xf32> to vector<8x256xf32>
    %171 = arith.addf %169, %170 : vector<8x256xf32>
    %172 = vector.extract_strided_slice %171 {offsets = [0, 0], sizes = [8, 128], strides = [1, 1]} : vector<8x256xf32> to vector<8x128xf32>
    %173 = arith.negf %172 : vector<8x128xf32>
    %174 = math.exp %173 : vector<8x128xf32>
    %cst_89 = arith.constant 1.000000e+00 : f32
    %175 = vector.broadcast %cst_89 : f32 to vector<8x128xf32>
    %176 = arith.addf %175, %174 : vector<8x128xf32>
    %177 = arith.divf %175, %176 : vector<8x128xf32>
    %178 = vector.extract_strided_slice %177 {offsets = [0, 0], sizes = [8, 32], strides = [1, 1]} : vector<8x128xf32> to vector<8x32xf32>
    %179 = vector.extract_strided_slice %177 {offsets = [0, 32], sizes = [8, 32], strides = [1, 1]} : vector<8x128xf32> to vector<8x32xf32>
    %180 = vector.extract_strided_slice %177 {offsets = [0, 64], sizes = [8, 32], strides = [1, 1]} : vector<8x128xf32> to vector<8x32xf32>
    %181 = vector.extract_strided_slice %177 {offsets = [0, 96], sizes = [8, 32], strides = [1, 1]} : vector<8x128xf32> to vector<8x32xf32>
    %182 = vector.extract_strided_slice %171 {offsets = [0, 128], sizes = [8, 32], strides = [1, 1]} : vector<8x256xf32> to vector<8x32xf32>
    %183 = vector.extract_strided_slice %171 {offsets = [0, 160], sizes = [8, 32], strides = [1, 1]} : vector<8x256xf32> to vector<8x32xf32>
    %184 = arith.mulf %178, %183 : vector<8x32xf32>
    %185 = arith.addf %182, %184 : vector<8x32xf32>
    %186 = math.tanh %185 : vector<8x32xf32>
    %187 = vector.extract_strided_slice %171 {offsets = [0, 192], sizes = [8, 32], strides = [1, 1]} : vector<8x256xf32> to vector<8x32xf32>
    %188 = vector.extract_strided_slice %171 {offsets = [0, 224], sizes = [8, 32], strides = [1, 1]} : vector<8x256xf32> to vector<8x32xf32>
    %189 = arith.mulf %180, %188 : vector<8x32xf32>
    %190 = arith.addf %187, %189 : vector<8x32xf32>
    %191 = math.tanh %190 : vector<8x32xf32>
    %cst_90 = arith.constant 1.000000e+00 : f32
    %192 = vector.broadcast %cst_90 : f32 to vector<8x32xf32>
    %193 = arith.subf %192, %179 : vector<8x32xf32>
    %194 = arith.mulf %193, %186 : vector<8x32xf32>
    %195 = arith.mulf %179, %167 : vector<8x32xf32>
    %196 = arith.addf %194, %195 : vector<8x32xf32>
    %cst_91 = arith.constant 1.000000e+00 : f32
    %197 = vector.broadcast %cst_91 : f32 to vector<8x32xf32>
    %198 = arith.subf %197, %181 : vector<8x32xf32>
    %199 = arith.mulf %198, %191 : vector<8x32xf32>
    %200 = arith.addf %196, %199 : vector<8x32xf32>
    %201 = arith.mulf %181, %120 : vector<8x32xf32>
    %202 = arith.addf %200, %201 : vector<8x32xf32>
    %c1_92 = arith.constant 1 : index
    %c0_93 = arith.constant 0 : index
    %c0_94 = arith.constant 0 : index
    %203 = vector.load %arg30[%c1_92, %c0_93, %c0_94] : memref<8x8x32xf32, #tpu.memory_space<vmem>>, vector<1x8x32xf32>
    %204 = vector.shape_cast %203 : vector<1x8x32xf32> to vector<8x32xf32>
    %205 = vector.shape_cast %202 : vector<8x32xf32> to vector<1x8x32xf32>
    tpu.vector_store %arg30[%c1_92, %c0_93, %c0_94], %205 {strides = array<i32>} : memref<8x8x32xf32, #tpu.memory_space<vmem>>, vector<1x8x32xf32>,
    %206 = vector.broadcast %13 : vector<1x32xf32> to vector<8x32xf32>
    %207 = arith.mulf %202, %206 : vector<8x32xf32>
    %cst_95 = arith.constant dense<0.000000e+00> : vector<8xf32>
    %208 = vector.multi_reduction <add>, %207, %cst_95 [1] : vector<8x32xf32> to vector<8xf32>
    %209 = vector.shape_cast %208 : vector<8xf32> to vector<8x1xf32>
    %c0_96 = arith.constant 0 : index
    %c1_97 = arith.constant 1 : index
    %210 = vector.load %arg32[%c0_96, %c1_97] : memref<8x8xf32, #tpu.memory_space<vmem>>, vector<8x1xf32>
    tpu.vector_store %arg32[%c0_96, %c1_97], %209 {strides = array<i32>} : memref<8x8xf32, #tpu.memory_space<vmem>>, vector<8x1xf32>,
    %cst_98 = arith.constant 0.000000e+00 : f32
    %211 = vector.broadcast %cst_98 : f32 to vector<8x8xf32>
    %212 = arith.select %138, %150, %211 : vector<8x8xi1>, vector<8x8xf32>
    %c1_99 = arith.constant 1 : index
    %c0_100 = arith.constant 0 : index
    %c0_101 = arith.constant 0 : index
    %213 = vector.load %arg27[%c1_99, %c0_100, %c0_101] : memref<8x8x8xf32, #tpu.memory_space<vmem>>, vector<1x8x8xf32>
    %214 = vector.shape_cast %213 : vector<1x8x8xf32> to vector<8x8xf32>
    %215 = vector.shape_cast %212 : vector<8x8xf32> to vector<1x8x8xf32>
    tpu.vector_store %arg27[%c1_99, %c0_100, %c0_101], %215 {strides = array<i32>} : memref<8x8x8xf32, #tpu.memory_space<vmem>>, vector<1x8x8xf32>,
    %c2 = arith.constant 2 : index
    %c0_102 = arith.constant 0 : index
    %c0_103 = arith.constant 0 : index
    %216 = vector.load %arg29[%c2, %c0_102, %c0_103] : memref<8x8x32xf32, #tpu.memory_space<vmem>>, vector<1x8x32xf32>
    %217 = vector.shape_cast %216 : vector<1x8x32xf32> to vector<8x32xf32>
    %218 = vector.broadcast %12 : vector<1x32xf32> to vector<8x32xf32>
    %219 = arith.mulf %217, %218 : vector<8x32xf32>
    %cst_104 = arith.constant dense<0.000000e+00> : vector<8xf32>
    %220 = vector.multi_reduction <add>, %219, %cst_104 [1] : vector<8x32xf32> to vector<8xf32>
    %221 = vector.shape_cast %220 : vector<8xf32> to vector<8x1xf32>
    %222 = vector.broadcast %14 : vector<1x1xf32> to vector<8x1xf32>
    %223 = arith.addf %221, %222 : vector<8x1xf32>
    %c0_105 = arith.constant 0 : index
    %c0_106 = arith.constant 0 : index
    %224 = vector.load %arg32[%c0_105, %c0_106] : memref<8x8xf32, #tpu.memory_space<vmem>>, vector<8x8xf32>
    %225 = vector.broadcast %223 : vector<8x1xf32> to vector<8x8xf32>
    %226 = arith.addf %224, %225 : vector<8x8xf32>
    %c2_107 = arith.constant 2 : index
    %c0_108 = arith.constant 0 : index
    %c0_109 = arith.constant 0 : index
    %227 = vector.load %arg2[%c2_107, %c0_108, %c0_109] : memref<8x8x8xf32, #tpu.memory_space<vmem>>, vector<1x8x8xf32>
    %228 = vector.shape_cast %227 : vector<1x8x8xf32> to vector<8x8xf32>
    %cst_110 = arith.constant 1.000000e+00 : f32
    %229 = vector.broadcast %cst_110 : f32 to vector<8x8xf32>
    %230 = arith.subf %229, %228 : vector<8x8xf32>
    %cst_111 = arith.constant 1.000000e+30 : f32
    %231 = vector.broadcast %cst_111 : f32 to vector<8x8xf32>
    %232 = arith.mulf %230, %231 : vector<8x8xf32>
    %233 = arith.subf %226, %232 : vector<8x8xf32>
    %c2_i32 = arith.constant 2 : i32
    %234 = vector.broadcast %c2_i32 : i32 to vector<8x8xi32>
    %235 = arith.cmpi slt, %11, %234 : vector<8x8xi32>
    %cst_112 = arith.constant -9.99999993E+36 : f32
    %236 = vector.broadcast %cst_112 : f32 to vector<8x8xf32>
    %237 = arith.select %235, %233, %236 : vector<8x8xi1>, vector<8x8xf32>
    %cst_113 = arith.constant dense<0xFF800000> : vector<8xf32>
    %238 = vector.multi_reduction <maximumf>, %237, %cst_113 [1] : vector<8x8xf32> to vector<8xf32>
    %239 = vector.shape_cast %238 : vector<8xf32> to vector<8x1xf32>
    %240 = vector.broadcast %239 : vector<8x1xf32> to vector<8x8xf32>
    %241 = arith.subf %237, %240 : vector<8x8xf32>
    %242 = math.exp %241 : vector<8x8xf32>
    %cst_114 = arith.constant dense<0.000000e+00> : vector<8xf32>
    %243 = vector.multi_reduction <add>, %242, %cst_114 [1] : vector<8x8xf32> to vector<8xf32>
    %244 = vector.shape_cast %243 : vector<8xf32> to vector<8x1xf32>
    %245 = tpu.reciprocal %244 {approx = true} : vector<8x1xf32> -> vector<8x1xf32>
    %246 = vector.broadcast %245 : vector<8x1xf32> to vector<8x8xf32>
    %247 = arith.mulf %242, %246 : vector<8x8xf32>
    %c2_115 = arith.constant 2 : index
    %c0_116 = arith.constant 0 : index
    %c0_117 = arith.constant 0 : index
    %248 = vector.load %arg3[%c2_115, %c0_116, %c0_117] : memref<8x8x8xf32, #tpu.memory_space<vmem>>, vector<1x8x8xf32>
    %249 = vector.shape_cast %248 : vector<1x8x8xf32> to vector<8x8xf32>
    %250 = arith.mulf %247, %249 : vector<8x8xf32>
    %251 = arith.subf %247, %250 : vector<8x8xf32>
    %252 = tpu.transpose %250, [1, 0] : vector<8x8xf32> -> vector<8x8xf32>
    %253 = tpu.transpose %251, [1, 0] : vector<8x8xf32> -> vector<8x8xf32>
    %c0_118 = arith.constant 0 : index
    %c0_119 = arith.constant 0 : index
    %c0_120 = arith.constant 0 : index
    %254 = vector.load %arg30[%c0_118, %c0_119, %c0_120] : memref<8x8x32xf32, #tpu.memory_space<vmem>>, vector<8x8x32xf32>
    %255 = vector.shape_cast %252 : vector<8x8xf32> to vector<8x8x1xf32>
    %256 = vector.broadcast %255 : vector<8x8x1xf32> to vector<8x8x32xf32>
    %257 = arith.mulf %256, %254 : vector<8x8x32xf32>
    %cst_121 = arith.constant dense<0.000000e+00> : vector<8x32xf32>
    %258 = vector.multi_reduction <add>, %257, %cst_121 [0] : vector<8x8x32xf32> to vector<8x32xf32>
    %259 = vector.shape_cast %253 : vector<8x8xf32> to vector<8x8x1xf32>
    %260 = vector.broadcast %259 : vector<8x8x1xf32> to vector<8x8x32xf32>
    %261 = arith.mulf %260, %254 : vector<8x8x32xf32>
    %cst_122 = arith.constant dense<0.000000e+00> : vector<8x32xf32>
    %262 = vector.multi_reduction <add>, %261, %cst_122 [0] : vector<8x8x32xf32> to vector<8x32xf32>
    %263 = tpu.concatenate %258, %262 in 1 : vector<8x32xf32>, vector<8x32xf32> -> vector<8x64xf32>
    %cst_123 = arith.constant dense<0.000000e+00> : vector<8x32xf32>
    %264 = tpu.matmul %263, %15, %cst_123 {dimension_numbers = #tpu.dot_dimension_numbers<[1], [0], [0], [1], [0, 0, 1, 1], [], []>} : vector<8x64xf32>, vector<64x32xf32>, vector<8x32xf32> -> vector<8x32xf32>
    %265 = tpu.concatenate %217, %264 in 1 : vector<8x32xf32>, vector<8x32xf32> -> vector<8x64xf32>
    %cst_124 = arith.constant dense<0.000000e+00> : vector<8x256xf32>
    %266 = tpu.matmul %265, %16, %cst_124 {dimension_numbers = #tpu.dot_dimension_numbers<[1], [0], [0], [1], [0, 0, 1, 1], [], []>} : vector<8x64xf32>, vector<64x256xf32>, vector<8x256xf32> -> vector<8x256xf32>
    %267 = vector.broadcast %17 : vector<1x256xf32> to vector<8x256xf32>
    %268 = arith.addf %266, %267 : vector<8x256xf32>
    %269 = vector.extract_strided_slice %268 {offsets = [0, 0], sizes = [8, 128], strides = [1, 1]} : vector<8x256xf32> to vector<8x128xf32>
    %270 = arith.negf %269 : vector<8x128xf32>
    %271 = math.exp %270 : vector<8x128xf32>
    %cst_125 = arith.constant 1.000000e+00 : f32
    %272 = vector.broadcast %cst_125 : f32 to vector<8x128xf32>
    %273 = arith.addf %272, %271 : vector<8x128xf32>
    %274 = arith.divf %272, %273 : vector<8x128xf32>
    %275 = vector.extract_strided_slice %274 {offsets = [0, 0], sizes = [8, 32], strides = [1, 1]} : vector<8x128xf32> to vector<8x32xf32>
    %276 = vector.extract_strided_slice %274 {offsets = [0, 32], sizes = [8, 32], strides = [1, 1]} : vector<8x128xf32> to vector<8x32xf32>
    %277 = vector.extract_strided_slice %274 {offsets = [0, 64], sizes = [8, 32], strides = [1, 1]} : vector<8x128xf32> to vector<8x32xf32>
    %278 = vector.extract_strided_slice %274 {offsets = [0, 96], sizes = [8, 32], strides = [1, 1]} : vector<8x128xf32> to vector<8x32xf32>
    %279 = vector.extract_strided_slice %268 {offsets = [0, 128], sizes = [8, 32], strides = [1, 1]} : vector<8x256xf32> to vector<8x32xf32>
    %280 = vector.extract_strided_slice %268 {offsets = [0, 160], sizes = [8, 32], strides = [1, 1]} : vector<8x256xf32> to vector<8x32xf32>
    %281 = arith.mulf %275, %280 : vector<8x32xf32>
    %282 = arith.addf %279, %281 : vector<8x32xf32>
    %283 = math.tanh %282 : vector<8x32xf32>
    %284 = vector.extract_strided_slice %268 {offsets = [0, 192], sizes = [8, 32], strides = [1, 1]} : vector<8x256xf32> to vector<8x32xf32>
    %285 = vector.extract_strided_slice %268 {offsets = [0, 224], sizes = [8, 32], strides = [1, 1]} : vector<8x256xf32> to vector<8x32xf32>
    %286 = arith.mulf %277, %285 : vector<8x32xf32>
    %287 = arith.addf %284, %286 : vector<8x32xf32>
    %288 = math.tanh %287 : vector<8x32xf32>
    %cst_126 = arith.constant 1.000000e+00 : f32
    %289 = vector.broadcast %cst_126 : f32 to vector<8x32xf32>
    %290 = arith.subf %289, %276 : vector<8x32xf32>
    %291 = arith.mulf %290, %283 : vector<8x32xf32>
    %292 = arith.mulf %276, %264 : vector<8x32xf32>
    %293 = arith.addf %291, %292 : vector<8x32xf32>
    %cst_127 = arith.constant 1.000000e+00 : f32
    %294 = vector.broadcast %cst_127 : f32 to vector<8x32xf32>
    %295 = arith.subf %294, %278 : vector<8x32xf32>
    %296 = arith.mulf %295, %288 : vector<8x32xf32>
    %297 = arith.addf %293, %296 : vector<8x32xf32>
    %298 = arith.mulf %278, %217 : vector<8x32xf32>
    %299 = arith.addf %297, %298 : vector<8x32xf32>
    %c2_128 = arith.constant 2 : index
    %c0_129 = arith.constant 0 : index
    %c0_130 = arith.constant 0 : index
    %300 = vector.load %arg30[%c2_128, %c0_129, %c0_130] : memref<8x8x32xf32, #tpu.memory_space<vmem>>, vector<1x8x32xf32>
    %301 = vector.shape_cast %300 : vector<1x8x32xf32> to vector<8x32xf32>
    %302 = vector.shape_cast %299 : vector<8x32xf32> to vector<1x8x32xf32>
    tpu.vector_store %arg30[%c2_128, %c0_129, %c0_130], %302 {strides = array<i32>} : memref<8x8x32xf32, #tpu.memory_space<vmem>>, vector<1x8x32xf32>,
    %303 = vector.broadcast %13 : vector<1x32xf32> to vector<8x32xf32>
    %304 = arith.mulf %299, %303 : vector<8x32xf32>
    %cst_131 = arith.constant dense<0.000000e+00> : vector<8xf32>
    %305 = vector.multi_reduction <add>, %304, %cst_131 [1] : vector<8x32xf32> to vector<8xf32>
    %306 = vector.shape_cast %305 : vector<8xf32> to vector<8x1xf32>
    %c0_132 = arith.constant 0 : index
    %c2_133 = arith.constant 2 : index
    %307 = vector.load %arg32[%c0_132, %c2_133] : memref<8x8xf32, #tpu.memory_space<vmem>>, vector<8x1xf32>
    tpu.vector_store %arg32[%c0_132, %c2_133], %306 {strides = array<i32>} : memref<8x8xf32, #tpu.memory_space<vmem>>, vector<8x1xf32>,
    %cst_134 = arith.constant 0.000000e+00 : f32
    %308 = vector.broadcast %cst_134 : f32 to vector<8x8xf32>
    %309 = arith.select %235, %247, %308 : vector<8x8xi1>, vector<8x8xf32>
    %c2_135 = arith.constant 2 : index
    %c0_136 = arith.constant 0 : index
    %c0_137 = arith.constant 0 : index
    %310 = vector.load %arg27[%c2_135, %c0_136, %c0_137] : memref<8x8x8xf32, #tpu.memory_space<vmem>>, vector<1x8x8xf32>
    %311 = vector.shape_cast %310 : vector<1x8x8xf32> to vector<8x8xf32>
    %312 = vector.shape_cast %309 : vector<8x8xf32> to vector<1x8x8xf32>
    tpu.vector_store %arg27[%c2_135, %c0_136, %c0_137], %312 {strides = array<i32>} : memref<8x8x8xf32, #tpu.memory_space<vmem>>, vector<1x8x8xf32>,
    %c3 = arith.constant 3 : index
    %c0_138 = arith.constant 0 : index
    %c0_139 = arith.constant 0 : index
    %313 = vector.load %arg29[%c3, %c0_138, %c0_139] : memref<8x8x32xf32, #tpu.memory_space<vmem>>, vector<1x8x32xf32>
    %314 = vector.shape_cast %313 : vector<1x8x32xf32> to vector<8x32xf32>
    %315 = vector.broadcast %12 : vector<1x32xf32> to vector<8x32xf32>
    %316 = arith.mulf %314, %315 : vector<8x32xf32>
    %cst_140 = arith.constant dense<0.000000e+00> : vector<8xf32>
    %317 = vector.multi_reduction <add>, %316, %cst_140 [1] : vector<8x32xf32> to vector<8xf32>
    %318 = vector.shape_cast %317 : vector<8xf32> to vector<8x1xf32>
    %319 = vector.broadcast %14 : vector<1x1xf32> to vector<8x1xf32>
    %320 = arith.addf %318, %319 : vector<8x1xf32>
    %c0_141 = arith.constant 0 : index
    %c0_142 = arith.constant 0 : index
    %321 = vector.load %arg32[%c0_141, %c0_142] : memref<8x8xf32, #tpu.memory_space<vmem>>, vector<8x8xf32>
    %322 = vector.broadcast %320 : vector<8x1xf32> to vector<8x8xf32>
    %323 = arith.addf %321, %322 : vector<8x8xf32>
    %c3_143 = arith.constant 3 : index
    %c0_144 = arith.constant 0 : index
    %c0_145 = arith.constant 0 : index
    %324 = vector.load %arg2[%c3_143, %c0_144, %c0_145] : memref<8x8x8xf32, #tpu.memory_space<vmem>>, vector<1x8x8xf32>
    %325 = vector.shape_cast %324 : vector<1x8x8xf32> to vector<8x8xf32>
    %cst_146 = arith.constant 1.000000e+00 : f32
    %326 = vector.broadcast %cst_146 : f32 to vector<8x8xf32>
    %327 = arith.subf %326, %325 : vector<8x8xf32>
    %cst_147 = arith.constant 1.000000e+30 : f32
    %328 = vector.broadcast %cst_147 : f32 to vector<8x8xf32>
    %329 = arith.mulf %327, %328 : vector<8x8xf32>
    %330 = arith.subf %323, %329 : vector<8x8xf32>
    %c3_i32 = arith.constant 3 : i32
    %331 = vector.broadcast %c3_i32 : i32 to vector<8x8xi32>
    %332 = arith.cmpi slt, %11, %331 : vector<8x8xi32>
    %cst_148 = arith.constant -9.99999993E+36 : f32
    %333 = vector.broadcast %cst_148 : f32 to vector<8x8xf32>
    %334 = arith.select %332, %330, %333 : vector<8x8xi1>, vector<8x8xf32>
    %cst_149 = arith.constant dense<0xFF800000> : vector<8xf32>
    %335 = vector.multi_reduction <maximumf>, %334, %cst_149 [1] : vector<8x8xf32> to vector<8xf32>
    %336 = vector.shape_cast %335 : vector<8xf32> to vector<8x1xf32>
    %337 = vector.broadcast %336 : vector<8x1xf32> to vector<8x8xf32>
    %338 = arith.subf %334, %337 : vector<8x8xf32>
    %339 = math.exp %338 : vector<8x8xf32>
    %cst_150 = arith.constant dense<0.000000e+00> : vector<8xf32>
    %340 = vector.multi_reduction <add>, %339, %cst_150 [1] : vector<8x8xf32> to vector<8xf32>
    %341 = vector.shape_cast %340 : vector<8xf32> to vector<8x1xf32>
    %342 = tpu.reciprocal %341 {approx = true} : vector<8x1xf32> -> vector<8x1xf32>
    %343 = vector.broadcast %342 : vector<8x1xf32> to vector<8x8xf32>
    %344 = arith.mulf %339, %343 : vector<8x8xf32>
    %c3_151 = arith.constant 3 : index
    %c0_152 = arith.constant 0 : index
    %c0_153 = arith.constant 0 : index
    %345 = vector.load %arg3[%c3_151, %c0_152, %c0_153] : memref<8x8x8xf32, #tpu.memory_space<vmem>>, vector<1x8x8xf32>
    %346 = vector.shape_cast %345 : vector<1x8x8xf32> to vector<8x8xf32>
    %347 = arith.mulf %344, %346 : vector<8x8xf32>
    %348 = arith.subf %344, %347 : vector<8x8xf32>
    %349 = tpu.transpose %347, [1, 0] : vector<8x8xf32> -> vector<8x8xf32>
    %350 = tpu.transpose %348, [1, 0] : vector<8x8xf32> -> vector<8x8xf32>
    %c0_154 = arith.constant 0 : index
    %c0_155 = arith.constant 0 : index
    %c0_156 = arith.constant 0 : index
    %351 = vector.load %arg30[%c0_154, %c0_155, %c0_156] : memref<8x8x32xf32, #tpu.memory_space<vmem>>, vector<8x8x32xf32>
    %352 = vector.shape_cast %349 : vector<8x8xf32> to vector<8x8x1xf32>
    %353 = vector.broadcast %352 : vector<8x8x1xf32> to vector<8x8x32xf32>
    %354 = arith.mulf %353, %351 : vector<8x8x32xf32>
    %cst_157 = arith.constant dense<0.000000e+00> : vector<8x32xf32>
    %355 = vector.multi_reduction <add>, %354, %cst_157 [0] : vector<8x8x32xf32> to vector<8x32xf32>
    %356 = vector.shape_cast %350 : vector<8x8xf32> to vector<8x8x1xf32>
    %357 = vector.broadcast %356 : vector<8x8x1xf32> to vector<8x8x32xf32>
    %358 = arith.mulf %357, %351 : vector<8x8x32xf32>
    %cst_158 = arith.constant dense<0.000000e+00> : vector<8x32xf32>
    %359 = vector.multi_reduction <add>, %358, %cst_158 [0] : vector<8x8x32xf32> to vector<8x32xf32>
    %360 = tpu.concatenate %355, %359 in 1 : vector<8x32xf32>, vector<8x32xf32> -> vector<8x64xf32>
    %cst_159 = arith.constant dense<0.000000e+00> : vector<8x32xf32>
    %361 = tpu.matmul %360, %15, %cst_159 {dimension_numbers = #tpu.dot_dimension_numbers<[1], [0], [0], [1], [0, 0, 1, 1], [], []>} : vector<8x64xf32>, vector<64x32xf32>, vector<8x32xf32> -> vector<8x32xf32>
    %362 = tpu.concatenate %314, %361 in 1 : vector<8x32xf32>, vector<8x32xf32> -> vector<8x64xf32>
    %cst_160 = arith.constant dense<0.000000e+00> : vector<8x256xf32>
    %363 = tpu.matmul %362, %16, %cst_160 {dimension_numbers = #tpu.dot_dimension_numbers<[1], [0], [0], [1], [0, 0, 1, 1], [], []>} : vector<8x64xf32>, vector<64x256xf32>, vector<8x256xf32> -> vector<8x256xf32>
    %364 = vector.broadcast %17 : vector<1x256xf32> to vector<8x256xf32>
    %365 = arith.addf %363, %364 : vector<8x256xf32>
    %366 = vector.extract_strided_slice %365 {offsets = [0, 0], sizes = [8, 128], strides = [1, 1]} : vector<8x256xf32> to vector<8x128xf32>
    %367 = arith.negf %366 : vector<8x128xf32>
    %368 = math.exp %367 : vector<8x128xf32>
    %cst_161 = arith.constant 1.000000e+00 : f32
    %369 = vector.broadcast %cst_161 : f32 to vector<8x128xf32>
    %370 = arith.addf %369, %368 : vector<8x128xf32>
    %371 = arith.divf %369, %370 : vector<8x128xf32>
    %372 = vector.extract_strided_slice %371 {offsets = [0, 0], sizes = [8, 32], strides = [1, 1]} : vector<8x128xf32> to vector<8x32xf32>
    %373 = vector.extract_strided_slice %371 {offsets = [0, 32], sizes = [8, 32], strides = [1, 1]} : vector<8x128xf32> to vector<8x32xf32>
    %374 = vector.extract_strided_slice %371 {offsets = [0, 64], sizes = [8, 32], strides = [1, 1]} : vector<8x128xf32> to vector<8x32xf32>
    %375 = vector.extract_strided_slice %371 {offsets = [0, 96], sizes = [8, 32], strides = [1, 1]} : vector<8x128xf32> to vector<8x32xf32>
    %376 = vector.extract_strided_slice %365 {offsets = [0, 128], sizes = [8, 32], strides = [1, 1]} : vector<8x256xf32> to vector<8x32xf32>
    %377 = vector.extract_strided_slice %365 {offsets = [0, 160], sizes = [8, 32], strides = [1, 1]} : vector<8x256xf32> to vector<8x32xf32>
    %378 = arith.mulf %372, %377 : vector<8x32xf32>
    %379 = arith.addf %376, %378 : vector<8x32xf32>
    %380 = math.tanh %379 : vector<8x32xf32>
    %381 = vector.extract_strided_slice %365 {offsets = [0, 192], sizes = [8, 32], strides = [1, 1]} : vector<8x256xf32> to vector<8x32xf32>
    %382 = vector.extract_strided_slice %365 {offsets = [0, 224], sizes = [8, 32], strides = [1, 1]} : vector<8x256xf32> to vector<8x32xf32>
    %383 = arith.mulf %374, %382 : vector<8x32xf32>
    %384 = arith.addf %381, %383 : vector<8x32xf32>
    %385 = math.tanh %384 : vector<8x32xf32>
    %cst_162 = arith.constant 1.000000e+00 : f32
    %386 = vector.broadcast %cst_162 : f32 to vector<8x32xf32>
    %387 = arith.subf %386, %373 : vector<8x32xf32>
    %388 = arith.mulf %387, %380 : vector<8x32xf32>
    %389 = arith.mulf %373, %361 : vector<8x32xf32>
    %390 = arith.addf %388, %389 : vector<8x32xf32>
    %cst_163 = arith.constant 1.000000e+00 : f32
    %391 = vector.broadcast %cst_163 : f32 to vector<8x32xf32>
    %392 = arith.subf %391, %375 : vector<8x32xf32>
    %393 = arith.mulf %392, %385 : vector<8x32xf32>
    %394 = arith.addf %390, %393 : vector<8x32xf32>
    %395 = arith.mulf %375, %314 : vector<8x32xf32>
    %396 = arith.addf %394, %395 : vector<8x32xf32>
    %c3_164 = arith.constant 3 : index
    %c0_165 = arith.constant 0 : index
    %c0_166 = arith.constant 0 : index
    %397 = vector.load %arg30[%c3_164, %c0_165, %c0_166] : memref<8x8x32xf32, #tpu.memory_space<vmem>>, vector<1x8x32xf32>
    %398 = vector.shape_cast %397 : vector<1x8x32xf32> to vector<8x32xf32>
    %399 = vector.shape_cast %396 : vector<8x32xf32> to vector<1x8x32xf32>
    tpu.vector_store %arg30[%c3_164, %c0_165, %c0_166], %399 {strides = array<i32>} : memref<8x8x32xf32, #tpu.memory_space<vmem>>, vector<1x8x32xf32>,
    %400 = vector.broadcast %13 : vector<1x32xf32> to vector<8x32xf32>
    %401 = arith.mulf %396, %400 : vector<8x32xf32>
    %cst_167 = arith.constant dense<0.000000e+00> : vector<8xf32>
    %402 = vector.multi_reduction <add>, %401, %cst_167 [1] : vector<8x32xf32> to vector<8xf32>
    %403 = vector.shape_cast %402 : vector<8xf32> to vector<8x1xf32>
    %c0_168 = arith.constant 0 : index
    %c3_169 = arith.constant 3 : index
    %404 = vector.load %arg32[%c0_168, %c3_169] : memref<8x8xf32, #tpu.memory_space<vmem>>, vector<8x1xf32>
    tpu.vector_store %arg32[%c0_168, %c3_169], %403 {strides = array<i32>} : memref<8x8xf32, #tpu.memory_space<vmem>>, vector<8x1xf32>,
    %cst_170 = arith.constant 0.000000e+00 : f32
    %405 = vector.broadcast %cst_170 : f32 to vector<8x8xf32>
    %406 = arith.select %332, %344, %405 : vector<8x8xi1>, vector<8x8xf32>
    %c3_171 = arith.constant 3 : index
    %c0_172 = arith.constant 0 : index
    %c0_173 = arith.constant 0 : index
    %407 = vector.load %arg27[%c3_171, %c0_172, %c0_173] : memref<8x8x8xf32, #tpu.memory_space<vmem>>, vector<1x8x8xf32>
    %408 = vector.shape_cast %407 : vector<1x8x8xf32> to vector<8x8xf32>
    %409 = vector.shape_cast %406 : vector<8x8xf32> to vector<1x8x8xf32>
    tpu.vector_store %arg27[%c3_171, %c0_172, %c0_173], %409 {strides = array<i32>} : memref<8x8x8xf32, #tpu.memory_space<vmem>>, vector<1x8x8xf32>,
    %c4 = arith.constant 4 : index
    %c0_174 = arith.constant 0 : index
    %c0_175 = arith.constant 0 : index
    %410 = vector.load %arg29[%c4, %c0_174, %c0_175] : memref<8x8x32xf32, #tpu.memory_space<vmem>>, vector<1x8x32xf32>
    %411 = vector.shape_cast %410 : vector<1x8x32xf32> to vector<8x32xf32>
    %412 = vector.broadcast %12 : vector<1x32xf32> to vector<8x32xf32>
    %413 = arith.mulf %411, %412 : vector<8x32xf32>
    %cst_176 = arith.constant dense<0.000000e+00> : vector<8xf32>
    %414 = vector.multi_reduction <add>, %413, %cst_176 [1] : vector<8x32xf32> to vector<8xf32>
    %415 = vector.shape_cast %414 : vector<8xf32> to vector<8x1xf32>
    %416 = vector.broadcast %14 : vector<1x1xf32> to vector<8x1xf32>
    %417 = arith.addf %415, %416 : vector<8x1xf32>
    %c0_177 = arith.constant 0 : index
    %c0_178 = arith.constant 0 : index
    %418 = vector.load %arg32[%c0_177, %c0_178] : memref<8x8xf32, #tpu.memory_space<vmem>>, vector<8x8xf32>
    %419 = vector.broadcast %417 : vector<8x1xf32> to vector<8x8xf32>
    %420 = arith.addf %418, %419 : vector<8x8xf32>
    %c4_179 = arith.constant 4 : index
    %c0_180 = arith.constant 0 : index
    %c0_181 = arith.constant 0 : index
    %421 = vector.load %arg2[%c4_179, %c0_180, %c0_181] : memref<8x8x8xf32, #tpu.memory_space<vmem>>, vector<1x8x8xf32>
    %422 = vector.shape_cast %421 : vector<1x8x8xf32> to vector<8x8xf32>
    %cst_182 = arith.constant 1.000000e+00 : f32
    %423 = vector.broadcast %cst_182 : f32 to vector<8x8xf32>
    %424 = arith.subf %423, %422 : vector<8x8xf32>
    %cst_183 = arith.constant 1.000000e+30 : f32
    %425 = vector.broadcast %cst_183 : f32 to vector<8x8xf32>
    %426 = arith.mulf %424, %425 : vector<8x8xf32>
    %427 = arith.subf %420, %426 : vector<8x8xf32>
    %c4_i32 = arith.constant 4 : i32
    %428 = vector.broadcast %c4_i32 : i32 to vector<8x8xi32>
    %429 = arith.cmpi slt, %11, %428 : vector<8x8xi32>
    %cst_184 = arith.constant -9.99999993E+36 : f32
    %430 = vector.broadcast %cst_184 : f32 to vector<8x8xf32>
    %431 = arith.select %429, %427, %430 : vector<8x8xi1>, vector<8x8xf32>
    %cst_185 = arith.constant dense<0xFF800000> : vector<8xf32>
    %432 = vector.multi_reduction <maximumf>, %431, %cst_185 [1] : vector<8x8xf32> to vector<8xf32>
    %433 = vector.shape_cast %432 : vector<8xf32> to vector<8x1xf32>
    %434 = vector.broadcast %433 : vector<8x1xf32> to vector<8x8xf32>
    %435 = arith.subf %431, %434 : vector<8x8xf32>
    %436 = math.exp %435 : vector<8x8xf32>
    %cst_186 = arith.constant dense<0.000000e+00> : vector<8xf32>
    %437 = vector.multi_reduction <add>, %436, %cst_186 [1] : vector<8x8xf32> to vector<8xf32>
    %438 = vector.shape_cast %437 : vector<8xf32> to vector<8x1xf32>
    %439 = tpu.reciprocal %438 {approx = true} : vector<8x1xf32> -> vector<8x1xf32>
    %440 = vector.broadcast %439 : vector<8x1xf32> to vector<8x8xf32>
    %441 = arith.mulf %436, %440 : vector<8x8xf32>
    %c4_187 = arith.constant 4 : index
    %c0_188 = arith.constant 0 : index
    %c0_189 = arith.constant 0 : index
    %442 = vector.load %arg3[%c4_187, %c0_188, %c0_189] : memref<8x8x8xf32, #tpu.memory_space<vmem>>, vector<1x8x8xf32>
    %443 = vector.shape_cast %442 : vector<1x8x8xf32> to vector<8x8xf32>
    %444 = arith.mulf %441, %443 : vector<8x8xf32>
    %445 = arith.subf %441, %444 : vector<8x8xf32>
    %446 = tpu.transpose %444, [1, 0] : vector<8x8xf32> -> vector<8x8xf32>
    %447 = tpu.transpose %445, [1, 0] : vector<8x8xf32> -> vector<8x8xf32>
    %c0_190 = arith.constant 0 : index
    %c0_191 = arith.constant 0 : index
    %c0_192 = arith.constant 0 : index
    %448 = vector.load %arg30[%c0_190, %c0_191, %c0_192] : memref<8x8x32xf32, #tpu.memory_space<vmem>>, vector<8x8x32xf32>
    %449 = vector.shape_cast %446 : vector<8x8xf32> to vector<8x8x1xf32>
    %450 = vector.broadcast %449 : vector<8x8x1xf32> to vector<8x8x32xf32>
    %451 = arith.mulf %450, %448 : vector<8x8x32xf32>
    %cst_193 = arith.constant dense<0.000000e+00> : vector<8x32xf32>
    %452 = vector.multi_reduction <add>, %451, %cst_193 [0] : vector<8x8x32xf32> to vector<8x32xf32>
    %453 = vector.shape_cast %447 : vector<8x8xf32> to vector<8x8x1xf32>
    %454 = vector.broadcast %453 : vector<8x8x1xf32> to vector<8x8x32xf32>
    %455 = arith.mulf %454, %448 : vector<8x8x32xf32>
    %cst_194 = arith.constant dense<0.000000e+00> : vector<8x32xf32>
    %456 = vector.multi_reduction <add>, %455, %cst_194 [0] : vector<8x8x32xf32> to vector<8x32xf32>
    %457 = tpu.concatenate %452, %456 in 1 : vector<8x32xf32>, vector<8x32xf32> -> vector<8x64xf32>
    %cst_195 = arith.constant dense<0.000000e+00> : vector<8x32xf32>
    %458 = tpu.matmul %457, %15, %cst_195 {dimension_numbers = #tpu.dot_dimension_numbers<[1], [0], [0], [1], [0, 0, 1, 1], [], []>} : vector<8x64xf32>, vector<64x32xf32>, vector<8x32xf32> -> vector<8x32xf32>
    %459 = tpu.concatenate %411, %458 in 1 : vector<8x32xf32>, vector<8x32xf32> -> vector<8x64xf32>
    %cst_196 = arith.constant dense<0.000000e+00> : vector<8x256xf32>
    %460 = tpu.matmul %459, %16, %cst_196 {dimension_numbers = #tpu.dot_dimension_numbers<[1], [0], [0], [1], [0, 0, 1, 1], [], []>} : vector<8x64xf32>, vector<64x256xf32>, vector<8x256xf32> -> vector<8x256xf32>
    %461 = vector.broadcast %17 : vector<1x256xf32> to vector<8x256xf32>
    %462 = arith.addf %460, %461 : vector<8x256xf32>
    %463 = vector.extract_strided_slice %462 {offsets = [0, 0], sizes = [8, 128], strides = [1, 1]} : vector<8x256xf32> to vector<8x128xf32>
    %464 = arith.negf %463 : vector<8x128xf32>
    %465 = math.exp %464 : vector<8x128xf32>
    %cst_197 = arith.constant 1.000000e+00 : f32
    %466 = vector.broadcast %cst_197 : f32 to vector<8x128xf32>
    %467 = arith.addf %466, %465 : vector<8x128xf32>
    %468 = arith.divf %466, %467 : vector<8x128xf32>
    %469 = vector.extract_strided_slice %468 {offsets = [0, 0], sizes = [8, 32], strides = [1, 1]} : vector<8x128xf32> to vector<8x32xf32>
    %470 = vector.extract_strided_slice %468 {offsets = [0, 32], sizes = [8, 32], strides = [1, 1]} : vector<8x128xf32> to vector<8x32xf32>
    %471 = vector.extract_strided_slice %468 {offsets = [0, 64], sizes = [8, 32], strides = [1, 1]} : vector<8x128xf32> to vector<8x32xf32>
    %472 = vector.extract_strided_slice %468 {offsets = [0, 96], sizes = [8, 32], strides = [1, 1]} : vector<8x128xf32> to vector<8x32xf32>
    %473 = vector.extract_strided_slice %462 {offsets = [0, 128], sizes = [8, 32], strides = [1, 1]} : vector<8x256xf32> to vector<8x32xf32>
    %474 = vector.extract_strided_slice %462 {offsets = [0, 160], sizes = [8, 32], strides = [1, 1]} : vector<8x256xf32> to vector<8x32xf32>
    %475 = arith.mulf %469, %474 : vector<8x32xf32>
    %476 = arith.addf %473, %475 : vector<8x32xf32>
    %477 = math.tanh %476 : vector<8x32xf32>
    %478 = vector.extract_strided_slice %462 {offsets = [0, 192], sizes = [8, 32], strides = [1, 1]} : vector<8x256xf32> to vector<8x32xf32>
    %479 = vector.extract_strided_slice %462 {offsets = [0, 224], sizes = [8, 32], strides = [1, 1]} : vector<8x256xf32> to vector<8x32xf32>
    %480 = arith.mulf %471, %479 : vector<8x32xf32>
    %481 = arith.addf %478, %480 : vector<8x32xf32>
    %482 = math.tanh %481 : vector<8x32xf32>
    %cst_198 = arith.constant 1.000000e+00 : f32
    %483 = vector.broadcast %cst_198 : f32 to vector<8x32xf32>
    %484 = arith.subf %483, %470 : vector<8x32xf32>
    %485 = arith.mulf %484, %477 : vector<8x32xf32>
    %486 = arith.mulf %470, %458 : vector<8x32xf32>
    %487 = arith.addf %485, %486 : vector<8x32xf32>
    %cst_199 = arith.constant 1.000000e+00 : f32
    %488 = vector.broadcast %cst_199 : f32 to vector<8x32xf32>
    %489 = arith.subf %488, %472 : vector<8x32xf32>
    %490 = arith.mulf %489, %482 : vector<8x32xf32>
    %491 = arith.addf %487, %490 : vector<8x32xf32>
    %492 = arith.mulf %472, %411 : vector<8x32xf32>
    %493 = arith.addf %491, %492 : vector<8x32xf32>
    %c4_200 = arith.constant 4 : index
    %c0_201 = arith.constant 0 : index
    %c0_202 = arith.constant 0 : index
    %494 = vector.load %arg30[%c4_200, %c0_201, %c0_202] : memref<8x8x32xf32, #tpu.memory_space<vmem>>, vector<1x8x32xf32>
    %495 = vector.shape_cast %494 : vector<1x8x32xf32> to vector<8x32xf32>
    %496 = vector.shape_cast %493 : vector<8x32xf32> to vector<1x8x32xf32>
    tpu.vector_store %arg30[%c4_200, %c0_201, %c0_202], %496 {strides = array<i32>} : memref<8x8x32xf32, #tpu.memory_space<vmem>>, vector<1x8x32xf32>,
    %497 = vector.broadcast %13 : vector<1x32xf32> to vector<8x32xf32>
    %498 = arith.mulf %493, %497 : vector<8x32xf32>
    %cst_203 = arith.constant dense<0.000000e+00> : vector<8xf32>
    %499 = vector.multi_reduction <add>, %498, %cst_203 [1] : vector<8x32xf32> to vector<8xf32>
    %500 = vector.shape_cast %499 : vector<8xf32> to vector<8x1xf32>
    %c0_204 = arith.constant 0 : index
    %c4_205 = arith.constant 4 : index
    %501 = vector.load %arg32[%c0_204, %c4_205] : memref<8x8xf32, #tpu.memory_space<vmem>>, vector<8x1xf32>
    tpu.vector_store %arg32[%c0_204, %c4_205], %500 {strides = array<i32>} : memref<8x8xf32, #tpu.memory_space<vmem>>, vector<8x1xf32>,
    %cst_206 = arith.constant 0.000000e+00 : f32
    %502 = vector.broadcast %cst_206 : f32 to vector<8x8xf32>
    %503 = arith.select %429, %441, %502 : vector<8x8xi1>, vector<8x8xf32>
    %c4_207 = arith.constant 4 : index
    %c0_208 = arith.constant 0 : index
    %c0_209 = arith.constant 0 : index
    %504 = vector.load %arg27[%c4_207, %c0_208, %c0_209] : memref<8x8x8xf32, #tpu.memory_space<vmem>>, vector<1x8x8xf32>
    %505 = vector.shape_cast %504 : vector<1x8x8xf32> to vector<8x8xf32>
    %506 = vector.shape_cast %503 : vector<8x8xf32> to vector<1x8x8xf32>
    tpu.vector_store %arg27[%c4_207, %c0_208, %c0_209], %506 {strides = array<i32>} : memref<8x8x8xf32, #tpu.memory_space<vmem>>, vector<1x8x8xf32>,
    %c5 = arith.constant 5 : index
    %c0_210 = arith.constant 0 : index
    %c0_211 = arith.constant 0 : index
    %507 = vector.load %arg29[%c5, %c0_210, %c0_211] : memref<8x8x32xf32, #tpu.memory_space<vmem>>, vector<1x8x32xf32>
    %508 = vector.shape_cast %507 : vector<1x8x32xf32> to vector<8x32xf32>
    %509 = vector.broadcast %12 : vector<1x32xf32> to vector<8x32xf32>
    %510 = arith.mulf %508, %509 : vector<8x32xf32>
    %cst_212 = arith.constant dense<0.000000e+00> : vector<8xf32>
    %511 = vector.multi_reduction <add>, %510, %cst_212 [1] : vector<8x32xf32> to vector<8xf32>
    %512 = vector.shape_cast %511 : vector<8xf32> to vector<8x1xf32>
    %513 = vector.broadcast %14 : vector<1x1xf32> to vector<8x1xf32>
    %514 = arith.addf %512, %513 : vector<8x1xf32>
    %c0_213 = arith.constant 0 : index
    %c0_214 = arith.constant 0 : index
    %515 = vector.load %arg32[%c0_213, %c0_214] : memref<8x8xf32, #tpu.memory_space<vmem>>, vector<8x8xf32>
    %516 = vector.broadcast %514 : vector<8x1xf32> to vector<8x8xf32>
    %517 = arith.addf %515, %516 : vector<8x8xf32>
    %c5_215 = arith.constant 5 : index
    %c0_216 = arith.constant 0 : index
    %c0_217 = arith.constant 0 : index
    %518 = vector.load %arg2[%c5_215, %c0_216, %c0_217] : memref<8x8x8xf32, #tpu.memory_space<vmem>>, vector<1x8x8xf32>
    %519 = vector.shape_cast %518 : vector<1x8x8xf32> to vector<8x8xf32>
    %cst_218 = arith.constant 1.000000e+00 : f32
    %520 = vector.broadcast %cst_218 : f32 to vector<8x8xf32>
    %521 = arith.subf %520, %519 : vector<8x8xf32>
    %cst_219 = arith.constant 1.000000e+30 : f32
    %522 = vector.broadcast %cst_219 : f32 to vector<8x8xf32>
    %523 = arith.mulf %521, %522 : vector<8x8xf32>
    %524 = arith.subf %517, %523 : vector<8x8xf32>
    %c5_i32 = arith.constant 5 : i32
    %525 = vector.broadcast %c5_i32 : i32 to vector<8x8xi32>
    %526 = arith.cmpi slt, %11, %525 : vector<8x8xi32>
    %cst_220 = arith.constant -9.99999993E+36 : f32
    %527 = vector.broadcast %cst_220 : f32 to vector<8x8xf32>
    %528 = arith.select %526, %524, %527 : vector<8x8xi1>, vector<8x8xf32>
    %cst_221 = arith.constant dense<0xFF800000> : vector<8xf32>
    %529 = vector.multi_reduction <maximumf>, %528, %cst_221 [1] : vector<8x8xf32> to vector<8xf32>
    %530 = vector.shape_cast %529 : vector<8xf32> to vector<8x1xf32>
    %531 = vector.broadcast %530 : vector<8x1xf32> to vector<8x8xf32>
    %532 = arith.subf %528, %531 : vector<8x8xf32>
    %533 = math.exp %532 : vector<8x8xf32>
    %cst_222 = arith.constant dense<0.000000e+00> : vector<8xf32>
    %534 = vector.multi_reduction <add>, %533, %cst_222 [1] : vector<8x8xf32> to vector<8xf32>
    %535 = vector.shape_cast %534 : vector<8xf32> to vector<8x1xf32>
    %536 = tpu.reciprocal %535 {approx = true} : vector<8x1xf32> -> vector<8x1xf32>
    %537 = vector.broadcast %536 : vector<8x1xf32> to vector<8x8xf32>
    %538 = arith.mulf %533, %537 : vector<8x8xf32>
    %c5_223 = arith.constant 5 : index
    %c0_224 = arith.constant 0 : index
    %c0_225 = arith.constant 0 : index
    %539 = vector.load %arg3[%c5_223, %c0_224, %c0_225] : memref<8x8x8xf32, #tpu.memory_space<vmem>>, vector<1x8x8xf32>
    %540 = vector.shape_cast %539 : vector<1x8x8xf32> to vector<8x8xf32>
    %541 = arith.mulf %538, %540 : vector<8x8xf32>
    %542 = arith.subf %538, %541 : vector<8x8xf32>
    %543 = tpu.transpose %541, [1, 0] : vector<8x8xf32> -> vector<8x8xf32>
    %544 = tpu.transpose %542, [1, 0] : vector<8x8xf32> -> vector<8x8xf32>
    %c0_226 = arith.constant 0 : index
    %c0_227 = arith.constant 0 : index
    %c0_228 = arith.constant 0 : index
    %545 = vector.load %arg30[%c0_226, %c0_227, %c0_228] : memref<8x8x32xf32, #tpu.memory_space<vmem>>, vector<8x8x32xf32>
    %546 = vector.shape_cast %543 : vector<8x8xf32> to vector<8x8x1xf32>
    %547 = vector.broadcast %546 : vector<8x8x1xf32> to vector<8x8x32xf32>
    %548 = arith.mulf %547, %545 : vector<8x8x32xf32>
    %cst_229 = arith.constant dense<0.000000e+00> : vector<8x32xf32>
    %549 = vector.multi_reduction <add>, %548, %cst_229 [0] : vector<8x8x32xf32> to vector<8x32xf32>
    %550 = vector.shape_cast %544 : vector<8x8xf32> to vector<8x8x1xf32>
    %551 = vector.broadcast %550 : vector<8x8x1xf32> to vector<8x8x32xf32>
    %552 = arith.mulf %551, %545 : vector<8x8x32xf32>
    %cst_230 = arith.constant dense<0.000000e+00> : vector<8x32xf32>
    %553 = vector.multi_reduction <add>, %552, %cst_230 [0] : vector<8x8x32xf32> to vector<8x32xf32>
    %554 = tpu.concatenate %549, %553 in 1 : vector<8x32xf32>, vector<8x32xf32> -> vector<8x64xf32>
    %cst_231 = arith.constant dense<0.000000e+00> : vector<8x32xf32>
    %555 = tpu.matmul %554, %15, %cst_231 {dimension_numbers = #tpu.dot_dimension_numbers<[1], [0], [0], [1], [0, 0, 1, 1], [], []>} : vector<8x64xf32>, vector<64x32xf32>, vector<8x32xf32> -> vector<8x32xf32>
    %556 = tpu.concatenate %508, %555 in 1 : vector<8x32xf32>, vector<8x32xf32> -> vector<8x64xf32>
    %cst_232 = arith.constant dense<0.000000e+00> : vector<8x256xf32>
    %557 = tpu.matmul %556, %16, %cst_232 {dimension_numbers = #tpu.dot_dimension_numbers<[1], [0], [0], [1], [0, 0, 1, 1], [], []>} : vector<8x64xf32>, vector<64x256xf32>, vector<8x256xf32> -> vector<8x256xf32>
    %558 = vector.broadcast %17 : vector<1x256xf32> to vector<8x256xf32>
    %559 = arith.addf %557, %558 : vector<8x256xf32>
    %560 = vector.extract_strided_slice %559 {offsets = [0, 0], sizes = [8, 128], strides = [1, 1]} : vector<8x256xf32> to vector<8x128xf32>
    %561 = arith.negf %560 : vector<8x128xf32>
    %562 = math.exp %561 : vector<8x128xf32>
    %cst_233 = arith.constant 1.000000e+00 : f32
    %563 = vector.broadcast %cst_233 : f32 to vector<8x128xf32>
    %564 = arith.addf %563, %562 : vector<8x128xf32>
    %565 = arith.divf %563, %564 : vector<8x128xf32>
    %566 = vector.extract_strided_slice %565 {offsets = [0, 0], sizes = [8, 32], strides = [1, 1]} : vector<8x128xf32> to vector<8x32xf32>
    %567 = vector.extract_strided_slice %565 {offsets = [0, 32], sizes = [8, 32], strides = [1, 1]} : vector<8x128xf32> to vector<8x32xf32>
    %568 = vector.extract_strided_slice %565 {offsets = [0, 64], sizes = [8, 32], strides = [1, 1]} : vector<8x128xf32> to vector<8x32xf32>
    %569 = vector.extract_strided_slice %565 {offsets = [0, 96], sizes = [8, 32], strides = [1, 1]} : vector<8x128xf32> to vector<8x32xf32>
    %570 = vector.extract_strided_slice %559 {offsets = [0, 128], sizes = [8, 32], strides = [1, 1]} : vector<8x256xf32> to vector<8x32xf32>
    %571 = vector.extract_strided_slice %559 {offsets = [0, 160], sizes = [8, 32], strides = [1, 1]} : vector<8x256xf32> to vector<8x32xf32>
    %572 = arith.mulf %566, %571 : vector<8x32xf32>
    %573 = arith.addf %570, %572 : vector<8x32xf32>
    %574 = math.tanh %573 : vector<8x32xf32>
    %575 = vector.extract_strided_slice %559 {offsets = [0, 192], sizes = [8, 32], strides = [1, 1]} : vector<8x256xf32> to vector<8x32xf32>
    %576 = vector.extract_strided_slice %559 {offsets = [0, 224], sizes = [8, 32], strides = [1, 1]} : vector<8x256xf32> to vector<8x32xf32>
    %577 = arith.mulf %568, %576 : vector<8x32xf32>
    %578 = arith.addf %575, %577 : vector<8x32xf32>
    %579 = math.tanh %578 : vector<8x32xf32>
    %cst_234 = arith.constant 1.000000e+00 : f32
    %580 = vector.broadcast %cst_234 : f32 to vector<8x32xf32>
    %581 = arith.subf %580, %567 : vector<8x32xf32>
    %582 = arith.mulf %581, %574 : vector<8x32xf32>
    %583 = arith.mulf %567, %555 : vector<8x32xf32>
    %584 = arith.addf %582, %583 : vector<8x32xf32>
    %cst_235 = arith.constant 1.000000e+00 : f32
    %585 = vector.broadcast %cst_235 : f32 to vector<8x32xf32>
    %586 = arith.subf %585, %569 : vector<8x32xf32>
    %587 = arith.mulf %586, %579 : vector<8x32xf32>
    %588 = arith.addf %584, %587 : vector<8x32xf32>
    %589 = arith.mulf %569, %508 : vector<8x32xf32>
    %590 = arith.addf %588, %589 : vector<8x32xf32>
    %c5_236 = arith.constant 5 : index
    %c0_237 = arith.constant 0 : index
    %c0_238 = arith.constant 0 : index
    %591 = vector.load %arg30[%c5_236, %c0_237, %c0_238] : memref<8x8x32xf32, #tpu.memory_space<vmem>>, vector<1x8x32xf32>
    %592 = vector.shape_cast %591 : vector<1x8x32xf32> to vector<8x32xf32>
    %593 = vector.shape_cast %590 : vector<8x32xf32> to vector<1x8x32xf32>
    tpu.vector_store %arg30[%c5_236, %c0_237, %c0_238], %593 {strides = array<i32>} : memref<8x8x32xf32, #tpu.memory_space<vmem>>, vector<1x8x32xf32>,
    %594 = vector.broadcast %13 : vector<1x32xf32> to vector<8x32xf32>
    %595 = arith.mulf %590, %594 : vector<8x32xf32>
    %cst_239 = arith.constant dense<0.000000e+00> : vector<8xf32>
    %596 = vector.multi_reduction <add>, %595, %cst_239 [1] : vector<8x32xf32> to vector<8xf32>
    %597 = vector.shape_cast %596 : vector<8xf32> to vector<8x1xf32>
    %c0_240 = arith.constant 0 : index
    %c5_241 = arith.constant 5 : index
    %598 = vector.load %arg32[%c0_240, %c5_241] : memref<8x8xf32, #tpu.memory_space<vmem>>, vector<8x1xf32>
    tpu.vector_store %arg32[%c0_240, %c5_241], %597 {strides = array<i32>} : memref<8x8xf32, #tpu.memory_space<vmem>>, vector<8x1xf32>,
    %cst_242 = arith.constant 0.000000e+00 : f32
    %599 = vector.broadcast %cst_242 : f32 to vector<8x8xf32>
    %600 = arith.select %526, %538, %599 : vector<8x8xi1>, vector<8x8xf32>
    %c5_243 = arith.constant 5 : index
    %c0_244 = arith.constant 0 : index
    %c0_245 = arith.constant 0 : index
    %601 = vector.load %arg27[%c5_243, %c0_244, %c0_245] : memref<8x8x8xf32, #tpu.memory_space<vmem>>, vector<1x8x8xf32>
    %602 = vector.shape_cast %601 : vector<1x8x8xf32> to vector<8x8xf32>
    %603 = vector.shape_cast %600 : vector<8x8xf32> to vector<1x8x8xf32>
    tpu.vector_store %arg27[%c5_243, %c0_244, %c0_245], %603 {strides = array<i32>} : memref<8x8x8xf32, #tpu.memory_space<vmem>>, vector<1x8x8xf32>,
    %c6 = arith.constant 6 : index
    %c0_246 = arith.constant 0 : index
    %c0_247 = arith.constant 0 : index
    %604 = vector.load %arg29[%c6, %c0_246, %c0_247] : memref<8x8x32xf32, #tpu.memory_space<vmem>>, vector<1x8x32xf32>
    %605 = vector.shape_cast %604 : vector<1x8x32xf32> to vector<8x32xf32>
    %606 = vector.broadcast %12 : vector<1x32xf32> to vector<8x32xf32>
    %607 = arith.mulf %605, %606 : vector<8x32xf32>
    %cst_248 = arith.constant dense<0.000000e+00> : vector<8xf32>
    %608 = vector.multi_reduction <add>, %607, %cst_248 [1] : vector<8x32xf32> to vector<8xf32>
    %609 = vector.shape_cast %608 : vector<8xf32> to vector<8x1xf32>
    %610 = vector.broadcast %14 : vector<1x1xf32> to vector<8x1xf32>
    %611 = arith.addf %609, %610 : vector<8x1xf32>
    %c0_249 = arith.constant 0 : index
    %c0_250 = arith.constant 0 : index
    %612 = vector.load %arg32[%c0_249, %c0_250] : memref<8x8xf32, #tpu.memory_space<vmem>>, vector<8x8xf32>
    %613 = vector.broadcast %611 : vector<8x1xf32> to vector<8x8xf32>
    %614 = arith.addf %612, %613 : vector<8x8xf32>
    %c6_251 = arith.constant 6 : index
    %c0_252 = arith.constant 0 : index
    %c0_253 = arith.constant 0 : index
    %615 = vector.load %arg2[%c6_251, %c0_252, %c0_253] : memref<8x8x8xf32, #tpu.memory_space<vmem>>, vector<1x8x8xf32>
    %616 = vector.shape_cast %615 : vector<1x8x8xf32> to vector<8x8xf32>
    %cst_254 = arith.constant 1.000000e+00 : f32
    %617 = vector.broadcast %cst_254 : f32 to vector<8x8xf32>
    %618 = arith.subf %617, %616 : vector<8x8xf32>
    %cst_255 = arith.constant 1.000000e+30 : f32
    %619 = vector.broadcast %cst_255 : f32 to vector<8x8xf32>
    %620 = arith.mulf %618, %619 : vector<8x8xf32>
    %621 = arith.subf %614, %620 : vector<8x8xf32>
    %c6_i32 = arith.constant 6 : i32
    %622 = vector.broadcast %c6_i32 : i32 to vector<8x8xi32>
    %623 = arith.cmpi slt, %11, %622 : vector<8x8xi32>
    %cst_256 = arith.constant -9.99999993E+36 : f32
    %624 = vector.broadcast %cst_256 : f32 to vector<8x8xf32>
    %625 = arith.select %623, %621, %624 : vector<8x8xi1>, vector<8x8xf32>
    %cst_257 = arith.constant dense<0xFF800000> : vector<8xf32>
    %626 = vector.multi_reduction <maximumf>, %625, %cst_257 [1] : vector<8x8xf32> to vector<8xf32>
    %627 = vector.shape_cast %626 : vector<8xf32> to vector<8x1xf32>
    %628 = vector.broadcast %627 : vector<8x1xf32> to vector<8x8xf32>
    %629 = arith.subf %625, %628 : vector<8x8xf32>
    %630 = math.exp %629 : vector<8x8xf32>
    %cst_258 = arith.constant dense<0.000000e+00> : vector<8xf32>
    %631 = vector.multi_reduction <add>, %630, %cst_258 [1] : vector<8x8xf32> to vector<8xf32>
    %632 = vector.shape_cast %631 : vector<8xf32> to vector<8x1xf32>
    %633 = tpu.reciprocal %632 {approx = true} : vector<8x1xf32> -> vector<8x1xf32>
    %634 = vector.broadcast %633 : vector<8x1xf32> to vector<8x8xf32>
    %635 = arith.mulf %630, %634 : vector<8x8xf32>
    %c6_259 = arith.constant 6 : index
    %c0_260 = arith.constant 0 : index
    %c0_261 = arith.constant 0 : index
    %636 = vector.load %arg3[%c6_259, %c0_260, %c0_261] : memref<8x8x8xf32, #tpu.memory_space<vmem>>, vector<1x8x8xf32>
    %637 = vector.shape_cast %636 : vector<1x8x8xf32> to vector<8x8xf32>
    %638 = arith.mulf %635, %637 : vector<8x8xf32>
    %639 = arith.subf %635, %638 : vector<8x8xf32>
    %640 = tpu.transpose %638, [1, 0] : vector<8x8xf32> -> vector<8x8xf32>
    %641 = tpu.transpose %639, [1, 0] : vector<8x8xf32> -> vector<8x8xf32>
    %c0_262 = arith.constant 0 : index
    %c0_263 = arith.constant 0 : index
    %c0_264 = arith.constant 0 : index
    %642 = vector.load %arg30[%c0_262, %c0_263, %c0_264] : memref<8x8x32xf32, #tpu.memory_space<vmem>>, vector<8x8x32xf32>
    %643 = vector.shape_cast %640 : vector<8x8xf32> to vector<8x8x1xf32>
    %644 = vector.broadcast %643 : vector<8x8x1xf32> to vector<8x8x32xf32>
    %645 = arith.mulf %644, %642 : vector<8x8x32xf32>
    %cst_265 = arith.constant dense<0.000000e+00> : vector<8x32xf32>
    %646 = vector.multi_reduction <add>, %645, %cst_265 [0] : vector<8x8x32xf32> to vector<8x32xf32>
    %647 = vector.shape_cast %641 : vector<8x8xf32> to vector<8x8x1xf32>
    %648 = vector.broadcast %647 : vector<8x8x1xf32> to vector<8x8x32xf32>
    %649 = arith.mulf %648, %642 : vector<8x8x32xf32>
    %cst_266 = arith.constant dense<0.000000e+00> : vector<8x32xf32>
    %650 = vector.multi_reduction <add>, %649, %cst_266 [0] : vector<8x8x32xf32> to vector<8x32xf32>
    %651 = tpu.concatenate %646, %650 in 1 : vector<8x32xf32>, vector<8x32xf32> -> vector<8x64xf32>
    %cst_267 = arith.constant dense<0.000000e+00> : vector<8x32xf32>
    %652 = tpu.matmul %651, %15, %cst_267 {dimension_numbers = #tpu.dot_dimension_numbers<[1], [0], [0], [1], [0, 0, 1, 1], [], []>} : vector<8x64xf32>, vector<64x32xf32>, vector<8x32xf32> -> vector<8x32xf32>
    %653 = tpu.concatenate %605, %652 in 1 : vector<8x32xf32>, vector<8x32xf32> -> vector<8x64xf32>
    %cst_268 = arith.constant dense<0.000000e+00> : vector<8x256xf32>
    %654 = tpu.matmul %653, %16, %cst_268 {dimension_numbers = #tpu.dot_dimension_numbers<[1], [0], [0], [1], [0, 0, 1, 1], [], []>} : vector<8x64xf32>, vector<64x256xf32>, vector<8x256xf32> -> vector<8x256xf32>
    %655 = vector.broadcast %17 : vector<1x256xf32> to vector<8x256xf32>
    %656 = arith.addf %654, %655 : vector<8x256xf32>
    %657 = vector.extract_strided_slice %656 {offsets = [0, 0], sizes = [8, 128], strides = [1, 1]} : vector<8x256xf32> to vector<8x128xf32>
    %658 = arith.negf %657 : vector<8x128xf32>
    %659 = math.exp %658 : vector<8x128xf32>
    %cst_269 = arith.constant 1.000000e+00 : f32
    %660 = vector.broadcast %cst_269 : f32 to vector<8x128xf32>
    %661 = arith.addf %660, %659 : vector<8x128xf32>
    %662 = arith.divf %660, %661 : vector<8x128xf32>
    %663 = vector.extract_strided_slice %662 {offsets = [0, 0], sizes = [8, 32], strides = [1, 1]} : vector<8x128xf32> to vector<8x32xf32>
    %664 = vector.extract_strided_slice %662 {offsets = [0, 32], sizes = [8, 32], strides = [1, 1]} : vector<8x128xf32> to vector<8x32xf32>
    %665 = vector.extract_strided_slice %662 {offsets = [0, 64], sizes = [8, 32], strides = [1, 1]} : vector<8x128xf32> to vector<8x32xf32>
    %666 = vector.extract_strided_slice %662 {offsets = [0, 96], sizes = [8, 32], strides = [1, 1]} : vector<8x128xf32> to vector<8x32xf32>
    %667 = vector.extract_strided_slice %656 {offsets = [0, 128], sizes = [8, 32], strides = [1, 1]} : vector<8x256xf32> to vector<8x32xf32>
    %668 = vector.extract_strided_slice %656 {offsets = [0, 160], sizes = [8, 32], strides = [1, 1]} : vector<8x256xf32> to vector<8x32xf32>
    %669 = arith.mulf %663, %668 : vector<8x32xf32>
    %670 = arith.addf %667, %669 : vector<8x32xf32>
    %671 = math.tanh %670 : vector<8x32xf32>
    %672 = vector.extract_strided_slice %656 {offsets = [0, 192], sizes = [8, 32], strides = [1, 1]} : vector<8x256xf32> to vector<8x32xf32>
    %673 = vector.extract_strided_slice %656 {offsets = [0, 224], sizes = [8, 32], strides = [1, 1]} : vector<8x256xf32> to vector<8x32xf32>
    %674 = arith.mulf %665, %673 : vector<8x32xf32>
    %675 = arith.addf %672, %674 : vector<8x32xf32>
    %676 = math.tanh %675 : vector<8x32xf32>
    %cst_270 = arith.constant 1.000000e+00 : f32
    %677 = vector.broadcast %cst_270 : f32 to vector<8x32xf32>
    %678 = arith.subf %677, %664 : vector<8x32xf32>
    %679 = arith.mulf %678, %671 : vector<8x32xf32>
    %680 = arith.mulf %664, %652 : vector<8x32xf32>
    %681 = arith.addf %679, %680 : vector<8x32xf32>
    %cst_271 = arith.constant 1.000000e+00 : f32
    %682 = vector.broadcast %cst_271 : f32 to vector<8x32xf32>
    %683 = arith.subf %682, %666 : vector<8x32xf32>
    %684 = arith.mulf %683, %676 : vector<8x32xf32>
    %685 = arith.addf %681, %684 : vector<8x32xf32>
    %686 = arith.mulf %666, %605 : vector<8x32xf32>
    %687 = arith.addf %685, %686 : vector<8x32xf32>
    %c6_272 = arith.constant 6 : index
    %c0_273 = arith.constant 0 : index
    %c0_274 = arith.constant 0 : index
    %688 = vector.load %arg30[%c6_272, %c0_273, %c0_274] : memref<8x8x32xf32, #tpu.memory_space<vmem>>, vector<1x8x32xf32>
    %689 = vector.shape_cast %688 : vector<1x8x32xf32> to vector<8x32xf32>
    %690 = vector.shape_cast %687 : vector<8x32xf32> to vector<1x8x32xf32>
    tpu.vector_store %arg30[%c6_272, %c0_273, %c0_274], %690 {strides = array<i32>} : memref<8x8x32xf32, #tpu.memory_space<vmem>>, vector<1x8x32xf32>,
    %691 = vector.broadcast %13 : vector<1x32xf32> to vector<8x32xf32>
    %692 = arith.mulf %687, %691 : vector<8x32xf32>
    %cst_275 = arith.constant dense<0.000000e+00> : vector<8xf32>
    %693 = vector.multi_reduction <add>, %692, %cst_275 [1] : vector<8x32xf32> to vector<8xf32>
    %694 = vector.shape_cast %693 : vector<8xf32> to vector<8x1xf32>
    %c0_276 = arith.constant 0 : index
    %c6_277 = arith.constant 6 : index
    %695 = vector.load %arg32[%c0_276, %c6_277] : memref<8x8xf32, #tpu.memory_space<vmem>>, vector<8x1xf32>
    tpu.vector_store %arg32[%c0_276, %c6_277], %694 {strides = array<i32>} : memref<8x8xf32, #tpu.memory_space<vmem>>, vector<8x1xf32>,
    %cst_278 = arith.constant 0.000000e+00 : f32
    %696 = vector.broadcast %cst_278 : f32 to vector<8x8xf32>
    %697 = arith.select %623, %635, %696 : vector<8x8xi1>, vector<8x8xf32>
    %c6_279 = arith.constant 6 : index
    %c0_280 = arith.constant 0 : index
    %c0_281 = arith.constant 0 : index
    %698 = vector.load %arg27[%c6_279, %c0_280, %c0_281] : memref<8x8x8xf32, #tpu.memory_space<vmem>>, vector<1x8x8xf32>
    %699 = vector.shape_cast %698 : vector<1x8x8xf32> to vector<8x8xf32>
    %700 = vector.shape_cast %697 : vector<8x8xf32> to vector<1x8x8xf32>
    tpu.vector_store %arg27[%c6_279, %c0_280, %c0_281], %700 {strides = array<i32>} : memref<8x8x8xf32, #tpu.memory_space<vmem>>, vector<1x8x8xf32>,
    %c7 = arith.constant 7 : index
    %c0_282 = arith.constant 0 : index
    %c0_283 = arith.constant 0 : index
    %701 = vector.load %arg29[%c7, %c0_282, %c0_283] : memref<8x8x32xf32, #tpu.memory_space<vmem>>, vector<1x8x32xf32>
    %702 = vector.shape_cast %701 : vector<1x8x32xf32> to vector<8x32xf32>
    %703 = vector.broadcast %12 : vector<1x32xf32> to vector<8x32xf32>
    %704 = arith.mulf %702, %703 : vector<8x32xf32>
    %cst_284 = arith.constant dense<0.000000e+00> : vector<8xf32>
    %705 = vector.multi_reduction <add>, %704, %cst_284 [1] : vector<8x32xf32> to vector<8xf32>
    %706 = vector.shape_cast %705 : vector<8xf32> to vector<8x1xf32>
    %707 = vector.broadcast %14 : vector<1x1xf32> to vector<8x1xf32>
    %708 = arith.addf %706, %707 : vector<8x1xf32>
    %c0_285 = arith.constant 0 : index
    %c0_286 = arith.constant 0 : index
    %709 = vector.load %arg32[%c0_285, %c0_286] : memref<8x8xf32, #tpu.memory_space<vmem>>, vector<8x8xf32>
    %710 = vector.broadcast %708 : vector<8x1xf32> to vector<8x8xf32>
    %711 = arith.addf %709, %710 : vector<8x8xf32>
    %c7_287 = arith.constant 7 : index
    %c0_288 = arith.constant 0 : index
    %c0_289 = arith.constant 0 : index
    %712 = vector.load %arg2[%c7_287, %c0_288, %c0_289] : memref<8x8x8xf32, #tpu.memory_space<vmem>>, vector<1x8x8xf32>
    %713 = vector.shape_cast %712 : vector<1x8x8xf32> to vector<8x8xf32>
    %cst_290 = arith.constant 1.000000e+00 : f32
    %714 = vector.broadcast %cst_290 : f32 to vector<8x8xf32>
    %715 = arith.subf %714, %713 : vector<8x8xf32>
    %cst_291 = arith.constant 1.000000e+30 : f32
    %716 = vector.broadcast %cst_291 : f32 to vector<8x8xf32>
    %717 = arith.mulf %715, %716 : vector<8x8xf32>
    %718 = arith.subf %711, %717 : vector<8x8xf32>
    %c7_i32 = arith.constant 7 : i32
    %719 = vector.broadcast %c7_i32 : i32 to vector<8x8xi32>
    %720 = arith.cmpi slt, %11, %719 : vector<8x8xi32>
    %cst_292 = arith.constant -9.99999993E+36 : f32
    %721 = vector.broadcast %cst_292 : f32 to vector<8x8xf32>
    %722 = arith.select %720, %718, %721 : vector<8x8xi1>, vector<8x8xf32>
    %cst_293 = arith.constant dense<0xFF800000> : vector<8xf32>
    %723 = vector.multi_reduction <maximumf>, %722, %cst_293 [1] : vector<8x8xf32> to vector<8xf32>
    %724 = vector.shape_cast %723 : vector<8xf32> to vector<8x1xf32>
    %725 = vector.broadcast %724 : vector<8x1xf32> to vector<8x8xf32>
    %726 = arith.subf %722, %725 : vector<8x8xf32>
    %727 = math.exp %726 : vector<8x8xf32>
    %cst_294 = arith.constant dense<0.000000e+00> : vector<8xf32>
    %728 = vector.multi_reduction <add>, %727, %cst_294 [1] : vector<8x8xf32> to vector<8xf32>
    %729 = vector.shape_cast %728 : vector<8xf32> to vector<8x1xf32>
    %730 = tpu.reciprocal %729 {approx = true} : vector<8x1xf32> -> vector<8x1xf32>
    %731 = vector.broadcast %730 : vector<8x1xf32> to vector<8x8xf32>
    %732 = arith.mulf %727, %731 : vector<8x8xf32>
    %c7_295 = arith.constant 7 : index
    %c0_296 = arith.constant 0 : index
    %c0_297 = arith.constant 0 : index
    %733 = vector.load %arg3[%c7_295, %c0_296, %c0_297] : memref<8x8x8xf32, #tpu.memory_space<vmem>>, vector<1x8x8xf32>
    %734 = vector.shape_cast %733 : vector<1x8x8xf32> to vector<8x8xf32>
    %735 = arith.mulf %732, %734 : vector<8x8xf32>
    %736 = arith.subf %732, %735 : vector<8x8xf32>
    %737 = tpu.transpose %735, [1, 0] : vector<8x8xf32> -> vector<8x8xf32>
    %738 = tpu.transpose %736, [1, 0] : vector<8x8xf32> -> vector<8x8xf32>
    %c0_298 = arith.constant 0 : index
    %c0_299 = arith.constant 0 : index
    %c0_300 = arith.constant 0 : index
    %739 = vector.load %arg30[%c0_298, %c0_299, %c0_300] : memref<8x8x32xf32, #tpu.memory_space<vmem>>, vector<8x8x32xf32>
    %740 = vector.shape_cast %737 : vector<8x8xf32> to vector<8x8x1xf32>
    %741 = vector.broadcast %740 : vector<8x8x1xf32> to vector<8x8x32xf32>
    %742 = arith.mulf %741, %739 : vector<8x8x32xf32>
    %cst_301 = arith.constant dense<0.000000e+00> : vector<8x32xf32>
    %743 = vector.multi_reduction <add>, %742, %cst_301 [0] : vector<8x8x32xf32> to vector<8x32xf32>
    %744 = vector.shape_cast %738 : vector<8x8xf32> to vector<8x8x1xf32>
    %745 = vector.broadcast %744 : vector<8x8x1xf32> to vector<8x8x32xf32>
    %746 = arith.mulf %745, %739 : vector<8x8x32xf32>
    %cst_302 = arith.constant dense<0.000000e+00> : vector<8x32xf32>
    %747 = vector.multi_reduction <add>, %746, %cst_302 [0] : vector<8x8x32xf32> to vector<8x32xf32>
    %748 = tpu.concatenate %743, %747 in 1 : vector<8x32xf32>, vector<8x32xf32> -> vector<8x64xf32>
    %cst_303 = arith.constant dense<0.000000e+00> : vector<8x32xf32>
    %749 = tpu.matmul %748, %15, %cst_303 {dimension_numbers = #tpu.dot_dimension_numbers<[1], [0], [0], [1], [0, 0, 1, 1], [], []>} : vector<8x64xf32>, vector<64x32xf32>, vector<8x32xf32> -> vector<8x32xf32>
    %750 = tpu.concatenate %702, %749 in 1 : vector<8x32xf32>, vector<8x32xf32> -> vector<8x64xf32>
    %cst_304 = arith.constant dense<0.000000e+00> : vector<8x256xf32>
    %751 = tpu.matmul %750, %16, %cst_304 {dimension_numbers = #tpu.dot_dimension_numbers<[1], [0], [0], [1], [0, 0, 1, 1], [], []>} : vector<8x64xf32>, vector<64x256xf32>, vector<8x256xf32> -> vector<8x256xf32>
    %752 = vector.broadcast %17 : vector<1x256xf32> to vector<8x256xf32>
    %753 = arith.addf %751, %752 : vector<8x256xf32>
    %754 = vector.extract_strided_slice %753 {offsets = [0, 0], sizes = [8, 128], strides = [1, 1]} : vector<8x256xf32> to vector<8x128xf32>
    %755 = arith.negf %754 : vector<8x128xf32>
    %756 = math.exp %755 : vector<8x128xf32>
    %cst_305 = arith.constant 1.000000e+00 : f32
    %757 = vector.broadcast %cst_305 : f32 to vector<8x128xf32>
    %758 = arith.addf %757, %756 : vector<8x128xf32>
    %759 = arith.divf %757, %758 : vector<8x128xf32>
    %760 = vector.extract_strided_slice %759 {offsets = [0, 0], sizes = [8, 32], strides = [1, 1]} : vector<8x128xf32> to vector<8x32xf32>
    %761 = vector.extract_strided_slice %759 {offsets = [0, 32], sizes = [8, 32], strides = [1, 1]} : vector<8x128xf32> to vector<8x32xf32>
    %762 = vector.extract_strided_slice %759 {offsets = [0, 64], sizes = [8, 32], strides = [1, 1]} : vector<8x128xf32> to vector<8x32xf32>
    %763 = vector.extract_strided_slice %759 {offsets = [0, 96], sizes = [8, 32], strides = [1, 1]} : vector<8x128xf32> to vector<8x32xf32>
    %764 = vector.extract_strided_slice %753 {offsets = [0, 128], sizes = [8, 32], strides = [1, 1]} : vector<8x256xf32> to vector<8x32xf32>
    %765 = vector.extract_strided_slice %753 {offsets = [0, 160], sizes = [8, 32], strides = [1, 1]} : vector<8x256xf32> to vector<8x32xf32>
    %766 = arith.mulf %760, %765 : vector<8x32xf32>
    %767 = arith.addf %764, %766 : vector<8x32xf32>
    %768 = math.tanh %767 : vector<8x32xf32>
    %769 = vector.extract_strided_slice %753 {offsets = [0, 192], sizes = [8, 32], strides = [1, 1]} : vector<8x256xf32> to vector<8x32xf32>
    %770 = vector.extract_strided_slice %753 {offsets = [0, 224], sizes = [8, 32], strides = [1, 1]} : vector<8x256xf32> to vector<8x32xf32>
    %771 = arith.mulf %762, %770 : vector<8x32xf32>
    %772 = arith.addf %769, %771 : vector<8x32xf32>
    %773 = math.tanh %772 : vector<8x32xf32>
    %cst_306 = arith.constant 1.000000e+00 : f32
    %774 = vector.broadcast %cst_306 : f32 to vector<8x32xf32>
    %775 = arith.subf %774, %761 : vector<8x32xf32>
    %776 = arith.mulf %775, %768 : vector<8x32xf32>
    %777 = arith.mulf %761, %749 : vector<8x32xf32>
    %778 = arith.addf %776, %777 : vector<8x32xf32>
    %cst_307 = arith.constant 1.000000e+00 : f32
    %779 = vector.broadcast %cst_307 : f32 to vector<8x32xf32>
    %780 = arith.subf %779, %763 : vector<8x32xf32>
    %781 = arith.mulf %780, %773 : vector<8x32xf32>
    %782 = arith.addf %778, %781 : vector<8x32xf32>
    %783 = arith.mulf %763, %702 : vector<8x32xf32>
    %784 = arith.addf %782, %783 : vector<8x32xf32>
    %c7_308 = arith.constant 7 : index
    %c0_309 = arith.constant 0 : index
    %c0_310 = arith.constant 0 : index
    %785 = vector.load %arg30[%c7_308, %c0_309, %c0_310] : memref<8x8x32xf32, #tpu.memory_space<vmem>>, vector<1x8x32xf32>
    %786 = vector.shape_cast %785 : vector<1x8x32xf32> to vector<8x32xf32>
    %787 = vector.shape_cast %784 : vector<8x32xf32> to vector<1x8x32xf32>
    tpu.vector_store %arg30[%c7_308, %c0_309, %c0_310], %787 {strides = array<i32>} : memref<8x8x32xf32, #tpu.memory_space<vmem>>, vector<1x8x32xf32>,
    %788 = vector.broadcast %13 : vector<1x32xf32> to vector<8x32xf32>
    %789 = arith.mulf %784, %788 : vector<8x32xf32>
    %cst_311 = arith.constant dense<0.000000e+00> : vector<8xf32>
    %790 = vector.multi_reduction <add>, %789, %cst_311 [1] : vector<8x32xf32> to vector<8xf32>
    %791 = vector.shape_cast %790 : vector<8xf32> to vector<8x1xf32>
    %c0_312 = arith.constant 0 : index
    %c7_313 = arith.constant 7 : index
    %792 = vector.load %arg32[%c0_312, %c7_313] : memref<8x8xf32, #tpu.memory_space<vmem>>, vector<8x1xf32>
    tpu.vector_store %arg32[%c0_312, %c7_313], %791 {strides = array<i32>} : memref<8x8xf32, #tpu.memory_space<vmem>>, vector<8x1xf32>,
    %cst_314 = arith.constant 0.000000e+00 : f32
    %793 = vector.broadcast %cst_314 : f32 to vector<8x8xf32>
    %794 = arith.select %720, %732, %793 : vector<8x8xi1>, vector<8x8xf32>
    %c7_315 = arith.constant 7 : index
    %c0_316 = arith.constant 0 : index
    %c0_317 = arith.constant 0 : index
    %795 = vector.load %arg27[%c7_315, %c0_316, %c0_317] : memref<8x8x8xf32, #tpu.memory_space<vmem>>, vector<1x8x8xf32>
    %796 = vector.shape_cast %795 : vector<1x8x8xf32> to vector<8x8xf32>
    %797 = vector.shape_cast %794 : vector<8x8xf32> to vector<1x8x8xf32>
    tpu.vector_store %arg27[%c7_315, %c0_316, %c0_317], %797 {strides = array<i32>} : memref<8x8x8xf32, #tpu.memory_space<vmem>>, vector<1x8x8xf32>,
    %c0_318 = arith.constant 0 : index
    %c0_319 = arith.constant 0 : index
    %798 = vector.load %arg12[%c0_318, %c0_319] : memref<1x32xf32, #tpu.memory_space<vmem>>, vector<1x32xf32>
    %c0_320 = arith.constant 0 : index
    %c0_321 = arith.constant 0 : index
    %799 = vector.load %arg13[%c0_320, %c0_321] : memref<1x32xf32, #tpu.memory_space<vmem>>, vector<1x32xf32>
    %c0_322 = arith.constant 0 : index
    %c0_323 = arith.constant 0 : index
    %800 = vector.load %arg14[%c0_322, %c0_323] : memref<1x1xf32, #tpu.memory_space<vmem>>, vector<1x1xf32>
    %c0_324 = arith.constant 0 : index
    %c0_325 = arith.constant 0 : index
    %801 = vector.load %arg15[%c0_324, %c0_325] : memref<64x32xf32, #tpu.memory_space<vmem>>, vector<64x32xf32>
    %c0_326 = arith.constant 0 : index
    %c0_327 = arith.constant 0 : index
    %802 = vector.load %arg16[%c0_326, %c0_327] : memref<64x256xf32, #tpu.memory_space<vmem>>, vector<64x256xf32>
    %c0_328 = arith.constant 0 : index
    %c0_329 = arith.constant 0 : index
    %803 = vector.load %arg17[%c0_328, %c0_329] : memref<1x256xf32, #tpu.memory_space<vmem>>, vector<1x256xf32>
    %cst_330 = arith.constant 0.000000e+00 : f32
    %804 = vector.broadcast %cst_330 : f32 to vector<8x8x32xf32>
    %c0_331 = arith.constant 0 : index
    %c0_332 = arith.constant 0 : index
    %c0_333 = arith.constant 0 : index
    %805 = vector.load %arg31[%c0_331, %c0_332, %c0_333] : memref<8x8x32xf32, #tpu.memory_space<vmem>>, vector<8x8x32xf32>
    tpu.vector_store %arg31[%c0_331, %c0_332, %c0_333], %804 {strides = array<i32>} : memref<8x8x32xf32, #tpu.memory_space<vmem>>, vector<8x8x32xf32>,
    %cst_334 = arith.constant 0.000000e+00 : f32
    %806 = vector.broadcast %cst_334 : f32 to vector<8x8xf32>
    %c0_335 = arith.constant 0 : index
    %c0_336 = arith.constant 0 : index
    %807 = vector.load %arg32[%c0_335, %c0_336] : memref<8x8xf32, #tpu.memory_space<vmem>>, vector<8x8xf32>
    tpu.vector_store %arg32[%c0_335, %c0_336], %806 {strides = array<i32>} : memref<8x8xf32, #tpu.memory_space<vmem>>, vector<8x8xf32>,
    %c0_337 = arith.constant 0 : index
    %c0_338 = arith.constant 0 : index
    %c0_339 = arith.constant 0 : index
    %808 = vector.load %arg30[%c0_337, %c0_338, %c0_339] : memref<8x8x32xf32, #tpu.memory_space<vmem>>, vector<1x8x32xf32>
    %809 = vector.shape_cast %808 : vector<1x8x32xf32> to vector<8x32xf32>
    %810 = vector.broadcast %798 : vector<1x32xf32> to vector<8x32xf32>
    %811 = arith.mulf %809, %810 : vector<8x32xf32>
    %cst_340 = arith.constant dense<0.000000e+00> : vector<8xf32>
    %812 = vector.multi_reduction <add>, %811, %cst_340 [1] : vector<8x32xf32> to vector<8xf32>
    %813 = vector.shape_cast %812 : vector<8xf32> to vector<8x1xf32>
    %814 = vector.broadcast %800 : vector<1x1xf32> to vector<8x1xf32>
    %815 = arith.addf %813, %814 : vector<8x1xf32>
    %c0_341 = arith.constant 0 : index
    %c0_342 = arith.constant 0 : index
    %816 = vector.load %arg32[%c0_341, %c0_342] : memref<8x8xf32, #tpu.memory_space<vmem>>, vector<8x8xf32>
    %817 = vector.broadcast %815 : vector<8x1xf32> to vector<8x8xf32>
    %818 = arith.addf %816, %817 : vector<8x8xf32>
    %c0_343 = arith.constant 0 : index
    %c0_344 = arith.constant 0 : index
    %c0_345 = arith.constant 0 : index
    %819 = vector.load %arg2[%c0_343, %c0_344, %c0_345] : memref<8x8x8xf32, #tpu.memory_space<vmem>>, vector<1x8x8xf32>
    %820 = vector.shape_cast %819 : vector<1x8x8xf32> to vector<8x8xf32>
    %cst_346 = arith.constant 1.000000e+00 : f32
    %821 = vector.broadcast %cst_346 : f32 to vector<8x8xf32>
    %822 = arith.subf %821, %820 : vector<8x8xf32>
    %cst_347 = arith.constant 1.000000e+30 : f32
    %823 = vector.broadcast %cst_347 : f32 to vector<8x8xf32>
    %824 = arith.mulf %822, %823 : vector<8x8xf32>
    %825 = arith.subf %818, %824 : vector<8x8xf32>
    %c0_i32_348 = arith.constant 0 : i32
    %826 = vector.broadcast %c0_i32_348 : i32 to vector<8x8xi32>
    %827 = arith.cmpi slt, %11, %826 : vector<8x8xi32>
    %cst_349 = arith.constant -9.99999993E+36 : f32
    %828 = vector.broadcast %cst_349 : f32 to vector<8x8xf32>
    %829 = arith.select %827, %825, %828 : vector<8x8xi1>, vector<8x8xf32>
    %cst_350 = arith.constant dense<0xFF800000> : vector<8xf32>
    %830 = vector.multi_reduction <maximumf>, %829, %cst_350 [1] : vector<8x8xf32> to vector<8xf32>
    %831 = vector.shape_cast %830 : vector<8xf32> to vector<8x1xf32>
    %832 = vector.broadcast %831 : vector<8x1xf32> to vector<8x8xf32>
    %833 = arith.subf %829, %832 : vector<8x8xf32>
    %834 = math.exp %833 : vector<8x8xf32>
    %cst_351 = arith.constant dense<0.000000e+00> : vector<8xf32>
    %835 = vector.multi_reduction <add>, %834, %cst_351 [1] : vector<8x8xf32> to vector<8xf32>
    %836 = vector.shape_cast %835 : vector<8xf32> to vector<8x1xf32>
    %837 = tpu.reciprocal %836 {approx = true} : vector<8x1xf32> -> vector<8x1xf32>
    %838 = vector.broadcast %837 : vector<8x1xf32> to vector<8x8xf32>
    %839 = arith.mulf %834, %838 : vector<8x8xf32>
    %c0_352 = arith.constant 0 : index
    %c0_353 = arith.constant 0 : index
    %c0_354 = arith.constant 0 : index
    %840 = vector.load %arg3[%c0_352, %c0_353, %c0_354] : memref<8x8x8xf32, #tpu.memory_space<vmem>>, vector<1x8x8xf32>
    %841 = vector.shape_cast %840 : vector<1x8x8xf32> to vector<8x8xf32>
    %842 = arith.mulf %839, %841 : vector<8x8xf32>
    %843 = arith.subf %839, %842 : vector<8x8xf32>
    %844 = tpu.transpose %842, [1, 0] : vector<8x8xf32> -> vector<8x8xf32>
    %845 = tpu.transpose %843, [1, 0] : vector<8x8xf32> -> vector<8x8xf32>
    %c0_355 = arith.constant 0 : index
    %c0_356 = arith.constant 0 : index
    %c0_357 = arith.constant 0 : index
    %846 = vector.load %arg31[%c0_355, %c0_356, %c0_357] : memref<8x8x32xf32, #tpu.memory_space<vmem>>, vector<8x8x32xf32>
    %847 = vector.shape_cast %844 : vector<8x8xf32> to vector<8x8x1xf32>
    %848 = vector.broadcast %847 : vector<8x8x1xf32> to vector<8x8x32xf32>
    %849 = arith.mulf %848, %846 : vector<8x8x32xf32>
    %cst_358 = arith.constant dense<0.000000e+00> : vector<8x32xf32>
    %850 = vector.multi_reduction <add>, %849, %cst_358 [0] : vector<8x8x32xf32> to vector<8x32xf32>
    %851 = vector.shape_cast %845 : vector<8x8xf32> to vector<8x8x1xf32>
    %852 = vector.broadcast %851 : vector<8x8x1xf32> to vector<8x8x32xf32>
    %853 = arith.mulf %852, %846 : vector<8x8x32xf32>
    %cst_359 = arith.constant dense<0.000000e+00> : vector<8x32xf32>
    %854 = vector.multi_reduction <add>, %853, %cst_359 [0] : vector<8x8x32xf32> to vector<8x32xf32>
    %855 = tpu.concatenate %850, %854 in 1 : vector<8x32xf32>, vector<8x32xf32> -> vector<8x64xf32>
    %cst_360 = arith.constant dense<0.000000e+00> : vector<8x32xf32>
    %856 = tpu.matmul %855, %801, %cst_360 {dimension_numbers = #tpu.dot_dimension_numbers<[1], [0], [0], [1], [0, 0, 1, 1], [], []>} : vector<8x64xf32>, vector<64x32xf32>, vector<8x32xf32> -> vector<8x32xf32>
    %857 = tpu.concatenate %809, %856 in 1 : vector<8x32xf32>, vector<8x32xf32> -> vector<8x64xf32>
    %cst_361 = arith.constant dense<0.000000e+00> : vector<8x256xf32>
    %858 = tpu.matmul %857, %802, %cst_361 {dimension_numbers = #tpu.dot_dimension_numbers<[1], [0], [0], [1], [0, 0, 1, 1], [], []>} : vector<8x64xf32>, vector<64x256xf32>, vector<8x256xf32> -> vector<8x256xf32>
    %859 = vector.broadcast %803 : vector<1x256xf32> to vector<8x256xf32>
    %860 = arith.addf %858, %859 : vector<8x256xf32>
    %861 = vector.extract_strided_slice %860 {offsets = [0, 0], sizes = [8, 128], strides = [1, 1]} : vector<8x256xf32> to vector<8x128xf32>
    %862 = arith.negf %861 : vector<8x128xf32>
    %863 = math.exp %862 : vector<8x128xf32>
    %cst_362 = arith.constant 1.000000e+00 : f32
    %864 = vector.broadcast %cst_362 : f32 to vector<8x128xf32>
    %865 = arith.addf %864, %863 : vector<8x128xf32>
    %866 = arith.divf %864, %865 : vector<8x128xf32>
    %867 = vector.extract_strided_slice %866 {offsets = [0, 0], sizes = [8, 32], strides = [1, 1]} : vector<8x128xf32> to vector<8x32xf32>
    %868 = vector.extract_strided_slice %866 {offsets = [0, 32], sizes = [8, 32], strides = [1, 1]} : vector<8x128xf32> to vector<8x32xf32>
    %869 = vector.extract_strided_slice %866 {offsets = [0, 64], sizes = [8, 32], strides = [1, 1]} : vector<8x128xf32> to vector<8x32xf32>
    %870 = vector.extract_strided_slice %866 {offsets = [0, 96], sizes = [8, 32], strides = [1, 1]} : vector<8x128xf32> to vector<8x32xf32>
    %871 = vector.extract_strided_slice %860 {offsets = [0, 128], sizes = [8, 32], strides = [1, 1]} : vector<8x256xf32> to vector<8x32xf32>
    %872 = vector.extract_strided_slice %860 {offsets = [0, 160], sizes = [8, 32], strides = [1, 1]} : vector<8x256xf32> to vector<8x32xf32>
    %873 = arith.mulf %867, %872 : vector<8x32xf32>
    %874 = arith.addf %871, %873 : vector<8x32xf32>
    %875 = math.tanh %874 : vector<8x32xf32>
    %876 = vector.extract_strided_slice %860 {offsets = [0, 192], sizes = [8, 32], strides = [1, 1]} : vector<8x256xf32> to vector<8x32xf32>
    %877 = vector.extract_strided_slice %860 {offsets = [0, 224], sizes = [8, 32], strides = [1, 1]} : vector<8x256xf32> to vector<8x32xf32>
    %878 = arith.mulf %869, %877 : vector<8x32xf32>
    %879 = arith.addf %876, %878 : vector<8x32xf32>
    %880 = math.tanh %879 : vector<8x32xf32>
    %cst_363 = arith.constant 1.000000e+00 : f32
    %881 = vector.broadcast %cst_363 : f32 to vector<8x32xf32>
    %882 = arith.subf %881, %868 : vector<8x32xf32>
    %883 = arith.mulf %882, %875 : vector<8x32xf32>
    %884 = arith.mulf %868, %856 : vector<8x32xf32>
    %885 = arith.addf %883, %884 : vector<8x32xf32>
    %cst_364 = arith.constant 1.000000e+00 : f32
    %886 = vector.broadcast %cst_364 : f32 to vector<8x32xf32>
    %887 = arith.subf %886, %870 : vector<8x32xf32>
    %888 = arith.mulf %887, %880 : vector<8x32xf32>
    %889 = arith.addf %885, %888 : vector<8x32xf32>
    %890 = arith.mulf %870, %809 : vector<8x32xf32>
    %891 = arith.addf %889, %890 : vector<8x32xf32>
    %c0_365 = arith.constant 0 : index
    %c0_366 = arith.constant 0 : index
    %c0_367 = arith.constant 0 : index
    %892 = vector.load %arg31[%c0_365, %c0_366, %c0_367] : memref<8x8x32xf32, #tpu.memory_space<vmem>>, vector<1x8x32xf32>
    %893 = vector.shape_cast %892 : vector<1x8x32xf32> to vector<8x32xf32>
    %894 = vector.shape_cast %891 : vector<8x32xf32> to vector<1x8x32xf32>
    tpu.vector_store %arg31[%c0_365, %c0_366, %c0_367], %894 {strides = array<i32>} : memref<8x8x32xf32, #tpu.memory_space<vmem>>, vector<1x8x32xf32>,
    %895 = vector.broadcast %799 : vector<1x32xf32> to vector<8x32xf32>
    %896 = arith.mulf %891, %895 : vector<8x32xf32>
    %cst_368 = arith.constant dense<0.000000e+00> : vector<8xf32>
    %897 = vector.multi_reduction <add>, %896, %cst_368 [1] : vector<8x32xf32> to vector<8xf32>
    %898 = vector.shape_cast %897 : vector<8xf32> to vector<8x1xf32>
    %c0_369 = arith.constant 0 : index
    %c0_370 = arith.constant 0 : index
    %899 = vector.load %arg32[%c0_369, %c0_370] : memref<8x8xf32, #tpu.memory_space<vmem>>, vector<8x1xf32>
    tpu.vector_store %arg32[%c0_369, %c0_370], %898 {strides = array<i32>} : memref<8x8xf32, #tpu.memory_space<vmem>>, vector<8x1xf32>,
    %cst_371 = arith.constant 0.000000e+00 : f32
    %900 = vector.broadcast %cst_371 : f32 to vector<8x8xf32>
    %901 = arith.select %827, %839, %900 : vector<8x8xi1>, vector<8x8xf32>
    %c0_372 = arith.constant 0 : index
    %c0_373 = arith.constant 0 : index
    %c0_374 = arith.constant 0 : index
    %902 = vector.load %arg28[%c0_372, %c0_373, %c0_374] : memref<8x8x8xf32, #tpu.memory_space<vmem>>, vector<1x8x8xf32>
    %903 = vector.shape_cast %902 : vector<1x8x8xf32> to vector<8x8xf32>
    %904 = vector.shape_cast %901 : vector<8x8xf32> to vector<1x8x8xf32>
    tpu.vector_store %arg28[%c0_372, %c0_373, %c0_374], %904 {strides = array<i32>} : memref<8x8x8xf32, #tpu.memory_space<vmem>>, vector<1x8x8xf32>,
    %c1_375 = arith.constant 1 : index
    %c0_376 = arith.constant 0 : index
    %c0_377 = arith.constant 0 : index
    %905 = vector.load %arg30[%c1_375, %c0_376, %c0_377] : memref<8x8x32xf32, #tpu.memory_space<vmem>>, vector<1x8x32xf32>
    %906 = vector.shape_cast %905 : vector<1x8x32xf32> to vector<8x32xf32>
    %907 = vector.broadcast %798 : vector<1x32xf32> to vector<8x32xf32>
    %908 = arith.mulf %906, %907 : vector<8x32xf32>
    %cst_378 = arith.constant dense<0.000000e+00> : vector<8xf32>
    %909 = vector.multi_reduction <add>, %908, %cst_378 [1] : vector<8x32xf32> to vector<8xf32>
    %910 = vector.shape_cast %909 : vector<8xf32> to vector<8x1xf32>
    %911 = vector.broadcast %800 : vector<1x1xf32> to vector<8x1xf32>
    %912 = arith.addf %910, %911 : vector<8x1xf32>
    %c0_379 = arith.constant 0 : index
    %c0_380 = arith.constant 0 : index
    %913 = vector.load %arg32[%c0_379, %c0_380] : memref<8x8xf32, #tpu.memory_space<vmem>>, vector<8x8xf32>
    %914 = vector.broadcast %912 : vector<8x1xf32> to vector<8x8xf32>
    %915 = arith.addf %913, %914 : vector<8x8xf32>
    %c1_381 = arith.constant 1 : index
    %c0_382 = arith.constant 0 : index
    %c0_383 = arith.constant 0 : index
    %916 = vector.load %arg2[%c1_381, %c0_382, %c0_383] : memref<8x8x8xf32, #tpu.memory_space<vmem>>, vector<1x8x8xf32>
    %917 = vector.shape_cast %916 : vector<1x8x8xf32> to vector<8x8xf32>
    %cst_384 = arith.constant 1.000000e+00 : f32
    %918 = vector.broadcast %cst_384 : f32 to vector<8x8xf32>
    %919 = arith.subf %918, %917 : vector<8x8xf32>
    %cst_385 = arith.constant 1.000000e+30 : f32
    %920 = vector.broadcast %cst_385 : f32 to vector<8x8xf32>
    %921 = arith.mulf %919, %920 : vector<8x8xf32>
    %922 = arith.subf %915, %921 : vector<8x8xf32>
    %c1_i32_386 = arith.constant 1 : i32
    %923 = vector.broadcast %c1_i32_386 : i32 to vector<8x8xi32>
    %924 = arith.cmpi slt, %11, %923 : vector<8x8xi32>
    %cst_387 = arith.constant -9.99999993E+36 : f32
    %925 = vector.broadcast %cst_387 : f32 to vector<8x8xf32>
    %926 = arith.select %924, %922, %925 : vector<8x8xi1>, vector<8x8xf32>
    %cst_388 = arith.constant dense<0xFF800000> : vector<8xf32>
    %927 = vector.multi_reduction <maximumf>, %926, %cst_388 [1] : vector<8x8xf32> to vector<8xf32>
    %928 = vector.shape_cast %927 : vector<8xf32> to vector<8x1xf32>
    %929 = vector.broadcast %928 : vector<8x1xf32> to vector<8x8xf32>
    %930 = arith.subf %926, %929 : vector<8x8xf32>
    %931 = math.exp %930 : vector<8x8xf32>
    %cst_389 = arith.constant dense<0.000000e+00> : vector<8xf32>
    %932 = vector.multi_reduction <add>, %931, %cst_389 [1] : vector<8x8xf32> to vector<8xf32>
    %933 = vector.shape_cast %932 : vector<8xf32> to vector<8x1xf32>
    %934 = tpu.reciprocal %933 {approx = true} : vector<8x1xf32> -> vector<8x1xf32>
    %935 = vector.broadcast %934 : vector<8x1xf32> to vector<8x8xf32>
    %936 = arith.mulf %931, %935 : vector<8x8xf32>
    %c1_390 = arith.constant 1 : index
    %c0_391 = arith.constant 0 : index
    %c0_392 = arith.constant 0 : index
    %937 = vector.load %arg3[%c1_390, %c0_391, %c0_392] : memref<8x8x8xf32, #tpu.memory_space<vmem>>, vector<1x8x8xf32>
    %938 = vector.shape_cast %937 : vector<1x8x8xf32> to vector<8x8xf32>
    %939 = arith.mulf %936, %938 : vector<8x8xf32>
    %940 = arith.subf %936, %939 : vector<8x8xf32>
    %941 = tpu.transpose %939, [1, 0] : vector<8x8xf32> -> vector<8x8xf32>
    %942 = tpu.transpose %940, [1, 0] : vector<8x8xf32> -> vector<8x8xf32>
    %c0_393 = arith.constant 0 : index
    %c0_394 = arith.constant 0 : index
    %c0_395 = arith.constant 0 : index
    %943 = vector.load %arg31[%c0_393, %c0_394, %c0_395] : memref<8x8x32xf32, #tpu.memory_space<vmem>>, vector<8x8x32xf32>
    %944 = vector.shape_cast %941 : vector<8x8xf32> to vector<8x8x1xf32>
    %945 = vector.broadcast %944 : vector<8x8x1xf32> to vector<8x8x32xf32>
    %946 = arith.mulf %945, %943 : vector<8x8x32xf32>
    %cst_396 = arith.constant dense<0.000000e+00> : vector<8x32xf32>
    %947 = vector.multi_reduction <add>, %946, %cst_396 [0] : vector<8x8x32xf32> to vector<8x32xf32>
    %948 = vector.shape_cast %942 : vector<8x8xf32> to vector<8x8x1xf32>
    %949 = vector.broadcast %948 : vector<8x8x1xf32> to vector<8x8x32xf32>
    %950 = arith.mulf %949, %943 : vector<8x8x32xf32>
    %cst_397 = arith.constant dense<0.000000e+00> : vector<8x32xf32>
    %951 = vector.multi_reduction <add>, %950, %cst_397 [0] : vector<8x8x32xf32> to vector<8x32xf32>
    %952 = tpu.concatenate %947, %951 in 1 : vector<8x32xf32>, vector<8x32xf32> -> vector<8x64xf32>
    %cst_398 = arith.constant dense<0.000000e+00> : vector<8x32xf32>
    %953 = tpu.matmul %952, %801, %cst_398 {dimension_numbers = #tpu.dot_dimension_numbers<[1], [0], [0], [1], [0, 0, 1, 1], [], []>} : vector<8x64xf32>, vector<64x32xf32>, vector<8x32xf32> -> vector<8x32xf32>
    %954 = tpu.concatenate %906, %953 in 1 : vector<8x32xf32>, vector<8x32xf32> -> vector<8x64xf32>
    %cst_399 = arith.constant dense<0.000000e+00> : vector<8x256xf32>
    %955 = tpu.matmul %954, %802, %cst_399 {dimension_numbers = #tpu.dot_dimension_numbers<[1], [0], [0], [1], [0, 0, 1, 1], [], []>} : vector<8x64xf32>, vector<64x256xf32>, vector<8x256xf32> -> vector<8x256xf32>
    %956 = vector.broadcast %803 : vector<1x256xf32> to vector<8x256xf32>
    %957 = arith.addf %955, %956 : vector<8x256xf32>
    %958 = vector.extract_strided_slice %957 {offsets = [0, 0], sizes = [8, 128], strides = [1, 1]} : vector<8x256xf32> to vector<8x128xf32>
    %959 = arith.negf %958 : vector<8x128xf32>
    %960 = math.exp %959 : vector<8x128xf32>
    %cst_400 = arith.constant 1.000000e+00 : f32
    %961 = vector.broadcast %cst_400 : f32 to vector<8x128xf32>
    %962 = arith.addf %961, %960 : vector<8x128xf32>
    %963 = arith.divf %961, %962 : vector<8x128xf32>
    %964 = vector.extract_strided_slice %963 {offsets = [0, 0], sizes = [8, 32], strides = [1, 1]} : vector<8x128xf32> to vector<8x32xf32>
    %965 = vector.extract_strided_slice %963 {offsets = [0, 32], sizes = [8, 32], strides = [1, 1]} : vector<8x128xf32> to vector<8x32xf32>
    %966 = vector.extract_strided_slice %963 {offsets = [0, 64], sizes = [8, 32], strides = [1, 1]} : vector<8x128xf32> to vector<8x32xf32>
    %967 = vector.extract_strided_slice %963 {offsets = [0, 96], sizes = [8, 32], strides = [1, 1]} : vector<8x128xf32> to vector<8x32xf32>
    %968 = vector.extract_strided_slice %957 {offsets = [0, 128], sizes = [8, 32], strides = [1, 1]} : vector<8x256xf32> to vector<8x32xf32>
    %969 = vector.extract_strided_slice %957 {offsets = [0, 160], sizes = [8, 32], strides = [1, 1]} : vector<8x256xf32> to vector<8x32xf32>
    %970 = arith.mulf %964, %969 : vector<8x32xf32>
    %971 = arith.addf %968, %970 : vector<8x32xf32>
    %972 = math.tanh %971 : vector<8x32xf32>
    %973 = vector.extract_strided_slice %957 {offsets = [0, 192], sizes = [8, 32], strides = [1, 1]} : vector<8x256xf32> to vector<8x32xf32>
    %974 = vector.extract_strided_slice %957 {offsets = [0, 224], sizes = [8, 32], strides = [1, 1]} : vector<8x256xf32> to vector<8x32xf32>
    %975 = arith.mulf %966, %974 : vector<8x32xf32>
    %976 = arith.addf %973, %975 : vector<8x32xf32>
    %977 = math.tanh %976 : vector<8x32xf32>
    %cst_401 = arith.constant 1.000000e+00 : f32
    %978 = vector.broadcast %cst_401 : f32 to vector<8x32xf32>
    %979 = arith.subf %978, %965 : vector<8x32xf32>
    %980 = arith.mulf %979, %972 : vector<8x32xf32>
    %981 = arith.mulf %965, %953 : vector<8x32xf32>
    %982 = arith.addf %980, %981 : vector<8x32xf32>
    %cst_402 = arith.constant 1.000000e+00 : f32
    %983 = vector.broadcast %cst_402 : f32 to vector<8x32xf32>
    %984 = arith.subf %983, %967 : vector<8x32xf32>
    %985 = arith.mulf %984, %977 : vector<8x32xf32>
    %986 = arith.addf %982, %985 : vector<8x32xf32>
    %987 = arith.mulf %967, %906 : vector<8x32xf32>
    %988 = arith.addf %986, %987 : vector<8x32xf32>
    %c1_403 = arith.constant 1 : index
    %c0_404 = arith.constant 0 : index
    %c0_405 = arith.constant 0 : index
    %989 = vector.load %arg31[%c1_403, %c0_404, %c0_405] : memref<8x8x32xf32, #tpu.memory_space<vmem>>, vector<1x8x32xf32>
    %990 = vector.shape_cast %989 : vector<1x8x32xf32> to vector<8x32xf32>
    %991 = vector.shape_cast %988 : vector<8x32xf32> to vector<1x8x32xf32>
    tpu.vector_store %arg31[%c1_403, %c0_404, %c0_405], %991 {strides = array<i32>} : memref<8x8x32xf32, #tpu.memory_space<vmem>>, vector<1x8x32xf32>,
    %992 = vector.broadcast %799 : vector<1x32xf32> to vector<8x32xf32>
    %993 = arith.mulf %988, %992 : vector<8x32xf32>
    %cst_406 = arith.constant dense<0.000000e+00> : vector<8xf32>
    %994 = vector.multi_reduction <add>, %993, %cst_406 [1] : vector<8x32xf32> to vector<8xf32>
    %995 = vector.shape_cast %994 : vector<8xf32> to vector<8x1xf32>
    %c0_407 = arith.constant 0 : index
    %c1_408 = arith.constant 1 : index
    %996 = vector.load %arg32[%c0_407, %c1_408] : memref<8x8xf32, #tpu.memory_space<vmem>>, vector<8x1xf32>
    tpu.vector_store %arg32[%c0_407, %c1_408], %995 {strides = array<i32>} : memref<8x8xf32, #tpu.memory_space<vmem>>, vector<8x1xf32>,
    %cst_409 = arith.constant 0.000000e+00 : f32
    %997 = vector.broadcast %cst_409 : f32 to vector<8x8xf32>
    %998 = arith.select %924, %936, %997 : vector<8x8xi1>, vector<8x8xf32>
    %c1_410 = arith.constant 1 : index
    %c0_411 = arith.constant 0 : index
    %c0_412 = arith.constant 0 : index
    %999 = vector.load %arg28[%c1_410, %c0_411, %c0_412] : memref<8x8x8xf32, #tpu.memory_space<vmem>>, vector<1x8x8xf32>
    %1000 = vector.shape_cast %999 : vector<1x8x8xf32> to vector<8x8xf32>
    %1001 = vector.shape_cast %998 : vector<8x8xf32> to vector<1x8x8xf32>
    tpu.vector_store %arg28[%c1_410, %c0_411, %c0_412], %1001 {strides = array<i32>} : memref<8x8x8xf32, #tpu.memory_space<vmem>>, vector<1x8x8xf32>,
    %c2_413 = arith.constant 2 : index
    %c0_414 = arith.constant 0 : index
    %c0_415 = arith.constant 0 : index
    %1002 = vector.load %arg30[%c2_413, %c0_414, %c0_415] : memref<8x8x32xf32, #tpu.memory_space<vmem>>, vector<1x8x32xf32>
    %1003 = vector.shape_cast %1002 : vector<1x8x32xf32> to vector<8x32xf32>
    %1004 = vector.broadcast %798 : vector<1x32xf32> to vector<8x32xf32>
    %1005 = arith.mulf %1003, %1004 : vector<8x32xf32>
    %cst_416 = arith.constant dense<0.000000e+00> : vector<8xf32>
    %1006 = vector.multi_reduction <add>, %1005, %cst_416 [1] : vector<8x32xf32> to vector<8xf32>
    %1007 = vector.shape_cast %1006 : vector<8xf32> to vector<8x1xf32>
    %1008 = vector.broadcast %800 : vector<1x1xf32> to vector<8x1xf32>
    %1009 = arith.addf %1007, %1008 : vector<8x1xf32>
    %c0_417 = arith.constant 0 : index
    %c0_418 = arith.constant 0 : index
    %1010 = vector.load %arg32[%c0_417, %c0_418] : memref<8x8xf32, #tpu.memory_space<vmem>>, vector<8x8xf32>
    %1011 = vector.broadcast %1009 : vector<8x1xf32> to vector<8x8xf32>
    %1012 = arith.addf %1010, %1011 : vector<8x8xf32>
    %c2_419 = arith.constant 2 : index
    %c0_420 = arith.constant 0 : index
    %c0_421 = arith.constant 0 : index
    %1013 = vector.load %arg2[%c2_419, %c0_420, %c0_421] : memref<8x8x8xf32, #tpu.memory_space<vmem>>, vector<1x8x8xf32>
    %1014 = vector.shape_cast %1013 : vector<1x8x8xf32> to vector<8x8xf32>
    %cst_422 = arith.constant 1.000000e+00 : f32
    %1015 = vector.broadcast %cst_422 : f32 to vector<8x8xf32>
    %1016 = arith.subf %1015, %1014 : vector<8x8xf32>
    %cst_423 = arith.constant 1.000000e+30 : f32
    %1017 = vector.broadcast %cst_423 : f32 to vector<8x8xf32>
    %1018 = arith.mulf %1016, %1017 : vector<8x8xf32>
    %1019 = arith.subf %1012, %1018 : vector<8x8xf32>
    %c2_i32_424 = arith.constant 2 : i32
    %1020 = vector.broadcast %c2_i32_424 : i32 to vector<8x8xi32>
    %1021 = arith.cmpi slt, %11, %1020 : vector<8x8xi32>
    %cst_425 = arith.constant -9.99999993E+36 : f32
    %1022 = vector.broadcast %cst_425 : f32 to vector<8x8xf32>
    %1023 = arith.select %1021, %1019, %1022 : vector<8x8xi1>, vector<8x8xf32>
    %cst_426 = arith.constant dense<0xFF800000> : vector<8xf32>
    %1024 = vector.multi_reduction <maximumf>, %1023, %cst_426 [1] : vector<8x8xf32> to vector<8xf32>
    %1025 = vector.shape_cast %1024 : vector<8xf32> to vector<8x1xf32>
    %1026 = vector.broadcast %1025 : vector<8x1xf32> to vector<8x8xf32>
    %1027 = arith.subf %1023, %1026 : vector<8x8xf32>
    %1028 = math.exp %1027 : vector<8x8xf32>
    %cst_427 = arith.constant dense<0.000000e+00> : vector<8xf32>
    %1029 = vector.multi_reduction <add>, %1028, %cst_427 [1] : vector<8x8xf32> to vector<8xf32>
    %1030 = vector.shape_cast %1029 : vector<8xf32> to vector<8x1xf32>
    %1031 = tpu.reciprocal %1030 {approx = true} : vector<8x1xf32> -> vector<8x1xf32>
    %1032 = vector.broadcast %1031 : vector<8x1xf32> to vector<8x8xf32>
    %1033 = arith.mulf %1028, %1032 : vector<8x8xf32>
    %c2_428 = arith.constant 2 : index
    %c0_429 = arith.constant 0 : index
    %c0_430 = arith.constant 0 : index
    %1034 = vector.load %arg3[%c2_428, %c0_429, %c0_430] : memref<8x8x8xf32, #tpu.memory_space<vmem>>, vector<1x8x8xf32>
    %1035 = vector.shape_cast %1034 : vector<1x8x8xf32> to vector<8x8xf32>
    %1036 = arith.mulf %1033, %1035 : vector<8x8xf32>
    %1037 = arith.subf %1033, %1036 : vector<8x8xf32>
    %1038 = tpu.transpose %1036, [1, 0] : vector<8x8xf32> -> vector<8x8xf32>
    %1039 = tpu.transpose %1037, [1, 0] : vector<8x8xf32> -> vector<8x8xf32>
    %c0_431 = arith.constant 0 : index
    %c0_432 = arith.constant 0 : index
    %c0_433 = arith.constant 0 : index
    %1040 = vector.load %arg31[%c0_431, %c0_432, %c0_433] : memref<8x8x32xf32, #tpu.memory_space<vmem>>, vector<8x8x32xf32>
    %1041 = vector.shape_cast %1038 : vector<8x8xf32> to vector<8x8x1xf32>
    %1042 = vector.broadcast %1041 : vector<8x8x1xf32> to vector<8x8x32xf32>
    %1043 = arith.mulf %1042, %1040 : vector<8x8x32xf32>
    %cst_434 = arith.constant dense<0.000000e+00> : vector<8x32xf32>
    %1044 = vector.multi_reduction <add>, %1043, %cst_434 [0] : vector<8x8x32xf32> to vector<8x32xf32>
    %1045 = vector.shape_cast %1039 : vector<8x8xf32> to vector<8x8x1xf32>
    %1046 = vector.broadcast %1045 : vector<8x8x1xf32> to vector<8x8x32xf32>
    %1047 = arith.mulf %1046, %1040 : vector<8x8x32xf32>
    %cst_435 = arith.constant dense<0.000000e+00> : vector<8x32xf32>
    %1048 = vector.multi_reduction <add>, %1047, %cst_435 [0] : vector<8x8x32xf32> to vector<8x32xf32>
    %1049 = tpu.concatenate %1044, %1048 in 1 : vector<8x32xf32>, vector<8x32xf32> -> vector<8x64xf32>
    %cst_436 = arith.constant dense<0.000000e+00> : vector<8x32xf32>
    %1050 = tpu.matmul %1049, %801, %cst_436 {dimension_numbers = #tpu.dot_dimension_numbers<[1], [0], [0], [1], [0, 0, 1, 1], [], []>} : vector<8x64xf32>, vector<64x32xf32>, vector<8x32xf32> -> vector<8x32xf32>
    %1051 = tpu.concatenate %1003, %1050 in 1 : vector<8x32xf32>, vector<8x32xf32> -> vector<8x64xf32>
    %cst_437 = arith.constant dense<0.000000e+00> : vector<8x256xf32>
    %1052 = tpu.matmul %1051, %802, %cst_437 {dimension_numbers = #tpu.dot_dimension_numbers<[1], [0], [0], [1], [0, 0, 1, 1], [], []>} : vector<8x64xf32>, vector<64x256xf32>, vector<8x256xf32> -> vector<8x256xf32>
    %1053 = vector.broadcast %803 : vector<1x256xf32> to vector<8x256xf32>
    %1054 = arith.addf %1052, %1053 : vector<8x256xf32>
    %1055 = vector.extract_strided_slice %1054 {offsets = [0, 0], sizes = [8, 128], strides = [1, 1]} : vector<8x256xf32> to vector<8x128xf32>
    %1056 = arith.negf %1055 : vector<8x128xf32>
    %1057 = math.exp %1056 : vector<8x128xf32>
    %cst_438 = arith.constant 1.000000e+00 : f32
    %1058 = vector.broadcast %cst_438 : f32 to vector<8x128xf32>
    %1059 = arith.addf %1058, %1057 : vector<8x128xf32>
    %1060 = arith.divf %1058, %1059 : vector<8x128xf32>
    %1061 = vector.extract_strided_slice %1060 {offsets = [0, 0], sizes = [8, 32], strides = [1, 1]} : vector<8x128xf32> to vector<8x32xf32>
    %1062 = vector.extract_strided_slice %1060 {offsets = [0, 32], sizes = [8, 32], strides = [1, 1]} : vector<8x128xf32> to vector<8x32xf32>
    %1063 = vector.extract_strided_slice %1060 {offsets = [0, 64], sizes = [8, 32], strides = [1, 1]} : vector<8x128xf32> to vector<8x32xf32>
    %1064 = vector.extract_strided_slice %1060 {offsets = [0, 96], sizes = [8, 32], strides = [1, 1]} : vector<8x128xf32> to vector<8x32xf32>
    %1065 = vector.extract_strided_slice %1054 {offsets = [0, 128], sizes = [8, 32], strides = [1, 1]} : vector<8x256xf32> to vector<8x32xf32>
    %1066 = vector.extract_strided_slice %1054 {offsets = [0, 160], sizes = [8, 32], strides = [1, 1]} : vector<8x256xf32> to vector<8x32xf32>
    %1067 = arith.mulf %1061, %1066 : vector<8x32xf32>
    %1068 = arith.addf %1065, %1067 : vector<8x32xf32>
    %1069 = math.tanh %1068 : vector<8x32xf32>
    %1070 = vector.extract_strided_slice %1054 {offsets = [0, 192], sizes = [8, 32], strides = [1, 1]} : vector<8x256xf32> to vector<8x32xf32>
    %1071 = vector.extract_strided_slice %1054 {offsets = [0, 224], sizes = [8, 32], strides = [1, 1]} : vector<8x256xf32> to vector<8x32xf32>
    %1072 = arith.mulf %1063, %1071 : vector<8x32xf32>
    %1073 = arith.addf %1070, %1072 : vector<8x32xf32>
    %1074 = math.tanh %1073 : vector<8x32xf32>
    %cst_439 = arith.constant 1.000000e+00 : f32
    %1075 = vector.broadcast %cst_439 : f32 to vector<8x32xf32>
    %1076 = arith.subf %1075, %1062 : vector<8x32xf32>
    %1077 = arith.mulf %1076, %1069 : vector<8x32xf32>
    %1078 = arith.mulf %1062, %1050 : vector<8x32xf32>
    %1079 = arith.addf %1077, %1078 : vector<8x32xf32>
    %cst_440 = arith.constant 1.000000e+00 : f32
    %1080 = vector.broadcast %cst_440 : f32 to vector<8x32xf32>
    %1081 = arith.subf %1080, %1064 : vector<8x32xf32>
    %1082 = arith.mulf %1081, %1074 : vector<8x32xf32>
    %1083 = arith.addf %1079, %1082 : vector<8x32xf32>
    %1084 = arith.mulf %1064, %1003 : vector<8x32xf32>
    %1085 = arith.addf %1083, %1084 : vector<8x32xf32>
    %c2_441 = arith.constant 2 : index
    %c0_442 = arith.constant 0 : index
    %c0_443 = arith.constant 0 : index
    %1086 = vector.load %arg31[%c2_441, %c0_442, %c0_443] : memref<8x8x32xf32, #tpu.memory_space<vmem>>, vector<1x8x32xf32>
    %1087 = vector.shape_cast %1086 : vector<1x8x32xf32> to vector<8x32xf32>
    %1088 = vector.shape_cast %1085 : vector<8x32xf32> to vector<1x8x32xf32>
    tpu.vector_store %arg31[%c2_441, %c0_442, %c0_443], %1088 {strides = array<i32>} : memref<8x8x32xf32, #tpu.memory_space<vmem>>, vector<1x8x32xf32>,
    %1089 = vector.broadcast %799 : vector<1x32xf32> to vector<8x32xf32>
    %1090 = arith.mulf %1085, %1089 : vector<8x32xf32>
    %cst_444 = arith.constant dense<0.000000e+00> : vector<8xf32>
    %1091 = vector.multi_reduction <add>, %1090, %cst_444 [1] : vector<8x32xf32> to vector<8xf32>
    %1092 = vector.shape_cast %1091 : vector<8xf32> to vector<8x1xf32>
    %c0_445 = arith.constant 0 : index
    %c2_446 = arith.constant 2 : index
    %1093 = vector.load %arg32[%c0_445, %c2_446] : memref<8x8xf32, #tpu.memory_space<vmem>>, vector<8x1xf32>
    tpu.vector_store %arg32[%c0_445, %c2_446], %1092 {strides = array<i32>} : memref<8x8xf32, #tpu.memory_space<vmem>>, vector<8x1xf32>,
    %cst_447 = arith.constant 0.000000e+00 : f32
    %1094 = vector.broadcast %cst_447 : f32 to vector<8x8xf32>
    %1095 = arith.select %1021, %1033, %1094 : vector<8x8xi1>, vector<8x8xf32>
    %c2_448 = arith.constant 2 : index
    %c0_449 = arith.constant 0 : index
    %c0_450 = arith.constant 0 : index
    %1096 = vector.load %arg28[%c2_448, %c0_449, %c0_450] : memref<8x8x8xf32, #tpu.memory_space<vmem>>, vector<1x8x8xf32>
    %1097 = vector.shape_cast %1096 : vector<1x8x8xf32> to vector<8x8xf32>
    %1098 = vector.shape_cast %1095 : vector<8x8xf32> to vector<1x8x8xf32>
    tpu.vector_store %arg28[%c2_448, %c0_449, %c0_450], %1098 {strides = array<i32>} : memref<8x8x8xf32, #tpu.memory_space<vmem>>, vector<1x8x8xf32>,
    %c3_451 = arith.constant 3 : index
    %c0_452 = arith.constant 0 : index
    %c0_453 = arith.constant 0 : index
    %1099 = vector.load %arg30[%c3_451, %c0_452, %c0_453] : memref<8x8x32xf32, #tpu.memory_space<vmem>>, vector<1x8x32xf32>
    %1100 = vector.shape_cast %1099 : vector<1x8x32xf32> to vector<8x32xf32>
    %1101 = vector.broadcast %798 : vector<1x32xf32> to vector<8x32xf32>
    %1102 = arith.mulf %1100, %1101 : vector<8x32xf32>
    %cst_454 = arith.constant dense<0.000000e+00> : vector<8xf32>
    %1103 = vector.multi_reduction <add>, %1102, %cst_454 [1] : vector<8x32xf32> to vector<8xf32>
    %1104 = vector.shape_cast %1103 : vector<8xf32> to vector<8x1xf32>
    %1105 = vector.broadcast %800 : vector<1x1xf32> to vector<8x1xf32>
    %1106 = arith.addf %1104, %1105 : vector<8x1xf32>
    %c0_455 = arith.constant 0 : index
    %c0_456 = arith.constant 0 : index
    %1107 = vector.load %arg32[%c0_455, %c0_456] : memref<8x8xf32, #tpu.memory_space<vmem>>, vector<8x8xf32>
    %1108 = vector.broadcast %1106 : vector<8x1xf32> to vector<8x8xf32>
    %1109 = arith.addf %1107, %1108 : vector<8x8xf32>
    %c3_457 = arith.constant 3 : index
    %c0_458 = arith.constant 0 : index
    %c0_459 = arith.constant 0 : index
    %1110 = vector.load %arg2[%c3_457, %c0_458, %c0_459] : memref<8x8x8xf32, #tpu.memory_space<vmem>>, vector<1x8x8xf32>
    %1111 = vector.shape_cast %1110 : vector<1x8x8xf32> to vector<8x8xf32>
    %cst_460 = arith.constant 1.000000e+00 : f32
    %1112 = vector.broadcast %cst_460 : f32 to vector<8x8xf32>
    %1113 = arith.subf %1112, %1111 : vector<8x8xf32>
    %cst_461 = arith.constant 1.000000e+30 : f32
    %1114 = vector.broadcast %cst_461 : f32 to vector<8x8xf32>
    %1115 = arith.mulf %1113, %1114 : vector<8x8xf32>
    %1116 = arith.subf %1109, %1115 : vector<8x8xf32>
    %c3_i32_462 = arith.constant 3 : i32
    %1117 = vector.broadcast %c3_i32_462 : i32 to vector<8x8xi32>
    %1118 = arith.cmpi slt, %11, %1117 : vector<8x8xi32>
    %cst_463 = arith.constant -9.99999993E+36 : f32
    %1119 = vector.broadcast %cst_463 : f32 to vector<8x8xf32>
    %1120 = arith.select %1118, %1116, %1119 : vector<8x8xi1>, vector<8x8xf32>
    %cst_464 = arith.constant dense<0xFF800000> : vector<8xf32>
    %1121 = vector.multi_reduction <maximumf>, %1120, %cst_464 [1] : vector<8x8xf32> to vector<8xf32>
    %1122 = vector.shape_cast %1121 : vector<8xf32> to vector<8x1xf32>
    %1123 = vector.broadcast %1122 : vector<8x1xf32> to vector<8x8xf32>
    %1124 = arith.subf %1120, %1123 : vector<8x8xf32>
    %1125 = math.exp %1124 : vector<8x8xf32>
    %cst_465 = arith.constant dense<0.000000e+00> : vector<8xf32>
    %1126 = vector.multi_reduction <add>, %1125, %cst_465 [1] : vector<8x8xf32> to vector<8xf32>
    %1127 = vector.shape_cast %1126 : vector<8xf32> to vector<8x1xf32>
    %1128 = tpu.reciprocal %1127 {approx = true} : vector<8x1xf32> -> vector<8x1xf32>
    %1129 = vector.broadcast %1128 : vector<8x1xf32> to vector<8x8xf32>
    %1130 = arith.mulf %1125, %1129 : vector<8x8xf32>
    %c3_466 = arith.constant 3 : index
    %c0_467 = arith.constant 0 : index
    %c0_468 = arith.constant 0 : index
    %1131 = vector.load %arg3[%c3_466, %c0_467, %c0_468] : memref<8x8x8xf32, #tpu.memory_space<vmem>>, vector<1x8x8xf32>
    %1132 = vector.shape_cast %1131 : vector<1x8x8xf32> to vector<8x8xf32>
    %1133 = arith.mulf %1130, %1132 : vector<8x8xf32>
    %1134 = arith.subf %1130, %1133 : vector<8x8xf32>
    %1135 = tpu.transpose %1133, [1, 0] : vector<8x8xf32> -> vector<8x8xf32>
    %1136 = tpu.transpose %1134, [1, 0] : vector<8x8xf32> -> vector<8x8xf32>
    %c0_469 = arith.constant 0 : index
    %c0_470 = arith.constant 0 : index
    %c0_471 = arith.constant 0 : index
    %1137 = vector.load %arg31[%c0_469, %c0_470, %c0_471] : memref<8x8x32xf32, #tpu.memory_space<vmem>>, vector<8x8x32xf32>
    %1138 = vector.shape_cast %1135 : vector<8x8xf32> to vector<8x8x1xf32>
    %1139 = vector.broadcast %1138 : vector<8x8x1xf32> to vector<8x8x32xf32>
    %1140 = arith.mulf %1139, %1137 : vector<8x8x32xf32>
    %cst_472 = arith.constant dense<0.000000e+00> : vector<8x32xf32>
    %1141 = vector.multi_reduction <add>, %1140, %cst_472 [0] : vector<8x8x32xf32> to vector<8x32xf32>
    %1142 = vector.shape_cast %1136 : vector<8x8xf32> to vector<8x8x1xf32>
    %1143 = vector.broadcast %1142 : vector<8x8x1xf32> to vector<8x8x32xf32>
    %1144 = arith.mulf %1143, %1137 : vector<8x8x32xf32>
    %cst_473 = arith.constant dense<0.000000e+00> : vector<8x32xf32>
    %1145 = vector.multi_reduction <add>, %1144, %cst_473 [0] : vector<8x8x32xf32> to vector<8x32xf32>
    %1146 = tpu.concatenate %1141, %1145 in 1 : vector<8x32xf32>, vector<8x32xf32> -> vector<8x64xf32>
    %cst_474 = arith.constant dense<0.000000e+00> : vector<8x32xf32>
    %1147 = tpu.matmul %1146, %801, %cst_474 {dimension_numbers = #tpu.dot_dimension_numbers<[1], [0], [0], [1], [0, 0, 1, 1], [], []>} : vector<8x64xf32>, vector<64x32xf32>, vector<8x32xf32> -> vector<8x32xf32>
    %1148 = tpu.concatenate %1100, %1147 in 1 : vector<8x32xf32>, vector<8x32xf32> -> vector<8x64xf32>
    %cst_475 = arith.constant dense<0.000000e+00> : vector<8x256xf32>
    %1149 = tpu.matmul %1148, %802, %cst_475 {dimension_numbers = #tpu.dot_dimension_numbers<[1], [0], [0], [1], [0, 0, 1, 1], [], []>} : vector<8x64xf32>, vector<64x256xf32>, vector<8x256xf32> -> vector<8x256xf32>
    %1150 = vector.broadcast %803 : vector<1x256xf32> to vector<8x256xf32>
    %1151 = arith.addf %1149, %1150 : vector<8x256xf32>
    %1152 = vector.extract_strided_slice %1151 {offsets = [0, 0], sizes = [8, 128], strides = [1, 1]} : vector<8x256xf32> to vector<8x128xf32>
    %1153 = arith.negf %1152 : vector<8x128xf32>
    %1154 = math.exp %1153 : vector<8x128xf32>
    %cst_476 = arith.constant 1.000000e+00 : f32
    %1155 = vector.broadcast %cst_476 : f32 to vector<8x128xf32>
    %1156 = arith.addf %1155, %1154 : vector<8x128xf32>
    %1157 = arith.divf %1155, %1156 : vector<8x128xf32>
    %1158 = vector.extract_strided_slice %1157 {offsets = [0, 0], sizes = [8, 32], strides = [1, 1]} : vector<8x128xf32> to vector<8x32xf32>
    %1159 = vector.extract_strided_slice %1157 {offsets = [0, 32], sizes = [8, 32], strides = [1, 1]} : vector<8x128xf32> to vector<8x32xf32>
    %1160 = vector.extract_strided_slice %1157 {offsets = [0, 64], sizes = [8, 32], strides = [1, 1]} : vector<8x128xf32> to vector<8x32xf32>
    %1161 = vector.extract_strided_slice %1157 {offsets = [0, 96], sizes = [8, 32], strides = [1, 1]} : vector<8x128xf32> to vector<8x32xf32>
    %1162 = vector.extract_strided_slice %1151 {offsets = [0, 128], sizes = [8, 32], strides = [1, 1]} : vector<8x256xf32> to vector<8x32xf32>
    %1163 = vector.extract_strided_slice %1151 {offsets = [0, 160], sizes = [8, 32], strides = [1, 1]} : vector<8x256xf32> to vector<8x32xf32>
    %1164 = arith.mulf %1158, %1163 : vector<8x32xf32>
    %1165 = arith.addf %1162, %1164 : vector<8x32xf32>
    %1166 = math.tanh %1165 : vector<8x32xf32>
    %1167 = vector.extract_strided_slice %1151 {offsets = [0, 192], sizes = [8, 32], strides = [1, 1]} : vector<8x256xf32> to vector<8x32xf32>
    %1168 = vector.extract_strided_slice %1151 {offsets = [0, 224], sizes = [8, 32], strides = [1, 1]} : vector<8x256xf32> to vector<8x32xf32>
    %1169 = arith.mulf %1160, %1168 : vector<8x32xf32>
    %1170 = arith.addf %1167, %1169 : vector<8x32xf32>
    %1171 = math.tanh %1170 : vector<8x32xf32>
    %cst_477 = arith.constant 1.000000e+00 : f32
    %1172 = vector.broadcast %cst_477 : f32 to vector<8x32xf32>
    %1173 = arith.subf %1172, %1159 : vector<8x32xf32>
    %1174 = arith.mulf %1173, %1166 : vector<8x32xf32>
    %1175 = arith.mulf %1159, %1147 : vector<8x32xf32>
    %1176 = arith.addf %1174, %1175 : vector<8x32xf32>
    %cst_478 = arith.constant 1.000000e+00 : f32
    %1177 = vector.broadcast %cst_478 : f32 to vector<8x32xf32>
    %1178 = arith.subf %1177, %1161 : vector<8x32xf32>
    %1179 = arith.mulf %1178, %1171 : vector<8x32xf32>
    %1180 = arith.addf %1176, %1179 : vector<8x32xf32>
    %1181 = arith.mulf %1161, %1100 : vector<8x32xf32>
    %1182 = arith.addf %1180, %1181 : vector<8x32xf32>
    %c3_479 = arith.constant 3 : index
    %c0_480 = arith.constant 0 : index
    %c0_481 = arith.constant 0 : index
    %1183 = vector.load %arg31[%c3_479, %c0_480, %c0_481] : memref<8x8x32xf32, #tpu.memory_space<vmem>>, vector<1x8x32xf32>
    %1184 = vector.shape_cast %1183 : vector<1x8x32xf32> to vector<8x32xf32>
    %1185 = vector.shape_cast %1182 : vector<8x32xf32> to vector<1x8x32xf32>
    tpu.vector_store %arg31[%c3_479, %c0_480, %c0_481], %1185 {strides = array<i32>} : memref<8x8x32xf32, #tpu.memory_space<vmem>>, vector<1x8x32xf32>,
    %1186 = vector.broadcast %799 : vector<1x32xf32> to vector<8x32xf32>
    %1187 = arith.mulf %1182, %1186 : vector<8x32xf32>
    %cst_482 = arith.constant dense<0.000000e+00> : vector<8xf32>
    %1188 = vector.multi_reduction <add>, %1187, %cst_482 [1] : vector<8x32xf32> to vector<8xf32>
    %1189 = vector.shape_cast %1188 : vector<8xf32> to vector<8x1xf32>
    %c0_483 = arith.constant 0 : index
    %c3_484 = arith.constant 3 : index
    %1190 = vector.load %arg32[%c0_483, %c3_484] : memref<8x8xf32, #tpu.memory_space<vmem>>, vector<8x1xf32>
    tpu.vector_store %arg32[%c0_483, %c3_484], %1189 {strides = array<i32>} : memref<8x8xf32, #tpu.memory_space<vmem>>, vector<8x1xf32>,
    %cst_485 = arith.constant 0.000000e+00 : f32
    %1191 = vector.broadcast %cst_485 : f32 to vector<8x8xf32>
    %1192 = arith.select %1118, %1130, %1191 : vector<8x8xi1>, vector<8x8xf32>
    %c3_486 = arith.constant 3 : index
    %c0_487 = arith.constant 0 : index
    %c0_488 = arith.constant 0 : index
    %1193 = vector.load %arg28[%c3_486, %c0_487, %c0_488] : memref<8x8x8xf32, #tpu.memory_space<vmem>>, vector<1x8x8xf32>
    %1194 = vector.shape_cast %1193 : vector<1x8x8xf32> to vector<8x8xf32>
    %1195 = vector.shape_cast %1192 : vector<8x8xf32> to vector<1x8x8xf32>
    tpu.vector_store %arg28[%c3_486, %c0_487, %c0_488], %1195 {strides = array<i32>} : memref<8x8x8xf32, #tpu.memory_space<vmem>>, vector<1x8x8xf32>,
    %c4_489 = arith.constant 4 : index
    %c0_490 = arith.constant 0 : index
    %c0_491 = arith.constant 0 : index
    %1196 = vector.load %arg30[%c4_489, %c0_490, %c0_491] : memref<8x8x32xf32, #tpu.memory_space<vmem>>, vector<1x8x32xf32>
    %1197 = vector.shape_cast %1196 : vector<1x8x32xf32> to vector<8x32xf32>
    %1198 = vector.broadcast %798 : vector<1x32xf32> to vector<8x32xf32>
    %1199 = arith.mulf %1197, %1198 : vector<8x32xf32>
    %cst_492 = arith.constant dense<0.000000e+00> : vector<8xf32>
    %1200 = vector.multi_reduction <add>, %1199, %cst_492 [1] : vector<8x32xf32> to vector<8xf32>
    %1201 = vector.shape_cast %1200 : vector<8xf32> to vector<8x1xf32>
    %1202 = vector.broadcast %800 : vector<1x1xf32> to vector<8x1xf32>
    %1203 = arith.addf %1201, %1202 : vector<8x1xf32>
    %c0_493 = arith.constant 0 : index
    %c0_494 = arith.constant 0 : index
    %1204 = vector.load %arg32[%c0_493, %c0_494] : memref<8x8xf32, #tpu.memory_space<vmem>>, vector<8x8xf32>
    %1205 = vector.broadcast %1203 : vector<8x1xf32> to vector<8x8xf32>
    %1206 = arith.addf %1204, %1205 : vector<8x8xf32>
    %c4_495 = arith.constant 4 : index
    %c0_496 = arith.constant 0 : index
    %c0_497 = arith.constant 0 : index
    %1207 = vector.load %arg2[%c4_495, %c0_496, %c0_497] : memref<8x8x8xf32, #tpu.memory_space<vmem>>, vector<1x8x8xf32>
    %1208 = vector.shape_cast %1207 : vector<1x8x8xf32> to vector<8x8xf32>
    %cst_498 = arith.constant 1.000000e+00 : f32
    %1209 = vector.broadcast %cst_498 : f32 to vector<8x8xf32>
    %1210 = arith.subf %1209, %1208 : vector<8x8xf32>
    %cst_499 = arith.constant 1.000000e+30 : f32
    %1211 = vector.broadcast %cst_499 : f32 to vector<8x8xf32>
    %1212 = arith.mulf %1210, %1211 : vector<8x8xf32>
    %1213 = arith.subf %1206, %1212 : vector<8x8xf32>
    %c4_i32_500 = arith.constant 4 : i32
    %1214 = vector.broadcast %c4_i32_500 : i32 to vector<8x8xi32>
    %1215 = arith.cmpi slt, %11, %1214 : vector<8x8xi32>
    %cst_501 = arith.constant -9.99999993E+36 : f32
    %1216 = vector.broadcast %cst_501 : f32 to vector<8x8xf32>
    %1217 = arith.select %1215, %1213, %1216 : vector<8x8xi1>, vector<8x8xf32>
    %cst_502 = arith.constant dense<0xFF800000> : vector<8xf32>
    %1218 = vector.multi_reduction <maximumf>, %1217, %cst_502 [1] : vector<8x8xf32> to vector<8xf32>
    %1219 = vector.shape_cast %1218 : vector<8xf32> to vector<8x1xf32>
    %1220 = vector.broadcast %1219 : vector<8x1xf32> to vector<8x8xf32>
    %1221 = arith.subf %1217, %1220 : vector<8x8xf32>
    %1222 = math.exp %1221 : vector<8x8xf32>
    %cst_503 = arith.constant dense<0.000000e+00> : vector<8xf32>
    %1223 = vector.multi_reduction <add>, %1222, %cst_503 [1] : vector<8x8xf32> to vector<8xf32>
    %1224 = vector.shape_cast %1223 : vector<8xf32> to vector<8x1xf32>
    %1225 = tpu.reciprocal %1224 {approx = true} : vector<8x1xf32> -> vector<8x1xf32>
    %1226 = vector.broadcast %1225 : vector<8x1xf32> to vector<8x8xf32>
    %1227 = arith.mulf %1222, %1226 : vector<8x8xf32>
    %c4_504 = arith.constant 4 : index
    %c0_505 = arith.constant 0 : index
    %c0_506 = arith.constant 0 : index
    %1228 = vector.load %arg3[%c4_504, %c0_505, %c0_506] : memref<8x8x8xf32, #tpu.memory_space<vmem>>, vector<1x8x8xf32>
    %1229 = vector.shape_cast %1228 : vector<1x8x8xf32> to vector<8x8xf32>
    %1230 = arith.mulf %1227, %1229 : vector<8x8xf32>
    %1231 = arith.subf %1227, %1230 : vector<8x8xf32>
    %1232 = tpu.transpose %1230, [1, 0] : vector<8x8xf32> -> vector<8x8xf32>
    %1233 = tpu.transpose %1231, [1, 0] : vector<8x8xf32> -> vector<8x8xf32>
    %c0_507 = arith.constant 0 : index
    %c0_508 = arith.constant 0 : index
    %c0_509 = arith.constant 0 : index
    %1234 = vector.load %arg31[%c0_507, %c0_508, %c0_509] : memref<8x8x32xf32, #tpu.memory_space<vmem>>, vector<8x8x32xf32>
    %1235 = vector.shape_cast %1232 : vector<8x8xf32> to vector<8x8x1xf32>
    %1236 = vector.broadcast %1235 : vector<8x8x1xf32> to vector<8x8x32xf32>
    %1237 = arith.mulf %1236, %1234 : vector<8x8x32xf32>
    %cst_510 = arith.constant dense<0.000000e+00> : vector<8x32xf32>
    %1238 = vector.multi_reduction <add>, %1237, %cst_510 [0] : vector<8x8x32xf32> to vector<8x32xf32>
    %1239 = vector.shape_cast %1233 : vector<8x8xf32> to vector<8x8x1xf32>
    %1240 = vector.broadcast %1239 : vector<8x8x1xf32> to vector<8x8x32xf32>
    %1241 = arith.mulf %1240, %1234 : vector<8x8x32xf32>
    %cst_511 = arith.constant dense<0.000000e+00> : vector<8x32xf32>
    %1242 = vector.multi_reduction <add>, %1241, %cst_511 [0] : vector<8x8x32xf32> to vector<8x32xf32>
    %1243 = tpu.concatenate %1238, %1242 in 1 : vector<8x32xf32>, vector<8x32xf32> -> vector<8x64xf32>
    %cst_512 = arith.constant dense<0.000000e+00> : vector<8x32xf32>
    %1244 = tpu.matmul %1243, %801, %cst_512 {dimension_numbers = #tpu.dot_dimension_numbers<[1], [0], [0], [1], [0, 0, 1, 1], [], []>} : vector<8x64xf32>, vector<64x32xf32>, vector<8x32xf32> -> vector<8x32xf32>
    %1245 = tpu.concatenate %1197, %1244 in 1 : vector<8x32xf32>, vector<8x32xf32> -> vector<8x64xf32>
    %cst_513 = arith.constant dense<0.000000e+00> : vector<8x256xf32>
    %1246 = tpu.matmul %1245, %802, %cst_513 {dimension_numbers = #tpu.dot_dimension_numbers<[1], [0], [0], [1], [0, 0, 1, 1], [], []>} : vector<8x64xf32>, vector<64x256xf32>, vector<8x256xf32> -> vector<8x256xf32>
    %1247 = vector.broadcast %803 : vector<1x256xf32> to vector<8x256xf32>
    %1248 = arith.addf %1246, %1247 : vector<8x256xf32>
    %1249 = vector.extract_strided_slice %1248 {offsets = [0, 0], sizes = [8, 128], strides = [1, 1]} : vector<8x256xf32> to vector<8x128xf32>
    %1250 = arith.negf %1249 : vector<8x128xf32>
    %1251 = math.exp %1250 : vector<8x128xf32>
    %cst_514 = arith.constant 1.000000e+00 : f32
    %1252 = vector.broadcast %cst_514 : f32 to vector<8x128xf32>
    %1253 = arith.addf %1252, %1251 : vector<8x128xf32>
    %1254 = arith.divf %1252, %1253 : vector<8x128xf32>
    %1255 = vector.extract_strided_slice %1254 {offsets = [0, 0], sizes = [8, 32], strides = [1, 1]} : vector<8x128xf32> to vector<8x32xf32>
    %1256 = vector.extract_strided_slice %1254 {offsets = [0, 32], sizes = [8, 32], strides = [1, 1]} : vector<8x128xf32> to vector<8x32xf32>
    %1257 = vector.extract_strided_slice %1254 {offsets = [0, 64], sizes = [8, 32], strides = [1, 1]} : vector<8x128xf32> to vector<8x32xf32>
    %1258 = vector.extract_strided_slice %1254 {offsets = [0, 96], sizes = [8, 32], strides = [1, 1]} : vector<8x128xf32> to vector<8x32xf32>
    %1259 = vector.extract_strided_slice %1248 {offsets = [0, 128], sizes = [8, 32], strides = [1, 1]} : vector<8x256xf32> to vector<8x32xf32>
    %1260 = vector.extract_strided_slice %1248 {offsets = [0, 160], sizes = [8, 32], strides = [1, 1]} : vector<8x256xf32> to vector<8x32xf32>
    %1261 = arith.mulf %1255, %1260 : vector<8x32xf32>
    %1262 = arith.addf %1259, %1261 : vector<8x32xf32>
    %1263 = math.tanh %1262 : vector<8x32xf32>
    %1264 = vector.extract_strided_slice %1248 {offsets = [0, 192], sizes = [8, 32], strides = [1, 1]} : vector<8x256xf32> to vector<8x32xf32>
    %1265 = vector.extract_strided_slice %1248 {offsets = [0, 224], sizes = [8, 32], strides = [1, 1]} : vector<8x256xf32> to vector<8x32xf32>
    %1266 = arith.mulf %1257, %1265 : vector<8x32xf32>
    %1267 = arith.addf %1264, %1266 : vector<8x32xf32>
    %1268 = math.tanh %1267 : vector<8x32xf32>
    %cst_515 = arith.constant 1.000000e+00 : f32
    %1269 = vector.broadcast %cst_515 : f32 to vector<8x32xf32>
    %1270 = arith.subf %1269, %1256 : vector<8x32xf32>
    %1271 = arith.mulf %1270, %1263 : vector<8x32xf32>
    %1272 = arith.mulf %1256, %1244 : vector<8x32xf32>
    %1273 = arith.addf %1271, %1272 : vector<8x32xf32>
    %cst_516 = arith.constant 1.000000e+00 : f32
    %1274 = vector.broadcast %cst_516 : f32 to vector<8x32xf32>
    %1275 = arith.subf %1274, %1258 : vector<8x32xf32>
    %1276 = arith.mulf %1275, %1268 : vector<8x32xf32>
    %1277 = arith.addf %1273, %1276 : vector<8x32xf32>
    %1278 = arith.mulf %1258, %1197 : vector<8x32xf32>
    %1279 = arith.addf %1277, %1278 : vector<8x32xf32>
    %c4_517 = arith.constant 4 : index
    %c0_518 = arith.constant 0 : index
    %c0_519 = arith.constant 0 : index
    %1280 = vector.load %arg31[%c4_517, %c0_518, %c0_519] : memref<8x8x32xf32, #tpu.memory_space<vmem>>, vector<1x8x32xf32>
    %1281 = vector.shape_cast %1280 : vector<1x8x32xf32> to vector<8x32xf32>
    %1282 = vector.shape_cast %1279 : vector<8x32xf32> to vector<1x8x32xf32>
    tpu.vector_store %arg31[%c4_517, %c0_518, %c0_519], %1282 {strides = array<i32>} : memref<8x8x32xf32, #tpu.memory_space<vmem>>, vector<1x8x32xf32>,
    %1283 = vector.broadcast %799 : vector<1x32xf32> to vector<8x32xf32>
    %1284 = arith.mulf %1279, %1283 : vector<8x32xf32>
    %cst_520 = arith.constant dense<0.000000e+00> : vector<8xf32>
    %1285 = vector.multi_reduction <add>, %1284, %cst_520 [1] : vector<8x32xf32> to vector<8xf32>
    %1286 = vector.shape_cast %1285 : vector<8xf32> to vector<8x1xf32>
    %c0_521 = arith.constant 0 : index
    %c4_522 = arith.constant 4 : index
    %1287 = vector.load %arg32[%c0_521, %c4_522] : memref<8x8xf32, #tpu.memory_space<vmem>>, vector<8x1xf32>
    tpu.vector_store %arg32[%c0_521, %c4_522], %1286 {strides = array<i32>} : memref<8x8xf32, #tpu.memory_space<vmem>>, vector<8x1xf32>,
    %cst_523 = arith.constant 0.000000e+00 : f32
    %1288 = vector.broadcast %cst_523 : f32 to vector<8x8xf32>
    %1289 = arith.select %1215, %1227, %1288 : vector<8x8xi1>, vector<8x8xf32>
    %c4_524 = arith.constant 4 : index
    %c0_525 = arith.constant 0 : index
    %c0_526 = arith.constant 0 : index
    %1290 = vector.load %arg28[%c4_524, %c0_525, %c0_526] : memref<8x8x8xf32, #tpu.memory_space<vmem>>, vector<1x8x8xf32>
    %1291 = vector.shape_cast %1290 : vector<1x8x8xf32> to vector<8x8xf32>
    %1292 = vector.shape_cast %1289 : vector<8x8xf32> to vector<1x8x8xf32>
    tpu.vector_store %arg28[%c4_524, %c0_525, %c0_526], %1292 {strides = array<i32>} : memref<8x8x8xf32, #tpu.memory_space<vmem>>, vector<1x8x8xf32>,
    %c5_527 = arith.constant 5 : index
    %c0_528 = arith.constant 0 : index
    %c0_529 = arith.constant 0 : index
    %1293 = vector.load %arg30[%c5_527, %c0_528, %c0_529] : memref<8x8x32xf32, #tpu.memory_space<vmem>>, vector<1x8x32xf32>
    %1294 = vector.shape_cast %1293 : vector<1x8x32xf32> to vector<8x32xf32>
    %1295 = vector.broadcast %798 : vector<1x32xf32> to vector<8x32xf32>
    %1296 = arith.mulf %1294, %1295 : vector<8x32xf32>
    %cst_530 = arith.constant dense<0.000000e+00> : vector<8xf32>
    %1297 = vector.multi_reduction <add>, %1296, %cst_530 [1] : vector<8x32xf32> to vector<8xf32>
    %1298 = vector.shape_cast %1297 : vector<8xf32> to vector<8x1xf32>
    %1299 = vector.broadcast %800 : vector<1x1xf32> to vector<8x1xf32>
    %1300 = arith.addf %1298, %1299 : vector<8x1xf32>
    %c0_531 = arith.constant 0 : index
    %c0_532 = arith.constant 0 : index
    %1301 = vector.load %arg32[%c0_531, %c0_532] : memref<8x8xf32, #tpu.memory_space<vmem>>, vector<8x8xf32>
    %1302 = vector.broadcast %1300 : vector<8x1xf32> to vector<8x8xf32>
    %1303 = arith.addf %1301, %1302 : vector<8x8xf32>
    %c5_533 = arith.constant 5 : index
    %c0_534 = arith.constant 0 : index
    %c0_535 = arith.constant 0 : index
    %1304 = vector.load %arg2[%c5_533, %c0_534, %c0_535] : memref<8x8x8xf32, #tpu.memory_space<vmem>>, vector<1x8x8xf32>
    %1305 = vector.shape_cast %1304 : vector<1x8x8xf32> to vector<8x8xf32>
    %cst_536 = arith.constant 1.000000e+00 : f32
    %1306 = vector.broadcast %cst_536 : f32 to vector<8x8xf32>
    %1307 = arith.subf %1306, %1305 : vector<8x8xf32>
    %cst_537 = arith.constant 1.000000e+30 : f32
    %1308 = vector.broadcast %cst_537 : f32 to vector<8x8xf32>
    %1309 = arith.mulf %1307, %1308 : vector<8x8xf32>
    %1310 = arith.subf %1303, %1309 : vector<8x8xf32>
    %c5_i32_538 = arith.constant 5 : i32
    %1311 = vector.broadcast %c5_i32_538 : i32 to vector<8x8xi32>
    %1312 = arith.cmpi slt, %11, %1311 : vector<8x8xi32>
    %cst_539 = arith.constant -9.99999993E+36 : f32
    %1313 = vector.broadcast %cst_539 : f32 to vector<8x8xf32>
    %1314 = arith.select %1312, %1310, %1313 : vector<8x8xi1>, vector<8x8xf32>
    %cst_540 = arith.constant dense<0xFF800000> : vector<8xf32>
    %1315 = vector.multi_reduction <maximumf>, %1314, %cst_540 [1] : vector<8x8xf32> to vector<8xf32>
    %1316 = vector.shape_cast %1315 : vector<8xf32> to vector<8x1xf32>
    %1317 = vector.broadcast %1316 : vector<8x1xf32> to vector<8x8xf32>
    %1318 = arith.subf %1314, %1317 : vector<8x8xf32>
    %1319 = math.exp %1318 : vector<8x8xf32>
    %cst_541 = arith.constant dense<0.000000e+00> : vector<8xf32>
    %1320 = vector.multi_reduction <add>, %1319, %cst_541 [1] : vector<8x8xf32> to vector<8xf32>
    %1321 = vector.shape_cast %1320 : vector<8xf32> to vector<8x1xf32>
    %1322 = tpu.reciprocal %1321 {approx = true} : vector<8x1xf32> -> vector<8x1xf32>
    %1323 = vector.broadcast %1322 : vector<8x1xf32> to vector<8x8xf32>
    %1324 = arith.mulf %1319, %1323 : vector<8x8xf32>
    %c5_542 = arith.constant 5 : index
    %c0_543 = arith.constant 0 : index
    %c0_544 = arith.constant 0 : index
    %1325 = vector.load %arg3[%c5_542, %c0_543, %c0_544] : memref<8x8x8xf32, #tpu.memory_space<vmem>>, vector<1x8x8xf32>
    %1326 = vector.shape_cast %1325 : vector<1x8x8xf32> to vector<8x8xf32>
    %1327 = arith.mulf %1324, %1326 : vector<8x8xf32>
    %1328 = arith.subf %1324, %1327 : vector<8x8xf32>
    %1329 = tpu.transpose %1327, [1, 0] : vector<8x8xf32> -> vector<8x8xf32>
    %1330 = tpu.transpose %1328, [1, 0] : vector<8x8xf32> -> vector<8x8xf32>
    %c0_545 = arith.constant 0 : index
    %c0_546 = arith.constant 0 : index
    %c0_547 = arith.constant 0 : index
    %1331 = vector.load %arg31[%c0_545, %c0_546, %c0_547] : memref<8x8x32xf32, #tpu.memory_space<vmem>>, vector<8x8x32xf32>
    %1332 = vector.shape_cast %1329 : vector<8x8xf32> to vector<8x8x1xf32>
    %1333 = vector.broadcast %1332 : vector<8x8x1xf32> to vector<8x8x32xf32>
    %1334 = arith.mulf %1333, %1331 : vector<8x8x32xf32>
    %cst_548 = arith.constant dense<0.000000e+00> : vector<8x32xf32>
    %1335 = vector.multi_reduction <add>, %1334, %cst_548 [0] : vector<8x8x32xf32> to vector<8x32xf32>
    %1336 = vector.shape_cast %1330 : vector<8x8xf32> to vector<8x8x1xf32>
    %1337 = vector.broadcast %1336 : vector<8x8x1xf32> to vector<8x8x32xf32>
    %1338 = arith.mulf %1337, %1331 : vector<8x8x32xf32>
    %cst_549 = arith.constant dense<0.000000e+00> : vector<8x32xf32>
    %1339 = vector.multi_reduction <add>, %1338, %cst_549 [0] : vector<8x8x32xf32> to vector<8x32xf32>
    %1340 = tpu.concatenate %1335, %1339 in 1 : vector<8x32xf32>, vector<8x32xf32> -> vector<8x64xf32>
    %cst_550 = arith.constant dense<0.000000e+00> : vector<8x32xf32>
    %1341 = tpu.matmul %1340, %801, %cst_550 {dimension_numbers = #tpu.dot_dimension_numbers<[1], [0], [0], [1], [0, 0, 1, 1], [], []>} : vector<8x64xf32>, vector<64x32xf32>, vector<8x32xf32> -> vector<8x32xf32>
    %1342 = tpu.concatenate %1294, %1341 in 1 : vector<8x32xf32>, vector<8x32xf32> -> vector<8x64xf32>
    %cst_551 = arith.constant dense<0.000000e+00> : vector<8x256xf32>
    %1343 = tpu.matmul %1342, %802, %cst_551 {dimension_numbers = #tpu.dot_dimension_numbers<[1], [0], [0], [1], [0, 0, 1, 1], [], []>} : vector<8x64xf32>, vector<64x256xf32>, vector<8x256xf32> -> vector<8x256xf32>
    %1344 = vector.broadcast %803 : vector<1x256xf32> to vector<8x256xf32>
    %1345 = arith.addf %1343, %1344 : vector<8x256xf32>
    %1346 = vector.extract_strided_slice %1345 {offsets = [0, 0], sizes = [8, 128], strides = [1, 1]} : vector<8x256xf32> to vector<8x128xf32>
    %1347 = arith.negf %1346 : vector<8x128xf32>
    %1348 = math.exp %1347 : vector<8x128xf32>
    %cst_552 = arith.constant 1.000000e+00 : f32
    %1349 = vector.broadcast %cst_552 : f32 to vector<8x128xf32>
    %1350 = arith.addf %1349, %1348 : vector<8x128xf32>
    %1351 = arith.divf %1349, %1350 : vector<8x128xf32>
    %1352 = vector.extract_strided_slice %1351 {offsets = [0, 0], sizes = [8, 32], strides = [1, 1]} : vector<8x128xf32> to vector<8x32xf32>
    %1353 = vector.extract_strided_slice %1351 {offsets = [0, 32], sizes = [8, 32], strides = [1, 1]} : vector<8x128xf32> to vector<8x32xf32>
    %1354 = vector.extract_strided_slice %1351 {offsets = [0, 64], sizes = [8, 32], strides = [1, 1]} : vector<8x128xf32> to vector<8x32xf32>
    %1355 = vector.extract_strided_slice %1351 {offsets = [0, 96], sizes = [8, 32], strides = [1, 1]} : vector<8x128xf32> to vector<8x32xf32>
    %1356 = vector.extract_strided_slice %1345 {offsets = [0, 128], sizes = [8, 32], strides = [1, 1]} : vector<8x256xf32> to vector<8x32xf32>
    %1357 = vector.extract_strided_slice %1345 {offsets = [0, 160], sizes = [8, 32], strides = [1, 1]} : vector<8x256xf32> to vector<8x32xf32>
    %1358 = arith.mulf %1352, %1357 : vector<8x32xf32>
    %1359 = arith.addf %1356, %1358 : vector<8x32xf32>
    %1360 = math.tanh %1359 : vector<8x32xf32>
    %1361 = vector.extract_strided_slice %1345 {offsets = [0, 192], sizes = [8, 32], strides = [1, 1]} : vector<8x256xf32> to vector<8x32xf32>
    %1362 = vector.extract_strided_slice %1345 {offsets = [0, 224], sizes = [8, 32], strides = [1, 1]} : vector<8x256xf32> to vector<8x32xf32>
    %1363 = arith.mulf %1354, %1362 : vector<8x32xf32>
    %1364 = arith.addf %1361, %1363 : vector<8x32xf32>
    %1365 = math.tanh %1364 : vector<8x32xf32>
    %cst_553 = arith.constant 1.000000e+00 : f32
    %1366 = vector.broadcast %cst_553 : f32 to vector<8x32xf32>
    %1367 = arith.subf %1366, %1353 : vector<8x32xf32>
    %1368 = arith.mulf %1367, %1360 : vector<8x32xf32>
    %1369 = arith.mulf %1353, %1341 : vector<8x32xf32>
    %1370 = arith.addf %1368, %1369 : vector<8x32xf32>
    %cst_554 = arith.constant 1.000000e+00 : f32
    %1371 = vector.broadcast %cst_554 : f32 to vector<8x32xf32>
    %1372 = arith.subf %1371, %1355 : vector<8x32xf32>
    %1373 = arith.mulf %1372, %1365 : vector<8x32xf32>
    %1374 = arith.addf %1370, %1373 : vector<8x32xf32>
    %1375 = arith.mulf %1355, %1294 : vector<8x32xf32>
    %1376 = arith.addf %1374, %1375 : vector<8x32xf32>
    %c5_555 = arith.constant 5 : index
    %c0_556 = arith.constant 0 : index
    %c0_557 = arith.constant 0 : index
    %1377 = vector.load %arg31[%c5_555, %c0_556, %c0_557] : memref<8x8x32xf32, #tpu.memory_space<vmem>>, vector<1x8x32xf32>
    %1378 = vector.shape_cast %1377 : vector<1x8x32xf32> to vector<8x32xf32>
    %1379 = vector.shape_cast %1376 : vector<8x32xf32> to vector<1x8x32xf32>
    tpu.vector_store %arg31[%c5_555, %c0_556, %c0_557], %1379 {strides = array<i32>} : memref<8x8x32xf32, #tpu.memory_space<vmem>>, vector<1x8x32xf32>,
    %1380 = vector.broadcast %799 : vector<1x32xf32> to vector<8x32xf32>
    %1381 = arith.mulf %1376, %1380 : vector<8x32xf32>
    %cst_558 = arith.constant dense<0.000000e+00> : vector<8xf32>
    %1382 = vector.multi_reduction <add>, %1381, %cst_558 [1] : vector<8x32xf32> to vector<8xf32>
    %1383 = vector.shape_cast %1382 : vector<8xf32> to vector<8x1xf32>
    %c0_559 = arith.constant 0 : index
    %c5_560 = arith.constant 5 : index
    %1384 = vector.load %arg32[%c0_559, %c5_560] : memref<8x8xf32, #tpu.memory_space<vmem>>, vector<8x1xf32>
    tpu.vector_store %arg32[%c0_559, %c5_560], %1383 {strides = array<i32>} : memref<8x8xf32, #tpu.memory_space<vmem>>, vector<8x1xf32>,
    %cst_561 = arith.constant 0.000000e+00 : f32
    %1385 = vector.broadcast %cst_561 : f32 to vector<8x8xf32>
    %1386 = arith.select %1312, %1324, %1385 : vector<8x8xi1>, vector<8x8xf32>
    %c5_562 = arith.constant 5 : index
    %c0_563 = arith.constant 0 : index
    %c0_564 = arith.constant 0 : index
    %1387 = vector.load %arg28[%c5_562, %c0_563, %c0_564] : memref<8x8x8xf32, #tpu.memory_space<vmem>>, vector<1x8x8xf32>
    %1388 = vector.shape_cast %1387 : vector<1x8x8xf32> to vector<8x8xf32>
    %1389 = vector.shape_cast %1386 : vector<8x8xf32> to vector<1x8x8xf32>
    tpu.vector_store %arg28[%c5_562, %c0_563, %c0_564], %1389 {strides = array<i32>} : memref<8x8x8xf32, #tpu.memory_space<vmem>>, vector<1x8x8xf32>,
    %c6_565 = arith.constant 6 : index
    %c0_566 = arith.constant 0 : index
    %c0_567 = arith.constant 0 : index
    %1390 = vector.load %arg30[%c6_565, %c0_566, %c0_567] : memref<8x8x32xf32, #tpu.memory_space<vmem>>, vector<1x8x32xf32>
    %1391 = vector.shape_cast %1390 : vector<1x8x32xf32> to vector<8x32xf32>
    %1392 = vector.broadcast %798 : vector<1x32xf32> to vector<8x32xf32>
    %1393 = arith.mulf %1391, %1392 : vector<8x32xf32>
    %cst_568 = arith.constant dense<0.000000e+00> : vector<8xf32>
    %1394 = vector.multi_reduction <add>, %1393, %cst_568 [1] : vector<8x32xf32> to vector<8xf32>
    %1395 = vector.shape_cast %1394 : vector<8xf32> to vector<8x1xf32>
    %1396 = vector.broadcast %800 : vector<1x1xf32> to vector<8x1xf32>
    %1397 = arith.addf %1395, %1396 : vector<8x1xf32>
    %c0_569 = arith.constant 0 : index
    %c0_570 = arith.constant 0 : index
    %1398 = vector.load %arg32[%c0_569, %c0_570] : memref<8x8xf32, #tpu.memory_space<vmem>>, vector<8x8xf32>
    %1399 = vector.broadcast %1397 : vector<8x1xf32> to vector<8x8xf32>
    %1400 = arith.addf %1398, %1399 : vector<8x8xf32>
    %c6_571 = arith.constant 6 : index
    %c0_572 = arith.constant 0 : index
    %c0_573 = arith.constant 0 : index
    %1401 = vector.load %arg2[%c6_571, %c0_572, %c0_573] : memref<8x8x8xf32, #tpu.memory_space<vmem>>, vector<1x8x8xf32>
    %1402 = vector.shape_cast %1401 : vector<1x8x8xf32> to vector<8x8xf32>
    %cst_574 = arith.constant 1.000000e+00 : f32
    %1403 = vector.broadcast %cst_574 : f32 to vector<8x8xf32>
    %1404 = arith.subf %1403, %1402 : vector<8x8xf32>
    %cst_575 = arith.constant 1.000000e+30 : f32
    %1405 = vector.broadcast %cst_575 : f32 to vector<8x8xf32>
    %1406 = arith.mulf %1404, %1405 : vector<8x8xf32>
    %1407 = arith.subf %1400, %1406 : vector<8x8xf32>
    %c6_i32_576 = arith.constant 6 : i32
    %1408 = vector.broadcast %c6_i32_576 : i32 to vector<8x8xi32>
    %1409 = arith.cmpi slt, %11, %1408 : vector<8x8xi32>
    %cst_577 = arith.constant -9.99999993E+36 : f32
    %1410 = vector.broadcast %cst_577 : f32 to vector<8x8xf32>
    %1411 = arith.select %1409, %1407, %1410 : vector<8x8xi1>, vector<8x8xf32>
    %cst_578 = arith.constant dense<0xFF800000> : vector<8xf32>
    %1412 = vector.multi_reduction <maximumf>, %1411, %cst_578 [1] : vector<8x8xf32> to vector<8xf32>
    %1413 = vector.shape_cast %1412 : vector<8xf32> to vector<8x1xf32>
    %1414 = vector.broadcast %1413 : vector<8x1xf32> to vector<8x8xf32>
    %1415 = arith.subf %1411, %1414 : vector<8x8xf32>
    %1416 = math.exp %1415 : vector<8x8xf32>
    %cst_579 = arith.constant dense<0.000000e+00> : vector<8xf32>
    %1417 = vector.multi_reduction <add>, %1416, %cst_579 [1] : vector<8x8xf32> to vector<8xf32>
    %1418 = vector.shape_cast %1417 : vector<8xf32> to vector<8x1xf32>
    %1419 = tpu.reciprocal %1418 {approx = true} : vector<8x1xf32> -> vector<8x1xf32>
    %1420 = vector.broadcast %1419 : vector<8x1xf32> to vector<8x8xf32>
    %1421 = arith.mulf %1416, %1420 : vector<8x8xf32>
    %c6_580 = arith.constant 6 : index
    %c0_581 = arith.constant 0 : index
    %c0_582 = arith.constant 0 : index
    %1422 = vector.load %arg3[%c6_580, %c0_581, %c0_582] : memref<8x8x8xf32, #tpu.memory_space<vmem>>, vector<1x8x8xf32>
    %1423 = vector.shape_cast %1422 : vector<1x8x8xf32> to vector<8x8xf32>
    %1424 = arith.mulf %1421, %1423 : vector<8x8xf32>
    %1425 = arith.subf %1421, %1424 : vector<8x8xf32>
    %1426 = tpu.transpose %1424, [1, 0] : vector<8x8xf32> -> vector<8x8xf32>
    %1427 = tpu.transpose %1425, [1, 0] : vector<8x8xf32> -> vector<8x8xf32>
    %c0_583 = arith.constant 0 : index
    %c0_584 = arith.constant 0 : index
    %c0_585 = arith.constant 0 : index
    %1428 = vector.load %arg31[%c0_583, %c0_584, %c0_585] : memref<8x8x32xf32, #tpu.memory_space<vmem>>, vector<8x8x32xf32>
    %1429 = vector.shape_cast %1426 : vector<8x8xf32> to vector<8x8x1xf32>
    %1430 = vector.broadcast %1429 : vector<8x8x1xf32> to vector<8x8x32xf32>
    %1431 = arith.mulf %1430, %1428 : vector<8x8x32xf32>
    %cst_586 = arith.constant dense<0.000000e+00> : vector<8x32xf32>
    %1432 = vector.multi_reduction <add>, %1431, %cst_586 [0] : vector<8x8x32xf32> to vector<8x32xf32>
    %1433 = vector.shape_cast %1427 : vector<8x8xf32> to vector<8x8x1xf32>
    %1434 = vector.broadcast %1433 : vector<8x8x1xf32> to vector<8x8x32xf32>
    %1435 = arith.mulf %1434, %1428 : vector<8x8x32xf32>
    %cst_587 = arith.constant dense<0.000000e+00> : vector<8x32xf32>
    %1436 = vector.multi_reduction <add>, %1435, %cst_587 [0] : vector<8x8x32xf32> to vector<8x32xf32>
    %1437 = tpu.concatenate %1432, %1436 in 1 : vector<8x32xf32>, vector<8x32xf32> -> vector<8x64xf32>
    %cst_588 = arith.constant dense<0.000000e+00> : vector<8x32xf32>
    %1438 = tpu.matmul %1437, %801, %cst_588 {dimension_numbers = #tpu.dot_dimension_numbers<[1], [0], [0], [1], [0, 0, 1, 1], [], []>} : vector<8x64xf32>, vector<64x32xf32>, vector<8x32xf32> -> vector<8x32xf32>
    %1439 = tpu.concatenate %1391, %1438 in 1 : vector<8x32xf32>, vector<8x32xf32> -> vector<8x64xf32>
    %cst_589 = arith.constant dense<0.000000e+00> : vector<8x256xf32>
    %1440 = tpu.matmul %1439, %802, %cst_589 {dimension_numbers = #tpu.dot_dimension_numbers<[1], [0], [0], [1], [0, 0, 1, 1], [], []>} : vector<8x64xf32>, vector<64x256xf32>, vector<8x256xf32> -> vector<8x256xf32>
    %1441 = vector.broadcast %803 : vector<1x256xf32> to vector<8x256xf32>
    %1442 = arith.addf %1440, %1441 : vector<8x256xf32>
    %1443 = vector.extract_strided_slice %1442 {offsets = [0, 0], sizes = [8, 128], strides = [1, 1]} : vector<8x256xf32> to vector<8x128xf32>
    %1444 = arith.negf %1443 : vector<8x128xf32>
    %1445 = math.exp %1444 : vector<8x128xf32>
    %cst_590 = arith.constant 1.000000e+00 : f32
    %1446 = vector.broadcast %cst_590 : f32 to vector<8x128xf32>
    %1447 = arith.addf %1446, %1445 : vector<8x128xf32>
    %1448 = arith.divf %1446, %1447 : vector<8x128xf32>
    %1449 = vector.extract_strided_slice %1448 {offsets = [0, 0], sizes = [8, 32], strides = [1, 1]} : vector<8x128xf32> to vector<8x32xf32>
    %1450 = vector.extract_strided_slice %1448 {offsets = [0, 32], sizes = [8, 32], strides = [1, 1]} : vector<8x128xf32> to vector<8x32xf32>
    %1451 = vector.extract_strided_slice %1448 {offsets = [0, 64], sizes = [8, 32], strides = [1, 1]} : vector<8x128xf32> to vector<8x32xf32>
    %1452 = vector.extract_strided_slice %1448 {offsets = [0, 96], sizes = [8, 32], strides = [1, 1]} : vector<8x128xf32> to vector<8x32xf32>
    %1453 = vector.extract_strided_slice %1442 {offsets = [0, 128], sizes = [8, 32], strides = [1, 1]} : vector<8x256xf32> to vector<8x32xf32>
    %1454 = vector.extract_strided_slice %1442 {offsets = [0, 160], sizes = [8, 32], strides = [1, 1]} : vector<8x256xf32> to vector<8x32xf32>
    %1455 = arith.mulf %1449, %1454 : vector<8x32xf32>
    %1456 = arith.addf %1453, %1455 : vector<8x32xf32>
    %1457 = math.tanh %1456 : vector<8x32xf32>
    %1458 = vector.extract_strided_slice %1442 {offsets = [0, 192], sizes = [8, 32], strides = [1, 1]} : vector<8x256xf32> to vector<8x32xf32>
    %1459 = vector.extract_strided_slice %1442 {offsets = [0, 224], sizes = [8, 32], strides = [1, 1]} : vector<8x256xf32> to vector<8x32xf32>
    %1460 = arith.mulf %1451, %1459 : vector<8x32xf32>
    %1461 = arith.addf %1458, %1460 : vector<8x32xf32>
    %1462 = math.tanh %1461 : vector<8x32xf32>
    %cst_591 = arith.constant 1.000000e+00 : f32
    %1463 = vector.broadcast %cst_591 : f32 to vector<8x32xf32>
    %1464 = arith.subf %1463, %1450 : vector<8x32xf32>
    %1465 = arith.mulf %1464, %1457 : vector<8x32xf32>
    %1466 = arith.mulf %1450, %1438 : vector<8x32xf32>
    %1467 = arith.addf %1465, %1466 : vector<8x32xf32>
    %cst_592 = arith.constant 1.000000e+00 : f32
    %1468 = vector.broadcast %cst_592 : f32 to vector<8x32xf32>
    %1469 = arith.subf %1468, %1452 : vector<8x32xf32>
    %1470 = arith.mulf %1469, %1462 : vector<8x32xf32>
    %1471 = arith.addf %1467, %1470 : vector<8x32xf32>
    %1472 = arith.mulf %1452, %1391 : vector<8x32xf32>
    %1473 = arith.addf %1471, %1472 : vector<8x32xf32>
    %c6_593 = arith.constant 6 : index
    %c0_594 = arith.constant 0 : index
    %c0_595 = arith.constant 0 : index
    %1474 = vector.load %arg31[%c6_593, %c0_594, %c0_595] : memref<8x8x32xf32, #tpu.memory_space<vmem>>, vector<1x8x32xf32>
    %1475 = vector.shape_cast %1474 : vector<1x8x32xf32> to vector<8x32xf32>
    %1476 = vector.shape_cast %1473 : vector<8x32xf32> to vector<1x8x32xf32>
    tpu.vector_store %arg31[%c6_593, %c0_594, %c0_595], %1476 {strides = array<i32>} : memref<8x8x32xf32, #tpu.memory_space<vmem>>, vector<1x8x32xf32>,
    %1477 = vector.broadcast %799 : vector<1x32xf32> to vector<8x32xf32>
    %1478 = arith.mulf %1473, %1477 : vector<8x32xf32>
    %cst_596 = arith.constant dense<0.000000e+00> : vector<8xf32>
    %1479 = vector.multi_reduction <add>, %1478, %cst_596 [1] : vector<8x32xf32> to vector<8xf32>
    %1480 = vector.shape_cast %1479 : vector<8xf32> to vector<8x1xf32>
    %c0_597 = arith.constant 0 : index
    %c6_598 = arith.constant 6 : index
    %1481 = vector.load %arg32[%c0_597, %c6_598] : memref<8x8xf32, #tpu.memory_space<vmem>>, vector<8x1xf32>
    tpu.vector_store %arg32[%c0_597, %c6_598], %1480 {strides = array<i32>} : memref<8x8xf32, #tpu.memory_space<vmem>>, vector<8x1xf32>,
    %cst_599 = arith.constant 0.000000e+00 : f32
    %1482 = vector.broadcast %cst_599 : f32 to vector<8x8xf32>
    %1483 = arith.select %1409, %1421, %1482 : vector<8x8xi1>, vector<8x8xf32>
    %c6_600 = arith.constant 6 : index
    %c0_601 = arith.constant 0 : index
    %c0_602 = arith.constant 0 : index
    %1484 = vector.load %arg28[%c6_600, %c0_601, %c0_602] : memref<8x8x8xf32, #tpu.memory_space<vmem>>, vector<1x8x8xf32>
    %1485 = vector.shape_cast %1484 : vector<1x8x8xf32> to vector<8x8xf32>
    %1486 = vector.shape_cast %1483 : vector<8x8xf32> to vector<1x8x8xf32>
    tpu.vector_store %arg28[%c6_600, %c0_601, %c0_602], %1486 {strides = array<i32>} : memref<8x8x8xf32, #tpu.memory_space<vmem>>, vector<1x8x8xf32>,
    %c7_603 = arith.constant 7 : index
    %c0_604 = arith.constant 0 : index
    %c0_605 = arith.constant 0 : index
    %1487 = vector.load %arg30[%c7_603, %c0_604, %c0_605] : memref<8x8x32xf32, #tpu.memory_space<vmem>>, vector<1x8x32xf32>
    %1488 = vector.shape_cast %1487 : vector<1x8x32xf32> to vector<8x32xf32>
    %1489 = vector.broadcast %798 : vector<1x32xf32> to vector<8x32xf32>
    %1490 = arith.mulf %1488, %1489 : vector<8x32xf32>
    %cst_606 = arith.constant dense<0.000000e+00> : vector<8xf32>
    %1491 = vector.multi_reduction <add>, %1490, %cst_606 [1] : vector<8x32xf32> to vector<8xf32>
    %1492 = vector.shape_cast %1491 : vector<8xf32> to vector<8x1xf32>
    %1493 = vector.broadcast %800 : vector<1x1xf32> to vector<8x1xf32>
    %1494 = arith.addf %1492, %1493 : vector<8x1xf32>
    %c0_607 = arith.constant 0 : index
    %c0_608 = arith.constant 0 : index
    %1495 = vector.load %arg32[%c0_607, %c0_608] : memref<8x8xf32, #tpu.memory_space<vmem>>, vector<8x8xf32>
    %1496 = vector.broadcast %1494 : vector<8x1xf32> to vector<8x8xf32>
    %1497 = arith.addf %1495, %1496 : vector<8x8xf32>
    %c7_609 = arith.constant 7 : index
    %c0_610 = arith.constant 0 : index
    %c0_611 = arith.constant 0 : index
    %1498 = vector.load %arg2[%c7_609, %c0_610, %c0_611] : memref<8x8x8xf32, #tpu.memory_space<vmem>>, vector<1x8x8xf32>
    %1499 = vector.shape_cast %1498 : vector<1x8x8xf32> to vector<8x8xf32>
    %cst_612 = arith.constant 1.000000e+00 : f32
    %1500 = vector.broadcast %cst_612 : f32 to vector<8x8xf32>
    %1501 = arith.subf %1500, %1499 : vector<8x8xf32>
    %cst_613 = arith.constant 1.000000e+30 : f32
    %1502 = vector.broadcast %cst_613 : f32 to vector<8x8xf32>
    %1503 = arith.mulf %1501, %1502 : vector<8x8xf32>
    %1504 = arith.subf %1497, %1503 : vector<8x8xf32>
    %c7_i32_614 = arith.constant 7 : i32
    %1505 = vector.broadcast %c7_i32_614 : i32 to vector<8x8xi32>
    %1506 = arith.cmpi slt, %11, %1505 : vector<8x8xi32>
    %cst_615 = arith.constant -9.99999993E+36 : f32
    %1507 = vector.broadcast %cst_615 : f32 to vector<8x8xf32>
    %1508 = arith.select %1506, %1504, %1507 : vector<8x8xi1>, vector<8x8xf32>
    %cst_616 = arith.constant dense<0xFF800000> : vector<8xf32>
    %1509 = vector.multi_reduction <maximumf>, %1508, %cst_616 [1] : vector<8x8xf32> to vector<8xf32>
    %1510 = vector.shape_cast %1509 : vector<8xf32> to vector<8x1xf32>
    %1511 = vector.broadcast %1510 : vector<8x1xf32> to vector<8x8xf32>
    %1512 = arith.subf %1508, %1511 : vector<8x8xf32>
    %1513 = math.exp %1512 : vector<8x8xf32>
    %cst_617 = arith.constant dense<0.000000e+00> : vector<8xf32>
    %1514 = vector.multi_reduction <add>, %1513, %cst_617 [1] : vector<8x8xf32> to vector<8xf32>
    %1515 = vector.shape_cast %1514 : vector<8xf32> to vector<8x1xf32>
    %1516 = tpu.reciprocal %1515 {approx = true} : vector<8x1xf32> -> vector<8x1xf32>
    %1517 = vector.broadcast %1516 : vector<8x1xf32> to vector<8x8xf32>
    %1518 = arith.mulf %1513, %1517 : vector<8x8xf32>
    %c7_618 = arith.constant 7 : index
    %c0_619 = arith.constant 0 : index
    %c0_620 = arith.constant 0 : index
    %1519 = vector.load %arg3[%c7_618, %c0_619, %c0_620] : memref<8x8x8xf32, #tpu.memory_space<vmem>>, vector<1x8x8xf32>
    %1520 = vector.shape_cast %1519 : vector<1x8x8xf32> to vector<8x8xf32>
    %1521 = arith.mulf %1518, %1520 : vector<8x8xf32>
    %1522 = arith.subf %1518, %1521 : vector<8x8xf32>
    %1523 = tpu.transpose %1521, [1, 0] : vector<8x8xf32> -> vector<8x8xf32>
    %1524 = tpu.transpose %1522, [1, 0] : vector<8x8xf32> -> vector<8x8xf32>
    %c0_621 = arith.constant 0 : index
    %c0_622 = arith.constant 0 : index
    %c0_623 = arith.constant 0 : index
    %1525 = vector.load %arg31[%c0_621, %c0_622, %c0_623] : memref<8x8x32xf32, #tpu.memory_space<vmem>>, vector<8x8x32xf32>
    %1526 = vector.shape_cast %1523 : vector<8x8xf32> to vector<8x8x1xf32>
    %1527 = vector.broadcast %1526 : vector<8x8x1xf32> to vector<8x8x32xf32>
    %1528 = arith.mulf %1527, %1525 : vector<8x8x32xf32>
    %cst_624 = arith.constant dense<0.000000e+00> : vector<8x32xf32>
    %1529 = vector.multi_reduction <add>, %1528, %cst_624 [0] : vector<8x8x32xf32> to vector<8x32xf32>
    %1530 = vector.shape_cast %1524 : vector<8x8xf32> to vector<8x8x1xf32>
    %1531 = vector.broadcast %1530 : vector<8x8x1xf32> to vector<8x8x32xf32>
    %1532 = arith.mulf %1531, %1525 : vector<8x8x32xf32>
    %cst_625 = arith.constant dense<0.000000e+00> : vector<8x32xf32>
    %1533 = vector.multi_reduction <add>, %1532, %cst_625 [0] : vector<8x8x32xf32> to vector<8x32xf32>
    %1534 = tpu.concatenate %1529, %1533 in 1 : vector<8x32xf32>, vector<8x32xf32> -> vector<8x64xf32>
    %cst_626 = arith.constant dense<0.000000e+00> : vector<8x32xf32>
    %1535 = tpu.matmul %1534, %801, %cst_626 {dimension_numbers = #tpu.dot_dimension_numbers<[1], [0], [0], [1], [0, 0, 1, 1], [], []>} : vector<8x64xf32>, vector<64x32xf32>, vector<8x32xf32> -> vector<8x32xf32>
    %1536 = tpu.concatenate %1488, %1535 in 1 : vector<8x32xf32>, vector<8x32xf32> -> vector<8x64xf32>
    %cst_627 = arith.constant dense<0.000000e+00> : vector<8x256xf32>
    %1537 = tpu.matmul %1536, %802, %cst_627 {dimension_numbers = #tpu.dot_dimension_numbers<[1], [0], [0], [1], [0, 0, 1, 1], [], []>} : vector<8x64xf32>, vector<64x256xf32>, vector<8x256xf32> -> vector<8x256xf32>
    %1538 = vector.broadcast %803 : vector<1x256xf32> to vector<8x256xf32>
    %1539 = arith.addf %1537, %1538 : vector<8x256xf32>
    %1540 = vector.extract_strided_slice %1539 {offsets = [0, 0], sizes = [8, 128], strides = [1, 1]} : vector<8x256xf32> to vector<8x128xf32>
    %1541 = arith.negf %1540 : vector<8x128xf32>
    %1542 = math.exp %1541 : vector<8x128xf32>
    %cst_628 = arith.constant 1.000000e+00 : f32
    %1543 = vector.broadcast %cst_628 : f32 to vector<8x128xf32>
    %1544 = arith.addf %1543, %1542 : vector<8x128xf32>
    %1545 = arith.divf %1543, %1544 : vector<8x128xf32>
    %1546 = vector.extract_strided_slice %1545 {offsets = [0, 0], sizes = [8, 32], strides = [1, 1]} : vector<8x128xf32> to vector<8x32xf32>
    %1547 = vector.extract_strided_slice %1545 {offsets = [0, 32], sizes = [8, 32], strides = [1, 1]} : vector<8x128xf32> to vector<8x32xf32>
    %1548 = vector.extract_strided_slice %1545 {offsets = [0, 64], sizes = [8, 32], strides = [1, 1]} : vector<8x128xf32> to vector<8x32xf32>
    %1549 = vector.extract_strided_slice %1545 {offsets = [0, 96], sizes = [8, 32], strides = [1, 1]} : vector<8x128xf32> to vector<8x32xf32>
    %1550 = vector.extract_strided_slice %1539 {offsets = [0, 128], sizes = [8, 32], strides = [1, 1]} : vector<8x256xf32> to vector<8x32xf32>
    %1551 = vector.extract_strided_slice %1539 {offsets = [0, 160], sizes = [8, 32], strides = [1, 1]} : vector<8x256xf32> to vector<8x32xf32>
    %1552 = arith.mulf %1546, %1551 : vector<8x32xf32>
    %1553 = arith.addf %1550, %1552 : vector<8x32xf32>
    %1554 = math.tanh %1553 : vector<8x32xf32>
    %1555 = vector.extract_strided_slice %1539 {offsets = [0, 192], sizes = [8, 32], strides = [1, 1]} : vector<8x256xf32> to vector<8x32xf32>
    %1556 = vector.extract_strided_slice %1539 {offsets = [0, 224], sizes = [8, 32], strides = [1, 1]} : vector<8x256xf32> to vector<8x32xf32>
    %1557 = arith.mulf %1548, %1556 : vector<8x32xf32>
    %1558 = arith.addf %1555, %1557 : vector<8x32xf32>
    %1559 = math.tanh %1558 : vector<8x32xf32>
    %cst_629 = arith.constant 1.000000e+00 : f32
    %1560 = vector.broadcast %cst_629 : f32 to vector<8x32xf32>
    %1561 = arith.subf %1560, %1547 : vector<8x32xf32>
    %1562 = arith.mulf %1561, %1554 : vector<8x32xf32>
    %1563 = arith.mulf %1547, %1535 : vector<8x32xf32>
    %1564 = arith.addf %1562, %1563 : vector<8x32xf32>
    %cst_630 = arith.constant 1.000000e+00 : f32
    %1565 = vector.broadcast %cst_630 : f32 to vector<8x32xf32>
    %1566 = arith.subf %1565, %1549 : vector<8x32xf32>
    %1567 = arith.mulf %1566, %1559 : vector<8x32xf32>
    %1568 = arith.addf %1564, %1567 : vector<8x32xf32>
    %1569 = arith.mulf %1549, %1488 : vector<8x32xf32>
    %1570 = arith.addf %1568, %1569 : vector<8x32xf32>
    %c7_631 = arith.constant 7 : index
    %c0_632 = arith.constant 0 : index
    %c0_633 = arith.constant 0 : index
    %1571 = vector.load %arg31[%c7_631, %c0_632, %c0_633] : memref<8x8x32xf32, #tpu.memory_space<vmem>>, vector<1x8x32xf32>
    %1572 = vector.shape_cast %1571 : vector<1x8x32xf32> to vector<8x32xf32>
    %1573 = vector.shape_cast %1570 : vector<8x32xf32> to vector<1x8x32xf32>
    tpu.vector_store %arg31[%c7_631, %c0_632, %c0_633], %1573 {strides = array<i32>} : memref<8x8x32xf32, #tpu.memory_space<vmem>>, vector<1x8x32xf32>,
    %1574 = vector.broadcast %799 : vector<1x32xf32> to vector<8x32xf32>
    %1575 = arith.mulf %1570, %1574 : vector<8x32xf32>
    %cst_634 = arith.constant dense<0.000000e+00> : vector<8xf32>
    %1576 = vector.multi_reduction <add>, %1575, %cst_634 [1] : vector<8x32xf32> to vector<8xf32>
    %1577 = vector.shape_cast %1576 : vector<8xf32> to vector<8x1xf32>
    %c0_635 = arith.constant 0 : index
    %c7_636 = arith.constant 7 : index
    %1578 = vector.load %arg32[%c0_635, %c7_636] : memref<8x8xf32, #tpu.memory_space<vmem>>, vector<8x1xf32>
    tpu.vector_store %arg32[%c0_635, %c7_636], %1577 {strides = array<i32>} : memref<8x8xf32, #tpu.memory_space<vmem>>, vector<8x1xf32>,
    %cst_637 = arith.constant 0.000000e+00 : f32
    %1579 = vector.broadcast %cst_637 : f32 to vector<8x8xf32>
    %1580 = arith.select %1506, %1518, %1579 : vector<8x8xi1>, vector<8x8xf32>
    %c7_638 = arith.constant 7 : index
    %c0_639 = arith.constant 0 : index
    %c0_640 = arith.constant 0 : index
    %1581 = vector.load %arg28[%c7_638, %c0_639, %c0_640] : memref<8x8x8xf32, #tpu.memory_space<vmem>>, vector<1x8x8xf32>
    %1582 = vector.shape_cast %1581 : vector<1x8x8xf32> to vector<8x8xf32>
    %1583 = vector.shape_cast %1580 : vector<8x8xf32> to vector<1x8x8xf32>
    tpu.vector_store %arg28[%c7_638, %c0_639, %c0_640], %1583 {strides = array<i32>} : memref<8x8x8xf32, #tpu.memory_space<vmem>>, vector<1x8x8xf32>,
    %c0_641 = arith.constant 0 : index
    %c0_642 = arith.constant 0 : index
    %1584 = vector.load %arg21[%c0_641, %c0_642] : memref<1x32xf32, #tpu.memory_space<vmem>>, vector<1x32xf32>
    %c0_643 = arith.constant 0 : index
    %c0_644 = arith.constant 0 : index
    %c0_645 = arith.constant 0 : index
    %1585 = vector.load %arg29[%c0_643, %c0_644, %c0_645] : memref<8x8x32xf32, #tpu.memory_space<vmem>>, vector<8x8x32xf32>
    %1586 = vector.shape_cast %1585 : vector<8x8x32xf32> to vector<64x32xf32>
    %c0_646 = arith.constant 0 : index
    %c0_647 = arith.constant 0 : index
    %1587 = vector.load %arg18[%c0_646, %c0_647] : memref<32x32xf32, #tpu.memory_space<vmem>>, vector<32x32xf32>
    %cst_648 = arith.constant dense<0.000000e+00> : vector<64x32xf32>
    %1588 = tpu.matmul %1586, %1587, %cst_648 {dimension_numbers = #tpu.dot_dimension_numbers<[1], [0], [0], [1], [0, 0, 1, 1], [], []>} : vector<64x32xf32>, vector<32x32xf32>, vector<64x32xf32> -> vector<64x32xf32>
    %1589 = vector.broadcast %1584 : vector<1x32xf32> to vector<64x32xf32>
    %1590 = arith.addf %1589, %1588 : vector<64x32xf32>
    %c0_649 = arith.constant 0 : index
    %c0_650 = arith.constant 0 : index
    %c0_651 = arith.constant 0 : index
    %1591 = vector.load %arg30[%c0_649, %c0_650, %c0_651] : memref<8x8x32xf32, #tpu.memory_space<vmem>>, vector<8x8x32xf32>
    %1592 = vector.shape_cast %1591 : vector<8x8x32xf32> to vector<64x32xf32>
    %c0_652 = arith.constant 0 : index
    %c0_653 = arith.constant 0 : index
    %1593 = vector.load %arg19[%c0_652, %c0_653] : memref<32x32xf32, #tpu.memory_space<vmem>>, vector<32x32xf32>
    %cst_654 = arith.constant dense<0.000000e+00> : vector<64x32xf32>
    %1594 = tpu.matmul %1592, %1593, %cst_654 {dimension_numbers = #tpu.dot_dimension_numbers<[1], [0], [0], [1], [0, 0, 1, 1], [], []>} : vector<64x32xf32>, vector<32x32xf32>, vector<64x32xf32> -> vector<64x32xf32>
    %1595 = arith.addf %1590, %1594 : vector<64x32xf32>
    %c0_655 = arith.constant 0 : index
    %c0_656 = arith.constant 0 : index
    %c0_657 = arith.constant 0 : index
    %1596 = vector.load %arg31[%c0_655, %c0_656, %c0_657] : memref<8x8x32xf32, #tpu.memory_space<vmem>>, vector<8x8x32xf32>
    %1597 = vector.shape_cast %1596 : vector<8x8x32xf32> to vector<64x32xf32>
    %c0_658 = arith.constant 0 : index
    %c0_659 = arith.constant 0 : index
    %1598 = vector.load %arg20[%c0_658, %c0_659] : memref<32x32xf32, #tpu.memory_space<vmem>>, vector<32x32xf32>
    %cst_660 = arith.constant dense<0.000000e+00> : vector<64x32xf32>
    %1599 = tpu.matmul %1597, %1598, %cst_660 {dimension_numbers = #tpu.dot_dimension_numbers<[1], [0], [0], [1], [0, 0, 1, 1], [], []>} : vector<64x32xf32>, vector<32x32xf32>, vector<64x32xf32> -> vector<64x32xf32>
    %1600 = arith.addf %1595, %1599 : vector<64x32xf32>
    %cst_661 = arith.constant 0.000000e+00 : f32
    %1601 = vector.broadcast %cst_661 : f32 to vector<64x32xf32>
    %1602 = arith.maximumf %1600, %1601 : vector<64x32xf32>
    %c0_662 = arith.constant 0 : index
    %c0_663 = arith.constant 0 : index
    %1603 = vector.load %arg22[%c0_662, %c0_663] : memref<32x32xf32, #tpu.memory_space<vmem>>, vector<32x32xf32>
    %cst_664 = arith.constant dense<0.000000e+00> : vector<64x32xf32>
    %1604 = tpu.matmul %1602, %1603, %cst_664 {dimension_numbers = #tpu.dot_dimension_numbers<[1], [0], [0], [1], [0, 0, 1, 1], [], []>} : vector<64x32xf32>, vector<32x32xf32>, vector<64x32xf32> -> vector<64x32xf32>
    %c0_665 = arith.constant 0 : index
    %c0_666 = arith.constant 0 : index
    %1605 = vector.load %arg23[%c0_665, %c0_666] : memref<1x32xf32, #tpu.memory_space<vmem>>, vector<1x32xf32>
    %1606 = vector.broadcast %1605 : vector<1x32xf32> to vector<64x32xf32>
    %1607 = arith.addf %1604, %1606 : vector<64x32xf32>
    %cst_667 = arith.constant 0.000000e+00 : f32
    %1608 = vector.broadcast %cst_667 : f32 to vector<64x32xf32>
    %1609 = arith.maximumf %1607, %1608 : vector<64x32xf32>
    %c0_668 = arith.constant 0 : index
    %c0_669 = arith.constant 0 : index
    %1610 = vector.load %arg24[%c0_668, %c0_669] : memref<32x32xf32, #tpu.memory_space<vmem>>, vector<32x32xf32>
    %cst_670 = arith.constant dense<0.000000e+00> : vector<64x32xf32>
    %1611 = tpu.matmul %1609, %1610, %cst_670 {dimension_numbers = #tpu.dot_dimension_numbers<[1], [0], [0], [1], [0, 0, 1, 1], [], []>} : vector<64x32xf32>, vector<32x32xf32>, vector<64x32xf32> -> vector<64x32xf32>
    %c0_671 = arith.constant 0 : index
    %c0_672 = arith.constant 0 : index
    %1612 = vector.load %arg25[%c0_671, %c0_672] : memref<1x32xf32, #tpu.memory_space<vmem>>, vector<1x32xf32>
    %1613 = vector.broadcast %1612 : vector<1x32xf32> to vector<64x32xf32>
    %1614 = arith.addf %1611, %1613 : vector<64x32xf32>
    %1615 = vector.shape_cast %1614 : vector<64x32xf32> to vector<8x8x32xf32>
    %c0_673 = arith.constant 0 : index
    %c0_674 = arith.constant 0 : index
    %c0_675 = arith.constant 0 : index
    %1616 = vector.load %arg26[%c0_673, %c0_674, %c0_675] : memref<8x8x32xf32, #tpu.memory_space<vmem>>, vector<8x8x32xf32>
    tpu.vector_store %arg26[%c0_673, %c0_674, %c0_675], %1615 {strides = array<i32>} : memref<8x8x32xf32, #tpu.memory_space<vmem>>, vector<8x8x32xf32>,
    return
  }
  func.func @transform_0(%arg0: i32) -> (i32, i32, i32) {
    %c0_i32 = arith.constant 0 : i32
    %c0_i32_0 = arith.constant 0 : i32
    %c0_i32_1 = arith.constant 0 : i32
    return %c0_i32, %arg0, %c0_i32_0 : i32, i32, i32
  }
  func.func @transform_1(%arg0: i32) -> (i32, i32, i32) {
    %c0_i32 = arith.constant 0 : i32
    %c0_i32_0 = arith.constant 0 : i32
    %c0_i32_1 = arith.constant 0 : i32
    return %c0_i32, %arg0, %c0_i32_0 : i32, i32, i32
  }
  func.func @transform_2(%arg0: i32) -> (i32, i32, i32) {
    %c0_i32 = arith.constant 0 : i32
    %c0_i32_0 = arith.constant 0 : i32
    %c0_i32_1 = arith.constant 0 : i32
    return %c0_i32, %arg0, %c0_i32_0 : i32, i32, i32
  }
  func.func @transform_3(%arg0: i32) -> (i32, i32) {
    %c0_i32 = arith.constant 0 : i32
    %c0_i32_0 = arith.constant 0 : i32
    %c0_i32_1 = arith.constant 0 : i32
    return %c0_i32, %c0_i32_0 : i32, i32
  }
  func.func @transform_4(%arg0: i32) -> (i32, i32) {
    %c0_i32 = arith.constant 0 : i32
    %c0_i32_0 = arith.constant 0 : i32
    %c0_i32_1 = arith.constant 0 : i32
    return %c0_i32, %c0_i32_0 : i32, i32
  }
  func.func @transform_5(%arg0: i32) -> (i32, i32) {
    %c0_i32 = arith.constant 0 : i32
    %c0_i32_0 = arith.constant 0 : i32
    %c0_i32_1 = arith.constant 0 : i32
    return %c0_i32, %c0_i32_0 : i32, i32
  }
  func.func @transform_6(%arg0: i32) -> (i32, i32) {
    %c0_i32 = arith.constant 0 : i32
    %c0_i32_0 = arith.constant 0 : i32
    %c0_i32_1 = arith.constant 0 : i32
    return %c0_i32, %c0_i32_0 : i32, i32
  }
  func.func @transform_7(%arg0: i32) -> (i32, i32) {
    %c0_i32 = arith.constant 0 : i32
    %c0_i32_0 = arith.constant 0 : i32
    %c0_i32_1 = arith.constant 0 : i32
    return %c0_i32, %c0_i32_0 : i32, i32
  }
  func.func @transform_8(%arg0: i32) -> (i32, i32) {
    %c0_i32 = arith.constant 0 : i32
    %c0_i32_0 = arith.constant 0 : i32
    %c0_i32_1 = arith.constant 0 : i32
    return %c0_i32, %c0_i32_0 : i32, i32
  }
  func.func @transform_9(%arg0: i32) -> (i32, i32) {
    %c0_i32 = arith.constant 0 : i32
    %c0_i32_0 = arith.constant 0 : i32
    %c0_i32_1 = arith.constant 0 : i32
    return %c0_i32, %c0_i32_0 : i32, i32
  }
  func.func @transform_10(%arg0: i32) -> (i32, i32) {
    %c0_i32 = arith.constant 0 : i32
    %c0_i32_0 = arith.constant 0 : i32
    %c0_i32_1 = arith.constant 0 : i32
    return %c0_i32, %c0_i32_0 : i32, i32
  }
  func.func @transform_11(%arg0: i32) -> (i32, i32) {
    %c0_i32 = arith.constant 0 : i32
    %c0_i32_0 = arith.constant 0 : i32
    %c0_i32_1 = arith.constant 0 : i32
    return %c0_i32, %c0_i32_0 : i32, i32
  }
  func.func @transform_12(%arg0: i32) -> (i32, i32) {
    %c0_i32 = arith.constant 0 : i32
    %c0_i32_0 = arith.constant 0 : i32
    %c0_i32_1 = arith.constant 0 : i32
    return %c0_i32, %c0_i32_0 : i32, i32
  }
  func.func @transform_13(%arg0: i32) -> (i32, i32) {
    %c0_i32 = arith.constant 0 : i32
    %c0_i32_0 = arith.constant 0 : i32
    %c0_i32_1 = arith.constant 0 : i32
    return %c0_i32, %c0_i32_0 : i32, i32
  }
  func.func @transform_14(%arg0: i32) -> (i32, i32) {
    %c0_i32 = arith.constant 0 : i32
    %c0_i32_0 = arith.constant 0 : i32
    %c0_i32_1 = arith.constant 0 : i32
    return %c0_i32, %c0_i32_0 : i32, i32
  }
  func.func @transform_15(%arg0: i32) -> (i32, i32) {
    %c0_i32 = arith.constant 0 : i32
    %c0_i32_0 = arith.constant 0 : i32
    %c0_i32_1 = arith.constant 0 : i32
    return %c0_i32, %c0_i32_0 : i32, i32
  }
  func.func @transform_16(%arg0: i32) -> (i32, i32) {
    %c0_i32 = arith.constant 0 : i32
    %c0_i32_0 = arith.constant 0 : i32
    %c0_i32_1 = arith.constant 0 : i32
    return %c0_i32, %c0_i32_0 : i32, i32
  }
  func.func @transform_17(%arg0: i32) -> (i32, i32) {
    %c0_i32 = arith.constant 0 : i32
    %c0_i32_0 = arith.constant 0 : i32
    %c0_i32_1 = arith.constant 0 : i32
    return %c0_i32, %c0_i32_0 : i32, i32
  }
  func.func @transform_18(%arg0: i32) -> (i32, i32) {
    %c0_i32 = arith.constant 0 : i32
    %c0_i32_0 = arith.constant 0 : i32
    %c0_i32_1 = arith.constant 0 : i32
    return %c0_i32, %c0_i32_0 : i32, i32
  }
  func.func @transform_19(%arg0: i32) -> (i32, i32) {
    %c0_i32 = arith.constant 0 : i32
    %c0_i32_0 = arith.constant 0 : i32
    %c0_i32_1 = arith.constant 0 : i32
    return %c0_i32, %c0_i32_0 : i32, i32
  }
  func.func @transform_20(%arg0: i32) -> (i32, i32) {
    %c0_i32 = arith.constant 0 : i32
    %c0_i32_0 = arith.constant 0 : i32
    %c0_i32_1 = arith.constant 0 : i32
    return %c0_i32, %c0_i32_0 : i32, i32
  }
  func.func @transform_21(%arg0: i32) -> (i32, i32) {
    %c0_i32 = arith.constant 0 : i32
    %c0_i32_0 = arith.constant 0 : i32
    %c0_i32_1 = arith.constant 0 : i32
    return %c0_i32, %c0_i32_0 : i32, i32
  }
  func.func @transform_22(%arg0: i32) -> (i32, i32) {
    %c0_i32 = arith.constant 0 : i32
    %c0_i32_0 = arith.constant 0 : i32
    %c0_i32_1 = arith.constant 0 : i32
    return %c0_i32, %c0_i32_0 : i32, i32
  }
  func.func @transform_23(%arg0: i32) -> (i32, i32) {
    %c0_i32 = arith.constant 0 : i32
    %c0_i32_0 = arith.constant 0 : i32
    %c0_i32_1 = arith.constant 0 : i32
    return %c0_i32, %c0_i32_0 : i32, i32
  }
  func.func @transform_24(%arg0: i32) -> (i32, i32) {
    %c0_i32 = arith.constant 0 : i32
    %c0_i32_0 = arith.constant 0 : i32
    %c0_i32_1 = arith.constant 0 : i32
    return %c0_i32, %c0_i32_0 : i32, i32
  }
  func.func @transform_25(%arg0: i32) -> (i32, i32, i32) {
    %c0_i32 = arith.constant 0 : i32
    %c0_i32_0 = arith.constant 0 : i32
    %c0_i32_1 = arith.constant 0 : i32
    return %c0_i32, %arg0, %c0_i32_0 : i32, i32, i32
  }
  func.func @transform_26(%arg0: i32) -> (i32, i32, i32) {
    %c0_i32 = arith.constant 0 : i32
    %c0_i32_0 = arith.constant 0 : i32
    %c0_i32_1 = arith.constant 0 : i32
    return %c0_i32, %arg0, %c0_i32_0 : i32, i32, i32
  }
  func.func @transform_27(%arg0: i32) -> (i32, i32, i32) {
    %c0_i32 = arith.constant 0 : i32
    %c0_i32_0 = arith.constant 0 : i32
    %c0_i32_1 = arith.constant 0 : i32
    return %c0_i32, %arg0, %c0_i32_0 : i32, i32, i32
  }
}

</mosaic_0001>

<bundles_post_ra>
// kernel: dagnn_encoder_forward.1
= control target key start
LH: loop header
LB: loop body
LE: loop exit
PB: predicated region body
PF: predicated region fallthrough
CT: control target
= control target key end

     0   :  { %vm290_vm0 = vcmask 64512   ;;  %v9835_v0 = vmov -inf   ;;  %vm106_vm1 = vcmask 261120   ;;  %v13250_v13 = vmov 0.0   ;;  %s9839_s28 = smov 96   ;;  %s13213_s2 = inlined_call_operand.vmem [shape: f32[8,8,8], index: 2, kind: input, shape index: {}]   ;;  %s13214_s8 = inlined_call_operand.vmem [shape: f32[64,32], index: 8, kind: input, shape index: {}]   ;;  %s13215_s3 = inlined_call_operand.vmem [shape: f32[32,32], index: 3, kind: input, shape index: {}]   ;;  %s13216_s0 = inlined_call_operand.vmem [shape: f32[8,8,32], index: 0, kind: input, shape index: {}]   ;;  %s13217_s9 = inlined_call_operand.vmem [shape: f32[64,256], index: 9, kind: input, shape index: {}]   ;;  %s13218_s4 = inlined_call_operand.vmem [shape: f32[1,32], index: 4, kind: input, shape index: {}]   ;;  %s13219_s10 = inlined_call_operand.vmem [shape: f32[1,256], index: 10, kind: input, shape index: {}]   ;;  %s13220_s6 = inlined_call_operand.vmem [shape: f32[1,32], index: 6, kind: input, shape index: {}]   ;;  %s13221_s7 = inlined_call_operand.<no memory space> [shape: f32[1,1], index: 7, kind: input, shape index: {}]   ;;  %s13222_s5 = inlined_call_operand.vmem [shape: f32[1,32], index: 5, kind: input, shape index: {}]   ;;  %s13223_s1 = inlined_call_operand.vmem [shape: f32[8,8,8], index: 1, kind: input, shape index: {}]   ;;  %s13224_s26 = inlined_call_operand.vmem [shape: f32[8,8,8], index: 26, kind: output, shape index: {1}]   ;;  %s13225_s14 = inlined_call_operand.vmem [shape: f32[64,32], index: 14, kind: input, shape index: {}]   ;;  %s13226_s15 = inlined_call_operand.vmem [shape: f32[64,256], index: 15, kind: input, shape index: {}]   ;;  %s13227_s16 = inlined_call_operand.vmem [shape: f32[1,256], index: 16, kind: input, shape index: {}]   ;;  %s13228_s12 = inlined_call_operand.vmem [shape: f32[1,32], index: 12, kind: input, shape index: {}]   ;;  %s13229_s13 = inlined_call_operand.<no memory space> [shape: f32[1,1], index: 13, kind: input, shape index: {}]   ;;  %s13230_s11 = inlined_call_operand.vmem [shape: f32[1,32], index: 11, kind: input, shape index: {}]   ;;  %s13231_s27 = inlined_call_operand.vmem [shape: f32[8,8,8], index: 27, kind: output, shape index: {2}]   ;;  %s13232_s17 = inlined_call_operand.vmem [shape: f32[32,32], index: 17, kind: input, shape index: {}]   ;;  %s13233_s19 = inlined_call_operand.vmem [shape: f32[32,32], index: 19, kind: input, shape index: {}]   ;;  %s13234_s18 = inlined_call_operand.vmem [shape: f32[32,32], index: 18, kind: input, shape index: {}]   ;;  %s13235_s20 = inlined_call_operand.vmem [shape: f32[1,32], index: 20, kind: input, shape index: {}]   ;;  %s13236_s21 = inlined_call_operand.vmem [shape: f32[32,32], index: 21, kind: input, shape index: {}]   ;;  %s13237_s23 = inlined_call_operand.vmem [shape: f32[32,32], index: 23, kind: input, shape index: {}]   ;;  %s13238_s22 = inlined_call_operand.vmem [shape: f32[1,32], index: 22, kind: input, shape index: {}]   ;;  %s13239_s24 = inlined_call_operand.vmem [shape: f32[1,32], index: 24, kind: input, shape index: {}]   ;;  %s13240_s25 = inlined_call_operand.vmem [shape: f32[8,8,32], index: 25, kind: output, shape index: {0}]  }
   0x1   :  { %13285 = sst [smem:[#allocation14_spill]] %s13213_s2  ;;  %v9983_v1 = vsel %vm290_vm0, -1e+37, %v9835_v0  ;;  %283 = vst.msk [vmem:[#allocation3 + $0x8] sm:$0xff] %vm106_vm1, %v13250_v13  ;;  %282 = vst.msk [vmem:[#allocation3] sm:$0xff] %vm106_vm1, %v13250_v13  ;;  %9147 = vmatprep.subr.mxu1 %v13250_v13  ;;  %v252_v14 = vlaneseq  ;;  %vm9837_vm2 = vmmov 0  }
   0x2   :  { %13286 = sst [smem:[#allocation15_spill]] %s13214_s8  ;;  %13297 = vst [vmem:[#allocation8_spill] sm:$0xff] %v9983_v1  ;;  %324 = vmax.xlane.f32.xlu0 %v9983_v1  ;;  %284 = vst.msk [vmem:[#allocation3 + $0x10] sm:$0xff] %vm106_vm1, %v13250_v13  ;;  %9163 = vmatprep.mubr.msk.f32.mxu1 %vm9837_vm2, %v13250_v13  ;;  %vm572_vm3 = vcmask 523264   ;;  %vm793_vm4 = vcmask 7168   ;;  %vm1270_vm6 = vcmask 15368  }
   0x3   :  { %13287 = sst [smem:[#allocation16_spill]] %s13215_s3  ;;  %285 = vst.msk [vmem:[#allocation3 + $0x18] sm:$0xff] %vm106_vm1, %v13250_v13  ;;  %286 = vst.msk [vmem:[#allocation3 + $0x20] sm:$0xff] %vm106_vm1, %v13250_v13  ;;  %v410_v15 = vshrl.u32 %v252_v14, 7  ;;  %vm1748_vm8 = vcmask 23568   ;;  %vm2226_vm10 = vcmask 31768  }
   0x4   :  { %13288 = sst [smem:[#allocation17_spill]] %s13216_s0  ;;  %287 = vst.msk [vmem:[#allocation3 + $0x28] sm:$0xff] %vm106_vm1, %v13250_v13  ;;  %288 = vst.msk [vmem:[#allocation3 + $0x30] sm:$0xff] %vm106_vm1, %v13250_v13  ;;  %s9840_s0 = smov 64   ;;  %vm2704_vm12 = vcmask 39968   ;;  %vm13271_vm14 = vcmask 48168  }
   0x5   :  { %13289 = sst [smem:[#allocation18_spill]] %s13217_s9  ;;  %289 = vst.msk [vmem:[#allocation3 + $0x38] sm:$0xff] %vm106_vm1, %v13250_v13  ;;  %4171 = vst.msk [vmem:[#allocation4] sm:$0xff] %vm106_vm1, %v13250_v13  ;;  %v10026_v16 = vsub.s32 1, %v410_v15  ;;  %v10028_v17 = vsub.s32 0, %v410_v15  ;;  %v10032_v21 = vsub.s32 2, %v410_v15 }
   0x6   :  { %13290 = sst [smem:[#allocation19_spill]] %s13218_s4  ;;  %291 = vst.msk [vmem:[#allocation5] sm:$0xff] %vm290_vm0, %v13250_v13  ;;  %v10034_v22 = vsub.s32 4, %v410_v15  ;;  %v10038_v25 = vsub.s32 3, %v410_v15  ;;  %v10040_v26 = vsub.s32 6, %v410_v15  ;;  %v10044_v29 = vsub.s32 5, %v410_v15 }
   0x7   :  { %13291 = sst [smem:[#allocation20_spill]] %s13219_s10  ;;  %4172 = vst.msk [vmem:[#allocation4 + $0x8] sm:$0xff] %vm106_vm1, %v13250_v13  ;;  %4173 = vst.msk [vmem:[#allocation4 + $0x10] sm:$0xff] %vm106_vm1, %v13250_v13  ;;  %v10047_v31 = vsub.s32 7, %v410_v15 }
   0x8   :  { %13292 = sst [smem:[#allocation21_spill]] %s13220_s6  ;;  %4174 = vst.msk [vmem:[#allocation4 + $0x18] sm:$0xff] %vm106_vm1, %v13250_v13  ;;  %4175 = vst.msk [vmem:[#allocation4 + $0x20] sm:$0xff] %vm106_vm1, %v13250_v13  ;;  %v10056_v40 = vld [vmem:[#allocation3 + $0x8] sm:$0xff]  ;;  %v10058_v41 = vld [vmem:[#allocation3] sm:$0xff] }
   0x9   :  { %13293 = sst [smem:[#allocation22_spill]] %s13221_s7  ;;  %4176 = vst.msk [vmem:[#allocation4 + $0x28] sm:$0xff] %vm106_vm1, %v13250_v13  ;;  %4177 = vst.msk [vmem:[#allocation4 + $0x30] sm:$0xff] %vm106_vm1, %v13250_v13  ;;  %v10060_v42 = vld [vmem:[#allocation3 + $0x10] sm:$0xff] }
   0xa   :  { %13294 = sst [smem:[#allocation23_spill]] %s13222_s5  ;;  %4178 = vst.msk [vmem:[#allocation4 + $0x38] sm:$0xff] %vm106_vm1, %v13250_v13  ;;  %13299 = vst [vmem:[#allocation9_spill] sm:$0xff] %v10026_v16  ;;  %v10066_v46 = vld [vmem:[#allocation3 + $0x18] sm:$0xff]  ;;  %v10088_v57 = vld [vmem:[#allocation3 + $0x20] sm:$0xff] }
   0xb   :  { %13295 = sst [smem:[#allocation24_spill]] %s13223_s1  ;;  %13300 = vst [vmem:[#allocation10_spill] sm:$0xff] %v10028_v17  ;;  %13301 = vst [vmem:[#allocation11_spill] sm:$0xff] %v10032_v21  ;;  %v10100_v62 = vld [vmem:[#allocation3 + $0x28] sm:$0xff]  ;;  %s13259_s1 = smov 32  }
   0xc   :  { %13296 = sst [smem:[#allocation25_spill]] %s13224_s26  ;;  %13302 = vst [vmem:[#allocation12_spill] sm:$0xff] %v10034_v22  ;;  %13303 = vst [vmem:[#allocation13_spill] sm:$0xff] %v10038_v25 }
   0xd   :  { %s13298_s9 = sld [smem:[#allocation14_spill]] }
   0xe   :  { %s13304_s4 = sld [smem:[#allocation15_spill]] }
   0xf   :  { %s13305_s29 = sld [smem:[#allocation16_spill]] }
  0x10   :  { %s13306_s3 = sld [smem:[#allocation17_spill]] }
  0x11   :  { %s13307_s5 = sld [smem:[#allocation18_spill]] }
  0x12   :  { %s13308_s8 = sld [smem:[#allocation19_spill]] }
  0x13   :  { %v334_v9 = vld [vmem:[%s13298_s9] sm:$0xff]  ;;  %s13309_s30 = sld [smem:[#allocation20_spill]] }
  0x14   :  { %v10074_v50 = vld [vmem:[%s13304_s4 + $0x38] sm:$0xff]  ;;  %v10084_v54 = vld [vmem:[%s13304_s4 + $0x30] sm:$0xff]  ;;  %v10096_v59 = vld [vmem:[%s13304_s4 + $0x28] sm:$0xff]  ;;  %s13310_s10 = sld [smem:[#allocation21_spill]] }
  0x15   :  { %9148 = vmatpush3.msra.mxu1 %v10074_v50  ;;  %v10106_v0 = vld [vmem:[%s13304_s4 + $0x20] sm:$0xff]  ;;  %s13311_s7 = sld [smem:[#allocation22_spill]] }
  0x16   :  { %9149 = vmatprep.subr.mxu1 %v13250_v13 }
  0x17   :  { %9150 = vmatpush3.msra.mxu1 %v10084_v54 }
  0x18   :  { %9151 = vmatprep.subr.mxu1 %v13250_v13 }
  0x19   :  { %9152 = vmatpush3.msra.mxu1 %v10096_v59 }
  0x1a   :  { %9153 = vmatprep.subr.mxu1 %v13250_v13 }
  0x1b   :  { %9154 = vmatpush3.msra.mxu1 %v10106_v0 }
  0x1c   :  { %9155 = vmatprep.subr.mxu1 %v13250_v13 }
  0x8b   :  { %v325_v2 = vpop.xlane.xlu0 %324 }
  0x8c   :  { %v326_v3 = vsub.f32 -1e+37, %v325_v2 }
  0x8e   :  { %v327_v4 = vmul.f32 1.442695, %v326_v3 }
  0x90   :  { %9568 = vpow2.f32 %v327_v4 }
  0x9d   :  { %v9569_v5 = vpop.eup %9568 }
  0x9e   :  { %v329_v6 = vsel %vm290_vm0, %v9569_v5, 0.0 }
  0x9f   :  { %330 = vadd.xlane.f32.xlu0 %v329_v6 }
 0x128   :  { %v331_v7 = vpop.xlane.xlu0 %330 }
 0x129   :  { %9570 = vrcp.f32 %v331_v7  ;;  %v10124_v7 = vld [vmem:[%s13304_s4 + $0x10] sm:$0xff] }
 0x136   :  { %v9571_v8 = vpop.eup %9570 }
 0x137   :  { %v333_v10 = vmul.f32 %v9571_v8, %v9569_v5  ;;  %v10116_v5 = vld [vmem:[%s13304_s4 + $0x18] sm:$0xff] }
 0x138   :  { %9156 = vmatpush3.msra.mxu1 %v10116_v5 }
 0x139   :  { %v335_v11 = vmul.f32 %v334_v9, %v333_v10  ;;  %9157 = vmatprep.subr.mxu1 %v13250_v13  ;;  %v10128_v9 = vld [vmem:[#allocation3 + $0x30] sm:$0xff] }
 0x13a   :  { %9158 = vmatpush3.msra.mxu1 %v10124_v7 }
 0x13b   :  { %v336_v12 = vsub.f32 %v333_v10, %v335_v11  ;;  %9159 = vmatprep.subr.mxu1 %v13250_v13 }
 0x13d   :  { %369 = vxpose.xlu1.b32.start.end [1/1] (short) (narrow) %v336_v12, 8  ;;  %v10136_v12 = vld [vmem:[%s13304_s4 + $0x8] sm:$0xff] }
 0x13e   :  { %9160 = vmatpush3.msra.mxu1 %v10136_v12 }
 0x13f   :  { %9161 = vmatprep.subr.mxu1 %v13250_v13 }
 0x1b9   :  { %v385_v18 = vpop.trf.xlu1 }
 0x1ba   :  { %v498_v19 = vrot.slane %v385_v18, %v10026_v16  ;;  %v491_v20 = vrot.slane %v385_v18, %v10028_v17  ;;  %v505_v23 = vrot.slane %v385_v18, %v10032_v21  ;;  %v519_v24 = vrot.slane %v385_v18, %v10034_v22 }
 0x1bb   :  { %v512_v27 = vrot.slane %v385_v18, %v10038_v25  ;;  %v533_v28 = vrot.slane %v385_v18, %v10040_v26  ;;  %v526_v30 = vrot.slane %v385_v18, %v10044_v29  ;;  %v540_v32 = vrot.slane %v385_v18, %v10047_v31  ;;  %v10140_v18 = vld [vmem:[#allocation3 + $0x38] sm:$0xff] }
 0x1bc   :  { %500 = vbcast.lane.b32.xlu0 %v498_v19, 256  ;;  %493 = vbcast.lane.b32.xlu1 %v491_v20, 256  ;;  %v10146_v20 = vld [vmem:[%s13304_s4] sm:$0xff] }
 0x1bd   :  { %9162 = vmatpush3.msra.mxu1 %v10146_v20 }
 0x1be   :  { %9166 = vmatprep.subr.mxu1 %v13250_v13 }
 0x1c0   :  { %507 = vbcast.lane.b32.xlu0 %v505_v23, 256  ;;  %521 = vbcast.lane.b32.xlu1 %v519_v24, 256 }
 0x1c4   :  { %514 = vbcast.lane.b32.xlu0 %v512_v27, 256  ;;  %535 = vbcast.lane.b32.xlu1 %v533_v28, 256  ;;  %v98_v28 = vld [vmem:[%s13305_s29 + $0x18] sm:$0xff] }
 0x1c5   :  { %9127 = vmatprep.subr.mxu0 %v98_v28 }
 0x1c6   :  { %9128 = vmatpush3.msra.mxu0 %v98_v28 }
 0x1c8   :  { %528 = vbcast.lane.b32.xlu0 %v526_v30, 256  ;;  %v97_v30 = vld [vmem:[%s13305_s29 + $0x10] sm:$0xff] }
 0x1c9   :  { %9129 = vmatprep.subr.mxu0 %v97_v30 }
 0x1ca   :  { %9130 = vmatpush3.msra.mxu0 %v97_v30 }
 0x1cc   :  { %542 = vbcast.lane.b32.xlu0 %v540_v32, 256 }
 0x1ed   :  { %337 = vxpose.xlu1.b32.start.end [1/1] (short) (narrow) %v335_v11, 8 }
 0x22e   :  { %v494_v33 = vpop.permute.xlu1 %493  ;;  %v501_v35 = vpop.permute.xlu0 %500 }
 0x22f   :  { %v545_v44 = vmul.f32 %v501_v35, %v10056_v40  ;;  %v544_v45 = vmul.f32 %v494_v33, %v10058_v41  ;;  %v87_v33 = vld [vmem:[%s13306_s3] sm:$0xff] }
 0x230   :  { %9135 = vmatprep.mubr.msk.f32.mxu0 %vm106_vm1, %v87_v33 }
 0x231   :  { %v553_v51 = vsel %vm106_vm1, %v545_v44, 0.0  ;;  %v552_v52 = vsel %vm106_vm1, %v544_v45, 0.0  ;;  %v88_v44 = vld [vmem:[%s13306_s3 + $0x8] sm:$0xff] }
 0x232   :  { %v522_v34 = vpop.permute.xlu1 %521  ;;  %v508_v38 = vpop.permute.xlu0 %507  ;;  %v554_v56 = vadd.f32 %v553_v51, %v552_v52 }
 0x233   :  { %v546_v48 = vmul.f32 %v508_v38, %v10060_v42  ;;  %v548_v2 = vmul.f32 %v522_v34, %v10088_v57  ;;  %v96_v34 = vld [vmem:[%s13305_s29 + $0x8] sm:$0xff] }
 0x234   :  { %9131 = vmatprep.subr.mxu0 %v96_v34 }
 0x235   :  { %v555_v55 = vsel %vm106_vm1, %v546_v48, 0.0  ;;  %v559_v8 = vsel %vm106_vm1, %v548_v2, 0.0  ;;  %9132 = vmatpush3.msra.mxu0 %v96_v34 }
 0x236   :  { %v10050_v36 = vpop.permute.xlu1 %535  ;;  %v515_v47 = vpop.permute.xlu0 %514  ;;  %v556_v61 = vadd.f32 %v555_v55, %v554_v56 }
 0x237   :  { %v547_v53 = vmul.f32 %v515_v47, %v10066_v46  ;;  %v550_v23 = vmul.f32 %v10050_v36, %v10128_v9 }
 0x239   :  { %v557_v60 = vsel %vm106_vm1, %v547_v53, 0.0  ;;  %v563_v35 = vsel %vm106_vm1, %v550_v23, 0.0 }
 0x23a   :  { %v529_v63 = vpop.permute.xlu0 %528  ;;  %v558_v3 = vadd.f32 %v557_v60, %v556_v61 }
 0x23b   :  { %v549_v6 = vmul.f32 %v529_v63, %v10100_v62 }
 0x23c   :  { %v560_v10 = vadd.f32 %v559_v8, %v558_v3 }
 0x23d   :  { %v561_v15 = vsel %vm106_vm1, %v549_v6, 0.0 }
 0x23e   :  { %v543_v19 = vpop.permute.xlu0 %542  ;;  %v562_v24 = vadd.f32 %v561_v15, %v560_v10 }
 0x23f   :  { %v551_v32 = vmul.f32 %v543_v19, %v10140_v18 }
 0x240   :  { %v564_v38 = vadd.f32 %v563_v35, %v562_v24 }
 0x269   :  { %v10052_v37 = vpop.trf.xlu1 }
 0x26a   :  { %v412_v39 = vrot.slane %v10052_v37, %v10028_v17  ;;  %v419_v43 = vrot.slane %v10052_v37, %v10026_v16  ;;  %v426_v49 = vrot.slane %v10052_v37, %v10032_v21  ;;  %v433_v58 = vrot.slane %v10052_v37, %v10038_v25 }
 0x26b   :  { %v440_v4 = vrot.slane %v10052_v37, %v10034_v22  ;;  %v447_v11 = vrot.slane %v10052_v37, %v10044_v29  ;;  %v454_v27 = vrot.slane %v10052_v37, %v10040_v26  ;;  %v461_v36 = vrot.slane %v10052_v37, %v10047_v31 }
 0x26c   :  { %414 = vbcast.lane.b32.xlu0 %v412_v39, 256  ;;  %v95_v39 = vld [vmem:[%s13305_s29] sm:$0xff] }
 0x26d   :  { %9133 = vmatprep.subr.mxu0 %v95_v39 }
 0x26e   :  { %9134 = vmatpush3.msra.mxu0 %v95_v39  ;;  %v90_v39 = vld [vmem:[%s13306_s3 + $0x18] sm:$0xff] }
 0x26f   :  { %9136 = vmatmul.mubr.msk.f32.vlgmr.msra.gmra.mxu0 %vm106_vm1, %v88_v44  ;;  %v10230_v44 = vld [vmem:[%s13307_s5 + $0x78] sm:$0xff] }
 0x270   :  { %421 = vbcast.lane.b32.xlu0 %v419_v43, 256  ;;  %v565_v43 = vsel %vm106_vm1, %v551_v32, 0.0  ;;  %681 = vmatprep.subr.mxu0 %v10230_v44 }
 0x271   :  { %v566_v45 = vadd.f32 %v565_v43, %v564_v38  ;;  %v89_v38 = vld [vmem:[%s13306_s3 + $0x10] sm:$0xff]  ;;  %v91_v43 = vld [vmem:[%s13306_s3 + $0x20] sm:$0xff] }
 0x272   :  { %9138 = vmatprep.mubr.msk.f32.mxu0 %vm106_vm1, %v89_v38 }
 0x273   :  { %9139 = vmatmul.mubr.msk.f32.gmra.mxu0 %vm106_vm1, %v90_v39 }
 0x274   :  { %428 = vbcast.lane.b32.xlu0 %v426_v49, 256  ;;  %9141 = vmatprep.mubr.msk.f32.mxu0 %vm106_vm1, %v91_v43 }
 0x278   :  { %435 = vbcast.lane.b32.xlu0 %v433_v58, 256 }
 0x27c   :  { %442 = vbcast.lane.b32.xlu0 %v440_v4, 256 }
 0x280   :  { %449 = vbcast.lane.b32.xlu0 %v447_v11, 256 }
 0x284   :  { %456 = vbcast.lane.b32.xlu0 %v454_v27, 256 }
 0x288   :  { %463 = vbcast.lane.b32.xlu0 %v461_v36, 256 }
 0x28c   :  { %568 = vrot.lane.b32.xlu0 %v566_v45, %s13259_s1  ;;  %v10235_v45 = vld [vmem:[%s13307_s5 + $0x70] sm:$0xff] }
 0x28d   :  { %682 = vmatpush1.msra.mxu0 %v10235_v45 }
 0x2de   :  { %v415_v37 = vpop.permute.xlu0 %414 }
 0x2df   :  { %v465_v52 = vmul.f32 %v415_v37, %v10058_v41  ;;  %v10242_v37 = vld [vmem:[%s13307_s5 + $0x68] sm:$0xff] }
 0x2e0   :  { %683 = vmatprep.subr.mxu0 %v10242_v37 }
 0x2e1   :  { %v473_v60 = vsel %vm106_vm1, %v465_v52, 0.0  ;;  %v10270_v52 = vld [vmem:[%s13307_s5 + $0x48] sm:$0xff] }
 0x2e2   :  { %v422_v47 = vpop.permute.xlu0 %421 }
 0x2e3   :  { %v466_v51 = vmul.f32 %v422_v47, %v10056_v40  ;;  %v10248_v47 = vld [vmem:[%s13307_s5 + $0x60] sm:$0xff] }
 0x2e4   :  { %684 = vmatpush1.msra.mxu0 %v10248_v47 }
 0x2e5   :  { %v474_v56 = vsel %vm106_vm1, %v466_v51, 0.0  ;;  %v10264_v51 = vld [vmem:[%s13307_s5 + $0x50] sm:$0xff] }
 0x2e6   :  { %v429_v48 = vpop.permute.xlu0 %428  ;;  %v475_v2 = vadd.f32 %v474_v56, %v473_v60  ;;  %v10283_v56 = vld [vmem:[%s13307_s5 + $0x40] sm:$0xff]  ;;  %v94_v60 = vld [vmem:[%s13306_s3 + $0x38] sm:$0xff] }
 0x2e7   :  { %v467_v53 = vmul.f32 %v429_v48, %v10060_v42  ;;  %v10254_v48 = vld [vmem:[%s13307_s5 + $0x58] sm:$0xff] }
 0x2e8   :  { %685 = vmatprep.subr.mxu0 %v10254_v48 }
 0x2e9   :  { %v476_v61 = vsel %vm106_vm1, %v467_v53, 0.0  ;;  %v93_v53 = vld [vmem:[%s13306_s3 + $0x30] sm:$0xff]  ;;  %686 = vmatpush1.msra.mxu0 %v10264_v51 }
 0x2ea   :  { %v436_v49 = vpop.permute.xlu0 %435  ;;  %v477_v41 = vadd.f32 %v476_v61, %v475_v2  ;;  %687 = vmatprep.subr.mxu0 %v10270_v52 }
 0x2eb   :  { %v468_v58 = vmul.f32 %v436_v49, %v10066_v46  ;;  %v92_v49 = vld [vmem:[%s13306_s3 + $0x28] sm:$0xff]  ;;  %688 = vmatpush1.msra.mxu0 %v10283_v56 }
 0x2ec   :  { %9142 = vmatmul.mubr.msk.f32.gmra.mxu0 %vm106_vm1, %v92_v49 }
 0x2ed   :  { %v478_v4 = vsel %vm106_vm1, %v468_v58, 0.0  ;;  %v10289_v58 = vld [vmem:[%s13307_s5 + $0x38] sm:$0xff]  ;;  %9144 = vmatprep.mubr.msk.f32.mxu0 %vm106_vm1, %v93_v53 }
 0x2ee   :  { %v443_v55 = vpop.permute.xlu0 %442  ;;  %v479_v10 = vadd.f32 %v478_v4, %v477_v41  ;;  %689 = vmatprep.subr.mxu0 %v10289_v58 }
 0x2ef   :  { %v469_v63 = vmul.f32 %v443_v55, %v10088_v57  ;;  %v8763_v55 = vld [vmem:[%s13308_s8] ss:$0 sm:$0xff]  ;;  %s13319_s8 = smov 32  }
 0x2f0   :  { %9145 = vmatmul.mubr.msk.f32.gmra.mxu0 %vm106_vm1, %v94_v60 }
 0x2f1   :  { %v480_v8 = vsel %vm106_vm1, %v469_v63, 0.0  ;;  %v10299_v63 = vld [vmem:[%s13307_s5 + $0x30] sm:$0xff]  ;;  %729 = vmatprep.mubr.f32.mxu0 %v13250_v13 }
 0x2f2   :  { %v450_v3 = vpop.permute.xlu0 %449  ;;  %v481_v23 = vadd.f32 %v480_v8, %v479_v10  ;;  %690 = vmatpush1.msra.mxu0 %v10299_v63  ;;  %v10318_v10 = vld [vmem:[%s13307_s5 + $0x18] sm:$0xff] }
 0x2f3   :  { %v470_v6 = vmul.f32 %v450_v3, %v10100_v62  ;;  %v10305_v3 = vld [vmem:[%s13307_s5 + $0x28] sm:$0xff] }
 0x2f4   :  { %691 = vmatprep.subr.mxu0 %v10305_v3 }
 0x2f5   :  { %v482_v15 = vsel %vm106_vm1, %v470_v6, 0.0  ;;  %v10312_v6 = vld [vmem:[%s13307_s5 + $0x20] sm:$0xff] }
 0x2f6   :  { %v457_v11 = vpop.permute.xlu0 %456  ;;  %v483_v27 = vadd.f32 %v482_v15, %v481_v23  ;;  %692 = vmatpush1.msra.mxu0 %v10312_v6  ;;  %v10341_v23 = vld [vmem:[%s13307_s5] sm:$0xff] }
 0x2f7   :  { %v471_v19 = vmul.f32 %v457_v11, %v10128_v9  ;;  %v10325_v11 = vld [vmem:[%s13307_s5 + $0x10] sm:$0xff]  ;;  %693 = vmatprep.subr.mxu0 %v10318_v10 }
 0x2f8   :  { %694 = vmatpush1.msra.mxu0 %v10325_v11 }
 0x2f9   :  { %v484_v24 = vsel %vm106_vm1, %v471_v19, 0.0  ;;  %v10332_v19 = vld [vmem:[%s13307_s5 + $0x8] sm:$0xff] }
 0x2fa   :  { %v464_v28 = vpop.permute.xlu0 %463  ;;  %v485_v32 = vadd.f32 %v484_v24, %v483_v27  ;;  %695 = vmatprep.subr.mxu0 %v10332_v19 }
 0x2fb   :  { %v472_v30 = vmul.f32 %v464_v28, %v10140_v18  ;;  %696 = vmatpush1.msra.mxu0 %v10341_v23 }
 0x2fc   :  { %1165 = vmatprep.subr.mxu0 %v10230_v44 }
 0x2fd   :  { %v486_v33 = vsel %vm106_vm1, %v472_v30, 0.0 }
 0x2fe   :  { %v487_v34 = vadd.f32 %v486_v33, %v485_v32  ;;  %v569_v35 = vpop.permute.xlu0 %568 }
 0x300   :  { %v571_v36 = vsel %vm106_vm1, %v487_v34, %v569_v35 }
 0x301   :  { %9164 = vmatmul.mubr.msk.f32.vlgmr.msra.gmra.mxu1 %vm572_vm3, %v571_v36 }
 0x302   :  { %9167 = vmatpush3.msra.mxu1 %v10074_v50  ;;  %9182 = vmatprep.mubr.msk.f32.mxu1 %vm9837_vm2, %v13250_v13 }
 0x303   :  { %9168 = vmatprep.subr.mxu1 %v13250_v13 }
 0x304   :  { %9169 = vmatpush3.msra.mxu1 %v10084_v54 }
 0x305   :  { %9170 = vmatprep.subr.mxu1 %v13250_v13 }
 0x306   :  { %9171 = vmatpush3.msra.mxu1 %v10096_v59 }
 0x307   :  { %9172 = vmatprep.subr.mxu1 %v13250_v13 }
 0x308   :  { %9173 = vmatpush3.msra.mxu1 %v10106_v0 }
 0x309   :  { %9174 = vmatprep.subr.mxu1 %v13250_v13 }
 0x30a   :  { %9175 = vmatpush3.msra.mxu1 %v10116_v5 }
 0x30b   :  { %9176 = vmatprep.subr.mxu1 %v13250_v13 }
 0x30c   :  { %9177 = vmatpush3.msra.mxu1 %v10124_v7 }
 0x30d   :  { %9178 = vmatprep.subr.mxu1 %v13250_v13 }
 0x30e   :  { %9179 = vmatpush3.msra.mxu1 %v10136_v12 }
 0x30f   :  { %9180 = vmatprep.subr.mxu1 %v13250_v13 }
 0x310   :  { %9181 = vmatpush3.msra.mxu1 %v10146_v20 }
 0x311   :  { %9185 = vmatprep.subr.mxu1 %v13250_v13 }
 0x32f   :  { %v9137_v61 = vpop.f32.mrf.mxu0 }
 0x330   :  { %v203_v2 = vadd.f32 %v9137_v61, %v8763_v55 }
 0x331   :  { %v197_v4 = vpop.f32.mrf.mxu0 }
 0x332   :  { %v237_v41 = vmax.f32 %v203_v2, 0.0  ;;  %v198_v8 = vadd.f32 %v8763_v55, %v197_v4 }
 0x333   :  { %v9140_v28 = vpop.f32.mrf.mxu0 }
 0x334   :  { %245 = vst.msk [vmem:[#allocation2 + $0x8] sm:$0xff] %vm106_vm1, %v237_v41  ;;  %v236_v15 = vmax.f32 %v198_v8, 0.0  ;;  %v213_v30 = vadd.f32 %v9140_v28, %v8763_v55 }
 0x335   :  { %v207_v32 = vpop.f32.mrf.mxu0 }
 0x336   :  { %244 = vst.msk [vmem:[#allocation2] sm:$0xff] %vm106_vm1, %v236_v15  ;;  %v239_v33 = vmax.f32 %v213_v30, 0.0  ;;  %v208_v34 = vadd.f32 %v8763_v55, %v207_v32 }
 0x338   :  { %247 = vst.msk [vmem:[#allocation2 + $0x18] sm:$0xff] %vm106_vm1, %v239_v33  ;;  %v238_v36 = vmax.f32 %v208_v34, 0.0 }
 0x33a   :  { %246 = vst.msk [vmem:[#allocation2 + $0x10] sm:$0xff] %vm106_vm1, %v238_v36 }
 0x3ac   :  { %v9143_v35 = vpop.f32.mrf.mxu0 }
 0x3ad   :  { %v223_v38 = vadd.f32 %v9143_v35, %v8763_v55 }
 0x3ae   :  { %v217_v39 = vpop.f32.mrf.mxu0 }
 0x3af   :  { %v241_v43 = vmax.f32 %v223_v38, 0.0  ;;  %v218_v49 = vadd.f32 %v8763_v55, %v217_v39 }
 0x3b0   :  { %v9146_v53 = vpop.f32.mrf.mxu0 }
 0x3b1   :  { %249 = vst.msk [vmem:[#allocation2 + $0x28] sm:$0xff] %vm106_vm1, %v241_v43  ;;  %v240_v60 = vmax.f32 %v218_v49, 0.0  ;;  %v233_v61 = vadd.f32 %v9146_v53, %v8763_v55 }
 0x3b2   :  { %v227_v2 = vpop.f32.mrf.mxu0 }
 0x3b3   :  { %248 = vst.msk [vmem:[#allocation2 + $0x20] sm:$0xff] %vm106_vm1, %v240_v60  ;;  %v243_v4 = vmax.f32 %v233_v61, 0.0  ;;  %v228_v41 = vadd.f32 %v8763_v55, %v227_v2  ;;  %v281_v55 = vld [vmem:[%s13309_s30] sm:$0x3]  ;;  %s13312_s30 = sld [smem:[#allocation23_spill]] }
 0x3b4   :  { %v10375_v28 = vrot.slane %v281_v55, %v10026_v16  ;;  %v10380_v34 = vrot.slane %v281_v55, %v10028_v17  ;;  %v8777_v55 = vld [vmem:[%s13310_s10] ss:$0 sm:$0xff]  ;;  %s13313_s10 = sld [smem:[#allocation24_spill]] }
 0x3b5   :  { %251 = vst.msk [vmem:[#allocation2 + $0x38] sm:$0xff] %vm106_vm1, %v243_v4  ;;  %v242_v8 = vmax.f32 %v228_v41, 0.0 }
 0x3b7   :  { %250 = vst.msk [vmem:[#allocation2 + $0x30] sm:$0xff] %vm106_vm1, %v242_v8 }
 0x3c1   :  { %v642_v24 = vpop.f32.mrf.mxu1 }
 0x3c2   :  { %647 = vrot.lane.b32.xlu0 %v642_v24, %s13259_s1  ;;  %v292_v24 = vld [vmem:[#allocation2] sm:$0xff] }
 0x3c3   :  { %v9165_v27 = vpop.f32.mrf.mxu1 }
 0x434   :  { %v648_v15 = vpop.permute.xlu0 %647 }
 0x435   :  { %v650_v27 = vsel %vm106_vm1, %v292_v24, %v648_v15 }
 0x436   :  { %8775 = vmatmul.mubr.msk.f32.vlgmr.msra.gmra.mxu0 %vm572_vm3, %v650_v27 }
 0x437   :  { %1166 = vmatpush1.msra.mxu0 %v10235_v45  ;;  %1213 = vmatprep.mubr.f32.mxu0 %v13250_v13 }
 0x438   :  { %1167 = vmatprep.subr.mxu0 %v10242_v37 }
 0x439   :  { %1168 = vmatpush1.msra.mxu0 %v10248_v47 }
 0x43a   :  { %1169 = vmatprep.subr.mxu0 %v10254_v48 }
 0x43b   :  { %1170 = vmatpush1.msra.mxu0 %v10264_v51 }
 0x43c   :  { %1171 = vmatprep.subr.mxu0 %v10270_v52 }
 0x43d   :  { %1172 = vmatpush1.msra.mxu0 %v10283_v56 }
 0x43e   :  { %1173 = vmatprep.subr.mxu0 %v10289_v58 }
 0x43f   :  { %1174 = vmatpush1.msra.mxu0 %v10299_v63 }
 0x440   :  { %1175 = vmatprep.subr.mxu0 %v10305_v3 }
 0x441   :  { %1176 = vmatpush1.msra.mxu0 %v10312_v6 }
 0x442   :  { %1177 = vmatprep.subr.mxu0 %v10318_v10 }
 0x443   :  { %1178 = vmatpush1.msra.mxu0 %v10325_v11 }
 0x444   :  { %1179 = vmatprep.subr.mxu0 %v10332_v19 }
 0x445   :  { %1180 = vmatpush1.msra.mxu0 %v10341_v23 }
 0x446   :  { %1643 = vmatprep.subr.mxu0 %v10230_v44 }
 0x4f6   :  { %v731_v30 = vpop.f32.mrf.mxu0 }
 0x4f7   :  { %v732_v35 = vadd.f32 %v731_v30, %v10380_v34 }
 0x4f8   :  { %v733_v32 = vpop.f32.mrf.mxu0 }
 0x4f9   :  { %v734_v33 = vadd.f32 %v733_v32, %v10375_v28  ;;  %v8776_v36 = vmul.f32 -1.442695, %v732_v35 }
 0x4fb   :  { %743 = vrot.lane.b32.xlu1 %v734_v33, %s9839_s28  ;;  %9572 = vpow2.f32 %v8776_v36 }
 0x508   :  { %v9573_v38 = vpop.eup %9572 }
 0x509   :  { %v739_v39 = vadd.f32 1.0, %v9573_v38 }
 0x50b   :  { %9574 = vrcp.f32 %v739_v39 }
 0x518   :  { %v9575_v43 = vpop.eup %9574 }
 0x519   :  { %v749_v8 = vsub.f32 1.0, %v9575_v43  ;;  %v755_v32 = vmul.f32 %v9575_v43, %v648_v15 }
 0x56d   :  { %v744_v49 = vpop.permute.xlu1 %743 }
 0x56e   :  { %v746_v53 = vmul.f32 %v9575_v43, %v744_v49 }
 0x570   :  { %v747_v60 = vadd.f32 %v746_v53, %v734_v33  ;;  %v10401_v53 = vld [vmem:[%s13312_s30] ss:$0 sm:$0xff] }
 0x572   :  { %9576 = vtanh.f32 %v747_v60  ;;  %v10403_v60 = vld [vmem:[#allocation2 + $0x8] sm:$0xff] }
 0x573   :  { %v799_v15 = vmul.f32 %v10401_v53, %v10403_v60 }
 0x57f   :  { %v9577_v61 = vpop.eup %9576 }
 0x580   :  { %751 = vrot.lane.b32.xlu0 %v9577_v61, %s13259_s1  ;;  %v13249_v61 = vmov 0  }
 0x581   :  { %9566 = vset.pattern.permute.xlu0 %v13249_v61 }
 0x584   :  { %763 = vrot.lane.b32.xlu0 %v292_v24, %s9839_s28  ;;  %v33_v24 = vstv %s13311_s7  ;;  %s13314_s7 = sld [smem:[#allocation25_spill]] }
 0x585   :  { %34 = vst [vmem:[#allocation6] sm:$0x1] %v33_v24 }
 0x58a   :  { %796 = vst.msk [vmem:[%s13314_s7] sm:$0xff] %vm290_vm0, %v13250_v13 }
 0x5f2   :  { %v752_v2 = vpop.permute.xlu0 %751 }
 0x5f3   :  { %v754_v27 = vmul.f32 %v752_v2, %v749_v8 }
 0x5f5   :  { %v756_v33 = vadd.f32 %v755_v32, %v754_v27  ;;  %v10419_v32 = vand.u32 127, %v252_v14 }
 0x5f6   :  { %v764_v4 = vpop.permute.xlu0 %763 }
 0x5f7   :  { %v766_v41 = vmul.f32 %v9575_v43, %v764_v4  ;;  %v800_v43 = vsel %vm106_vm1, %v799_v15, 0.0  ;;  %vm816_vm5 = vcmp.lt.s32.totalorder %v10419_v32, 1  ;;  %vm1294_vm7 = vcmp.lt.s32.totalorder %v10419_v32, 2 }
 0x5f8   :  { %vm1772_vm9 = vcmp.lt.s32.totalorder %v10419_v32, 3  ;;  %vm2250_vm11 = vcmp.lt.s32.totalorder %v10419_v32, 4  ;;  %vm2728_vm13 = vcmp.lt.s32.totalorder %v10419_v32, 5  ;;  %vm13270_vm15 = vcmp.lt.s32.totalorder %v10419_v32, 6 }
 0x5f9   :  { %768 = vrot.lane.b32.xlu0 %v766_v41, %s9840_s0  ;;  %v10410_v41 = vld [vmem:[#allocation6] ss:$0 sm:$0xff] }
 0x5fd   :  { %758 = vrot.lane.b32.xlu0 %v754_v27, %s9840_s0 }
 0x601   :  { %782 = vrot.lane.b32.xlu0 %v8777_v55, %s13259_s1 }
 0x66b   :  { %v769_v30 = vpop.permute.xlu0 %768 }
 0x66f   :  { %v759_v35 = vpop.permute.xlu0 %758 }
 0x670   :  { %v761_v36 = vadd.f32 %v759_v35, %v756_v33 }
 0x672   :  { %v771_v38 = vadd.f32 %v769_v30, %v761_v36  ;;  %v8778_v30 = vld [vmem:[%s13313_s10 + $0x8] sm:$0xff] }
 0x673   :  { %v10394_v39 = vpop.permute.xlu0 %782  ;;  %v813_v24 = vsub.f32 1.0, %v8778_v30 }
 0x674   :  { %v785_v49 = vmul.f32 %v10394_v39, %v771_v38 }
 0x675   :  { %v814_v33 = vmul.f32 1e+30, %v813_v24 }
 0x676   :  { %787 = vrot.lane.b32.xlu0 %v785_v49, %s9839_s28 }
 0x695   :  { %801 = vadd.xlane.f32.xlu0 %v800_v43 }
 0x6e8   :  { %v788_v2 = vpop.permute.xlu0 %787 }
 0x6e9   :  { %v790_v4 = vsel %vm106_vm1, %v788_v2, 0.0 }
 0x6ea   :  { %791 = vadd.xlane.f32.xlu1 %v790_v4 }
 0x71e   :  { %v802_v8 = vpop.xlane.xlu0 %801 }
 0x71f   :  { %v803_v27 = vadd.f32 %v10410_v41, %v802_v8 }
 0x721   :  { %807 = vperm.xlu0 %9566, %v803_v27  }
 0x725   :  { %773 = vrot.lane.b32.xlu0 %v771_v38, %s9839_s28 }
 0x773   :  { %v792_v55 = vpop.xlane.xlu1 %791 }
 0x774   :  { %794 = vst.msk [vmem:[#allocation5] sm:$0xff] %vm793_vm4, %v792_v55 }
 0x77b   :  { %v804_v35 = vld [vmem:[#allocation5] sm:$0xff] }
 0x79c   :  { %v808_v36 = vpop.permute.xlu0 %807 }
 0x79d   :  { %v810_v49 = vadd.f32 %v808_v36, %v804_v35 }
 0x79f   :  { %v815_v15 = vsub.f32 %v810_v49, %v814_v33  ;;  %v8779_v33 = vld [vmem:[%s13298_s9 + $0x8] sm:$0xff] }
 0x7a0   :  { %v774_v38 = vpop.permute.xlu0 %773 }
 0x7a1   :  { %776 = vst.msk [vmem:[#allocation3] sm:$0xff] %vm106_vm1, %v774_v38  ;;  %v817_v43 = vsel %vm816_vm5, %v815_v15, -1e+37 }
 0x7a2   :  { %v818_v2 = vsel %vm290_vm0, %v817_v43, -inf }
 0x7a3   :  { %819 = vmax.xlane.f32.xlu1 %v818_v2 }
 0x82c   :  { %v820_v4 = vpop.xlane.xlu1 %819 }
 0x82d   :  { %v821_v8 = vsub.f32 %v817_v43, %v820_v4 }
 0x82f   :  { %v822_v14 = vmul.f32 1.442695, %v821_v8 }
 0x831   :  { %9578 = vpow2.f32 %v822_v14 }
 0x83e   :  { %v9579_v27 = vpop.eup %9578 }
 0x83f   :  { %v824_v55 = vsel %vm290_vm0, %v9579_v27, 0.0 }
 0x840   :  { %825 = vadd.xlane.f32.xlu1 %v824_v55 }
 0x8c9   :  { %v826_v30 = vpop.xlane.xlu1 %825 }
 0x8ca   :  { %9580 = vrcp.f32 %v826_v30 }
 0x8d7   :  { %v9581_v24 = vpop.eup %9580 }
 0x8d8   :  { %v828_v35 = vmul.f32 %v9581_v24, %v9579_v27 }
 0x8da   :  { %v831_v36 = vmul.f32 %v8779_v33, %v828_v35  ;;  %v1272_v49 = vsel %vm816_vm5, %v828_v35, 0.0 }
 0x8db   :  { %8783 = vst.msk [vmem:[%s13314_s7 + $0x8] sm:$0xff] %vm290_vm0, %v1272_v49 }
 0x8dc   :  { %v832_v15 = vsub.f32 %v828_v35, %v831_v36 }
 0x8de   :  { %865 = vxpose.xlu1.b32.start.end [1/1] (short) (narrow) %v832_v15, 8 }
 0x95a   :  { %v881_v38 = vpop.trf.xlu1 }
 0x95b   :  { %v1022_v43 = vrot.slane %v881_v38, %v10044_v29  ;;  %v987_v2 = vrot.slane %v881_v38, %v10028_v17  ;;  %v994_v4 = vrot.slane %v881_v38, %v10026_v16  ;;  %v1001_v8 = vrot.slane %v881_v38, %v10032_v21 }
 0x95c   :  { %v1008_v14 = vrot.slane %v881_v38, %v10038_v25  ;;  %v1015_v27 = vrot.slane %v881_v38, %v10034_v22  ;;  %v1029_v55 = vrot.slane %v881_v38, %v10040_v26  ;;  %v1036_v30 = vrot.slane %v881_v38, %v10047_v31 }
 0x95d   :  { %1024 = vbcast.lane.b32.xlu1 %v1022_v43, 256  ;;  %989 = vbcast.lane.b32.xlu0 %v987_v2, 256 }
 0x961   :  { %996 = vbcast.lane.b32.xlu0 %v994_v4, 256 }
 0x965   :  { %1003 = vbcast.lane.b32.xlu0 %v1001_v8, 256 }
 0x969   :  { %1010 = vbcast.lane.b32.xlu0 %v1008_v14, 256 }
 0x96d   :  { %1017 = vbcast.lane.b32.xlu0 %v1015_v27, 256 }
 0x971   :  { %1031 = vbcast.lane.b32.xlu0 %v1029_v55, 256  ;;  %v10453_v55 = vld [vmem:[#allocation3] sm:$0xff] }
 0x975   :  { %1038 = vbcast.lane.b32.xlu0 %v1036_v30, 256 }
 0x993   :  { %833 = vxpose.xlu0.b32.start.end [1/1] (short) (narrow) %v831_v36, 8 }
 0x9cf   :  { %v990_v24 = vpop.permute.xlu0 %989 }
 0x9d0   :  { %v1040_v36 = vmul.f32 %v990_v24, %v10453_v55 }
 0x9d3   :  { %v997_v33 = vpop.permute.xlu0 %996 }
 0x9d4   :  { %v1041_v38 = vmul.f32 %v997_v33, %v10056_v40 }
 0x9d6   :  { %v1049_v13 = vsel %vm106_vm1, %v1041_v38, 0.0 }
 0x9d7   :  { %v1004_v35 = vpop.permute.xlu0 %1003 }
 0x9d8   :  { %v1042_v30 = vmul.f32 %v1004_v35, %v10060_v42 }
 0x9db   :  { %v1011_v49 = vpop.permute.xlu0 %1010 }
 0x9dc   :  { %v1043_v1 = vmul.f32 %v1011_v49, %v10066_v46 }
 0x9de   :  { %v1053_v24 = vsel %vm106_vm1, %v1043_v1, 0.0 }
 0x9df   :  { %v1018_v15 = vpop.permute.xlu0 %1017 }
 0x9e0   :  { %v1044_v33 = vmul.f32 %v1018_v15, %v10088_v57 }
 0x9e3   :  { %v1032_v43 = vpop.permute.xlu0 %1031 }
 0x9e7   :  { %v1039_v2 = vpop.permute.xlu0 %1038 }
 0x9e8   :  { %v1047_v1 = vmul.f32 %v1039_v2, %v10140_v18 }
 0xa0f   :  { %v849_v4 = vpop.trf.xlu0 }
 0xa10   :  { %v929_v8 = vrot.slane %v849_v4, %v10038_v25  ;;  %v908_v14 = vrot.slane %v849_v4, %v10028_v17  ;;  %v915_v27 = vrot.slane %v849_v4, %v10026_v16  ;;  %v922_v61 = vrot.slane %v849_v4, %v10032_v21  ;;  %v1025_v16 = vpop.permute.xlu1 %1024 }
 0xa11   :  { %v1055_v21 = vsel %vm106_vm1, %v1044_v33, 0.0  ;;  %v943_v49 = vrot.slane %v849_v4, %v10044_v29  ;;  %v1061_v33 = vsel %vm106_vm1, %v1047_v1, 0.0 }
 0xa12   :  { %931 = vbcast.lane.b32.xlu0 %v929_v8, 256  ;;  %910 = vbcast.lane.b32.xlu1 %v908_v14, 256  ;;  %v1048_v8 = vsel %vm106_vm1, %v1040_v36, 0.0  ;;  %v1051_v14 = vsel %vm106_vm1, %v1042_v30, 0.0  ;;  %v1046_v30 = vmul.f32 %v1032_v43, %v10128_v9 }
 0xa13   :  { %v1050_v25 = vadd.f32 %v1049_v13, %v1048_v8  ;;  %v950_v13 = vrot.slane %v849_v4, %v10040_v26 }
 0xa15   :  { %v1052_v35 = vadd.f32 %v1051_v14, %v1050_v25  ;;  %v1059_v25 = vsel %vm106_vm1, %v1046_v30, 0.0  ;;  %v957_v14 = vrot.slane %v849_v4, %v10047_v31 }
 0xa16   :  { %917 = vbcast.lane.b32.xlu1 %v915_v27, 256  ;;  %v936_v27 = vrot.slane %v849_v4, %v10034_v22 }
 0xa17   :  { %v1054_v38 = vadd.f32 %v1053_v24, %v1052_v35 }
 0xa19   :  { %v1056_v36 = vadd.f32 %v1055_v21, %v1054_v38 }
 0xa1a   :  { %924 = vbcast.lane.b32.xlu1 %v922_v61, 256  ;;  %v1045_v61 = vmul.f32 %v1025_v16, %v10100_v62 }
 0xa1c   :  { %v1057_v15 = vsel %vm106_vm1, %v1045_v61, 0.0 }
 0xa1d   :  { %v1058_v8 = vadd.f32 %v1057_v15, %v1056_v36 }
 0xa1e   :  { %938 = vbcast.lane.b32.xlu1 %v936_v27, 256 }
 0xa1f   :  { %v1060_v27 = vadd.f32 %v1059_v25, %v1058_v8 }
 0xa21   :  { %v1062_v16 = vadd.f32 %v1061_v33, %v1060_v27 }
 0xa22   :  { %945 = vbcast.lane.b32.xlu1 %v943_v49, 256 }
 0xa26   :  { %952 = vbcast.lane.b32.xlu1 %v950_v13, 256 }
 0xa2a   :  { %959 = vbcast.lane.b32.xlu1 %v957_v14, 256 }
 0xa2e   :  { %1064 = vrot.lane.b32.xlu1 %v1062_v16, %s13259_s1 }
 0xa84   :  { %v911_v21 = vpop.permute.xlu1 %910  ;;  %v932_v61 = vpop.permute.xlu0 %931 }
 0xa85   :  { %v961_v35 = vmul.f32 %v911_v21, %v10453_v55  ;;  %v964_v15 = vmul.f32 %v932_v61, %v10066_v46 }
 0xa87   :  { %v969_v4 = vsel %vm106_vm1, %v961_v35, 0.0  ;;  %v974_v25 = vsel %vm106_vm1, %v964_v15, 0.0 }
 0xa88   :  { %v918_v43 = vpop.permute.xlu1 %917 }
 0xa89   :  { %v962_v24 = vmul.f32 %v918_v43, %v10056_v40 }
 0xa8b   :  { %v970_v38 = vsel %vm106_vm1, %v962_v24, 0.0 }
 0xa8c   :  { %v925_v2 = vpop.permute.xlu1 %924  ;;  %v971_v30 = vadd.f32 %v970_v38, %v969_v4  ;;  %v13315_v4 = vmov 0.0  }
 0xa8d   :  { %v963_v49 = vmul.f32 %v925_v2, %v10060_v42  ;;  %4681 = vst.msk [vmem:[%s13231_s27] sm:$0xff] %vm290_vm0, %v13315_v4 }
 0xa8f   :  { %v972_v36 = vsel %vm106_vm1, %v963_v49, 0.0 }
 0xa90   :  { %v939_v13 = vpop.permute.xlu1 %938  ;;  %v973_v1 = vadd.f32 %v972_v36, %v971_v30 }
 0xa91   :  { %v965_v8 = vmul.f32 %v939_v13, %v10088_v57 }
 0xa92   :  { %v975_v33 = vadd.f32 %v974_v25, %v973_v1 }
 0xa93   :  { %v976_v42 = vsel %vm106_vm1, %v965_v8, 0.0 }
 0xa94   :  { %v946_v40 = vpop.permute.xlu1 %945  ;;  %v977_v43 = vadd.f32 %v976_v42, %v975_v33 }
 0xa95   :  { %v966_v14 = vmul.f32 %v946_v40, %v10100_v62 }
 0xa97   :  { %v978_v16 = vsel %vm106_vm1, %v966_v14, 0.0 }
 0xa98   :  { %v953_v27 = vpop.permute.xlu1 %952  ;;  %v979_v46 = vadd.f32 %v978_v16, %v977_v43 }
 0xa99   :  { %v967_v21 = vmul.f32 %v953_v27, %v10128_v9  ;;  %v8784_v27 = vld [vmem:[%s13313_s10 + $0x10] sm:$0xff] }
 0xa9a   :  { %v1291_v16 = vsub.f32 1.0, %v8784_v27 }
 0xa9b   :  { %v980_v24 = vsel %vm106_vm1, %v967_v21, 0.0 }
 0xa9c   :  { %v960_v35 = vpop.permute.xlu1 %959  ;;  %v981_v2 = vadd.f32 %v980_v24, %v979_v46  ;;  %v1292_v21 = vmul.f32 1e+30, %v1291_v16  ;;  %v10588_v16 = vld [vmem:[#allocation3 + $0x20] sm:$0xff] }
 0xa9d   :  { %v968_v57 = vmul.f32 %v960_v35, %v10140_v18 }
 0xa9f   :  { %v982_v38 = vsel %vm106_vm1, %v968_v57, 0.0 }
 0xaa0   :  { %v983_v49 = vadd.f32 %v982_v38, %v981_v2  ;;  %v1065_v62 = vpop.permute.xlu1 %1064 }
 0xaa2   :  { %v1067_v61 = vsel %vm106_vm1, %v983_v49, %v1065_v62 }
 0xaa3   :  { %9183 = vmatmul.mubr.msk.f32.vlgmr.msra.gmra.mxu1 %vm572_vm3, %v1067_v61 }
 0xaa4   :  { %9186 = vmatpush3.msra.mxu1 %v10074_v50  ;;  %9201 = vmatprep.mubr.msk.f32.mxu1 %vm9837_vm2, %v13315_v4 }
 0xaa5   :  { %9187 = vmatprep.subr.mxu1 %v13315_v4 }
 0xaa6   :  { %9188 = vmatpush3.msra.mxu1 %v10084_v54 }
 0xaa7   :  { %9189 = vmatprep.subr.mxu1 %v13315_v4 }
 0xaa8   :  { %9190 = vmatpush3.msra.mxu1 %v10096_v59 }
 0xaa9   :  { %9191 = vmatprep.subr.mxu1 %v13315_v4 }
 0xaaa   :  { %9192 = vmatpush3.msra.mxu1 %v10106_v0 }
 0xaab   :  { %9193 = vmatprep.subr.mxu1 %v13315_v4 }
 0xaac   :  { %9194 = vmatpush3.msra.mxu1 %v10116_v5 }
 0xaad   :  { %9195 = vmatprep.subr.mxu1 %v13315_v4 }
 0xaae   :  { %9196 = vmatpush3.msra.mxu1 %v10124_v7 }
 0xaaf   :  { %9197 = vmatprep.subr.mxu1 %v13315_v4 }
 0xab0   :  { %9198 = vmatpush3.msra.mxu1 %v10136_v12 }
 0xab1   :  { %9199 = vmatprep.subr.mxu1 %v13315_v4 }
 0xab2   :  { %9200 = vmatpush3.msra.mxu1 %v10146_v20 }
 0xab3   :  { %9204 = vmatprep.subr.mxu1 %v13315_v4 }
 0xb63   :  { %v1137_v50 = vpop.f32.mrf.mxu1 }
 0xb64   :  { %1142 = vrot.lane.b32.xlu1 %v1137_v50, %s13259_s1 }
 0xb65   :  { %v9184_v54 = vpop.f32.mrf.mxu1 }
 0xbd6   :  { %v1143_v59 = vpop.permute.xlu1 %1142 }
 0xbd7   :  { %v1145_v0 = vsel %vm106_vm1, %v10403_v60, %v1143_v59 }
 0xbd8   :  { %8781 = vmatmul.mubr.msk.f32.vlgmr.msra.gmra.mxu0 %vm572_vm3, %v1145_v0 }
 0xbd9   :  { %1644 = vmatpush1.msra.mxu0 %v10235_v45  ;;  %1691 = vmatprep.mubr.f32.mxu0 %v13315_v4 }
 0xbda   :  { %1645 = vmatprep.subr.mxu0 %v10242_v37 }
 0xbdb   :  { %1646 = vmatpush1.msra.mxu0 %v10248_v47 }
 0xbdc   :  { %1647 = vmatprep.subr.mxu0 %v10254_v48 }
 0xbdd   :  { %1648 = vmatpush1.msra.mxu0 %v10264_v51 }
 0xbde   :  { %1649 = vmatprep.subr.mxu0 %v10270_v52 }
 0xbdf   :  { %1650 = vmatpush1.msra.mxu0 %v10283_v56 }
 0xbe0   :  { %1651 = vmatprep.subr.mxu0 %v10289_v58 }
 0xbe1   :  { %1652 = vmatpush1.msra.mxu0 %v10299_v63 }
 0xbe2   :  { %1653 = vmatprep.subr.mxu0 %v10305_v3 }
 0xbe3   :  { %1654 = vmatpush1.msra.mxu0 %v10312_v6  ;;  %v10541_v6 = vld [vmem:[#allocation2 + $0x10] sm:$0xff] }
 0xbe4   :  { %1655 = vmatprep.subr.mxu0 %v10318_v10  ;;  %v1277_v10 = vmul.f32 %v10401_v53, %v10541_v6 }
 0xbe5   :  { %1656 = vmatpush1.msra.mxu0 %v10325_v11 }
 0xbe6   :  { %1657 = vmatprep.subr.mxu0 %v10332_v19  ;;  %v1278_v11 = vsel %vm106_vm1, %v1277_v10, 0.0 }
 0xbe7   :  { %1658 = vmatpush1.msra.mxu0 %v10341_v23 }
 0xbe8   :  { %2121 = vmatprep.subr.mxu0 %v10230_v44 }
 0xc98   :  { %v1215_v5 = vpop.f32.mrf.mxu0 }
 0xc99   :  { %v1216_v12 = vadd.f32 %v1215_v5, %v10380_v34 }
 0xc9a   :  { %v1217_v7 = vpop.f32.mrf.mxu0 }
 0xc9b   :  { %v1218_v9 = vadd.f32 %v1217_v7, %v10375_v28  ;;  %v8782_v18 = vmul.f32 -1.442695, %v1216_v12 }
 0xc9d   :  { %1227 = vrot.lane.b32.xlu1 %v1218_v9, %s9839_s28  ;;  %9582 = vpow2.f32 %v8782_v18 }
 0xcaa   :  { %v9583_v20 = vpop.eup %9582 }
 0xcab   :  { %v1223_v45 = vadd.f32 1.0, %v9583_v20  ;;  %v13316_v20 = vld [vmem:[#allocation9_spill] sm:$0xff] }
 0xcad   :  { %9584 = vrcp.f32 %v1223_v45 }
 0xcba   :  { %v9585_v37 = vpop.eup %9584 }
 0xcbb   :  { %v1233_v44 = vsub.f32 1.0, %v9585_v37  ;;  %v1239_v19 = vmul.f32 %v9585_v37, %v1143_v59  ;;  %v8785_v59 = vld [vmem:[%s13298_s9 + $0x10] sm:$0xff] }
 0xd0f   :  { %v1228_v47 = vpop.permute.xlu1 %1227 }
 0xd10   :  { %v1230_v48 = vmul.f32 %v9585_v37, %v1228_v47 }
 0xd12   :  { %v1231_v51 = vadd.f32 %v1230_v48, %v1218_v9  ;;  %v13318_v48 = vld [vmem:[#allocation13_spill] sm:$0xff] }
 0xd14   :  { %9586 = vtanh.f32 %v1231_v51 }
 0xd21   :  { %v9587_v52 = vpop.eup %9586 }
 0xd22   :  { %1235 = vrot.lane.b32.xlu1 %v9587_v52, %s13259_s1 }
 0xd26   :  { %1247 = vrot.lane.b32.xlu1 %v10403_v60, %s9839_s28 }
 0xd94   :  { %v1236_v56 = vpop.permute.xlu1 %1235 }
 0xd95   :  { %v1238_v58 = vmul.f32 %v1236_v56, %v1233_v44 }
 0xd97   :  { %1242 = vrot.lane.b32.xlu1 %v1238_v58, %s9840_s0  ;;  %v1240_v60 = vadd.f32 %v1239_v19, %v1238_v58 }
 0xd98   :  { %v1248_v63 = vpop.permute.xlu1 %1247 }
 0xd99   :  { %v1250_v3 = vmul.f32 %v9585_v37, %v1248_v63  ;;  %v13317_v37 = vld [vmem:[#allocation11_spill] sm:$0xff] }
 0xd9b   :  { %1252 = vrot.lane.b32.xlu0 %v1250_v3, %s9840_s0 }
 0xdba   :  { %1279 = vadd.xlane.f32.xlu0 %v1278_v11 }
 0xe09   :  { %v1243_v23 = vpop.permute.xlu1 %1242 }
 0xe0a   :  { %v1245_v36 = vadd.f32 %v1243_v23, %v1240_v60 }
 0xe0d   :  { %v1253_v30 = vpop.permute.xlu0 %1252 }
 0xe0e   :  { %v1255_v13 = vadd.f32 %v1253_v30, %v1245_v36 }
 0xe10   :  { %v1262_v15 = vmul.f32 %v1255_v13, %v10394_v39 }
 0xe12   :  { %1264 = vrot.lane.b32.xlu1 %v1262_v15, %s9839_s28 }
 0xe43   :  { %v1280_v1 = vpop.xlane.xlu0 %1279 }
 0xe44   :  { %v1281_v8 = vadd.f32 %v10410_v41, %v1280_v1 }
 0xe46   :  { %1285 = vperm.xlu0 %9566, %v1281_v8  }
 0xe4a   :  { %1257 = vrot.lane.b32.xlu0 %v1255_v13, %s9839_s28 }
 0xe84   :  { %v1265_v40 = vpop.permute.xlu1 %1264 }
 0xe85   :  { %v1267_v25 = vsel %vm106_vm1, %v1265_v40, 0.0  ;;  %v1377_v40 = vld [vmem:[#allocation3 + $0x10] sm:$0xff] }
 0xe86   :  { %1268 = vadd.xlane.f32.xlu1 %v1267_v25 }
 0xec1   :  { %v1286_v14 = vpop.permute.xlu0 %1285 }
 0xec5   :  { %v1258_v33 = vpop.permute.xlu0 %1257 }
 0xec6   :  { %1261 = vst.msk [vmem:[#allocation3 + $0x8] sm:$0xff] %vm106_vm1, %v1258_v33  ;;  %v10585_v33 = vld [vmem:[#allocation3 + $0x18] sm:$0xff] }
 0xecd   :  { %v10581_v8 = vld [vmem:[#allocation3 + $0x8] sm:$0xff] }
 0xf0f   :  { %v1269_v42 = vpop.xlane.xlu1 %1268 }
 0xf10   :  { %1271 = vst.msk [vmem:[#allocation5] sm:$0xff] %vm1270_vm6, %v1269_v42 }
 0xf17   :  { %v1282_v43 = vld [vmem:[#allocation5] sm:$0xff] }
 0xf18   :  { %v1288_v24 = vadd.f32 %v1286_v14, %v1282_v43 }
 0xf1a   :  { %v1293_v46 = vsub.f32 %v1288_v24, %v1292_v21 }
 0xf1c   :  { %v1295_v35 = vsel %vm1294_vm7, %v1293_v46, -1e+37  ;;  %v10593_v46 = vld [vmem:[#allocation3 + $0x28] sm:$0xff] }
 0xf1d   :  { %v1296_v57 = vsel %vm290_vm0, %v1295_v35, -inf }
 0xf1e   :  { %1297 = vmax.xlane.f32.xlu1 %v1296_v57 }
 0xfa7   :  { %v1298_v2 = vpop.xlane.xlu1 %1297 }
 0xfa8   :  { %v1299_v38 = vsub.f32 %v1295_v35, %v1298_v2 }
 0xfaa   :  { %v1300_v49 = vmul.f32 1.442695, %v1299_v38 }
 0xfac   :  { %9588 = vpow2.f32 %v1300_v49  ;;  %v10598_v49 = vld [vmem:[#allocation3 + $0x30] sm:$0xff] }
 0xfb9   :  { %v9589_v62 = vpop.eup %9588 }
 0xfba   :  { %v1302_v61 = vsel %vm290_vm0, %v9589_v62, 0.0 }
 0xfbb   :  { %1303 = vadd.xlane.f32.xlu1 %v1302_v61 }
0x1044   :  { %v1304_v50 = vpop.xlane.xlu1 %1303 }
0x1045   :  { %9590 = vrcp.f32 %v1304_v50 }
0x1052   :  { %v9591_v54 = vpop.eup %9590 }
0x1053   :  { %v1306_v0 = vmul.f32 %v9591_v54, %v9589_v62 }
0x1055   :  { %v1309_v5 = vmul.f32 %v8785_v59, %v1306_v0  ;;  %v1750_v7 = vsel %vm1294_vm7, %v1306_v0, 0.0  ;;  %v10603_v59 = vld [vmem:[#allocation3 + $0x38] sm:$0xff] }
0x1056   :  { %8789 = vst.msk [vmem:[%s13314_s7 + $0x10] sm:$0xff] %vm290_vm0, %v1750_v7 }
0x1057   :  { %v1310_v9 = vsub.f32 %v1306_v0, %v1309_v5 }
0x1059   :  { %1343 = vxpose.xlu1.b32.start.end [1/1] (short) (narrow) %v1310_v9, 8 }
0x10d5   :  { %v1359_v12 = vpop.trf.xlu1 }
0x10d6   :  { %v1465_v18 = vrot.slane %v1359_v12, %v10028_v17  ;;  %v1472_v45 = vrot.slane %v1359_v12, %v13316_v20  ;;  %v1479_v47 = vrot.slane %v1359_v12, %v13317_v37  ;;  %v1486_v51 = vrot.slane %v1359_v12, %v13318_v48 }
0x10d7   :  { %v1493_v52 = vrot.slane %v1359_v12, %v10034_v22  ;;  %v1500_v44 = vrot.slane %v1359_v12, %v10044_v29  ;;  %v1507_v56 = vrot.slane %v1359_v12, %v10040_v26  ;;  %v1514_v58 = vrot.slane %v1359_v12, %v10047_v31 }
0x10d8   :  { %1467 = vbcast.lane.b32.xlu0 %v1465_v18, 256 }
0x10dc   :  { %1474 = vbcast.lane.b32.xlu0 %v1472_v45, 256 }
0x10e0   :  { %1481 = vbcast.lane.b32.xlu0 %v1479_v47, 256 }
0x10e4   :  { %1488 = vbcast.lane.b32.xlu0 %v1486_v51, 256 }
0x10e8   :  { %1495 = vbcast.lane.b32.xlu0 %v1493_v52, 256 }
0x10ec   :  { %1502 = vbcast.lane.b32.xlu0 %v1500_v44, 256 }
0x10f0   :  { %1509 = vbcast.lane.b32.xlu0 %v1507_v56, 256 }
0x10f4   :  { %1516 = vbcast.lane.b32.xlu0 %v1514_v58, 256 }
0x1112   :  { %1311 = vxpose.xlu0.b32.start.end [1/1] (short) (narrow) %v1309_v5, 8 }
0x114a   :  { %v1468_v63 = vpop.permute.xlu0 %1467 }
0x114b   :  { %v1518_v42 = vmul.f32 %v1468_v63, %v10453_v55 }
0x114d   :  { %v1526_v35 = vsel %vm106_vm1, %v1518_v42, 0.0 }
0x114e   :  { %v1475_v3 = vpop.permute.xlu0 %1474 }
0x114f   :  { %v1519_v14 = vmul.f32 %v1475_v3, %v10581_v8 }
0x1151   :  { %v1527_v43 = vsel %vm106_vm1, %v1519_v14, 0.0 }
0x1152   :  { %v1482_v10 = vpop.permute.xlu0 %1481  ;;  %v1528_v38 = vadd.f32 %v1527_v43, %v1526_v35 }
0x1153   :  { %v1520_v27 = vmul.f32 %v1482_v10, %v1377_v40 }
0x1155   :  { %v1529_v57 = vsel %vm106_vm1, %v1520_v27, 0.0 }
0x1156   :  { %v1489_v11 = vpop.permute.xlu0 %1488  ;;  %v1530_v54 = vadd.f32 %v1529_v57, %v1528_v38 }
0x1157   :  { %v1521_v24 = vmul.f32 %v1489_v11, %v10585_v33 }
0x1159   :  { %v1531_v61 = vsel %vm106_vm1, %v1521_v24, 0.0 }
0x115a   :  { %v1496_v19 = vpop.permute.xlu0 %1495  ;;  %v1532_v7 = vadd.f32 %v1531_v61, %v1530_v54 }
0x115b   :  { %v1522_v2 = vmul.f32 %v1496_v19, %v10588_v16 }
0x115d   :  { %v1533_v0 = vsel %vm106_vm1, %v1522_v2, 0.0 }
0x115e   :  { %v1503_v23 = vpop.permute.xlu0 %1502  ;;  %v1534_v45 = vadd.f32 %v1533_v0, %v1532_v7 }
0x115f   :  { %v1523_v50 = vmul.f32 %v1503_v23, %v10593_v46 }
0x1161   :  { %v1535_v12 = vsel %vm106_vm1, %v1523_v50, 0.0 }
0x1162   :  { %v1510_v60 = vpop.permute.xlu0 %1509  ;;  %v1536_v51 = vadd.f32 %v1535_v12, %v1534_v45  ;;  %v10643_v45 = vld [vmem:[%s13304_s4 + $0x30] sm:$0xff] }
0x1163   :  { %v1524_v5 = vmul.f32 %v1510_v60, %v10598_v49 }
0x1165   :  { %v1537_v47 = vsel %vm106_vm1, %v1524_v5, 0.0 }
0x1166   :  { %v1517_v36 = vpop.permute.xlu0 %1516  ;;  %v1538_v56 = vadd.f32 %v1537_v47, %v1536_v51  ;;  %v10650_v47 = vld [vmem:[%s13304_s4 + $0x28] sm:$0xff]  ;;  %v10657_v51 = vld [vmem:[%s13304_s4 + $0x20] sm:$0xff] }
0x1167   :  { %v1525_v18 = vmul.f32 %v1517_v36, %v10603_v59 }
0x1169   :  { %v1539_v44 = vsel %vm106_vm1, %v1525_v18, 0.0  ;;  %v10634_v18 = vld [vmem:[%s13304_s4 + $0x38] sm:$0xff] }
0x116a   :  { %v1540_v58 = vadd.f32 %v1539_v44, %v1538_v56  ;;  %v10671_v44 = vld [vmem:[%s13304_s4 + $0x10] sm:$0xff]  ;;  %v10678_v56 = vld [vmem:[%s13304_s4 + $0x8] sm:$0xff] }
0x118e   :  { %v1327_v30 = vpop.trf.xlu0 }
0x118f   :  { %v1393_v13 = vrot.slane %v1327_v30, %v13316_v20  ;;  %v1386_v15 = vrot.slane %v1327_v30, %v10028_v17  ;;  %v1400_v1 = vrot.slane %v1327_v30, %v13317_v37  ;;  %v1407_v25 = vrot.slane %v1327_v30, %v13318_v48 }
0x1190   :  { %v1414_v21 = vrot.slane %v1327_v30, %v10034_v22  ;;  %v1421_v62 = vrot.slane %v1327_v30, %v10044_v29  ;;  %v1428_v9 = vrot.slane %v1327_v30, %v10040_v26  ;;  %v1435_v52 = vrot.slane %v1327_v30, %v10047_v31 }
0x1191   :  { %1395 = vbcast.lane.b32.xlu0 %v1393_v13, 256  ;;  %1388 = vbcast.lane.b32.xlu1 %v1386_v15, 256 }
0x1195   :  { %1402 = vbcast.lane.b32.xlu1 %v1400_v1, 256 }
0x1199   :  { %1409 = vbcast.lane.b32.xlu1 %v1407_v25, 256 }
0x119d   :  { %1416 = vbcast.lane.b32.xlu1 %v1414_v21, 256 }
0x11a1   :  { %1423 = vbcast.lane.b32.xlu1 %v1421_v62, 256 }
0x11a5   :  { %1430 = vbcast.lane.b32.xlu1 %v1428_v9, 256 }
0x11a9   :  { %1437 = vbcast.lane.b32.xlu1 %v1435_v52, 256  ;;  %v10664_v52 = vld [vmem:[%s13304_s4 + $0x18] sm:$0xff] }
0x11ad   :  { %1542 = vrot.lane.b32.xlu1 %v1540_v58, %s13259_s1  ;;  %v10685_v58 = vld [vmem:[%s13304_s4] sm:$0xff] }
0x1203   :  { %v1389_v63 = vpop.permute.xlu1 %1388  ;;  %v1396_v10 = vpop.permute.xlu0 %1395 }
0x1204   :  { %v1440_v19 = vmul.f32 %v1396_v10, %v10581_v8  ;;  %v1439_v23 = vmul.f32 %v1389_v63, %v10453_v55 }
0x1206   :  { %v1448_v13 = vsel %vm106_vm1, %v1440_v19, 0.0  ;;  %v1447_v30 = vsel %vm106_vm1, %v1439_v23, 0.0  ;;  %v10699_v19 = vld [vmem:[%s13307_s5 + $0x70] sm:$0xff]  ;;  %v10706_v23 = vld [vmem:[%s13307_s5 + $0x68] sm:$0xff] }
0x1207   :  { %v1403_v3 = vpop.permute.xlu1 %1402  ;;  %v1449_v14 = vadd.f32 %v1448_v13, %v1447_v30  ;;  %v10724_v13 = vld [vmem:[%s13307_s5 + $0x50] sm:$0xff]  ;;  %v10730_v30 = vld [vmem:[%s13307_s5 + $0x48] sm:$0xff] }
0x1208   :  { %v1441_v60 = vmul.f32 %v1403_v3, %v1377_v40 }
0x120a   :  { %v1450_v1 = vsel %vm106_vm1, %v1441_v60, 0.0  ;;  %v10712_v60 = vld [vmem:[%s13307_s5 + $0x60] sm:$0xff] }
0x120b   :  { %v1410_v11 = vpop.permute.xlu1 %1409  ;;  %v1451_v43 = vadd.f32 %v1450_v1, %v1449_v14  ;;  %v10742_v1 = vld [vmem:[%s13307_s5 + $0x38] sm:$0xff]  ;;  %v10754_v14 = vld [vmem:[%s13307_s5 + $0x28] sm:$0xff] }
0x120c   :  { %v1442_v15 = vmul.f32 %v1410_v11, %v10585_v33 }
0x120e   :  { %v1452_v27 = vsel %vm106_vm1, %v1442_v15, 0.0  ;;  %v10736_v15 = vld [vmem:[%s13307_s5 + $0x40] sm:$0xff] }
0x120f   :  { %v1417_v36 = vpop.permute.xlu1 %1416  ;;  %v1453_v24 = vadd.f32 %v1452_v27, %v1451_v43  ;;  %v10766_v27 = vld [vmem:[%s13307_s5 + $0x18] sm:$0xff]  ;;  %v10778_v43 = vld [vmem:[%s13307_s5 + $0x8] sm:$0xff] }
0x1210   :  { %v1443_v25 = vmul.f32 %v1417_v36, %v10588_v16  ;;  %v10718_v36 = vld [vmem:[%s13307_s5 + $0x58] sm:$0xff] }
0x1212   :  { %v1454_v40 = vsel %vm106_vm1, %v1443_v25, 0.0  ;;  %v10748_v25 = vld [vmem:[%s13307_s5 + $0x30] sm:$0xff] }
0x1213   :  { %v1424_v42 = vpop.permute.xlu1 %1423  ;;  %v1455_v38 = vadd.f32 %v1454_v40, %v1453_v24  ;;  %v10784_v40 = vld [vmem:[%s13307_s5] sm:$0xff]  ;;  %v10790_v24 = vld [vmem:[%s13307_s5 + $0x78] sm:$0xff] }
0x1214   :  { %v1444_v21 = vmul.f32 %v1424_v42, %v10593_v46  ;;  %v10760_v42 = vld [vmem:[%s13307_s5 + $0x20] sm:$0xff] }
0x1216   :  { %v1456_v57 = vsel %vm106_vm1, %v1444_v21, 0.0  ;;  %v10772_v21 = vld [vmem:[%s13307_s5 + $0x10] sm:$0xff] }
0x1217   :  { %v1431_v35 = vpop.permute.xlu1 %1430  ;;  %v1457_v61 = vadd.f32 %v1456_v57, %v1455_v38 }
0x1218   :  { %v1445_v2 = vmul.f32 %v1431_v35, %v10598_v49 }
0x121a   :  { %v1458_v62 = vsel %vm106_vm1, %v1445_v2, 0.0 }
0x121b   :  { %v1438_v50 = vpop.permute.xlu1 %1437  ;;  %v1459_v0 = vadd.f32 %v1458_v62, %v1457_v61 }
0x121c   :  { %v1446_v54 = vmul.f32 %v1438_v50, %v10603_v59 }
0x121e   :  { %v1460_v5 = vsel %vm106_vm1, %v1446_v54, 0.0 }
0x121f   :  { %v1461_v7 = vadd.f32 %v1460_v5, %v1459_v0  ;;  %v1543_v9 = vpop.permute.xlu1 %1542 }
0x1221   :  { %v1545_v12 = vsel %vm106_vm1, %v1461_v7, %v1543_v9 }
0x1222   :  { %9202 = vmatmul.mubr.msk.f32.vlgmr.msra.gmra.mxu1 %vm572_vm3, %v1545_v12 }
0x1223   :  { %9205 = vmatpush3.msra.mxu1 %v10634_v18  ;;  %9220 = vmatprep.mubr.msk.f32.mxu1 %vm9837_vm2, %v13315_v4 }
0x1224   :  { %9206 = vmatprep.subr.mxu1 %v13315_v4 }
0x1225   :  { %9207 = vmatpush3.msra.mxu1 %v10643_v45 }
0x1226   :  { %9208 = vmatprep.subr.mxu1 %v13315_v4 }
0x1227   :  { %9209 = vmatpush3.msra.mxu1 %v10650_v47 }
0x1228   :  { %9210 = vmatprep.subr.mxu1 %v13315_v4 }
0x1229   :  { %9211 = vmatpush3.msra.mxu1 %v10657_v51 }
0x122a   :  { %9212 = vmatprep.subr.mxu1 %v13315_v4 }
0x122b   :  { %9213 = vmatpush3.msra.mxu1 %v10664_v52 }
0x122c   :  { %9214 = vmatprep.subr.mxu1 %v13315_v4 }
0x122d   :  { %9215 = vmatpush3.msra.mxu1 %v10671_v44 }
0x122e   :  { %9216 = vmatprep.subr.mxu1 %v13315_v4 }
0x122f   :  { %9217 = vmatpush3.msra.mxu1 %v10678_v56 }
0x1230   :  { %9218 = vmatprep.subr.mxu1 %v13315_v4 }
0x1231   :  { %9219 = vmatpush3.msra.mxu1 %v10685_v58 }
0x1232   :  { %9223 = vmatprep.subr.mxu1 %v13315_v4 }
0x12e2   :  { %v1615_v63 = vpop.f32.mrf.mxu1 }
0x12e3   :  { %1620 = vrot.lane.b32.xlu1 %v1615_v63, %s13259_s1 }
0x12e4   :  { %v9203_v3 = vpop.f32.mrf.mxu1 }
0x1355   :  { %v10690_v10 = vpop.permute.xlu1 %1620 }
0x1356   :  { %v1623_v11 = vsel %vm106_vm1, %v10541_v6, %v10690_v10 }
0x1357   :  { %8787 = vmatmul.mubr.msk.f32.vlgmr.msra.gmra.mxu0 %vm572_vm3, %v1623_v11 }
0x1358   :  { %2122 = vmatpush1.msra.mxu0 %v10699_v19  ;;  %2169 = vmatprep.mubr.f32.mxu0 %v13315_v4 }
0x1359   :  { %2123 = vmatprep.subr.mxu0 %v10706_v23 }
0x135a   :  { %2124 = vmatpush1.msra.mxu0 %v10712_v60 }
0x135b   :  { %2125 = vmatprep.subr.mxu0 %v10718_v36 }
0x135c   :  { %2126 = vmatpush1.msra.mxu0 %v10724_v13 }
0x135d   :  { %2127 = vmatprep.subr.mxu0 %v10730_v30 }
0x135e   :  { %2128 = vmatpush1.msra.mxu0 %v10736_v15 }
0x135f   :  { %2129 = vmatprep.subr.mxu0 %v10742_v1 }
0x1360   :  { %2130 = vmatpush1.msra.mxu0 %v10748_v25 }
0x1361   :  { %2131 = vmatprep.subr.mxu0 %v10754_v14 }
0x1362   :  { %2132 = vmatpush1.msra.mxu0 %v10760_v42 }
0x1363   :  { %2133 = vmatprep.subr.mxu0 %v10766_v27 }
0x1364   :  { %2134 = vmatpush1.msra.mxu0 %v10772_v21 }
0x1365   :  { %2135 = vmatprep.subr.mxu0 %v10778_v43 }
0x1366   :  { %2136 = vmatpush1.msra.mxu0 %v10784_v40 }
0x1367   :  { %2599 = vmatprep.subr.mxu0 %v10790_v24 }
0x1417   :  { %v1693_v35 = vpop.f32.mrf.mxu0 }
0x1418   :  { %v1694_v38 = vadd.f32 %v1693_v35, %v10380_v34 }
0x1419   :  { %v1695_v57 = vpop.f32.mrf.mxu0 }
0x141a   :  { %v1696_v2 = vadd.f32 %v1695_v57, %v10375_v28  ;;  %v8788_v62 = vmul.f32 -1.442695, %v1694_v38 }
0x141c   :  { %1705 = vrot.lane.b32.xlu1 %v1696_v2, %s9839_s28  ;;  %9592 = vpow2.f32 %v8788_v62 }
0x1420   :  { %1725 = vrot.lane.b32.xlu1 %v10541_v6, %s9839_s28  ;;  %v10800_v6 = vld [vmem:[#allocation2 + $0x18] sm:$0xff] }
0x1421   :  { %v1755_v3 = vmul.f32 %v10401_v53, %v10800_v6 }
0x1423   :  { %v1756_v11 = vsel %vm106_vm1, %v1755_v3, 0.0 }
0x1429   :  { %v9593_v61 = vpop.eup %9592 }
0x142a   :  { %v1701_v50 = vadd.f32 1.0, %v9593_v61 }
0x142c   :  { %9594 = vrcp.f32 %v1701_v50 }
0x1439   :  { %v9595_v54 = vpop.eup %9594 }
0x143a   :  { %v1711_v35 = vsub.f32 1.0, %v9595_v54 }
0x148e   :  { %v1706_v0 = vpop.permute.xlu1 %1705 }
0x148f   :  { %v1708_v5 = vmul.f32 %v9595_v54, %v1706_v0 }
0x1491   :  { %v1709_v7 = vadd.f32 %v1708_v5, %v1696_v2  ;;  %v1717_v2 = vmul.f32 %v9595_v54, %v10690_v10 }
0x1492   :  { %v1726_v9 = vpop.permute.xlu1 %1725 }
0x1493   :  { %9596 = vtanh.f32 %v1709_v7  ;;  %v1728_v12 = vmul.f32 %v9595_v54, %v1726_v9  ;;  %v8790_v54 = vld [vmem:[%s13313_s10 + $0x18] sm:$0xff] }
0x1494   :  { %v1769_v3 = vsub.f32 1.0, %v8790_v54 }
0x1495   :  { %1730 = vrot.lane.b32.xlu1 %v1728_v12, %s9840_s0 }
0x14a0   :  { %v9597_v63 = vpop.eup %9596 }
0x14a1   :  { %1713 = vrot.lane.b32.xlu0 %v9597_v63, %s13319_s8 }
0x14b9   :  { %1757 = vadd.xlane.f32.xlu1 %v1756_v11  ;;  %v1770_v11 = vmul.f32 1e+30, %v1769_v3 }
0x1507   :  { %v1731_v0 = vpop.permute.xlu1 %1730 }
0x1513   :  { %v1714_v57 = vpop.permute.xlu0 %1713 }
0x1514   :  { %v1716_v38 = vmul.f32 %v1714_v57, %v1711_v35 }
0x1516   :  { %1720 = vrot.lane.b32.xlu0 %v1716_v38, %s9840_s0  ;;  %v1718_v62 = vadd.f32 %v1717_v2, %v1716_v38 }
0x1542   :  { %v1758_v12 = vpop.xlane.xlu1 %1757 }
0x1543   :  { %v1759_v63 = vadd.f32 %v10410_v41, %v1758_v12 }
0x1588   :  { %v1721_v61 = vpop.permute.xlu0 %1720 }
0x1589   :  { %v1723_v50 = vadd.f32 %v1721_v61, %v1718_v62 }
0x158b   :  { %v1733_v5 = vadd.f32 %v1731_v0, %v1723_v50 }
0x158d   :  { %v1740_v7 = vmul.f32 %v1733_v5, %v10394_v39 }
0x158f   :  { %1742 = vrot.lane.b32.xlu0 %v1740_v7, %s9839_s28 }
0x1601   :  { %v1743_v53 = vpop.permute.xlu0 %1742 }
0x1602   :  { %v1745_v9 = vsel %vm106_vm1, %v1743_v53, 0.0 }
0x1603   :  { %1746 = vadd.xlane.f32.xlu0 %v1745_v9 }
0x1619   :  { %1763 = vperm.xlu0 %9566, %v1759_v63   ;;  %v8791_v63 = vld [vmem:[%s13298_s9 + $0x18] sm:$0xff] }
0x161d   :  { %1735 = vrot.lane.b32.xlu0 %v1733_v5, %s9839_s28 }
0x168c   :  { %v1747_v10 = vpop.xlane.xlu0 %1746 }
0x168d   :  { %1749 = vst.msk [vmem:[#allocation5] sm:$0xff] %vm1748_vm8, %v1747_v10 }
0x1694   :  { %v1760_v35 = vld [vmem:[#allocation5] sm:$0xff]  ;;  %v1764_v57 = vpop.permute.xlu0 %1763 }
0x1695   :  { %v1766_v38 = vadd.f32 %v1764_v57, %v1760_v35 }
0x1697   :  { %v1771_v2 = vsub.f32 %v1766_v38, %v1770_v11 }
0x1698   :  { %v1736_v41 = vpop.permute.xlu0 %1735 }
0x1699   :  { %1739 = vst.msk [vmem:[#allocation3 + $0x10] sm:$0xff] %vm106_vm1, %v1736_v41  ;;  %v1773_v62 = vsel %vm1772_vm9, %v1771_v2, -1e+37 }
0x169a   :  { %v1774_v61 = vsel %vm290_vm0, %v1773_v62, -inf }
0x169b   :  { %1775 = vmax.xlane.f32.xlu1 %v1774_v61 }
0x1724   :  { %v1776_v50 = vpop.xlane.xlu1 %1775 }
0x1725   :  { %v1777_v0 = vsub.f32 %v1773_v62, %v1776_v50 }
0x1727   :  { %v1778_v5 = vmul.f32 1.442695, %v1777_v0 }
0x1729   :  { %9598 = vpow2.f32 %v1778_v5 }
0x1736   :  { %v9599_v7 = vpop.eup %9598 }
0x1737   :  { %v1780_v53 = vsel %vm290_vm0, %v9599_v7, 0.0 }
0x1738   :  { %1781 = vadd.xlane.f32.xlu1 %v1780_v53 }
0x17c1   :  { %v1782_v9 = vpop.xlane.xlu1 %1781 }
0x17c2   :  { %9600 = vrcp.f32 %v1782_v9 }
0x17cf   :  { %v9601_v12 = vpop.eup %9600 }
0x17d0   :  { %v1784_v10 = vmul.f32 %v9601_v12, %v9599_v7 }
0x17d2   :  { %v1787_v54 = vmul.f32 %v8791_v63, %v1784_v10  ;;  %v2228_v3 = vsel %vm1772_vm9, %v1784_v10, 0.0 }
0x17d3   :  { %8795 = vst.msk [vmem:[%s13314_s7 + $0x18] sm:$0xff] %vm290_vm0, %v2228_v3 }
0x17d4   :  { %v1788_v11 = vsub.f32 %v1784_v10, %v1787_v54 }
0x17d6   :  { %1821 = vxpose.xlu1.b32.start.end [1/1] (short) (narrow) %v1788_v11, 8 }
0x1852   :  { %v1837_v35 = vpop.trf.xlu1 }
0x1853   :  { %v1943_v57 = vrot.slane %v1837_v35, %v10028_v17  ;;  %v1950_v38 = vrot.slane %v1837_v35, %v13316_v20  ;;  %v1957_v2 = vrot.slane %v1837_v35, %v13317_v37  ;;  %v1964_v41 = vrot.slane %v1837_v35, %v13318_v48 }
0x1854   :  { %v1971_v62 = vrot.slane %v1837_v35, %v10034_v22  ;;  %v1978_v61 = vrot.slane %v1837_v35, %v10044_v29  ;;  %v1985_v50 = vrot.slane %v1837_v35, %v10040_v26  ;;  %v1992_v0 = vrot.slane %v1837_v35, %v10047_v31 }
0x1855   :  { %1945 = vbcast.lane.b32.xlu0 %v1943_v57, 256 }
0x1859   :  { %1952 = vbcast.lane.b32.xlu0 %v1950_v38, 256 }
0x185d   :  { %1959 = vbcast.lane.b32.xlu0 %v1957_v2, 256 }
0x1861   :  { %1966 = vbcast.lane.b32.xlu0 %v1964_v41, 256  ;;  %v10844_v41 = vld [vmem:[#allocation3 + $0x10] sm:$0xff] }
0x1865   :  { %1973 = vbcast.lane.b32.xlu0 %v1971_v62, 256 }
0x1869   :  { %1980 = vbcast.lane.b32.xlu0 %v1978_v61, 256 }
0x186d   :  { %1987 = vbcast.lane.b32.xlu0 %v1985_v50, 256 }
0x1871   :  { %1994 = vbcast.lane.b32.xlu0 %v1992_v0, 256 }
0x188f   :  { %1789 = vxpose.xlu0.b32.start.end [1/1] (short) (narrow) %v1787_v54, 8 }
0x18c7   :  { %v1946_v5 = vpop.permute.xlu0 %1945 }
0x18c8   :  { %v1996_v62 = vmul.f32 %v1946_v5, %v10453_v55 }
0x18cb   :  { %v1953_v7 = vpop.permute.xlu0 %1952 }
0x18cc   :  { %v1997_v35 = vmul.f32 %v1953_v7, %v10581_v8 }
0x18ce   :  { %v2005_v0 = vsel %vm106_vm1, %v1997_v35, 0.0 }
0x18cf   :  { %v1960_v53 = vpop.permute.xlu0 %1959 }
0x18d0   :  { %v1998_v61 = vmul.f32 %v1960_v53, %v10844_v41 }
0x18d3   :  { %v1967_v9 = vpop.permute.xlu0 %1966 }
0x18d7   :  { %v1974_v12 = vpop.permute.xlu0 %1973 }
0x18d8   :  { %v2000_v7 = vmul.f32 %v1974_v12, %v10588_v16 }
0x18da   :  { %v2011_v35 = vsel %vm106_vm1, %v2000_v7, 0.0 }
0x18db   :  { %v1981_v63 = vpop.permute.xlu0 %1980 }
0x18dc   :  { %v2001_v53 = vmul.f32 %v1981_v63, %v10593_v46 }
0x18df   :  { %v1988_v10 = vpop.permute.xlu0 %1987 }
0x18e3   :  { %v1995_v3 = vpop.permute.xlu0 %1994 }
0x18e4   :  { %v2003_v12 = vmul.f32 %v1995_v3, %v10603_v59 }
0x190b   :  { %v1805_v11 = vpop.trf.xlu0 }
0x190c   :  { %v1871_v57 = vrot.slane %v1805_v11, %v13316_v20  ;;  %v1864_v38 = vrot.slane %v1805_v11, %v10028_v17  ;;  %v1878_v2 = vrot.slane %v1805_v11, %v13317_v37  ;;  %v1885_v54 = vrot.slane %v1805_v11, %v13318_v48 }
0x190d   :  { %v1892_v50 = vrot.slane %v1805_v11, %v10034_v22  ;;  %v1913_v63 = vrot.slane %v1805_v11, %v10047_v31 }
0x190e   :  { %1873 = vbcast.lane.b32.xlu0 %v1871_v57, 256  ;;  %1866 = vbcast.lane.b32.xlu1 %v1864_v38, 256  ;;  %v1999_v57 = vmul.f32 %v1967_v9, %v10585_v33  ;;  %v2004_v38 = vsel %vm106_vm1, %v1996_v62, 0.0  ;;  %v2002_v9 = vmul.f32 %v1988_v10, %v10598_v49  ;;  %v1906_v62 = vrot.slane %v1805_v11, %v10040_v26 }
0x190f   :  { %v2006_v48 = vadd.f32 %v2005_v0, %v2004_v38 }
0x1910   :  { %v2009_v5 = vsel %vm106_vm1, %v1999_v57, 0.0  ;;  %v2015_v38 = vsel %vm106_vm1, %v2002_v9, 0.0 }
0x1912   :  { %1880 = vbcast.lane.b32.xlu1 %v1878_v2, 256  ;;  %v2007_v2 = vsel %vm106_vm1, %v1998_v61, 0.0  ;;  %v2013_v61 = vsel %vm106_vm1, %v2001_v53, 0.0 }
0x1913   :  { %v2008_v37 = vadd.f32 %v2007_v2, %v2006_v48  ;;  %v2017_v48 = vsel %vm106_vm1, %v2003_v12, 0.0 }
0x1916   :  { %1887 = vbcast.lane.b32.xlu1 %v1885_v54, 256  ;;  %v1899_v54 = vrot.slane %v1805_v11, %v10044_v29 }
0x191a   :  { %1894 = vbcast.lane.b32.xlu1 %v1892_v50, 256  ;;  %v2010_v50 = vadd.f32 %v2009_v5, %v2008_v37 }
0x191c   :  { %v2012_v0 = vadd.f32 %v2011_v35, %v2010_v50 }
0x191e   :  { %1901 = vbcast.lane.b32.xlu1 %v1899_v54, 256  ;;  %v2014_v57 = vadd.f32 %v2013_v61, %v2012_v0 }
0x1920   :  { %v2016_v2 = vadd.f32 %v2015_v38, %v2014_v57 }
0x1922   :  { %1908 = vbcast.lane.b32.xlu1 %v1906_v62, 256  ;;  %v2018_v7 = vadd.f32 %v2017_v48, %v2016_v2 }
0x1926   :  { %1915 = vbcast.lane.b32.xlu1 %v1913_v63, 256 }
0x192a   :  { %2020 = vrot.lane.b32.xlu1 %v2018_v7, %s13319_s8 }
0x1980   :  { %v1867_v37 = vpop.permute.xlu1 %1866  ;;  %v1874_v54 = vpop.permute.xlu0 %1873 }
0x1981   :  { %v1918_v3 = vmul.f32 %v1874_v54, %v10581_v8  ;;  %v1917_v53 = vmul.f32 %v1867_v37, %v10453_v55 }
0x1983   :  { %v1926_v11 = vsel %vm106_vm1, %v1918_v3, 0.0  ;;  %v1925_v50 = vsel %vm106_vm1, %v1917_v53, 0.0 }
0x1984   :  { %v1881_v10 = vpop.permute.xlu1 %1880  ;;  %v1927_v0 = vadd.f32 %v1926_v11, %v1925_v50 }
0x1985   :  { %v1919_v35 = vmul.f32 %v1881_v10, %v10844_v41 }
0x1987   :  { %v1928_v61 = vsel %vm106_vm1, %v1919_v35, 0.0 }
0x1988   :  { %v1888_v5 = vpop.permute.xlu1 %1887  ;;  %v1929_v55 = vadd.f32 %v1928_v61, %v1927_v0 }
0x1989   :  { %v1920_v62 = vmul.f32 %v1888_v5, %v10585_v33 }
0x198b   :  { %v1930_v57 = vsel %vm106_vm1, %v1920_v62, 0.0 }
0x198c   :  { %v1895_v9 = vpop.permute.xlu1 %1894  ;;  %v1931_v2 = vadd.f32 %v1930_v57, %v1929_v55 }
0x198d   :  { %v1921_v12 = vmul.f32 %v1895_v9, %v10588_v16 }
0x198f   :  { %v1932_v48 = vsel %vm106_vm1, %v1921_v12, 0.0 }
0x1990   :  { %v1902_v38 = vpop.permute.xlu1 %1901  ;;  %v1933_v33 = vadd.f32 %v1932_v48, %v1931_v2 }
0x1991   :  { %v1922_v63 = vmul.f32 %v1902_v38, %v10593_v46 }
0x1993   :  { %v1934_v37 = vsel %vm106_vm1, %v1922_v63, 0.0 }
0x1994   :  { %v1909_v7 = vpop.permute.xlu1 %1908  ;;  %v1935_v5 = vadd.f32 %v1934_v37, %v1933_v33 }
0x1995   :  { %v1923_v10 = vmul.f32 %v1909_v7, %v10598_v49 }
0x1997   :  { %v1936_v54 = vsel %vm106_vm1, %v1923_v10, 0.0 }
0x1998   :  { %v1916_v3 = vpop.permute.xlu1 %1915  ;;  %v1937_v35 = vadd.f32 %v1936_v54, %v1935_v5 }
0x1999   :  { %v1924_v53 = vmul.f32 %v1916_v3, %v10603_v59 }
0x199b   :  { %v1938_v9 = vsel %vm106_vm1, %v1924_v53, 0.0 }
0x199c   :  { %v1939_v11 = vadd.f32 %v1938_v9, %v1937_v35  ;;  %v2021_v50 = vpop.permute.xlu1 %2020  ;;  %v10935_v9 = vld [vmem:[%s13312_s30] ss:$0 sm:$0xff] }
0x199e   :  { %v2023_v62 = vsel %vm106_vm1, %v1939_v11, %v2021_v50 }
0x199f   :  { %9221 = vmatmul.mubr.msk.f32.vlgmr.msra.gmra.mxu1 %vm572_vm3, %v2023_v62 }
0x19a0   :  { %9224 = vmatpush3.msra.mxu1 %v10634_v18  ;;  %9239 = vmatprep.mubr.msk.f32.mxu1 %vm9837_vm2, %v13315_v4 }
0x19a1   :  { %9225 = vmatprep.subr.mxu1 %v13315_v4 }
0x19a2   :  { %9226 = vmatpush3.msra.mxu1 %v10643_v45 }
0x19a3   :  { %9227 = vmatprep.subr.mxu1 %v13315_v4 }
0x19a4   :  { %9228 = vmatpush3.msra.mxu1 %v10650_v47 }
0x19a5   :  { %9229 = vmatprep.subr.mxu1 %v13315_v4 }
0x19a6   :  { %9230 = vmatpush3.msra.mxu1 %v10657_v51 }
0x19a7   :  { %9231 = vmatprep.subr.mxu1 %v13315_v4 }
0x19a8   :  { %9232 = vmatpush3.msra.mxu1 %v10664_v52 }
0x19a9   :  { %9233 = vmatprep.subr.mxu1 %v13315_v4 }
0x19aa   :  { %9234 = vmatpush3.msra.mxu1 %v10671_v44 }
0x19ab   :  { %9235 = vmatprep.subr.mxu1 %v13315_v4 }
0x19ac   :  { %9236 = vmatpush3.msra.mxu1 %v10678_v56 }
0x19ad   :  { %9237 = vmatprep.subr.mxu1 %v13315_v4 }
0x19ae   :  { %9238 = vmatpush3.msra.mxu1 %v10685_v58 }
0x19af   :  { %9242 = vmatprep.subr.mxu1 %v13315_v4 }
0x1a5f   :  { %v2093_v61 = vpop.f32.mrf.mxu1 }
0x1a60   :  { %2098 = vrot.lane.b32.xlu1 %v2093_v61, %s13319_s8 }
0x1a61   :  { %v9222_v12 = vpop.f32.mrf.mxu1 }
0x1ad2   :  { %v2099_v0 = vpop.permute.xlu1 %2098 }
0x1ad3   :  { %v2101_v38 = vsel %vm106_vm1, %v10800_v6, %v2099_v0 }
0x1ad4   :  { %8793 = vmatmul.mubr.msk.f32.vlgmr.msra.gmra.mxu0 %vm572_vm3, %v2101_v38 }
0x1ad5   :  { %2600 = vmatpush1.msra.mxu0 %v10699_v19  ;;  %2647 = vmatprep.mubr.f32.mxu0 %v13315_v4 }
0x1ad6   :  { %2601 = vmatprep.subr.mxu0 %v10706_v23 }
0x1ad7   :  { %2602 = vmatpush1.msra.mxu0 %v10712_v60 }
0x1ad8   :  { %2603 = vmatprep.subr.mxu0 %v10718_v36 }
0x1ad9   :  { %2604 = vmatpush1.msra.mxu0 %v10724_v13 }
0x1ada   :  { %2605 = vmatprep.subr.mxu0 %v10730_v30 }
0x1adb   :  { %2606 = vmatpush1.msra.mxu0 %v10736_v15 }
0x1adc   :  { %2607 = vmatprep.subr.mxu0 %v10742_v1 }
0x1add   :  { %2608 = vmatpush1.msra.mxu0 %v10748_v25 }
0x1ade   :  { %2609 = vmatprep.subr.mxu0 %v10754_v14 }
0x1adf   :  { %2610 = vmatpush1.msra.mxu0 %v10760_v42 }
0x1ae0   :  { %2611 = vmatprep.subr.mxu0 %v10766_v27 }
0x1ae1   :  { %2612 = vmatpush1.msra.mxu0 %v10772_v21 }
0x1ae2   :  { %2613 = vmatprep.subr.mxu0 %v10778_v43 }
0x1ae3   :  { %2614 = vmatpush1.msra.mxu0 %v10784_v40 }
0x1ae4   :  { %3077 = vmatprep.subr.mxu0 %v10790_v24 }
0x1b94   :  { %v2171_v57 = vpop.f32.mrf.mxu0 }
0x1b95   :  { %v2172_v48 = vadd.f32 %v2171_v57, %v10380_v34 }
0x1b96   :  { %v2173_v63 = vpop.f32.mrf.mxu0 }
0x1b97   :  { %v2174_v55 = vadd.f32 %v2173_v63, %v10375_v28  ;;  %v8794_v2 = vmul.f32 -1.442695, %v2172_v48 }
0x1b99   :  { %2183 = vrot.lane.b32.xlu1 %v2174_v55, %s9839_s28  ;;  %9602 = vpow2.f32 %v8794_v2 }
0x1b9d   :  { %2203 = vrot.lane.b32.xlu1 %v10800_v6, %s9839_s28  ;;  %v10930_v6 = vld [vmem:[#allocation2 + $0x20] sm:$0xff] }
0x1b9e   :  { %v2233_v11 = vmul.f32 %v10935_v9, %v10930_v6 }
0x1ba0   :  { %v2234_v50 = vsel %vm106_vm1, %v2233_v11, 0.0 }
0x1ba6   :  { %v9603_v7 = vpop.eup %9602 }
0x1ba7   :  { %v2179_v37 = vadd.f32 1.0, %v9603_v7 }
0x1ba9   :  { %9604 = vrcp.f32 %v2179_v37 }
0x1bb6   :  { %v9605_v10 = vpop.eup %9604 }
0x1bb7   :  { %v2189_v62 = vsub.f32 1.0, %v9605_v10  ;;  %v2195_v38 = vmul.f32 %v9605_v10, %v2099_v0 }
0x1c0b   :  { %v2184_v33 = vpop.permute.xlu1 %2183 }
0x1c0c   :  { %v2186_v54 = vmul.f32 %v9605_v10, %v2184_v33 }
0x1c0e   :  { %v2187_v5 = vadd.f32 %v2186_v54, %v2174_v55 }
0x1c0f   :  { %v2204_v3 = vpop.permute.xlu1 %2203 }
0x1c10   :  { %9606 = vtanh.f32 %v2187_v5  ;;  %v2206_v53 = vmul.f32 %v9605_v10, %v2204_v3  ;;  %v10944_v5 = vld [vmem:[#allocation6] ss:$0 sm:$0xff]  ;;  %v8796_v10 = vld [vmem:[%s13313_s10 + $0x20] sm:$0xff] }
0x1c12   :  { %2208 = vrot.lane.b32.xlu1 %v2206_v53, %s9840_s0  ;;  %v2247_v53 = vsub.f32 1.0, %v8796_v10 }
0x1c1d   :  { %v9607_v35 = vpop.eup %9606 }
0x1c1e   :  { %2191 = vrot.lane.b32.xlu0 %v9607_v35, %s13319_s8  ;;  %v2248_v35 = vmul.f32 1e+30, %v2247_v53 }
0x1c36   :  { %2235 = vadd.xlane.f32.xlu1 %v2234_v50 }
0x1c84   :  { %v2209_v48 = vpop.permute.xlu1 %2208 }
0x1c90   :  { %v2192_v61 = vpop.permute.xlu0 %2191 }
0x1c91   :  { %v2194_v12 = vmul.f32 %v2192_v61, %v2189_v62 }
0x1c93   :  { %2198 = vrot.lane.b32.xlu0 %v2194_v12, %s9840_s0  ;;  %v2196_v57 = vadd.f32 %v2195_v38, %v2194_v12 }
0x1cbf   :  { %v2236_v54 = vpop.xlane.xlu1 %2235 }
0x1cc0   :  { %v2237_v3 = vadd.f32 %v10944_v5, %v2236_v54  ;;  %v8797_v54 = vld [vmem:[%s13298_s9 + $0x20] sm:$0xff] }
0x1d05   :  { %v2199_v63 = vpop.permute.xlu0 %2198 }
0x1d06   :  { %v2201_v55 = vadd.f32 %v2199_v63, %v2196_v57 }
0x1d08   :  { %v2211_v2 = vadd.f32 %v2209_v48, %v2201_v55 }
0x1d0a   :  { %v2218_v7 = vmul.f32 %v2211_v2, %v10394_v39 }
0x1d0c   :  { %2220 = vrot.lane.b32.xlu0 %v2218_v7, %s9839_s28 }
0x1d7e   :  { %v2221_v37 = vpop.permute.xlu0 %2220 }
0x1d7f   :  { %v2223_v33 = vsel %vm106_vm1, %v2221_v37, 0.0 }
0x1d80   :  { %2224 = vadd.xlane.f32.xlu0 %v2223_v33 }
0x1d96   :  { %2241 = vperm.xlu0 %9566, %v2237_v3  }
0x1d9a   :  { %2213 = vrot.lane.b32.xlu0 %v2211_v2, %s9839_s28 }
0x1e09   :  { %v2225_v0 = vpop.xlane.xlu0 %2224 }
0x1e0a   :  { %2227 = vst.msk [vmem:[#allocation5] sm:$0xff] %vm2226_vm10, %v2225_v0 }
0x1e11   :  { %v2238_v11 = vld [vmem:[#allocation5] sm:$0xff]  ;;  %v2242_v50 = vpop.permute.xlu0 %2241 }
0x1e12   :  { %v2244_v62 = vadd.f32 %v2242_v50, %v2238_v11 }
0x1e14   :  { %v2249_v61 = vsub.f32 %v2244_v62, %v2248_v35  ;;  %v13320_v62 = vld [vmem:[#allocation11_spill] sm:$0xff] }
0x1e15   :  { %v2214_v12 = vpop.permute.xlu0 %2213 }
0x1e16   :  { %2217 = vst.msk [vmem:[#allocation3 + $0x18] sm:$0xff] %vm106_vm1, %v2214_v12  ;;  %v2251_v38 = vsel %vm2250_vm11, %v2249_v61, -1e+37  ;;  %v13321_v12 = vld [vmem:[#allocation13_spill] sm:$0xff] }
0x1e17   :  { %v2252_v57 = vsel %vm290_vm0, %v2251_v38, -inf }
0x1e18   :  { %2253 = vmax.xlane.f32.xlu1 %v2252_v57 }
0x1ea1   :  { %v2254_v63 = vpop.xlane.xlu1 %2253 }
0x1ea2   :  { %v2255_v55 = vsub.f32 %v2251_v38, %v2254_v63 }
0x1ea4   :  { %v2256_v48 = vmul.f32 1.442695, %v2255_v55 }
0x1ea6   :  { %9608 = vpow2.f32 %v2256_v48 }
0x1eb3   :  { %v9609_v2 = vpop.eup %9608 }
0x1eb4   :  { %v2258_v7 = vsel %vm290_vm0, %v9609_v2, 0.0 }
0x1eb5   :  { %2259 = vadd.xlane.f32.xlu1 %v2258_v7 }
0x1f3e   :  { %v2260_v37 = vpop.xlane.xlu1 %2259 }
0x1f3f   :  { %9610 = vrcp.f32 %v2260_v37 }
0x1f4c   :  { %v9611_v33 = vpop.eup %9610 }
0x1f4d   :  { %v2262_v3 = vmul.f32 %v9611_v33, %v9609_v2 }
0x1f4f   :  { %v2265_v0 = vmul.f32 %v8797_v54, %v2262_v3  ;;  %v2706_v10 = vsel %vm2250_vm11, %v2262_v3, 0.0 }
0x1f50   :  { %8801 = vst.msk [vmem:[%s13314_s7 + $0x20] sm:$0xff] %vm290_vm0, %v2706_v10 }
0x1f51   :  { %v2266_v53 = vsub.f32 %v2262_v3, %v2265_v0 }
0x1f53   :  { %2299 = vxpose.xlu1.b32.start.end [1/1] (short) (narrow) %v2266_v53, 8 }
0x1fcf   :  { %v2315_v35 = vpop.trf.xlu1 }
0x1fd0   :  { %v2421_v11 = vrot.slane %v2315_v35, %v10028_v17  ;;  %v2428_v50 = vrot.slane %v2315_v35, %v13316_v20  ;;  %v2435_v61 = vrot.slane %v2315_v35, %v13320_v62  ;;  %v2442_v38 = vrot.slane %v2315_v35, %v13321_v12 }
0x1fd1   :  { %v2449_v57 = vrot.slane %v2315_v35, %v10034_v22  ;;  %v2456_v63 = vrot.slane %v2315_v35, %v10044_v29  ;;  %v2463_v55 = vrot.slane %v2315_v35, %v10040_v26  ;;  %v2470_v48 = vrot.slane %v2315_v35, %v10047_v31 }
0x1fd2   :  { %2423 = vbcast.lane.b32.xlu0 %v2421_v11, 256 }
0x1fd6   :  { %2430 = vbcast.lane.b32.xlu0 %v2428_v50, 256 }
0x1fda   :  { %2437 = vbcast.lane.b32.xlu0 %v2435_v61, 256 }
0x1fde   :  { %2444 = vbcast.lane.b32.xlu0 %v2442_v38, 256 }
0x1fe2   :  { %2451 = vbcast.lane.b32.xlu0 %v2449_v57, 256  ;;  %v10982_v57 = vld [vmem:[#allocation3] sm:$0xff] }
0x1fe6   :  { %2458 = vbcast.lane.b32.xlu0 %v2456_v63, 256 }
0x1fea   :  { %2465 = vbcast.lane.b32.xlu0 %v2463_v55, 256 }
0x1fee   :  { %2472 = vbcast.lane.b32.xlu0 %v2470_v48, 256  ;;  %v10986_v48 = vld [vmem:[#allocation3 + $0x18] sm:$0xff] }
0x200c   :  { %2267 = vxpose.xlu0.b32.start.end [1/1] (short) (narrow) %v2265_v0, 8 }
0x2044   :  { %v2424_v2 = vpop.permute.xlu0 %2423 }
0x2045   :  { %v2474_v63 = vmul.f32 %v2424_v2, %v10982_v57 }
0x2048   :  { %v2431_v7 = vpop.permute.xlu0 %2430 }
0x2049   :  { %v2475_v35 = vmul.f32 %v2431_v7, %v10581_v8 }
0x204c   :  { %v2438_v37 = vpop.permute.xlu0 %2437 }
0x204d   :  { %v2476_v55 = vmul.f32 %v2438_v37, %v10844_v41 }
0x204f   :  { %v2485_v7 = vsel %vm106_vm1, %v2476_v55, 0.0 }
0x2050   :  { %v2445_v33 = vpop.permute.xlu0 %2444 }
0x2054   :  { %v2452_v54 = vpop.permute.xlu0 %2451 }
0x2058   :  { %v2459_v3 = vpop.permute.xlu0 %2458 }
0x205c   :  { %v2466_v10 = vpop.permute.xlu0 %2465 }
0x2060   :  { %v2473_v53 = vpop.permute.xlu0 %2472 }
0x2088   :  { %v2283_v11 = vpop.trf.xlu0 }
0x2089   :  { %v2349_v50 = vrot.slane %v2283_v11, %v13316_v20  ;;  %v2342_v61 = vrot.slane %v2283_v11, %v10028_v17  ;;  %v2356_v38 = vrot.slane %v2283_v11, %v13320_v62  ;;  %v2363_v0 = vrot.slane %v2283_v11, %v13321_v12 }
0x208a   :  { %v2477_v62 = vmul.f32 %v2445_v33, %v10986_v48  ;;  %v2478_v12 = vmul.f32 %v2452_v54, %v10588_v16  ;;  %v2377_v2 = vrot.slane %v2283_v11, %v10044_v29  ;;  %v2479_v20 = vmul.f32 %v2459_v3, %v10593_v46 }
0x208b   :  { %2351 = vbcast.lane.b32.xlu0 %v2349_v50, 256  ;;  %2344 = vbcast.lane.b32.xlu1 %v2342_v61, 256  ;;  %v2370_v50 = vrot.slane %v2283_v11, %v10034_v22  ;;  %v2483_v61 = vsel %vm106_vm1, %v2475_v35, 0.0  ;;  %v2480_v33 = vmul.f32 %v2466_v10, %v10598_v49  ;;  %v2481_v54 = vmul.f32 %v2473_v53, %v10603_v59 }
0x208c   :  { %v2487_v37 = vsel %vm106_vm1, %v2477_v62, 0.0  ;;  %v2489_v35 = vsel %vm106_vm1, %v2478_v12, 0.0  ;;  %v2491_v55 = vsel %vm106_vm1, %v2479_v20, 0.0  ;;  %v2391_v3 = vrot.slane %v2283_v11, %v10047_v31 }
0x208f   :  { %2681 = vrot.lane.b32.xlu0 %v10930_v6, %s9839_s28  ;;  %2358 = vbcast.lane.b32.xlu1 %v2356_v38, 256  ;;  %v2482_v38 = vsel %vm106_vm1, %v2474_v63, 0.0  ;;  %v2384_v63 = vrot.slane %v2283_v11, %v10040_v26 }
0x2093   :  { %2365 = vbcast.lane.b32.xlu1 %v2363_v0, 256  ;;  %v2484_v0 = vadd.f32 %v2483_v61, %v2482_v38  ;;  %v2493_v38 = vsel %vm106_vm1, %v2480_v33, 0.0 }
0x2095   :  { %v2486_v17 = vadd.f32 %v2485_v7, %v2484_v0  ;;  %v2495_v7 = vsel %vm106_vm1, %v2481_v54, 0.0 }
0x2097   :  { %2372 = vbcast.lane.b32.xlu1 %v2370_v50, 256  ;;  %v2488_v50 = vadd.f32 %v2487_v37, %v2486_v17 }
0x2099   :  { %v2490_v61 = vadd.f32 %v2489_v35, %v2488_v50 }
0x209b   :  { %2379 = vbcast.lane.b32.xlu1 %v2377_v2, 256  ;;  %v2492_v62 = vadd.f32 %v2491_v55, %v2490_v61 }
0x209d   :  { %v2494_v0 = vadd.f32 %v2493_v38, %v2492_v62 }
0x209f   :  { %2386 = vbcast.lane.b32.xlu1 %v2384_v63, 256  ;;  %v2496_v12 = vadd.f32 %v2495_v7, %v2494_v0 }
0x20a3   :  { %2393 = vbcast.lane.b32.xlu1 %v2391_v3, 256 }
0x20a7   :  { %2498 = vrot.lane.b32.xlu1 %v2496_v12, %s13319_s8 }
0x20fd   :  { %v2345_v17 = vpop.permute.xlu1 %2344  ;;  %v2352_v2 = vpop.permute.xlu0 %2351 }
0x20fe   :  { %v2396_v53 = vmul.f32 %v2352_v2, %v10581_v8  ;;  %v2395_v37 = vmul.f32 %v2345_v17, %v10982_v57 }
0x2100   :  { %v2404_v11 = vsel %vm106_vm1, %v2396_v53, 0.0  ;;  %v2403_v50 = vsel %vm106_vm1, %v2395_v37, 0.0 }
0x2101   :  { %v2359_v10 = vpop.permute.xlu1 %2358  ;;  %v2405_v61 = vadd.f32 %v2404_v11, %v2403_v50 }
0x2102   :  { %v2397_v35 = vmul.f32 %v2359_v10, %v10844_v41 }
0x2104   :  { %v2406_v55 = vsel %vm106_vm1, %v2397_v35, 0.0 }
0x2105   :  { %v2366_v20 = vpop.permute.xlu1 %2365  ;;  %v2407_v3 = vadd.f32 %v2406_v55, %v2405_v61 }
0x2106   :  { %v2398_v63 = vmul.f32 %v2366_v20, %v10986_v48 }
0x2108   :  { %v2408_v62 = vsel %vm106_vm1, %v2398_v63, 0.0 }
0x2109   :  { %v2373_v33 = vpop.permute.xlu1 %2372  ;;  %v2409_v0 = vadd.f32 %v2408_v62, %v2407_v3 }
0x210a   :  { %v2399_v54 = vmul.f32 %v2373_v33, %v10588_v16 }
0x210c   :  { %v2410_v7 = vsel %vm106_vm1, %v2399_v54, 0.0 }
0x210d   :  { %v2380_v38 = vpop.permute.xlu1 %2379  ;;  %v2411_v2 = vadd.f32 %v2410_v7, %v2409_v0 }
0x210e   :  { %v2400_v8 = vmul.f32 %v2380_v38, %v10593_v46 }
0x2110   :  { %v2412_v17 = vsel %vm106_vm1, %v2400_v8, 0.0 }
0x2111   :  { %v2387_v12 = vpop.permute.xlu1 %2386  ;;  %v2413_v53 = vadd.f32 %v2412_v17, %v2411_v2  ;;  %v8802_v17 = vld [vmem:[%s13313_s10 + $0x28] sm:$0xff] }
0x2112   :  { %v2401_v10 = vmul.f32 %v2387_v12, %v10598_v49 }
0x2114   :  { %v2414_v20 = vsel %vm106_vm1, %v2401_v10, 0.0  ;;  %v2725_v10 = vsub.f32 1.0, %v8802_v17 }
0x2115   :  { %v2394_v16 = vpop.permute.xlu1 %2393  ;;  %v2415_v35 = vadd.f32 %v2414_v20, %v2413_v53 }
0x2116   :  { %v2402_v37 = vmul.f32 %v2394_v16, %v10603_v59  ;;  %v2726_v2 = vmul.f32 1e+30, %v2725_v10 }
0x2118   :  { %v2416_v33 = vsel %vm106_vm1, %v2402_v37, 0.0 }
0x2119   :  { %v2417_v46 = vadd.f32 %v2416_v33, %v2415_v35  ;;  %v2499_v11 = vpop.permute.xlu1 %2498 }
0x211b   :  { %v2501_v50 = vsel %vm106_vm1, %v2417_v46, %v2499_v11 }
0x211c   :  { %9240 = vmatmul.mubr.msk.f32.vlgmr.msra.gmra.mxu1 %vm572_vm3, %v2501_v50 }
0x211d   :  { %9243 = vmatpush3.msra.mxu1 %v10634_v18  ;;  %9258 = vmatprep.mubr.msk.f32.mxu1 %vm9837_vm2, %v13315_v4 }
0x211e   :  { %9244 = vmatprep.subr.mxu1 %v13315_v4 }
0x211f   :  { %9245 = vmatpush3.msra.mxu1 %v10643_v45 }
0x2120   :  { %9246 = vmatprep.subr.mxu1 %v13315_v4 }
0x2121   :  { %9247 = vmatpush3.msra.mxu1 %v10650_v47 }
0x2122   :  { %9248 = vmatprep.subr.mxu1 %v13315_v4 }
0x2123   :  { %9249 = vmatpush3.msra.mxu1 %v10657_v51 }
0x2124   :  { %9250 = vmatprep.subr.mxu1 %v13315_v4 }
0x2125   :  { %9251 = vmatpush3.msra.mxu1 %v10664_v52 }
0x2126   :  { %9252 = vmatprep.subr.mxu1 %v13315_v4 }
0x2127   :  { %9253 = vmatpush3.msra.mxu1 %v10671_v44 }
0x2128   :  { %9254 = vmatprep.subr.mxu1 %v13315_v4 }
0x2129   :  { %9255 = vmatpush3.msra.mxu1 %v10678_v56 }
0x212a   :  { %9256 = vmatprep.subr.mxu1 %v13315_v4 }
0x212b   :  { %9257 = vmatpush3.msra.mxu1 %v10685_v58 }
0x212c   :  { %9261 = vmatprep.subr.mxu1 %v13315_v4 }
0x21dc   :  { %v2571_v49 = vpop.f32.mrf.mxu1 }
0x21dd   :  { %2576 = vrot.lane.b32.xlu1 %v2571_v49, %s13319_s8 }
0x21de   :  { %v9241_v59 = vpop.f32.mrf.mxu1 }
0x224f   :  { %v2577_v18 = vpop.permute.xlu1 %2576 }
0x2250   :  { %v2579_v45 = vsel %vm106_vm1, %v10930_v6, %v2577_v18 }
0x2251   :  { %8799 = vmatmul.mubr.msk.f32.vlgmr.msra.gmra.mxu0 %vm572_vm3, %v2579_v45  ;;  %v8803_v45 = vld [vmem:[%s13298_s9 + $0x28] sm:$0xff] }
0x2252   :  { %3078 = vmatpush1.msra.mxu0 %v10699_v19  ;;  %3125 = vmatprep.mubr.f32.mxu0 %v13315_v4 }
0x2253   :  { %3079 = vmatprep.subr.mxu0 %v10706_v23 }
0x2254   :  { %3080 = vmatpush1.msra.mxu0 %v10712_v60  ;;  %v2682_v60 = vpop.permute.xlu0 %2681 }
0x2255   :  { %3081 = vmatprep.subr.mxu0 %v10718_v36 }
0x2256   :  { %3082 = vmatpush1.msra.mxu0 %v10724_v13  ;;  %v11067_v13 = vld [vmem:[#allocation2 + $0x28] sm:$0xff] }
0x2257   :  { %3083 = vmatprep.subr.mxu0 %v10730_v30  ;;  %v2711_v30 = vmul.f32 %v10935_v9, %v11067_v13 }
0x2258   :  { %3084 = vmatpush1.msra.mxu0 %v10736_v15 }
0x2259   :  { %3085 = vmatprep.subr.mxu0 %v10742_v1  ;;  %v2712_v15 = vsel %vm106_vm1, %v2711_v30, 0.0 }
0x225a   :  { %3086 = vmatpush1.msra.mxu0 %v10748_v25 }
0x225b   :  { %3087 = vmatprep.subr.mxu0 %v10754_v14 }
0x225c   :  { %3088 = vmatpush1.msra.mxu0 %v10760_v42 }
0x225d   :  { %3089 = vmatprep.subr.mxu0 %v10766_v27 }
0x225e   :  { %3090 = vmatpush1.msra.mxu0 %v10772_v21 }
0x225f   :  { %3091 = vmatprep.subr.mxu0 %v10778_v43 }
0x2260   :  { %3092 = vmatpush1.msra.mxu0 %v10784_v40 }
0x2261   :  { %3555 = vmatprep.subr.mxu0 %v10790_v24 }
0x2311   :  { %v2649_v47 = vpop.f32.mrf.mxu0 }
0x2312   :  { %v2650_v51 = vadd.f32 %v2649_v47, %v10380_v34 }
0x2313   :  { %v2651_v52 = vpop.f32.mrf.mxu0 }
0x2314   :  { %v8800_v44 = vmul.f32 -1.442695, %v2650_v51  ;;  %v2652_v56 = vadd.f32 %v2651_v52, %v10375_v28 }
0x2316   :  { %9612 = vpow2.f32 %v8800_v44  ;;  %2661 = vrot.lane.b32.xlu1 %v2652_v56, %s9839_s28 }
0x2323   :  { %v9613_v58 = vpop.eup %9612 }
0x2324   :  { %v2657_v19 = vadd.f32 1.0, %v9613_v58  ;;  %v13322_v58 = vld [vmem:[#allocation10_spill] sm:$0xff] }
0x2326   :  { %9614 = vrcp.f32 %v2657_v19 }
0x2333   :  { %v9615_v23 = vpop.eup %9614 }
0x2334   :  { %v2684_v36 = vmul.f32 %v9615_v23, %v2682_v60  ;;  %v2667_v40 = vsub.f32 1.0, %v9615_v23  ;;  %v2673_v63 = vmul.f32 %v9615_v23, %v2577_v18 }
0x2336   :  { %2686 = vrot.lane.b32.xlu0 %v2684_v36, %s9840_s0  ;;  %v13324_v36 = vld [vmem:[#allocation11_spill] sm:$0xff] }
0x2355   :  { %2713 = vadd.xlane.f32.xlu0 %v2712_v15  ;;  %v13325_v15 = vld [vmem:[#allocation13_spill] sm:$0xff] }
0x2388   :  { %v2662_v1 = vpop.permute.xlu1 %2661 }
0x2389   :  { %v2664_v25 = vmul.f32 %v9615_v23, %v2662_v1  ;;  %v13323_v23 = vld [vmem:[#allocation9_spill] sm:$0xff] }
0x238b   :  { %v2665_v14 = vadd.f32 %v2664_v25, %v2652_v56 }
0x238d   :  { %9616 = vtanh.f32 %v2665_v14 }
0x239a   :  { %v9617_v42 = vpop.eup %9616 }
0x239b   :  { %2669 = vrot.lane.b32.xlu1 %v9617_v42, %s13319_s8 }
0x23a8   :  { %v2687_v27 = vpop.permute.xlu0 %2686 }
0x23de   :  { %v2714_v21 = vpop.xlane.xlu0 %2713 }
0x23df   :  { %v2715_v43 = vadd.f32 %v10944_v5, %v2714_v21 }
0x23e1   :  { %2719 = vperm.xlu0 %9566, %v2715_v43  }
0x240d   :  { %v2670_v24 = vpop.permute.xlu1 %2669 }
0x240e   :  { %v2672_v6 = vmul.f32 %v2670_v24, %v2667_v40 }
0x2410   :  { %2676 = vrot.lane.b32.xlu1 %v2672_v6, %s9840_s0  ;;  %v2674_v55 = vadd.f32 %v2673_v63, %v2672_v6 }
0x245c   :  { %v2720_v8 = vpop.permute.xlu0 %2719 }
0x2482   :  { %v2677_v54 = vpop.permute.xlu1 %2676 }
0x2483   :  { %v2679_v61 = vadd.f32 %v2677_v54, %v2674_v55 }
0x2485   :  { %v2689_v38 = vadd.f32 %v2687_v27, %v2679_v61 }
0x2487   :  { %v2696_v62 = vmul.f32 %v2689_v38, %v10394_v39  ;;  %2691 = vrot.lane.b32.xlu0 %v2689_v38, %s9839_s28 }
0x2489   :  { %2698 = vrot.lane.b32.xlu1 %v2696_v62, %s9839_s28 }
0x24f9   :  { %v2692_v3 = vpop.permute.xlu0 %2691 }
0x24fa   :  { %2695 = vst.msk [vmem:[#allocation3 + $0x20] sm:$0xff] %vm106_vm1, %v2692_v3  ;;  %v11109_v3 = vld [vmem:[#allocation3 + $0x8] sm:$0xff] }
0x24fb   :  { %v2699_v7 = vpop.permute.xlu1 %2698 }
0x24fc   :  { %v2701_v0 = vsel %vm106_vm1, %v2699_v7, 0.0 }
0x24fd   :  { %2702 = vadd.xlane.f32.xlu1 %v2701_v0 }
0x2586   :  { %v2703_v12 = vpop.xlane.xlu1 %2702 }
0x2587   :  { %2705 = vst.msk [vmem:[#allocation5] sm:$0xff] %vm2704_vm12, %v2703_v12 }
0x258e   :  { %v2716_v20 = vld [vmem:[#allocation5] sm:$0xff] }
0x258f   :  { %v2722_v53 = vadd.f32 %v2720_v8, %v2716_v20 }
0x2591   :  { %v2727_v16 = vsub.f32 %v2722_v53, %v2726_v2  ;;  %v11118_v53 = vld [vmem:[#allocation3 + $0x20] sm:$0xff] }
0x2593   :  { %v2729_v37 = vsel %vm2728_vm13, %v2727_v16, -1e+37  ;;  %v2814_v16 = vld [vmem:[#allocation3 + $0x28] sm:$0xff] }
0x2594   :  { %v2730_v35 = vsel %vm290_vm0, %v2729_v37, -inf }
0x2595   :  { %2731 = vmax.xlane.f32.xlu1 %v2730_v35 }
0x261e   :  { %v2732_v33 = vpop.xlane.xlu1 %2731 }
0x261f   :  { %v2733_v46 = vsub.f32 %v2729_v37, %v2732_v33 }
0x2621   :  { %v2734_v11 = vmul.f32 1.442695, %v2733_v46 }
0x2623   :  { %9618 = vpow2.f32 %v2734_v11  ;;  %v11123_v11 = vld [vmem:[#allocation3 + $0x30] sm:$0xff] }
0x2630   :  { %v9619_v50 = vpop.eup %9618 }
0x2631   :  { %v2736_v49 = vsel %vm290_vm0, %v9619_v50, 0.0 }
0x2632   :  { %2737 = vadd.xlane.f32.xlu1 %v2736_v49 }
0x26bb   :  { %v2738_v59 = vpop.xlane.xlu1 %2737 }
0x26bc   :  { %9620 = vrcp.f32 %v2738_v59 }
0x26c9   :  { %v9621_v18 = vpop.eup %9620 }
0x26ca   :  { %v2740_v47 = vmul.f32 %v9621_v18, %v9619_v50 }
0x26cc   :  { %v2743_v51 = vmul.f32 %v8803_v45, %v2740_v47  ;;  %v3184_v52 = vsel %vm2728_vm13, %v2740_v47, 0.0  ;;  %v11127_v45 = vld [vmem:[#allocation3 + $0x38] sm:$0xff] }
0x26cd   :  { %8807 = vst.msk [vmem:[%s13314_s7 + $0x28] sm:$0xff] %vm290_vm0, %v3184_v52 }
0x26ce   :  { %v2744_v44 = vsub.f32 %v2740_v47, %v2743_v51 }
0x26d0   :  { %2777 = vxpose.xlu1.b32.start.end [1/1] (short) (narrow) %v2744_v44, 8 }
0x274c   :  { %v2793_v56 = vpop.trf.xlu1 }
0x274d   :  { %v2899_v19 = vrot.slane %v2793_v56, %v13322_v58  ;;  %v2906_v60 = vrot.slane %v2793_v56, %v13323_v23  ;;  %v2913_v30 = vrot.slane %v2793_v56, %v13324_v36  ;;  %v2920_v1 = vrot.slane %v2793_v56, %v13325_v15 }
0x274e   :  { %v2927_v25 = vrot.slane %v2793_v56, %v10034_v22  ;;  %v2934_v14 = vrot.slane %v2793_v56, %v10044_v29  ;;  %v2941_v42 = vrot.slane %v2793_v56, %v10040_v26  ;;  %v2948_v27 = vrot.slane %v2793_v56, %v10047_v31 }
0x274f   :  { %2901 = vbcast.lane.b32.xlu0 %v2899_v19, 256 }
0x2753   :  { %2908 = vbcast.lane.b32.xlu0 %v2906_v60, 256 }
0x2757   :  { %2915 = vbcast.lane.b32.xlu0 %v2913_v30, 256 }
0x275b   :  { %2922 = vbcast.lane.b32.xlu0 %v2920_v1, 256 }
0x275f   :  { %2929 = vbcast.lane.b32.xlu0 %v2927_v25, 256 }
0x2763   :  { %2936 = vbcast.lane.b32.xlu0 %v2934_v14, 256 }
0x2767   :  { %2943 = vbcast.lane.b32.xlu0 %v2941_v42, 256 }
0x276b   :  { %2950 = vbcast.lane.b32.xlu0 %v2948_v27, 256 }
0x2789   :  { %2745 = vxpose.xlu0.b32.start.end [1/1] (short) (narrow) %v2743_v51, 8 }
0x27c1   :  { %v2902_v21 = vpop.permute.xlu0 %2901 }
0x27c2   :  { %v2952_v12 = vmul.f32 %v2902_v21, %v10982_v57 }
0x27c4   :  { %v2960_v37 = vsel %vm106_vm1, %v2952_v12, 0.0 }
0x27c5   :  { %v2909_v43 = vpop.permute.xlu0 %2908 }
0x27c6   :  { %v2953_v0 = vmul.f32 %v2909_v43, %v11109_v3 }
0x27c8   :  { %v2961_v2 = vsel %vm106_vm1, %v2953_v0, 0.0 }
0x27c9   :  { %v2916_v40 = vpop.permute.xlu0 %2915  ;;  %v2962_v46 = vadd.f32 %v2961_v2, %v2960_v37 }
0x27ca   :  { %v2954_v17 = vmul.f32 %v2916_v40, %v10844_v41 }
0x27cc   :  { %v2963_v35 = vsel %vm106_vm1, %v2954_v17, 0.0 }
0x27cd   :  { %v2923_v24 = vpop.permute.xlu0 %2922  ;;  %v2964_v18 = vadd.f32 %v2963_v35, %v2962_v46 }
0x27ce   :  { %v2955_v20 = vmul.f32 %v2923_v24, %v10986_v48 }
0x27d0   :  { %v2965_v49 = vsel %vm106_vm1, %v2955_v20, 0.0 }
0x27d1   :  { %v2930_v6 = vpop.permute.xlu0 %2929  ;;  %v2966_v52 = vadd.f32 %v2965_v49, %v2964_v18 }
0x27d2   :  { %v2956_v33 = vmul.f32 %v2930_v6, %v11118_v53 }
0x27d4   :  { %v2967_v47 = vsel %vm106_vm1, %v2956_v33, 0.0 }
0x27d5   :  { %v2937_v63 = vpop.permute.xlu0 %2936  ;;  %v2968_v60 = vadd.f32 %v2967_v47, %v2966_v52 }
0x27d6   :  { %v2957_v59 = vmul.f32 %v2937_v63, %v2814_v16 }
0x27d8   :  { %v2969_v56 = vsel %vm106_vm1, %v2957_v59, 0.0 }
0x27d9   :  { %v2944_v55 = vpop.permute.xlu0 %2943  ;;  %v2970_v1 = vadd.f32 %v2969_v56, %v2968_v60  ;;  %v11158_v56 = vld [vmem:[%s13304_s4 + $0x38] sm:$0xff]  ;;  %v11174_v60 = vld [vmem:[%s13304_s4 + $0x28] sm:$0xff] }
0x27da   :  { %v2958_v51 = vmul.f32 %v2944_v55, %v11123_v11 }
0x27dc   :  { %v2971_v30 = vsel %vm106_vm1, %v2958_v51, 0.0 }
0x27dd   :  { %v2951_v54 = vpop.permute.xlu0 %2950  ;;  %v2972_v42 = vadd.f32 %v2971_v30, %v2970_v1  ;;  %v11181_v30 = vld [vmem:[%s13304_s4 + $0x20] sm:$0xff]  ;;  %v11188_v1 = vld [vmem:[%s13304_s4 + $0x18] sm:$0xff] }
0x27de   :  { %v2959_v19 = vmul.f32 %v2951_v54, %v11127_v45 }
0x27e0   :  { %v2973_v14 = vsel %vm106_vm1, %v2959_v19, 0.0  ;;  %v11167_v19 = vld [vmem:[%s13304_s4 + $0x30] sm:$0xff] }
0x27e1   :  { %v2974_v27 = vadd.f32 %v2973_v14, %v2972_v42  ;;  %v11202_v14 = vld [vmem:[%s13304_s4 + $0x8] sm:$0xff]  ;;  %v11209_v42 = vld [vmem:[%s13304_s4] sm:$0xff] }
0x2805   :  { %v2761_v61 = vpop.trf.xlu0 }
0x2806   :  { %v2827_v38 = vrot.slane %v2761_v61, %v13323_v23  ;;  %v2820_v62 = vrot.slane %v2761_v61, %v13322_v58  ;;  %v2834_v8 = vrot.slane %v2761_v61, %v13324_v36  ;;  %v2841_v7 = vrot.slane %v2761_v61, %v13325_v15 }
0x2807   :  { %v2848_v10 = vrot.slane %v2761_v61, %v10034_v22  ;;  %v2855_v50 = vrot.slane %v2761_v61, %v10044_v29  ;;  %v2862_v44 = vrot.slane %v2761_v61, %v10040_v26  ;;  %v2869_v25 = vrot.slane %v2761_v61, %v10047_v31 }
0x2808   :  { %2829 = vbcast.lane.b32.xlu0 %v2827_v38, 256  ;;  %2822 = vbcast.lane.b32.xlu1 %v2820_v62, 256 }
0x280c   :  { %2836 = vbcast.lane.b32.xlu1 %v2834_v8, 256 }
0x2810   :  { %2843 = vbcast.lane.b32.xlu1 %v2841_v7, 256 }
0x2814   :  { %2850 = vbcast.lane.b32.xlu1 %v2848_v10, 256 }
0x2818   :  { %2857 = vbcast.lane.b32.xlu1 %v2855_v50, 256 }
0x281c   :  { %2864 = vbcast.lane.b32.xlu1 %v2862_v44, 256 }
0x2820   :  { %2871 = vbcast.lane.b32.xlu1 %v2869_v25, 256  ;;  %v11195_v25 = vld [vmem:[%s13304_s4 + $0x10] sm:$0xff] }
0x2824   :  { %2976 = vrot.lane.b32.xlu1 %v2974_v27, %s13319_s8 }
0x287a   :  { %v2823_v21 = vpop.permute.xlu1 %2822  ;;  %v2830_v40 = vpop.permute.xlu0 %2829 }
0x287b   :  { %v2874_v6 = vmul.f32 %v2830_v40, %v11109_v3  ;;  %v2873_v63 = vmul.f32 %v2823_v21, %v10982_v57 }
0x287d   :  { %v2882_v61 = vsel %vm106_vm1, %v2874_v6, 0.0  ;;  %v2881_v38 = vsel %vm106_vm1, %v2873_v63, 0.0  ;;  %v11230_v6 = vld [vmem:[%s13307_s5 + $0x68] sm:$0xff]  ;;  %v11236_v63 = vld [vmem:[%s13307_s5 + $0x60] sm:$0xff] }
0x287e   :  { %v2837_v43 = vpop.permute.xlu1 %2836  ;;  %v2883_v0 = vadd.f32 %v2882_v61, %v2881_v38  ;;  %v11254_v61 = vld [vmem:[%s13307_s5 + $0x48] sm:$0xff]  ;;  %v11260_v38 = vld [vmem:[%s13307_s5 + $0x40] sm:$0xff] }
0x287f   :  { %v2875_v55 = vmul.f32 %v2837_v43, %v10844_v41 }
0x2881   :  { %v2884_v8 = vsel %vm106_vm1, %v2875_v55, 0.0  ;;  %v11242_v55 = vld [vmem:[%s13307_s5 + $0x58] sm:$0xff] }
0x2882   :  { %v2844_v24 = vpop.permute.xlu1 %2843  ;;  %v2885_v2 = vadd.f32 %v2884_v8, %v2883_v0  ;;  %v11272_v8 = vld [vmem:[%s13307_s5 + $0x30] sm:$0xff]  ;;  %v11284_v0 = vld [vmem:[%s13307_s5 + $0x20] sm:$0xff] }
0x2883   :  { %v2876_v62 = vmul.f32 %v2844_v24, %v10986_v48  ;;  %v11223_v24 = vld [vmem:[%s13307_s5 + $0x70] sm:$0xff] }
0x2885   :  { %v2886_v17 = vsel %vm106_vm1, %v2876_v62, 0.0  ;;  %v11266_v62 = vld [vmem:[%s13307_s5 + $0x38] sm:$0xff] }
0x2886   :  { %v2851_v54 = vpop.permute.xlu1 %2850  ;;  %v2887_v41 = vadd.f32 %v2886_v17, %v2885_v2  ;;  %v11296_v17 = vld [vmem:[%s13307_s5 + $0x10] sm:$0xff]  ;;  %v11308_v2 = vld [vmem:[%s13307_s5] sm:$0xff] }
0x2887   :  { %v2877_v7 = vmul.f32 %v2851_v54, %v11118_v53  ;;  %v11248_v54 = vld [vmem:[%s13307_s5 + $0x50] sm:$0xff] }
0x2889   :  { %v2888_v20 = vsel %vm106_vm1, %v2877_v7, 0.0  ;;  %v11278_v7 = vld [vmem:[%s13307_s5 + $0x28] sm:$0xff] }
0x288a   :  { %v2858_v12 = vpop.permute.xlu1 %2857  ;;  %v2889_v46 = vadd.f32 %v2888_v20, %v2887_v41  ;;  %v9777_v20 = vld [vmem:[%s13307_s5 + $0x78] sm:$0xff] }
0x288b   :  { %v2878_v10 = vmul.f32 %v2858_v12, %v2814_v16  ;;  %v11290_v12 = vld [vmem:[%s13307_s5 + $0x18] sm:$0xff] }
0x288d   :  { %v2890_v35 = vsel %vm106_vm1, %v2878_v10, 0.0  ;;  %v11302_v10 = vld [vmem:[%s13307_s5 + $0x8] sm:$0xff] }
0x288e   :  { %v2865_v37 = vpop.permute.xlu1 %2864  ;;  %v2891_v49 = vadd.f32 %v2890_v35, %v2889_v46 }
0x288f   :  { %v2879_v33 = vmul.f32 %v2865_v37, %v11123_v11 }
0x2891   :  { %v2892_v50 = vsel %vm106_vm1, %v2879_v33, 0.0 }
0x2892   :  { %v2872_v59 = vpop.permute.xlu1 %2871  ;;  %v2893_v47 = vadd.f32 %v2892_v50, %v2891_v49 }
0x2893   :  { %v2880_v18 = vmul.f32 %v2872_v59, %v11127_v45 }
0x2895   :  { %v2894_v51 = vsel %vm106_vm1, %v2880_v18, 0.0 }
0x2896   :  { %v2895_v16 = vadd.f32 %v2894_v51, %v2893_v47  ;;  %v2977_v52 = vpop.permute.xlu1 %2976 }
0x2898   :  { %v2979_v44 = vsel %vm106_vm1, %v2895_v16, %v2977_v52 }
0x2899   :  { %9259 = vmatmul.mubr.msk.f32.vlgmr.msra.gmra.mxu1 %vm572_vm3, %v2979_v44 }
0x289a   :  { %9262 = vmatpush3.msra.mxu1 %v11158_v56  ;;  %9277 = vmatprep.mubr.msk.f32.mxu1 %vm9837_vm2, %v13315_v4 }
0x289b   :  { %9263 = vmatprep.subr.mxu1 %v13315_v4 }
0x289c   :  { %9264 = vmatpush3.msra.mxu1 %v11167_v19 }
0x289d   :  { %9265 = vmatprep.subr.mxu1 %v13315_v4 }
0x289e   :  { %9266 = vmatpush3.msra.mxu1 %v11174_v60 }
0x289f   :  { %9267 = vmatprep.subr.mxu1 %v13315_v4 }
0x28a0   :  { %9268 = vmatpush3.msra.mxu1 %v11181_v30 }
0x28a1   :  { %9269 = vmatprep.subr.mxu1 %v13315_v4 }
0x28a2   :  { %9270 = vmatpush3.msra.mxu1 %v11188_v1 }
0x28a3   :  { %9271 = vmatprep.subr.mxu1 %v13315_v4 }
0x28a4   :  { %9272 = vmatpush3.msra.mxu1 %v11195_v25 }
0x28a5   :  { %9273 = vmatprep.subr.mxu1 %v13315_v4 }
0x28a6   :  { %9274 = vmatpush3.msra.mxu1 %v11202_v14 }
0x28a7   :  { %9275 = vmatprep.subr.mxu1 %v13315_v4 }
0x28a8   :  { %9276 = vmatpush3.msra.mxu1 %v11209_v42 }
0x28a9   :  { %9280 = vmatprep.subr.mxu1 %v13315_v4 }
0x2959   :  { %v3049_v27 = vpop.f32.mrf.mxu1 }
0x295a   :  { %3054 = vrot.lane.b32.xlu1 %v3049_v27, %s13319_s8 }
0x295b   :  { %v9260_v21 = vpop.f32.mrf.mxu1 }
0x29cc   :  { %v11214_v43 = vpop.permute.xlu1 %3054 }
0x29cd   :  { %v3057_v40 = vsel %vm106_vm1, %v11067_v13, %v11214_v43 }
0x29ce   :  { %8805 = vmatmul.mubr.msk.f32.vlgmr.msra.gmra.mxu0 %vm572_vm3, %v3057_v40 }
0x29cf   :  { %3556 = vmatpush1.msra.mxu0 %v11223_v24  ;;  %3603 = vmatprep.mubr.f32.mxu0 %v13315_v4 }
0x29d0   :  { %3557 = vmatprep.subr.mxu0 %v11230_v6 }
0x29d1   :  { %3558 = vmatpush1.msra.mxu0 %v11236_v63 }
0x29d2   :  { %3559 = vmatprep.subr.mxu0 %v11242_v55 }
0x29d3   :  { %3560 = vmatpush1.msra.mxu0 %v11248_v54 }
0x29d4   :  { %3561 = vmatprep.subr.mxu0 %v11254_v61 }
0x29d5   :  { %3562 = vmatpush1.msra.mxu0 %v11260_v38 }
0x29d6   :  { %3563 = vmatprep.subr.mxu0 %v11266_v62 }
0x29d7   :  { %3564 = vmatpush1.msra.mxu0 %v11272_v8 }
0x29d8   :  { %3565 = vmatprep.subr.mxu0 %v11278_v7 }
0x29d9   :  { %3566 = vmatpush1.msra.mxu0 %v11284_v0 }
0x29da   :  { %3567 = vmatprep.subr.mxu0 %v11290_v12 }
0x29db   :  { %3568 = vmatpush1.msra.mxu0 %v11296_v17 }
0x29dc   :  { %3569 = vmatprep.subr.mxu0 %v11302_v10 }
0x29dd   :  { %3570 = vmatpush1.msra.mxu0 %v11308_v2 }
0x29de   :  { %4033 = vmatprep.subr.mxu0 %v9777_v20 }
0x2a8e   :  { %v3127_v41 = vpop.f32.mrf.mxu0 }
0x2a8f   :  { %v3128_v33 = vadd.f32 %v3127_v41, %v10380_v34 }
0x2a90   :  { %v3129_v37 = vpop.f32.mrf.mxu0 }
0x2a91   :  { %v3130_v35 = vadd.f32 %v3129_v37, %v10375_v28  ;;  %v8806_v46 = vmul.f32 -1.442695, %v3128_v33 }
0x2a93   :  { %3139 = vrot.lane.b32.xlu1 %v3130_v35, %s9839_s28  ;;  %9622 = vpow2.f32 %v8806_v46 }
0x2a97   :  { %3159 = vrot.lane.b32.xlu1 %v11067_v13, %s9839_s28  ;;  %v11321_v13 = vld [vmem:[#allocation2 + $0x30] sm:$0xff] }
0x2a98   :  { %v3189_v27 = vmul.f32 %v10935_v9, %v11321_v13 }
0x2a9a   :  { %v3190_v21 = vsel %vm106_vm1, %v3189_v27, 0.0 }
0x2aa0   :  { %v9623_v50 = vpop.eup %9622 }
0x2aa1   :  { %v3135_v49 = vadd.f32 1.0, %v9623_v50 }
0x2aa3   :  { %9624 = vrcp.f32 %v3135_v49 }
0x2ab0   :  { %v9625_v59 = vpop.eup %9624 }
0x2ab1   :  { %v3145_v40 = vsub.f32 1.0, %v9625_v59  ;;  %v3151_v37 = vmul.f32 %v9625_v59, %v11214_v43 }
0x2b05   :  { %v3140_v18 = vpop.permute.xlu1 %3139 }
0x2b06   :  { %v3142_v47 = vmul.f32 %v9625_v59, %v3140_v18 }
0x2b08   :  { %v3143_v51 = vadd.f32 %v3142_v47, %v3130_v35 }
0x2b09   :  { %v3160_v16 = vpop.permute.xlu1 %3159 }
0x2b0a   :  { %9626 = vtanh.f32 %v3143_v51  ;;  %v3162_v52 = vmul.f32 %v9625_v59, %v3160_v16  ;;  %v8808_v59 = vld [vmem:[%s13313_s10 + $0x30] sm:$0xff] }
0x2b0c   :  { %3164 = vrot.lane.b32.xlu1 %v3162_v52, %s9840_s0  ;;  %v3203_v52 = vsub.f32 1.0, %v8808_v59 }
0x2b17   :  { %v9627_v44 = vpop.eup %9626 }
0x2b18   :  { %3147 = vrot.lane.b32.xlu0 %v9627_v44, %s13319_s8  ;;  %v3204_v44 = vmul.f32 1e+30, %v3203_v52 }
0x2b30   :  { %3191 = vadd.xlane.f32.xlu1 %v3190_v21 }
0x2b7e   :  { %v3165_v50 = vpop.permute.xlu1 %3164 }
0x2b8a   :  { %v3148_v20 = vpop.permute.xlu0 %3147 }
0x2b8b   :  { %v3150_v41 = vmul.f32 %v3148_v20, %v3145_v40 }
0x2b8d   :  { %3154 = vrot.lane.b32.xlu0 %v3150_v41, %s9840_s0  ;;  %v3152_v35 = vadd.f32 %v3151_v37, %v3150_v41 }
0x2bb9   :  { %v3192_v51 = vpop.xlane.xlu1 %3191 }
0x2bba   :  { %v3193_v16 = vadd.f32 %v10944_v5, %v3192_v51 }
0x2bff   :  { %v3155_v33 = vpop.permute.xlu0 %3154 }
0x2c00   :  { %v3157_v46 = vadd.f32 %v3155_v33, %v3152_v35 }
0x2c02   :  { %v3167_v49 = vadd.f32 %v3165_v50, %v3157_v46 }
0x2c04   :  { %v3174_v18 = vmul.f32 %v3167_v49, %v10394_v39 }
0x2c06   :  { %3176 = vrot.lane.b32.xlu0 %v3174_v18, %s9839_s28 }
0x2c78   :  { %v3177_v9 = vpop.permute.xlu0 %3176 }
0x2c79   :  { %v3179_v47 = vsel %vm106_vm1, %v3177_v9, 0.0 }
0x2c7a   :  { %3180 = vadd.xlane.f32.xlu0 %v3179_v47  ;;  %v8809_v47 = vld [vmem:[%s13298_s9 + $0x30] sm:$0xff] }
0x2c90   :  { %3197 = vperm.xlu0 %9566, %v3193_v16  }
0x2c94   :  { %3169 = vrot.lane.b32.xlu0 %v3167_v49, %s9839_s28 }
0x2d03   :  { %v3181_v43 = vpop.xlane.xlu0 %3180 }
0x2d04   :  { %3183 = vst.msk [vmem:[#allocation5] sm:$0xff] %vm13271_vm14, %v3181_v43  ;;  %vm13272_vm14 = vcmp.lt.s32.totalorder %v10419_v32, 7 }
0x2d0b   :  { %v3194_v27 = vld [vmem:[#allocation5] sm:$0xff]  ;;  %v3198_v21 = vpop.permute.xlu0 %3197 }
0x2d0c   :  { %v3200_v40 = vadd.f32 %v3198_v21, %v3194_v27 }
0x2d0e   :  { %v3205_v20 = vsub.f32 %v3200_v40, %v3204_v44 }
0x2d0f   :  { %v3170_v5 = vpop.permute.xlu0 %3169 }
0x2d10   :  { %3173 = vst.msk [vmem:[#allocation3 + $0x28] sm:$0xff] %vm106_vm1, %v3170_v5  ;;  %v3207_v41 = vsel %vm13270_vm15, %v3205_v20, -1e+37 }
0x2d11   :  { %v3208_v37 = vsel %vm290_vm0, %v3207_v41, -inf }
0x2d12   :  { %3209 = vmax.xlane.f32.xlu1 %v3208_v37 }
0x2d9b   :  { %v3210_v35 = vpop.xlane.xlu1 %3209 }
0x2d9c   :  { %v3211_v33 = vsub.f32 %v3207_v41, %v3210_v35 }
0x2d9e   :  { %v3212_v46 = vmul.f32 1.442695, %v3211_v33 }
0x2da0   :  { %9628 = vpow2.f32 %v3212_v46 }
0x2dad   :  { %v9629_v50 = vpop.eup %9628 }
0x2dae   :  { %v3214_v49 = vsel %vm290_vm0, %v9629_v50, 0.0 }
0x2daf   :  { %3215 = vadd.xlane.f32.xlu1 %v3214_v49 }
0x2e38   :  { %v3216_v18 = vpop.xlane.xlu1 %3215 }
0x2e39   :  { %9630 = vrcp.f32 %v3216_v18 }
0x2e46   :  { %v9631_v9 = vpop.eup %9630 }
0x2e47   :  { %v3218_v51 = vmul.f32 %v9631_v9, %v9629_v50 }
0x2e49   :  { %v3221_v16 = vmul.f32 %v8809_v47, %v3218_v51  ;;  %v3662_v43 = vsel %vm13270_vm15, %v3218_v51, 0.0  ;;  %vm3660_vm15 = vcmask 56368  }
0x2e4a   :  { %8813 = vst.msk [vmem:[%s13314_s7 + $0x30] sm:$0xff] %vm290_vm0, %v3662_v43 }
0x2e4b   :  { %v3222_v59 = vsub.f32 %v3218_v51, %v3221_v16 }
0x2e4d   :  { %3255 = vxpose.xlu1.b32.start.end [1/1] (short) (narrow) %v3222_v59, 8 }
0x2ec9   :  { %v3271_v52 = vpop.trf.xlu1 }
0x2eca   :  { %v3377_v44 = vrot.slane %v3271_v52, %v13322_v58  ;;  %v3384_v27 = vrot.slane %v3271_v52, %v13323_v23  ;;  %v3391_v21 = vrot.slane %v3271_v52, %v13324_v36  ;;  %v3398_v40 = vrot.slane %v3271_v52, %v13325_v15 }
0x2ecb   :  { %v3405_v20 = vrot.slane %v3271_v52, %v10034_v22  ;;  %v3412_v5 = vrot.slane %v3271_v52, %v10044_v29  ;;  %v3419_v41 = vrot.slane %v3271_v52, %v10040_v26  ;;  %v3426_v37 = vrot.slane %v3271_v52, %v10047_v31 }
0x2ecc   :  { %3379 = vbcast.lane.b32.xlu0 %v3377_v44, 256 }
0x2ed0   :  { %3386 = vbcast.lane.b32.xlu0 %v3384_v27, 256  ;;  %v11367_v27 = vld [vmem:[#allocation3 + $0x10] sm:$0xff] }
0x2ed4   :  { %3393 = vbcast.lane.b32.xlu0 %v3391_v21, 256 }
0x2ed8   :  { %3400 = vbcast.lane.b32.xlu0 %v3398_v40, 256 }
0x2edc   :  { %3407 = vbcast.lane.b32.xlu0 %v3405_v20, 256 }
0x2ee0   :  { %3414 = vbcast.lane.b32.xlu0 %v3412_v5, 256 }
0x2ee4   :  { %3421 = vbcast.lane.b32.xlu0 %v3419_v41, 256 }
0x2ee8   :  { %3428 = vbcast.lane.b32.xlu0 %v3426_v37, 256 }
0x2f06   :  { %3223 = vxpose.xlu0.b32.start.end [1/1] (short) (narrow) %v3221_v16, 8 }
0x2f3e   :  { %v3380_v35 = vpop.permute.xlu0 %3379 }
0x2f3f   :  { %v3430_v21 = vmul.f32 %v3380_v35, %v10982_v57 }
0x2f41   :  { %v3438_v37 = vsel %vm106_vm1, %v3430_v21, 0.0 }
0x2f42   :  { %v3387_v33 = vpop.permute.xlu0 %3386 }
0x2f43   :  { %v3431_v52 = vmul.f32 %v3387_v33, %v11109_v3 }
0x2f45   :  { %v3439_v5 = vsel %vm106_vm1, %v3431_v52, 0.0 }
0x2f46   :  { %v3394_v46 = vpop.permute.xlu0 %3393 }
0x2f47   :  { %v3432_v40 = vmul.f32 %v3394_v46, %v11367_v27 }
0x2f4a   :  { %v3401_v50 = vpop.permute.xlu0 %3400 }
0x2f4b   :  { %v3433_v41 = vmul.f32 %v3401_v50, %v10986_v48 }
0x2f4d   :  { %v3443_v46 = vsel %vm106_vm1, %v3433_v41, 0.0 }
0x2f4e   :  { %v3408_v49 = vpop.permute.xlu0 %3407 }
0x2f4f   :  { %v3434_v33 = vmul.f32 %v3408_v49, %v11118_v53 }
0x2f51   :  { %v3445_v50 = vsel %vm106_vm1, %v3434_v33, 0.0 }
0x2f52   :  { %v3415_v18 = vpop.permute.xlu0 %3414 }
0x2f56   :  { %v3422_v9 = vpop.permute.xlu0 %3421 }
0x2f57   :  { %v3436_v52 = vmul.f32 %v3422_v9, %v11123_v11 }
0x2f5a   :  { %v3429_v47 = vpop.permute.xlu0 %3428 }
0x2f82   :  { %v3239_v51 = vpop.trf.xlu0 }
0x2f83   :  { %v3305_v43 = vrot.slane %v3239_v51, %v13323_v23  ;;  %v3298_v59 = vrot.slane %v3239_v51, %v13322_v58  ;;  %v3312_v44 = vrot.slane %v3239_v51, %v13324_v36  ;;  %v3319_v16 = vrot.slane %v3239_v51, %v13325_v15 }
0x2f84   :  { %v3326_v20 = vrot.slane %v3239_v51, %v10034_v22  ;;  %v3333_v35 = vrot.slane %v3239_v51, %v10044_v29 }
0x2f85   :  { %3307 = vbcast.lane.b32.xlu0 %v3305_v43, 256  ;;  %3300 = vbcast.lane.b32.xlu1 %v3298_v59, 256  ;;  %v3441_v43 = vsel %vm106_vm1, %v3432_v40, 0.0  ;;  %v3440_v59 = vadd.f32 %v3439_v5, %v3438_v37  ;;  %v3340_v40 = vrot.slane %v3239_v51, %v10040_v26  ;;  %v3449_v37 = vsel %vm106_vm1, %v3436_v52, 0.0 }
0x2f87   :  { %v3442_v22 = vadd.f32 %v3441_v43, %v3440_v59 }
0x2f89   :  { %3637 = vrot.lane.b32.xlu0 %v11321_v13, %s9839_s28  ;;  %3314 = vbcast.lane.b32.xlu1 %v3312_v44, 256  ;;  %v11377_v44 = vld [vmem:[#allocation3 + $0x28] sm:$0xff]  ;;  %v3444_v21 = vadd.f32 %v3443_v46, %v3442_v22 }
0x2f8b   :  { %v3446_v5 = vadd.f32 %v3445_v50, %v3444_v21 }
0x2f8d   :  { %3321 = vbcast.lane.b32.xlu1 %v3319_v16, 256  ;;  %v3435_v16 = vmul.f32 %v3415_v18, %v11377_v44  ;;  %v3347_v18 = vrot.slane %v3239_v51, %v10047_v31 }
0x2f8f   :  { %v3447_v49 = vsel %vm106_vm1, %v3435_v16, 0.0 }
0x2f90   :  { %v3448_v41 = vadd.f32 %v3447_v49, %v3446_v5 }
0x2f91   :  { %3328 = vbcast.lane.b32.xlu1 %v3326_v20, 256  ;;  %v3437_v20 = vmul.f32 %v3429_v47, %v11127_v45 }
0x2f92   :  { %v3450_v59 = vadd.f32 %v3449_v37, %v3448_v41 }
0x2f93   :  { %v3451_v43 = vsel %vm106_vm1, %v3437_v20, 0.0 }
0x2f94   :  { %v3452_v33 = vadd.f32 %v3451_v43, %v3450_v59 }
0x2f95   :  { %3335 = vbcast.lane.b32.xlu1 %v3333_v35, 256 }
0x2f99   :  { %3342 = vbcast.lane.b32.xlu1 %v3340_v40, 256 }
0x2f9d   :  { %3349 = vbcast.lane.b32.xlu1 %v3347_v18, 256 }
0x2fa1   :  { %3454 = vrot.lane.b32.xlu1 %v3452_v33, %s13319_s8 }
0x2ff7   :  { %v3301_v22 = vpop.permute.xlu1 %3300  ;;  %v3308_v35 = vpop.permute.xlu0 %3307 }
0x2ff8   :  { %v3352_v47 = vmul.f32 %v3308_v35, %v11109_v3  ;;  %v3351_v16 = vmul.f32 %v3301_v22, %v10982_v57 }
0x2ffa   :  { %v3360_v51 = vsel %vm106_vm1, %v3352_v47, 0.0  ;;  %v3359_v21 = vsel %vm106_vm1, %v3351_v16, 0.0 }
0x2ffb   :  { %v3315_v9 = vpop.permute.xlu1 %3314  ;;  %v3361_v5 = vadd.f32 %v3360_v51, %v3359_v21 }
0x2ffc   :  { %v3353_v50 = vmul.f32 %v3315_v9, %v11367_v27 }
0x2ffe   :  { %v3362_v49 = vsel %vm106_vm1, %v3353_v50, 0.0 }
0x2fff   :  { %v3322_v46 = vpop.permute.xlu1 %3321  ;;  %v3363_v57 = vadd.f32 %v3362_v49, %v3361_v5 }
0x3000   :  { %v3354_v40 = vmul.f32 %v3322_v46, %v10986_v48 }
0x3002   :  { %v3364_v41 = vsel %vm106_vm1, %v3354_v40, 0.0 }
0x3003   :  { %v3329_v52 = vpop.permute.xlu1 %3328  ;;  %v3365_v59 = vadd.f32 %v3364_v41, %v3363_v57 }
0x3004   :  { %v3355_v20 = vmul.f32 %v3329_v52, %v11118_v53 }
0x3006   :  { %v3366_v43 = vsel %vm106_vm1, %v3355_v20, 0.0 }
0x3007   :  { %v3336_v37 = vpop.permute.xlu1 %3335  ;;  %v3367_v48 = vadd.f32 %v3366_v43, %v3365_v59 }
0x3008   :  { %v3356_v18 = vmul.f32 %v3336_v37, %v11377_v44 }
0x300a   :  { %v3368_v22 = vsel %vm106_vm1, %v3356_v18, 0.0 }
0x300b   :  { %v3343_v33 = vpop.permute.xlu1 %3342  ;;  %v3369_v46 = vadd.f32 %v3368_v22, %v3367_v48 }
0x300c   :  { %v3357_v9 = vmul.f32 %v3343_v33, %v11123_v11 }
0x300e   :  { %v3370_v35 = vsel %vm106_vm1, %v3357_v9, 0.0 }
0x300f   :  { %v3350_v47 = vpop.permute.xlu1 %3349  ;;  %v3371_v50 = vadd.f32 %v3370_v35, %v3369_v46 }
0x3010   :  { %v3358_v16 = vmul.f32 %v3350_v47, %v11127_v45  ;;  %v8814_v47 = vld [vmem:[%s13313_s10 + $0x38] sm:$0xff] }
0x3012   :  { %v3372_v52 = vsel %vm106_vm1, %v3358_v16, 0.0  ;;  %v3681_v16 = vsub.f32 1.0, %v8814_v47 }
0x3013   :  { %v3373_v51 = vadd.f32 %v3372_v52, %v3371_v50  ;;  %v3455_v21 = vpop.permute.xlu1 %3454 }
0x3014   :  { %v3682_v50 = vmul.f32 1e+30, %v3681_v16 }
0x3015   :  { %v3457_v40 = vsel %vm106_vm1, %v3373_v51, %v3455_v21 }
0x3016   :  { %9278 = vmatmul.mubr.msk.f32.vlgmr.msra.gmra.mxu1 %vm572_vm3, %v3457_v40 }
0x3017   :  { %9281 = vmatpush3.msra.mxu1 %v11158_v56  ;;  %9296 = vmatprep.mubr.msk.f32.mxu1 %vm9837_vm2, %v13315_v4 }
0x3018   :  { %9282 = vmatprep.subr.mxu1 %v13315_v4 }
0x3019   :  { %9283 = vmatpush3.msra.mxu1 %v11167_v19 }
0x301a   :  { %9284 = vmatprep.subr.mxu1 %v13315_v4 }
0x301b   :  { %9285 = vmatpush3.msra.mxu1 %v11174_v60 }
0x301c   :  { %9286 = vmatprep.subr.mxu1 %v13315_v4 }
0x301d   :  { %9287 = vmatpush3.msra.mxu1 %v11181_v30 }
0x301e   :  { %9288 = vmatprep.subr.mxu1 %v13315_v4 }
0x301f   :  { %9289 = vmatpush3.msra.mxu1 %v11188_v1 }
0x3020   :  { %9290 = vmatprep.subr.mxu1 %v13315_v4 }
0x3021   :  { %9291 = vmatpush3.msra.mxu1 %v11195_v25 }
0x3022   :  { %9292 = vmatprep.subr.mxu1 %v13315_v4 }
0x3023   :  { %9293 = vmatpush3.msra.mxu1 %v11202_v14 }
0x3024   :  { %9294 = vmatprep.subr.mxu1 %v13315_v4 }
0x3025   :  { %9295 = vmatpush3.msra.mxu1 %v11209_v42 }
0x3026   :  { %9299 = vmatprep.subr.mxu1 %v13315_v4 }
0x30d6   :  { %v3527_v11 = vpop.f32.mrf.mxu1 }
0x30d7   :  { %3532 = vrot.lane.b32.xlu1 %v3527_v11, %s13319_s8 }
0x30d8   :  { %v9279_v56 = vpop.f32.mrf.mxu1 }
0x30d9   :  { %v13326_v56 = vld [vmem:[#allocation8_spill] sm:$0xff] }
0x3149   :  { %v3533_v19 = vpop.permute.xlu1 %3532 }
0x314a   :  { %v3535_v60 = vsel %vm106_vm1, %v11321_v13, %v3533_v19  ;;  %v9779_v13 = vld [vmem:[#allocation6] ss:$0 sm:$0xff] }
0x314b   :  { %8811 = vmatmul.mubr.msk.f32.vlgmr.msra.gmra.mxu0 %vm572_vm3, %v3535_v60 }
0x314c   :  { %4034 = vmatpush1.msra.mxu0 %v11223_v24  ;;  %4081 = vmatprep.mubr.f32.mxu0 %v13315_v4 }
0x314d   :  { %4035 = vmatprep.subr.mxu0 %v11230_v6 }
0x314e   :  { %4036 = vmatpush1.msra.mxu0 %v11236_v63 }
0x314f   :  { %4037 = vmatprep.subr.mxu0 %v11242_v55  ;;  %v3638_v55 = vpop.permute.xlu0 %3637 }
0x3150   :  { %4038 = vmatpush1.msra.mxu0 %v11248_v54 }
0x3151   :  { %4039 = vmatprep.subr.mxu0 %v11254_v61  ;;  %v11451_v61 = vld [vmem:[#allocation2 + $0x38] sm:$0xff] }
0x3152   :  { %4040 = vmatpush1.msra.mxu0 %v11260_v38  ;;  %v9778_v38 = vld [vmem:[%s13312_s30] ss:$0 sm:$0xff] }
0x3153   :  { %4041 = vmatprep.subr.mxu0 %v11266_v62  ;;  %v3667_v62 = vmul.f32 %v9778_v38, %v11451_v61 }
0x3154   :  { %4042 = vmatpush1.msra.mxu0 %v11272_v8 }
0x3155   :  { %4043 = vmatprep.subr.mxu0 %v11278_v7  ;;  %v3668_v8 = vsel %vm106_vm1, %v3667_v62, 0.0 }
0x3156   :  { %4044 = vmatpush1.msra.mxu0 %v11284_v0 }
0x3157   :  { %4045 = vmatprep.subr.mxu0 %v11290_v12 }
0x3158   :  { %4046 = vmatpush1.msra.mxu0 %v11296_v17 }
0x3159   :  { %4047 = vmatprep.subr.mxu0 %v11302_v10 }
0x315a   :  { %4048 = vmatpush1.msra.mxu0 %v11308_v2 }
0x320b   :  { %v3605_v30 = vpop.f32.mrf.mxu0 }
0x320c   :  { %v3606_v1 = vadd.f32 %v3605_v30, %v10380_v34 }
0x320d   :  { %v3607_v25 = vpop.f32.mrf.mxu0 }
0x320e   :  { %v8812_v14 = vmul.f32 -1.442695, %v3606_v1  ;;  %v3608_v42 = vadd.f32 %v3607_v25, %v10375_v28 }
0x3210   :  { %9632 = vpow2.f32 %v8812_v14  ;;  %3617 = vrot.lane.b32.xlu1 %v3608_v42, %s9839_s28 }
0x321d   :  { %v9633_v24 = vpop.eup %9632 }
0x321e   :  { %v3613_v6 = vadd.f32 1.0, %v9633_v24 }
0x3220   :  { %9634 = vrcp.f32 %v3613_v6 }
0x322d   :  { %v9635_v63 = vpop.eup %9634 }
0x322e   :  { %v3640_v54 = vmul.f32 %v9635_v63, %v3638_v55  ;;  %v3623_v20 = vsub.f32 1.0, %v9635_v63  ;;  %v3629_v41 = vmul.f32 %v9635_v63, %v3533_v19 }
0x3230   :  { %3642 = vrot.lane.b32.xlu0 %v3640_v54, %s9840_s0 }
0x324f   :  { %3669 = vadd.xlane.f32.xlu0 %v3668_v8 }
0x3282   :  { %v3618_v7 = vpop.permute.xlu1 %3617 }
0x3283   :  { %v3620_v0 = vmul.f32 %v9635_v63, %v3618_v7 }
0x3285   :  { %v3621_v12 = vadd.f32 %v3620_v0, %v3608_v42  ;;  %v4221_v0 = vld [vmem:[%s13298_s9] sm:$0xff] }
0x3287   :  { %9636 = vtanh.f32 %v3621_v12 }
0x3294   :  { %v9637_v17 = vpop.eup %9636 }
0x3295   :  { %3625 = vrot.lane.b32.xlu1 %v9637_v17, %s13319_s8 }
0x32a2   :  { %v3643_v10 = vpop.permute.xlu0 %3642 }
0x32d8   :  { %v3670_v2 = vpop.xlane.xlu0 %3669 }
0x32d9   :  { %v3671_v49 = vadd.f32 %v9779_v13, %v3670_v2 }
0x32db   :  { %3675 = vperm.xlu0 %9566, %v3671_v49  }
0x3307   :  { %v3626_v5 = vpop.permute.xlu1 %3625 }
0x3308   :  { %v3628_v37 = vmul.f32 %v3626_v5, %v3623_v20 }
0x330a   :  { %3632 = vrot.lane.b32.xlu1 %v3628_v37, %s9840_s0  ;;  %v3630_v18 = vadd.f32 %v3629_v41, %v3628_v37  ;;  %v13327_v37 = vld [vmem:[#allocation12_spill] sm:$0xff] }
0x3356   :  { %v3676_v22 = vpop.permute.xlu0 %3675 }
0x337c   :  { %v3633_v57 = vpop.permute.xlu1 %3632 }
0x337d   :  { %v3635_v43 = vadd.f32 %v3633_v57, %v3630_v18  ;;  %v8815_v18 = vld [vmem:[%s13298_s9 + $0x38] sm:$0xff] }
0x337f   :  { %v3645_v59 = vadd.f32 %v3643_v10, %v3635_v43 }
0x3381   :  { %v3652_v33 = vmul.f32 %v3645_v59, %v10394_v39  ;;  %3647 = vrot.lane.b32.xlu0 %v3645_v59, %s9839_s28 }
0x3383   :  { %3654 = vrot.lane.b32.xlu1 %v3652_v33, %s9839_s28 }
0x33f3   :  { %v3648_v9 = vpop.permute.xlu0 %3647 }
0x33f4   :  { %3651 = vst.msk [vmem:[#allocation3 + $0x30] sm:$0xff] %vm106_vm1, %v3648_v9 }
0x33f5   :  { %v3655_v48 = vpop.permute.xlu1 %3654 }
0x33f6   :  { %v3657_v35 = vsel %vm106_vm1, %v3655_v48, 0.0 }
0x33f7   :  { %3658 = vadd.xlane.f32.xlu1 %v3657_v35 }
0x3480   :  { %v3659_v46 = vpop.xlane.xlu1 %3658 }
0x3481   :  { %3661 = vst.msk [vmem:[#allocation5] sm:$0xff] %vm3660_vm15, %v3659_v46 }
0x3488   :  { %v3672_v52 = vld [vmem:[#allocation5] sm:$0xff] }
0x3489   :  { %v3678_v51 = vadd.f32 %v3676_v22, %v3672_v52 }
0x348b   :  { %v3683_v21 = vsub.f32 %v3678_v51, %v3682_v50 }
0x348d   :  { %v3685_v40 = vsel %vm13272_vm14, %v3683_v21, -1e+37 }
0x348e   :  { %v3686_v11 = vsel %vm290_vm0, %v3685_v40, -inf }
0x348f   :  { %3687 = vmax.xlane.f32.xlu1 %v3686_v11 }
0x3493   :  { %4211 = vmax.xlane.f32.xlu1 %v13326_v56  ;;  %v13328_v56 = vmov 0  }
0x3518   :  { %v3688_v19 = vpop.xlane.xlu1 %3687 }
0x3519   :  { %v3689_v60 = vsub.f32 %v3685_v40, %v3688_v19 }
0x351b   :  { %v3690_v30 = vmul.f32 1.442695, %v3689_v60 }
0x351c   :  { %v4212_v1 = vpop.xlane.xlu1 %4211 }
0x351d   :  { %9638 = vpow2.f32 %v3690_v30  ;;  %v4213_v25 = vsub.f32 -1e+37, %v4212_v1 }
0x351f   :  { %v4214_v14 = vmul.f32 1.442695, %v4213_v25 }
0x3521   :  { %9640 = vpow2.f32 %v4214_v14 }
0x352a   :  { %v9639_v42 = vpop.eup %9638 }
0x352b   :  { %v3692_v24 = vsel %vm290_vm0, %v9639_v42, 0.0 }
0x352c   :  { %3693 = vadd.xlane.f32.xlu1 %v3692_v24 }
0x352e   :  { %v9641_v6 = vpop.eup %9640 }
0x352f   :  { %v4216_v63 = vsel %vm290_vm0, %v9641_v6, 0.0 }
0x3530   :  { %4217 = vadd.xlane.f32.xlu1 %v4216_v63 }
0x35b5   :  { %v3694_v55 = vpop.xlane.xlu1 %3693 }
0x35b6   :  { %9642 = vrcp.f32 %v3694_v55 }
0x35b9   :  { %v4218_v54 = vpop.xlane.xlu1 %4217 }
0x35ba   :  { %9644 = vrcp.f32 %v4218_v54 }
0x35c3   :  { %v9643_v38 = vpop.eup %9642 }
0x35c4   :  { %v3696_v62 = vmul.f32 %v9643_v38, %v9639_v42 }
0x35c6   :  { %v4140_v8 = vsel %vm13272_vm14, %v3696_v62, 0.0  ;;  %v3699_v57 = vmul.f32 %v8815_v18, %v3696_v62  ;;  %vm4138_vm14 = vcmask 64568  }
0x35c7   :  { %v9645_v7 = vpop.eup %9644  ;;  %8819 = vst.msk [vmem:[%s13314_s7 + $0x38] sm:$0xff] %vm290_vm0, %v4140_v8 }
0x35c8   :  { %v4220_v12 = vmul.f32 %v9645_v7, %v9641_v6  ;;  %v3700_v43 = vsub.f32 %v3696_v62, %v3699_v57  ;;  %v11513_v6 = vld [vmem:[#allocation3] sm:$0xff]  ;;  %v11518_v62 = vld [vmem:[#allocation3 + $0x18] sm:$0xff] }
0x35ca   :  { %v4222_v17 = vmul.f32 %v4221_v0, %v4220_v12 }
0x35cc   :  { %v4223_v10 = vsub.f32 %v4220_v12, %v4222_v17 }
0x35ce   :  { %4256 = vxpose.xlu1.b32.start.end [1/1] (short) (narrow) %v4223_v10, 8 }
0x364a   :  { %v4272_v2 = vpop.trf.xlu1 }
0x364b   :  { %v4385_v13 = vrot.slane %v4272_v2, %v13323_v23  ;;  %v4378_v49 = vrot.slane %v4272_v2, %v13322_v58  ;;  %v4399_v20 = vrot.slane %v4272_v2, %v13325_v15  ;;  %v4392_v5 = vrot.slane %v4272_v2, %v13324_v36 }
0x364c   :  { %v4406_v41 = vrot.slane %v4272_v2, %v13327_v37  ;;  %v4413_v21 = vrot.slane %v4272_v2, %v10044_v29  ;;  %v4420_v40 = vrot.slane %v4272_v2, %v10040_v26  ;;  %v4427_v11 = vrot.slane %v4272_v2, %v10047_v31 }
0x364d   :  { %4387 = vbcast.lane.b32.xlu1 %v4385_v13, 256  ;;  %4380 = vbcast.lane.b32.xlu0 %v4378_v49, 256 }
0x3651   :  { %4401 = vbcast.lane.b32.xlu1 %v4399_v20, 256  ;;  %4394 = vbcast.lane.b32.xlu0 %v4392_v5, 256 }
0x3655   :  { %4408 = vbcast.lane.b32.xlu0 %v4406_v41, 256 }
0x3673   :  { %3733 = vxpose.xlu0.b32.start.end [1/1] (short) (narrow) %v3700_v43, 8 }
0x36bf   :  { %v11493_v59 = vpop.permute.xlu0 %4380  ;;  %v4388_v30 = vpop.permute.xlu1 %4387 }
0x36c3   :  { %v11495_v33 = vpop.permute.xlu0 %4394  ;;  %v11511_v25 = vpop.permute.xlu1 %4401 }
0x36c7   :  { %v11497_v22 = vpop.permute.xlu0 %4408 }
0x36ef   :  { %v3749_v9 = vpop.trf.xlu0 }
0x36f0   :  { %v3862_v48 = vrot.slane %v3749_v9, %v13323_v23  ;;  %v3855_v35 = vrot.slane %v3749_v9, %v13322_v58  ;;  %v3890_v46 = vrot.slane %v3749_v9, %v10044_v29  ;;  %v3869_v47 = vrot.slane %v3749_v9, %v13324_v36 }
0x36f1   :  { %v3904_v16 = vrot.slane %v3749_v9, %v10047_v31  ;;  %v3876_v50 = vrot.slane %v3749_v9, %v13325_v15  ;;  %v3883_v52 = vrot.slane %v3749_v9, %v13327_v37  ;;  %v3897_v51 = vrot.slane %v3749_v9, %v10040_v26 }
0x36f2   :  { %3864 = vbcast.lane.b32.xlu1 %v3862_v48, 256  ;;  %3857 = vbcast.lane.b32.xlu0 %v3855_v35, 256  ;;  %v11534_v35 = vld [vmem:[#allocation3 + $0x30] sm:$0xff] }
0x36f6   :  { %3892 = vbcast.lane.b32.xlu1 %v3890_v46, 256  ;;  %3871 = vbcast.lane.b32.xlu0 %v3869_v47, 256 }
0x36fa   :  { %3906 = vbcast.lane.b32.xlu1 %v3904_v16, 256  ;;  %3878 = vbcast.lane.b32.xlu0 %v3876_v50, 256 }
0x36fe   :  { %3885 = vbcast.lane.b32.xlu0 %v3883_v52, 256 }
0x3702   :  { %3899 = vbcast.lane.b32.xlu0 %v3897_v51, 256 }
0x3706   :  { %4415 = vbcast.lane.b32.xlu0 %v4413_v21, 256 }
0x370a   :  { %4422 = vbcast.lane.b32.xlu0 %v4420_v40, 256 }
0x370e   :  { %4429 = vbcast.lane.b32.xlu0 %v4427_v11, 256 }
0x3723   :  { %3701 = vxpose.xlu1.b32.start.end [1/1] (short) (narrow) %v3699_v57, 8 }
0x372c   :  { %4224 = vxpose.xlu0.b32.start.end [1/1] (short) (narrow) %v4222_v17, 8 }
0x3741   :  { %9567 = vset.pattern.permute.xlu1 %v13328_v56 }
0x3764   :  { %v3858_v19 = vpop.permute.xlu0 %3857  ;;  %v3865_v42 = vpop.permute.xlu1 %3864 }
0x3765   :  { %v3909_v63 = vmul.f32 %v3865_v42, %v11109_v3  ;;  %v3908_v55 = vmul.f32 %v3858_v19, %v11513_v6  ;;  %v11546_v42 = vld [vmem:[#allocation4 + $0x8] sm:$0xff] }
0x3767   :  { %v3917_v8 = vsel %vm106_vm1, %v3909_v63, 0.0  ;;  %v3916_v7 = vsel %vm106_vm1, %v3908_v55, 0.0  ;;  %v11552_v63 = vld [vmem:[#allocation4 + $0x10] sm:$0xff] }
0x3768   :  { %v3872_v60 = vpop.permute.xlu0 %3871  ;;  %v3893_v54 = vpop.permute.xlu1 %3892  ;;  %v3918_v3 = vadd.f32 %v3917_v8, %v3916_v7  ;;  %v4433_v8 = vmul.f32 %v11495_v33, %v11552_v63 }
0x3769   :  { %v3910_v38 = vmul.f32 %v3872_v60, %v11367_v27  ;;  %v3913_v57 = vmul.f32 %v3893_v54, %v11377_v44  ;;  %v4432_v54 = vmul.f32 %v4388_v30, %v11546_v42 }
0x376a   :  { %v4442_v30 = vsel %vm106_vm1, %v4433_v8, 0.0 }
0x376b   :  { %v3919_v17 = vsel %vm106_vm1, %v3910_v38, 0.0  ;;  %v3925_v46 = vsel %vm106_vm1, %v3913_v57, 0.0  ;;  %v11577_v57 = vld [vmem:[#allocation4 + $0x30] sm:$0xff] }
0x376c   :  { %v3879_v1 = vpop.permute.xlu0 %3878  ;;  %v3907_v2 = vpop.permute.xlu1 %3906  ;;  %v3920_v49 = vadd.f32 %v3919_v17, %v3918_v3  ;;  %v4440_v17 = vsel %vm106_vm1, %v4432_v54, 0.0  ;;  %v11564_v3 = vld [vmem:[#allocation4 + $0x18] sm:$0xff] }
0x376d   :  { %v3911_v0 = vmul.f32 %v3879_v1, %v11518_v62  ;;  %v3915_v21 = vmul.f32 %v3907_v2, %v11127_v45  ;;  %v11567_v2 = vld [vmem:[#allocation4 + $0x20] sm:$0xff] }
0x376f   :  { %v3921_v13 = vsel %vm106_vm1, %v3911_v0, 0.0  ;;  %v3929_v60 = vsel %vm106_vm1, %v3915_v21, 0.0 }
0x3770   :  { %v3886_v14 = vpop.permute.xlu0 %3885  ;;  %v3922_v41 = vadd.f32 %v3921_v13, %v3920_v49  ;;  %v4434_v13 = vmul.f32 %v11511_v25, %v11564_v3 }
0x3771   :  { %v3912_v10 = vmul.f32 %v3886_v14, %v11118_v53 }
0x3773   :  { %v3923_v20 = vsel %vm106_vm1, %v3912_v10, 0.0 }
0x3774   :  { %v3900_v24 = vpop.permute.xlu0 %3899  ;;  %v3924_v48 = vadd.f32 %v3923_v20, %v3922_v41  ;;  %v11573_v41 = vld [vmem:[#allocation4 + $0x28] sm:$0xff] }
0x3775   :  { %v3914_v53 = vmul.f32 %v3900_v24, %v11534_v35  ;;  %v11548_v24 = vld [vmem:[#allocation4] sm:$0xff] }
0x3776   :  { %v3926_v52 = vadd.f32 %v3925_v46, %v3924_v48  ;;  %v4431_v38 = vmul.f32 %v11493_v59, %v11548_v24 }
0x3777   :  { %v3927_v51 = vsel %vm106_vm1, %v3914_v53, 0.0  ;;  %v11583_v53 = vld [vmem:[#allocation4 + $0x38] sm:$0xff] }
0x3778   :  { %v11523_v12 = vpop.permute.xlu0 %4415  ;;  %v3928_v56 = vadd.f32 %v3927_v51, %v3926_v52  ;;  %v4439_v10 = vsel %vm106_vm1, %v4431_v38, 0.0 }
0x3779   :  { %v4441_v59 = vadd.f32 %v4440_v17, %v4439_v10  ;;  %v4436_v48 = vmul.f32 %v11523_v12, %v11573_v41 }
0x377a   :  { %v3930_v14 = vadd.f32 %v3929_v60, %v3928_v56 }
0x377b   :  { %v4443_v20 = vadd.f32 %v4442_v30, %v4441_v59 }
0x377c   :  { %v11529_v5 = vpop.permute.xlu0 %4422 }
0x3780   :  { %v4430_v47 = vpop.permute.xlu0 %4429 }
0x3781   :  { %v4438_v52 = vmul.f32 %v4430_v47, %v11583_v53 }
0x3783   :  { %v4452_v56 = vsel %vm106_vm1, %v4438_v52, 0.0  ;;  %v9782_v52 = vld [vmem:[#allocation3 + $0x38] sm:$0xff] }
0x379f   :  { %v3717_v18 = vpop.trf.xlu1 }
0x37a0   :  { %v3776_v43 = vrot.slane %v3717_v18, %v13322_v58  ;;  %v3783_v9 = vrot.slane %v3717_v18, %v13323_v23  ;;  %v3790_v16 = vrot.slane %v3717_v18, %v13324_v36  ;;  %v3818_v50 = vrot.slane %v3717_v18, %v10040_v26 }
0x37a1   :  { %v3797_v11 = vrot.slane %v3717_v18, %v13325_v15  ;;  %v3804_v1 = vrot.slane %v3717_v18, %v13327_v37  ;;  %v3811_v55 = vrot.slane %v3717_v18, %v10044_v29  ;;  %v3825_v0 = vrot.slane %v3717_v18, %v10047_v31 }
0x37a2   :  { %3778 = vbcast.lane.b32.xlu1 %v3776_v43, 256  ;;  %3785 = vbcast.lane.b32.xlu0 %v3783_v9, 256  ;;  %v4435_v18 = vmul.f32 %v11497_v22, %v11567_v2  ;;  %v4444_v9 = vsel %vm106_vm1, %v4434_v13, 0.0  ;;  %v9781_v13 = vld [vmem:[#allocation3 + $0x20] sm:$0xff] }
0x37a3   :  { %v4445_v25 = vadd.f32 %v4444_v9, %v4443_v20 }
0x37a4   :  { %v4446_v46 = vsel %vm106_vm1, %v4435_v18, 0.0 }
0x37a5   :  { %v4447_v51 = vadd.f32 %v4446_v46, %v4445_v25 }
0x37a6   :  { %3792 = vbcast.lane.b32.xlu1 %v3790_v16, 256  ;;  %3820 = vbcast.lane.b32.xlu0 %v3818_v50, 256  ;;  %v4437_v16 = vmul.f32 %v11529_v5, %v11577_v57  ;;  %v4448_v50 = vsel %vm106_vm1, %v4436_v48, 0.0 }
0x37a7   :  { %v4449_v12 = vadd.f32 %v4448_v50, %v4447_v51 }
0x37a8   :  { %v4240_v40 = vpop.trf.xlu0  ;;  %v4450_v21 = vsel %vm106_vm1, %v4437_v16, 0.0 }
0x37a9   :  { %v4299_v19 = vrot.slane %v4240_v40, %v13322_v58  ;;  %v4320_v45 = vrot.slane %v4240_v40, %v13325_v15  ;;  %v4334_v7 = vrot.slane %v4240_v40, %v10044_v29  ;;  %v4306_v33 = vrot.slane %v4240_v40, %v13323_v23 }
0x37aa   :  { %3799 = vbcast.lane.b32.xlu1 %v3797_v11, 256  ;;  %v4348_v49 = vrot.slane %v4240_v40, %v10047_v31  ;;  %v4313_v43 = vrot.slane %v4240_v40, %v13324_v36  ;;  %v4327_v22 = vrot.slane %v4240_v40, %v13327_v37  ;;  %v4341_v11 = vrot.slane %v4240_v40, %v10040_v26 }
0x37ab   :  { %4301 = vbcast.lane.b32.xlu0 %v4299_v19, 256  ;;  %v4451_v19 = vadd.f32 %v4450_v21, %v4449_v12 }
0x37ad   :  { %v4453_v60 = vadd.f32 %v4452_v56, %v4451_v19 }
0x37ae   :  { %3806 = vbcast.lane.b32.xlu1 %v3804_v1, 256 }
0x37af   :  { %3932 = vrot.lane.b32.xlu0 %v3930_v14, %s13319_s8 }
0x37b2   :  { %3813 = vbcast.lane.b32.xlu1 %v3811_v55, 256  ;;  %v9780_v55 = vld [vmem:[#allocation3 + $0x8] sm:$0xff] }
0x37b3   :  { %4322 = vbcast.lane.b32.xlu0 %v4320_v45, 256 }
0x37b6   :  { %3827 = vbcast.lane.b32.xlu1 %v3825_v0, 256 }
0x37b7   :  { %4336 = vbcast.lane.b32.xlu0 %v4334_v7, 256 }
0x37ba   :  { %4308 = vbcast.lane.b32.xlu1 %v4306_v33, 256 }
0x37bb   :  { %4350 = vbcast.lane.b32.xlu0 %v4348_v49, 256 }
0x37be   :  { %4315 = vbcast.lane.b32.xlu1 %v4313_v43, 256 }
0x37c2   :  { %4329 = vbcast.lane.b32.xlu1 %v4327_v22, 256 }
0x37c6   :  { %4343 = vbcast.lane.b32.xlu1 %v4341_v11, 256 }
0x37ca   :  { %4455 = vrot.lane.b32.xlu1 %v4453_v60, %s13319_s8 }
0x3814   :  { %v3779_v5 = vpop.permute.xlu1 %3778  ;;  %v3786_v1 = vpop.permute.xlu0 %3785 }
0x3815   :  { %v3829_v47 = vmul.f32 %v3779_v5, %v11513_v6  ;;  %v3830_v54 = vmul.f32 %v9780_v55, %v3786_v1 }
0x3817   :  { %v3837_v40 = vsel %vm106_vm1, %v3829_v47, 0.0  ;;  %v3838_v7 = vsel %vm106_vm1, %v3830_v54, 0.0 }
0x3818   :  { %v3793_v14 = vpop.permute.xlu1 %3792  ;;  %v3821_v45 = vpop.permute.xlu0 %3820  ;;  %v3839_v30 = vadd.f32 %v3838_v7, %v3837_v40  ;;  %v11641_v7 = vld [vmem:[%s13225_s14 + $0x20] sm:$0xff] }
0x3819   :  { %v3831_v38 = vmul.f32 %v3793_v14, %v11367_v27  ;;  %v3835_v48 = vmul.f32 %v3821_v45, %v11534_v35  ;;  %v11621_v14 = vld [vmem:[%s13225_s14 + $0x30] sm:$0xff] }
0x381b   :  { %v3840_v10 = vsel %vm106_vm1, %v3831_v38, 0.0  ;;  %v3848_v50 = vsel %vm106_vm1, %v3835_v48, 0.0  ;;  %v11633_v38 = vld [vmem:[%s13225_s14 + $0x28] sm:$0xff] }
0x381c   :  { %v3800_v8 = vpop.permute.xlu1 %3799  ;;  %v3841_v20 = vadd.f32 %v3840_v10, %v3839_v30 }
0x381d   :  { %v3832_v0 = vmul.f32 %v3800_v8, %v11518_v62  ;;  %v4302_v17 = vpop.permute.xlu0 %4301 }
0x381e   :  { %v4352_v60 = vmul.f32 %v4302_v17, %v11548_v24 }
0x381f   :  { %v3842_v33 = vsel %vm106_vm1, %v3832_v0, 0.0 }
0x3820   :  { %v3807_v59 = vpop.permute.xlu1 %3806  ;;  %v3843_v27 = vadd.f32 %v3842_v33, %v3841_v20  ;;  %v4360_v47 = vsel %vm106_vm1, %v4352_v60, 0.0  ;;  %v11651_v33 = vld [vmem:[%s13225_s14 + $0x18] sm:$0xff] }
0x3821   :  { %v3833_v49 = vmul.f32 %v9781_v13, %v3807_v59  ;;  %v3933_v43 = vpop.permute.xlu0 %3932 }
0x3823   :  { %v3844_v18 = vsel %vm106_vm1, %v3833_v49, 0.0 }
0x3824   :  { %v3814_v9 = vpop.permute.xlu1 %3813  ;;  %v3845_v62 = vadd.f32 %v3844_v18, %v3843_v27  ;;  %v11659_v18 = vld [vmem:[%s13225_s14 + $0x10] sm:$0xff] }
0x3825   :  { %v3834_v25 = vmul.f32 %v3814_v9, %v11377_v44  ;;  %v4323_v21 = vpop.permute.xlu0 %4322  ;;  %v11613_v44 = vld [vmem:[%s13225_s14 + $0x38] sm:$0xff] }
0x3826   :  { %v4355_v55 = vmul.f32 %v4323_v21, %v11564_v3 }
0x3827   :  { %v3846_v46 = vsel %vm106_vm1, %v3834_v25, 0.0 }
0x3828   :  { %v3847_v16 = vadd.f32 %v3846_v46, %v3845_v62  ;;  %v3828_v22 = vpop.permute.xlu1 %3827  ;;  %v4365_v10 = vsel %vm106_vm1, %v4355_v55, 0.0  ;;  %v11669_v62 = vld [vmem:[%s13225_s14 + $0x8] sm:$0xff]  ;;  %v11737_v55 = vld [vmem:[%s13226_s15 + $0x58] sm:$0xff] }
0x3829   :  { %v3836_v51 = vmul.f32 %v9782_v52, %v3828_v22  ;;  %v4337_v45 = vpop.permute.xlu0 %4336  ;;  %v11677_v22 = vld [vmem:[%s13225_s14] sm:$0xff] }
0x382a   :  { %v3849_v12 = vadd.f32 %v3848_v50, %v3847_v16  ;;  %v4357_v30 = vmul.f32 %v4337_v45, %v11573_v41 }
0x382b   :  { %v3850_v11 = vsel %vm106_vm1, %v3836_v51, 0.0 }
0x382c   :  { %v3851_v56 = vadd.f32 %v3850_v11, %v3849_v12  ;;  %v4309_v19 = vpop.permute.xlu1 %4308  ;;  %v4369_v9 = vsel %vm106_vm1, %v4357_v30, 0.0  ;;  %v11707_v11 = vld [vmem:[%s13226_s15 + $0x78] sm:$0xff]  ;;  %v11780_v30 = vld [vmem:[%s13226_s15 + $0x20] sm:$0xff] }
0x382d   :  { %v4353_v35 = vmul.f32 %v4309_v19, %v11546_v42  ;;  %v4351_v13 = vpop.permute.xlu0 %4350  ;;  %4567 = vmatprep.subr.mxu0 %v11707_v11 }
0x382e   :  { %v3935_v5 = vsel %vm106_vm1, %v3851_v56, %v3933_v43  ;;  %v4359_v48 = vmul.f32 %v4351_v13, %v11583_v53  ;;  %v11792_v13 = vld [vmem:[%s13226_s15 + $0x10] sm:$0xff] }
0x382f   :  { %v4361_v1 = vsel %vm106_vm1, %v4353_v35, 0.0  ;;  %9297 = vmatmul.mubr.msk.f32.vlgmr.msra.gmra.mxu1 %vm572_vm3, %v3935_v5 }
0x3830   :  { %v4316_v24 = vpop.permute.xlu1 %4315  ;;  %9300 = vmatpush3.msra.mxu1 %v11613_v44  ;;  %9315 = vmatprep.mubr.msk.f32.mxu1 %vm9837_vm2, %v13315_v4  ;;  %v4362_v8 = vadd.f32 %v4361_v1, %v4360_v47  ;;  %v4373_v52 = vsel %vm106_vm1, %v4359_v48, 0.0  ;;  %v11717_v1 = vld [vmem:[%s13226_s15 + $0x70] sm:$0xff]  ;;  %v11731_v47 = vld [vmem:[%s13226_s15 + $0x60] sm:$0xff] }
0x3831   :  { %v4354_v54 = vmul.f32 %v4316_v24, %v11552_v63  ;;  %9301 = vmatprep.subr.mxu1 %v13315_v4  ;;  %v11725_v24 = vld [vmem:[%s13226_s15 + $0x68] sm:$0xff] }
0x3832   :  { %9302 = vmatpush3.msra.mxu1 %v11621_v14 }
0x3833   :  { %v4363_v40 = vsel %vm106_vm1, %v4354_v54, 0.0  ;;  %9303 = vmatprep.subr.mxu1 %v13315_v4  ;;  %v11744_v54 = vld [vmem:[%s13226_s15 + $0x50] sm:$0xff] }
0x3834   :  { %v4364_v0 = vadd.f32 %v4363_v40, %v4362_v8  ;;  %v4330_v17 = vpop.permute.xlu1 %4329  ;;  %9304 = vmatpush3.msra.mxu1 %v11633_v38  ;;  %v11750_v8 = vld [vmem:[%s13226_s15 + $0x48] sm:$0xff]  ;;  %v11756_v40 = vld [vmem:[%s13226_s15 + $0x40] sm:$0xff] }
0x3835   :  { %v4356_v59 = vmul.f32 %v4330_v17, %v11567_v2  ;;  %9305 = vmatprep.subr.mxu1 %v13315_v4  ;;  %v11768_v17 = vld [vmem:[%s13226_s15 + $0x30] sm:$0xff] }
0x3836   :  { %v4366_v49 = vadd.f32 %v4365_v10, %v4364_v0  ;;  %9306 = vmatpush3.msra.mxu1 %v11641_v7  ;;  %v11762_v0 = vld [vmem:[%s13226_s15 + $0x38] sm:$0xff]  ;;  %v11774_v10 = vld [vmem:[%s13226_s15 + $0x28] sm:$0xff] }
0x3837   :  { %v4367_v20 = vsel %vm106_vm1, %v4356_v59, 0.0  ;;  %9307 = vmatprep.subr.mxu1 %v13315_v4  ;;  %v11786_v59 = vld [vmem:[%s13226_s15 + $0x18] sm:$0xff] }
0x3838   :  { %v4368_v27 = vadd.f32 %v4367_v20, %v4366_v49  ;;  %v4344_v43 = vpop.permute.xlu1 %4343  ;;  %9308 = vmatpush3.msra.mxu1 %v11651_v33  ;;  %v11798_v49 = vld [vmem:[%s13226_s15 + $0x8] sm:$0xff]  ;;  %v11804_v20 = vld [vmem:[%s13226_s15] sm:$0xff] }
0x3839   :  { %v4358_v25 = vmul.f32 %v4344_v43, %v11577_v57  ;;  %9309 = vmatprep.subr.mxu1 %v13315_v4 }
0x383a   :  { %v4370_v46 = vadd.f32 %v4369_v9, %v4368_v27  ;;  %9310 = vmatpush3.msra.mxu1 %v11659_v18 }
0x383b   :  { %v4371_v16 = vsel %vm106_vm1, %v4358_v25, 0.0  ;;  %9311 = vmatprep.subr.mxu1 %v13315_v4 }
0x383c   :  { %v4372_v50 = vadd.f32 %v4371_v16, %v4370_v46  ;;  %9312 = vmatpush3.msra.mxu1 %v11669_v62  ;;  %v4456_v21 = vpop.permute.xlu1 %4455  ;;  %v4170_v46 = vld [vmem:[%s13227_s16] sm:$0x3] }
0x383d   :  { %9313 = vmatprep.subr.mxu1 %v13315_v4  ;;  %v11839_v16 = vrot.slane %v4170_v46, %v13323_v23 }
0x383e   :  { %v4374_v51 = vadd.f32 %v4373_v52, %v4372_v50  ;;  %9314 = vmatpush3.msra.mxu1 %v11677_v22 }
0x383f   :  { %9318 = vmatprep.subr.mxu1 %v13315_v4 }
0x3840   :  { %v4458_v12 = vsel %vm106_vm1, %v4374_v51, %v4456_v21 }
0x3841   :  { %9316 = vmatmul.mubr.msk.f32.vlgmr.msra.gmra.mxu1 %vm572_vm3, %v4458_v12  ;;  %v11849_v12 = vrot.slane %v4170_v46, %v13322_v58 }
0x3842   :  { %9319 = vmatpush3.msra.mxu1 %v11613_v44  ;;  %9334 = vmatprep.mubr.msk.f32.mxu1 %vm9837_vm2, %v13315_v4 }
0x3843   :  { %9320 = vmatprep.subr.mxu1 %v13315_v4 }
0x3844   :  { %9321 = vmatpush3.msra.mxu1 %v11621_v14 }
0x3845   :  { %9322 = vmatprep.subr.mxu1 %v13315_v4 }
0x3846   :  { %9323 = vmatpush3.msra.mxu1 %v11633_v38 }
0x3847   :  { %9324 = vmatprep.subr.mxu1 %v13315_v4 }
0x3848   :  { %9325 = vmatpush3.msra.mxu1 %v11641_v7 }
0x3849   :  { %9326 = vmatprep.subr.mxu1 %v13315_v4 }
0x384a   :  { %9327 = vmatpush3.msra.mxu1 %v11651_v33 }
0x384b   :  { %9328 = vmatprep.subr.mxu1 %v13315_v4 }
0x384c   :  { %9329 = vmatpush3.msra.mxu1 %v11659_v18 }
0x384d   :  { %9330 = vmatprep.subr.mxu1 %v13315_v4 }
0x384e   :  { %9331 = vmatpush3.msra.mxu1 %v11669_v62 }
0x384f   :  { %9332 = vmatprep.subr.mxu1 %v13315_v4 }
0x3850   :  { %9333 = vmatpush3.msra.mxu1 %v11677_v22 }
0x3851   :  { %9337 = vmatprep.subr.mxu1 %v13315_v4 }
0x38ef   :  { %v4005_v56 = vpop.f32.mrf.mxu1 }
0x38f0   :  { %4010 = vrot.lane.b32.xlu0 %v4005_v56, %s13319_s8 }
0x38f1   :  { %v9298_v19 = vpop.f32.mrf.mxu1 }
0x3901   :  { %v4528_v60 = vpop.f32.mrf.mxu1 }
0x3902   :  { %4533 = vrot.lane.b32.xlu1 %v4528_v60, %s13319_s8 }
0x3903   :  { %v9317_v35 = vpop.f32.mrf.mxu1 }
0x3962   :  { %v11712_v5 = vpop.permute.xlu0 %4010 }
0x3963   :  { %v4013_v45 = vsel %vm106_vm1, %v11451_v61, %v11712_v5 }
0x3964   :  { %8817 = vmatmul.mubr.msk.f32.vlgmr.msra.gmra.mxu0 %vm572_vm3, %v4013_v45 }
0x3965   :  { %4568 = vmatpush1.msra.mxu0 %v11717_v1  ;;  %4615 = vmatprep.mubr.f32.mxu0 %v13315_v4 }
0x3966   :  { %4569 = vmatprep.subr.mxu0 %v11725_v24 }
0x3967   :  { %4570 = vmatpush1.msra.mxu0 %v11731_v47 }
0x3968   :  { %4571 = vmatprep.subr.mxu0 %v11737_v55 }
0x3969   :  { %4572 = vmatpush1.msra.mxu0 %v11744_v54 }
0x396a   :  { %4573 = vmatprep.subr.mxu0 %v11750_v8 }
0x396b   :  { %4574 = vmatpush1.msra.mxu0 %v11756_v40 }
0x396c   :  { %4575 = vmatprep.subr.mxu0 %v11762_v0 }
0x396d   :  { %4576 = vmatpush1.msra.mxu0 %v11768_v17 }
0x396e   :  { %4577 = vmatprep.subr.mxu0 %v11774_v10 }
0x396f   :  { %4578 = vmatpush1.msra.mxu0 %v11780_v30 }
0x3970   :  { %4579 = vmatprep.subr.mxu0 %v11786_v59 }
0x3971   :  { %4580 = vmatpush1.msra.mxu0 %v11792_v13 }
0x3972   :  { %4581 = vmatprep.subr.mxu0 %v11798_v49 }
0x3973   :  { %4582 = vmatpush1.msra.mxu0 %v11804_v20 }
0x3974   :  { %v11809_v27 = vpop.permute.xlu1 %4533  ;;  %5046 = vmatprep.subr.mxu0 %v11707_v11 }
0x3975   :  { %v4536_v43 = vsel %vm106_vm1, %v11513_v6, %v11809_v27 }
0x3976   :  { %8823 = vmatmul.mubr.msk.f32.vlgmr.msra.gmra.mxu0 %vm572_vm3, %v4536_v43 }
0x3977   :  { %5047 = vmatpush1.msra.mxu0 %v11717_v1  ;;  %5094 = vmatprep.mubr.f32.mxu0 %v13315_v4 }
0x3978   :  { %5048 = vmatprep.subr.mxu0 %v11725_v24 }
0x3979   :  { %5049 = vmatpush1.msra.mxu0 %v11731_v47 }
0x397a   :  { %5050 = vmatprep.subr.mxu0 %v11737_v55 }
0x397b   :  { %5051 = vmatpush1.msra.mxu0 %v11744_v54 }
0x397c   :  { %5052 = vmatprep.subr.mxu0 %v11750_v8 }
0x397d   :  { %5053 = vmatpush1.msra.mxu0 %v11756_v40 }
0x397e   :  { %5054 = vmatprep.subr.mxu0 %v11762_v0 }
0x397f   :  { %5055 = vmatpush1.msra.mxu0 %v11768_v17 }
0x3980   :  { %5056 = vmatprep.subr.mxu0 %v11774_v10 }
0x3981   :  { %5057 = vmatpush1.msra.mxu0 %v11780_v30 }
0x3982   :  { %5058 = vmatprep.subr.mxu0 %v11786_v59 }
0x3983   :  { %5059 = vmatpush1.msra.mxu0 %v11792_v13 }
0x3984   :  { %5060 = vmatprep.subr.mxu0 %v11798_v49 }
0x3985   :  { %5061 = vmatpush1.msra.mxu0 %v11804_v20 }
0x3986   :  { %5519 = vmatprep.subr.mxu0 %v11707_v11 }
0x3a24   :  { %v4083_v9 = vpop.f32.mrf.mxu0 }
0x3a26   :  { %v4085_v48 = vpop.f32.mrf.mxu0 }
0x3a27   :  { %v4086_v25 = vadd.f32 %v4085_v48, %v10375_v28  ;;  %v4084_v28 = vadd.f32 %v4083_v9, %v10380_v34 }
0x3a29   :  { %4095 = vrot.lane.b32.xlu0 %v4086_v25, %s9839_s28  ;;  %v8818_v21 = vmul.f32 -1.442695, %v4084_v28 }
0x3a2b   :  { %9646 = vpow2.f32 %v8818_v21 }
0x3a36   :  { %v4617_v50 = vpop.f32.mrf.mxu0 }
0x3a37   :  { %v4618_v56 = vadd.f32 %v4617_v50, %v11849_v12 }
0x3a38   :  { %v4619_v52 = vpop.f32.mrf.mxu0  ;;  %v9647_v19 = vpop.eup %9646 }
0x3a39   :  { %v4620_v51 = vadd.f32 %v4619_v52, %v11839_v16  ;;  %v8824_v60 = vmul.f32 -1.442695, %v4618_v56  ;;  %v4091_v35 = vadd.f32 1.0, %v9647_v19 }
0x3a3b   :  { %4629 = vrot.lane.b32.xlu1 %v4620_v51, %s9839_s28  ;;  %9648 = vpow2.f32 %v8824_v60 }
0x3a3c   :  { %9650 = vrcp.f32 %v4091_v35 }
0x3a3f   :  { %4115 = vrot.lane.b32.xlu1 %v11451_v61, %s9839_s28 }
0x3a43   :  { %4649 = vrot.lane.b32.xlu1 %v11513_v6, %s9839_s28 }
0x3a48   :  { %v9649_v45 = vpop.eup %9648 }
0x3a49   :  { %v9651_v43 = vpop.eup %9650  ;;  %v4625_v61 = vadd.f32 1.0, %v9649_v45 }
0x3a4b   :  { %9652 = vrcp.f32 %v4625_v61 }
0x3a58   :  { %v9653_v34 = vpop.eup %9652 }
0x3a9b   :  { %v4096_v48 = vpop.permute.xlu0 %4095 }
0x3a9c   :  { %v4098_v52 = vmul.f32 %v9651_v43, %v4096_v48  ;;  %v4635_v48 = vsub.f32 1.0, %v9653_v34 }
0x3a9e   :  { %v4099_v6 = vadd.f32 %v4098_v52, %v4086_v25  ;;  %v4101_v25 = vsub.f32 1.0, %v9651_v43 }
0x3aa0   :  { %9654 = vtanh.f32 %v4099_v6  ;;  %v8825_v6 = vld [vmem:[%s13228_s12] ss:$0 sm:$0xff] }
0x3aad   :  { %v9655_v9 = vpop.eup %9654  ;;  %v4630_v28 = vpop.permute.xlu1 %4629 }
0x3aae   :  { %v4632_v46 = vmul.f32 %v9653_v34, %v4630_v28  ;;  %4103 = vrot.lane.b32.xlu0 %v9655_v9, %s13319_s8  ;;  %v4107_v9 = vmul.f32 %v9651_v43, %v11712_v5 }
0x3ab0   :  { %v4633_v50 = vadd.f32 %v4632_v46, %v4620_v51 }
0x3ab1   :  { %v4116_v21 = vpop.permute.xlu1 %4115 }
0x3ab2   :  { %9656 = vtanh.f32 %v4633_v50  ;;  %v4118_v56 = vmul.f32 %v9651_v43, %v4116_v21 }
0x3ab4   :  { %4120 = vrot.lane.b32.xlu1 %v4118_v56, %s9840_s0 }
0x3ab5   :  { %v4650_v19 = vpop.permute.xlu1 %4649 }
0x3ab6   :  { %v4652_v60 = vmul.f32 %v9653_v34, %v4650_v19 }
0x3ab8   :  { %4654 = vrot.lane.b32.xlu1 %v4652_v60, %s9840_s0  ;;  %v35_v60 = vstv %s13229_s13 }
0x3ab9   :  { %36 = vst [vmem:[#allocation7] sm:$0x1] %v35_v60 }
0x3abf   :  { %v9657_v35 = vpop.eup %9656 }
0x3ac0   :  { %4637 = vrot.lane.b32.xlu0 %v9657_v35, %s13319_s8  ;;  %v4641_v35 = vmul.f32 %v9653_v34, %v11809_v27 }
0x3b20   :  { %v4104_v45 = vpop.permute.xlu0 %4103 }
0x3b21   :  { %v4106_v61 = vmul.f32 %v4104_v45, %v4101_v25 }
0x3b23   :  { %4110 = vrot.lane.b32.xlu0 %v4106_v61, %s9840_s0  ;;  %v4108_v28 = vadd.f32 %v4107_v9, %v4106_v61 }
0x3b26   :  { %v4121_v21 = vpop.permute.xlu1 %4120 }
0x3b2a   :  { %v4655_v45 = vpop.permute.xlu1 %4654 }
0x3b32   :  { %v4638_v52 = vpop.permute.xlu0 %4637 }
0x3b33   :  { %v4640_v51 = vmul.f32 %v4638_v52, %v4635_v48 }
0x3b35   :  { %4644 = vrot.lane.b32.xlu0 %v4640_v51, %s9840_s0  ;;  %v4642_v25 = vadd.f32 %v4641_v35, %v4640_v51 }
0x3b39   :  { %4668 = vrot.lane.b32.xlu0 %v8825_v6, %s13319_s8  ;;  %v11881_v6 = vld [vmem:[#allocation3 + $0x8] sm:$0xff] }
0x3b95   :  { %v4111_v46 = vpop.permute.xlu0 %4110 }
0x3b96   :  { %v4113_v50 = vadd.f32 %v4111_v46, %v4108_v28 }
0x3b98   :  { %v11863_v56 = vadd.f32 %v4121_v21, %v4113_v50  ;;  %v11888_v50 = vld [vmem:[#allocation7] ss:$0 sm:$0xff] }
0x3b9a   :  { %13329 = vst [vmem:[#allocation8_spill] sm:$0xff] %v11863_v56  ;;  %v4130_v19 = vmul.f32 %v11863_v56, %v10394_v39  ;;  %v11879_v39 = vld [vmem:[%s13230_s11] ss:$0 sm:$0xff] }
0x3b9b   :  { %v4683_v27 = vmul.f32 %v11879_v39, %v11881_v6 }
0x3b9c   :  { %4132 = vrot.lane.b32.xlu1 %v4130_v19, %s9839_s28 }
0x3b9d   :  { %v4684_v34 = vsel %vm106_vm1, %v4683_v27, 0.0 }
0x3ba7   :  { %v4645_v5 = vpop.permute.xlu0 %4644 }
0x3ba8   :  { %v4647_v43 = vadd.f32 %v4645_v5, %v4642_v25  ;;  %v8826_v25 = vld [vmem:[%s13313_s10 + $0x8] sm:$0xff] }
0x3ba9   :  { %v4696_v5 = vsub.f32 1.0, %v8826_v25 }
0x3baa   :  { %v4657_v61 = vadd.f32 %v4655_v45, %v4647_v43 }
0x3bab   :  { %v11872_v48 = vpop.permute.xlu0 %4668  ;;  %v4697_v43 = vmul.f32 1e+30, %v4696_v5  ;;  %v8827_v5 = vld [vmem:[%s13298_s9 + $0x8] sm:$0xff] }
0x3bac   :  { %v4671_v52 = vmul.f32 %v11872_v48, %v4657_v61 }
0x3bae   :  { %4673 = vrot.lane.b32.xlu0 %v4671_v52, %s9839_s28 }
0x3bc0   :  { %4685 = vadd.xlane.f32.xlu1 %v4684_v34 }
0x3c0e   :  { %v4133_v51 = vpop.permute.xlu1 %4132 }
0x3c0f   :  { %v4135_v9 = vsel %vm106_vm1, %v4133_v51, 0.0 }
0x3c10   :  { %4136 = vadd.xlane.f32.xlu0 %v4135_v9 }
0x3c20   :  { %v4674_v28 = vpop.permute.xlu0 %4673 }
0x3c21   :  { %v4676_v46 = vsel %vm106_vm1, %v4674_v28, 0.0 }
0x3c22   :  { %4677 = vadd.xlane.f32.xlu0 %v4676_v46 }
0x3c49   :  { %v4686_v21 = vpop.xlane.xlu1 %4685 }
0x3c4a   :  { %v4687_v19 = vadd.f32 %v11888_v50, %v4686_v21 }
0x3c4c   :  { %4691 = vperm.xlu1 %9567, %v4687_v19  }
0x3c50   :  { %4659 = vrot.lane.b32.xlu1 %v4657_v61, %s9839_s28 }
0x3c99   :  { %v4137_v60 = vpop.xlane.xlu0 %4136 }
0x3c9a   :  { %4139 = vst.msk [vmem:[#allocation5] sm:$0xff] %vm4138_vm14, %v4137_v60 }
0x3c9b   :  { %4179 = vst.msk [vmem:[#allocation5] sm:$0xff] %vm290_vm0, %v13315_v4 }
0x3cab   :  { %v4678_v35 = vpop.xlane.xlu0 %4677 }
0x3cac   :  { %4679 = vst.msk [vmem:[#allocation5] sm:$0xff] %vm793_vm4, %v4678_v35  ;;  %vm13340_vm4 = vcmask 48168  }
0x3cb3   :  { %v4688_v52 = vld [vmem:[#allocation5] sm:$0xff] }
0x3cc7   :  { %v4692_v45 = vpop.permute.xlu1 %4691 }
0x3cc8   :  { %v4694_v27 = vadd.f32 %v4692_v45, %v4688_v52 }
0x3cca   :  { %v4698_v61 = vsub.f32 %v4694_v27, %v4697_v43 }
0x3ccb   :  { %v4660_v34 = vpop.permute.xlu1 %4659 }
0x3ccc   :  { %4662 = vst.msk [vmem:[#allocation4] sm:$0xff] %vm106_vm1, %v4660_v34  ;;  %v4699_v51 = vsel %vm816_vm5, %v4698_v61, -1e+37 }
0x3ccd   :  { %v4700_v9 = vsel %vm290_vm0, %v4699_v51, -inf }
0x3cce   :  { %4701 = vmax.xlane.f32.xlu0 %v4700_v9 }
0x3d57   :  { %v4702_v28 = vpop.xlane.xlu0 %4701 }
0x3d58   :  { %v4703_v46 = vsub.f32 %v4699_v51, %v4702_v28 }
0x3d5a   :  { %v4704_v21 = vmul.f32 1.442695, %v4703_v46 }
0x3d5c   :  { %9658 = vpow2.f32 %v4704_v21 }
0x3d69   :  { %v9659_v19 = vpop.eup %9658 }
0x3d6a   :  { %v4706_v60 = vsel %vm290_vm0, %v9659_v19, 0.0 }
0x3d6b   :  { %4707 = vadd.xlane.f32.xlu0 %v4706_v60 }
0x3df4   :  { %v4708_v35 = vpop.xlane.xlu0 %4707 }
0x3df5   :  { %9660 = vrcp.f32 %v4708_v35 }
0x3e02   :  { %v9661_v25 = vpop.eup %9660 }
0x3e03   :  { %v4710_v43 = vmul.f32 %v9661_v25, %v9659_v19 }
0x3e05   :  { %v5152_v45 = vsel %vm816_vm5, %v4710_v43, 0.0  ;;  %v4712_v52 = vmul.f32 %v8827_v5, %v4710_v43  ;;  %vm13341_vm5 = vcmp.lt.s32.totalorder %v10419_v32, 6 }
0x3e06   :  { %8831 = vst.msk [vmem:[%s13231_s27 + $0x8] sm:$0xff] %vm290_vm0, %v5152_v45 }
0x3e07   :  { %v4713_v27 = vsub.f32 %v4710_v43, %v4712_v52 }
0x3e09   :  { %4746 = vxpose.xlu0.b32.start.end [1/1] (short) (narrow) %v4713_v27, 8 }
0x3e85   :  { %v4762_v61 = vpop.trf.xlu0 }
0x3e86   :  { %v4868_v34 = vrot.slane %v4762_v61, %v13322_v58  ;;  %v4875_v51 = vrot.slane %v4762_v61, %v13323_v23  ;;  %v4882_v9 = vrot.slane %v4762_v61, %v13324_v36  ;;  %v4889_v28 = vrot.slane %v4762_v61, %v13325_v15 }
0x3e87   :  { %v4896_v46 = vrot.slane %v4762_v61, %v13327_v37  ;;  %v4903_v21 = vrot.slane %v4762_v61, %v10044_v29  ;;  %v4910_v19 = vrot.slane %v4762_v61, %v10040_v26  ;;  %v4917_v60 = vrot.slane %v4762_v61, %v10047_v31 }
0x3e88   :  { %4870 = vbcast.lane.b32.xlu1 %v4868_v34, 256 }
0x3e8c   :  { %4877 = vbcast.lane.b32.xlu1 %v4875_v51, 256 }
0x3e90   :  { %4884 = vbcast.lane.b32.xlu1 %v4882_v9, 256 }
0x3e94   :  { %4891 = vbcast.lane.b32.xlu1 %v4889_v28, 256 }
0x3e98   :  { %4898 = vbcast.lane.b32.xlu1 %v4896_v46, 256 }
0x3e9c   :  { %4905 = vbcast.lane.b32.xlu1 %v4903_v21, 256 }
0x3ea0   :  { %4912 = vbcast.lane.b32.xlu1 %v4910_v19, 256  ;;  %v11931_v19 = vld [vmem:[#allocation4] sm:$0xff] }
0x3ea4   :  { %4919 = vbcast.lane.b32.xlu1 %v4917_v60, 256 }
0x3ecd   :  { %4714 = vxpose.xlu1.b32.start.end [1/1] (short) (narrow) %v4712_v52, 8 }
0x3efa   :  { %v4871_v35 = vpop.permute.xlu1 %4870 }
0x3efb   :  { %v4921_v60 = vmul.f32 %v4871_v35, %v11931_v19 }
0x3efe   :  { %v4878_v25 = vpop.permute.xlu1 %4877 }
0x3eff   :  { %v4922_v61 = vmul.f32 %v4878_v25, %v11546_v42 }
0x3f02   :  { %v4885_v5 = vpop.permute.xlu1 %4884 }
0x3f03   :  { %v4923_v56 = vmul.f32 %v4885_v5, %v11552_v63 }
0x3f06   :  { %v4892_v43 = vpop.permute.xlu1 %4891 }
0x3f0a   :  { %v4899_v45 = vpop.permute.xlu1 %4898 }
0x3f0b   :  { %v4925_v25 = vmul.f32 %v4899_v45, %v11567_v2 }
0x3f0e   :  { %v4906_v27 = vpop.permute.xlu1 %4905 }
0x3f0f   :  { %v4926_v5 = vmul.f32 %v4906_v27, %v11573_v41 }
0x3f12   :  { %v4913_v34 = vpop.permute.xlu1 %4912 }
0x3f16   :  { %v4920_v51 = vpop.permute.xlu1 %4919 }
0x3f17   :  { %v4928_v45 = vmul.f32 %v4920_v51, %v11583_v53 }
0x3f49   :  { %v4730_v9 = vpop.trf.xlu1 }
0x3f4a   :  { %v4796_v28 = vrot.slane %v4730_v9, %v13323_v23  ;;  %v4789_v46 = vrot.slane %v4730_v9, %v13322_v58  ;;  %v4803_v21 = vrot.slane %v4730_v9, %v13324_v36  ;;  %v4810_v52 = vrot.slane %v4730_v9, %v13325_v15 }
0x3f4b   :  { %v4817_v23 = vrot.slane %v4730_v9, %v13327_v37  ;;  %v4930_v58 = vsel %vm106_vm1, %v4922_v61, 0.0  ;;  %v4936_v61 = vsel %vm106_vm1, %v4925_v25, 0.0  ;;  %v4838_v27 = vrot.slane %v4730_v9, %v10047_v31 }
0x3f4c   :  { %4798 = vbcast.lane.b32.xlu1 %v4796_v28, 256  ;;  %4791 = vbcast.lane.b32.xlu0 %v4789_v46, 256  ;;  %v4924_v28 = vmul.f32 %v4892_v43, %v11564_v3  ;;  %v4929_v46 = vsel %vm106_vm1, %v4921_v60, 0.0  ;;  %v4927_v43 = vmul.f32 %v4913_v34, %v11577_v57  ;;  %v4831_v60 = vrot.slane %v4730_v9, %v10040_v26 }
0x3f4d   :  { %v4931_v15 = vadd.f32 %v4930_v58, %v4929_v46 }
0x3f4e   :  { %v4934_v35 = vsel %vm106_vm1, %v4924_v28, 0.0  ;;  %v4940_v46 = vsel %vm106_vm1, %v4927_v43, 0.0 }
0x3f50   :  { %4805 = vbcast.lane.b32.xlu0 %v4803_v21, 256  ;;  %v4932_v21 = vsel %vm106_vm1, %v4923_v56, 0.0  ;;  %v4938_v56 = vsel %vm106_vm1, %v4926_v5, 0.0 }
0x3f51   :  { %v4933_v36 = vadd.f32 %v4932_v21, %v4931_v15  ;;  %v4942_v15 = vsel %vm106_vm1, %v4928_v45, 0.0 }
0x3f54   :  { %4812 = vbcast.lane.b32.xlu0 %v4810_v52, 256  ;;  %v4824_v52 = vrot.slane %v4730_v9, %v10044_v29 }
0x3f58   :  { %4819 = vbcast.lane.b32.xlu0 %v4817_v23, 256  ;;  %v4935_v23 = vadd.f32 %v4934_v35, %v4933_v36 }
0x3f5a   :  { %v4937_v58 = vadd.f32 %v4936_v61, %v4935_v23 }
0x3f5c   :  { %4826 = vbcast.lane.b32.xlu0 %v4824_v52, 256  ;;  %v4939_v28 = vadd.f32 %v4938_v56, %v4937_v58 }
0x3f5e   :  { %v4941_v21 = vadd.f32 %v4940_v46, %v4939_v28 }
0x3f60   :  { %4833 = vbcast.lane.b32.xlu0 %v4831_v60, 256  ;;  %v4943_v25 = vadd.f32 %v4942_v15, %v4941_v21 }
0x3f64   :  { %4840 = vbcast.lane.b32.xlu0 %v4838_v27, 256 }
0x3f68   :  { %4945 = vrot.lane.b32.xlu0 %v4943_v25, %s13319_s8 }
0x3fbe   :  { %v4792_v36 = vpop.permute.xlu0 %4791  ;;  %v4799_v52 = vpop.permute.xlu1 %4798 }
0x3fbf   :  { %v4843_v51 = vmul.f32 %v4799_v52, %v11546_v42  ;;  %v4842_v5 = vmul.f32 %v4792_v36, %v11931_v19 }
0x3fc1   :  { %v4851_v9 = vsel %vm106_vm1, %v4843_v51, 0.0  ;;  %v4850_v23 = vsel %vm106_vm1, %v4842_v5, 0.0 }
0x3fc2   :  { %v4806_v34 = vpop.permute.xlu0 %4805  ;;  %v4852_v58 = vadd.f32 %v4851_v9, %v4850_v23 }
0x3fc3   :  { %v4844_v61 = vmul.f32 %v4806_v34, %v11552_v63 }
0x3fc5   :  { %v4853_v56 = vsel %vm106_vm1, %v4844_v61, 0.0 }
0x3fc6   :  { %v4813_v35 = vpop.permute.xlu0 %4812  ;;  %v4854_v27 = vadd.f32 %v4853_v56, %v4852_v58 }
0x3fc7   :  { %v4845_v60 = vmul.f32 %v4813_v35, %v11564_v3 }
0x3fc9   :  { %v4855_v28 = vsel %vm106_vm1, %v4845_v60, 0.0 }
0x3fca   :  { %v4820_v43 = vpop.permute.xlu0 %4819  ;;  %v4856_v15 = vadd.f32 %v4855_v28, %v4854_v27 }
0x3fcb   :  { %v4846_v45 = vmul.f32 %v4820_v43, %v11567_v2 }
0x3fcd   :  { %v4857_v63 = vsel %vm106_vm1, %v4846_v45, 0.0 }
0x3fce   :  { %v4827_v46 = vpop.permute.xlu0 %4826  ;;  %v4858_v3 = vadd.f32 %v4857_v63, %v4856_v15  ;;  %v8832_v15 = vld [vmem:[%s13313_s10 + $0x10] sm:$0xff] }
0x3fcf   :  { %v4847_v42 = vmul.f32 %v4827_v46, %v11573_v41 }
0x3fd1   :  { %v4859_v25 = vsel %vm106_vm1, %v4847_v42, 0.0 }
0x3fd2   :  { %v4834_v21 = vpop.permute.xlu0 %4833  ;;  %v4860_v52 = vadd.f32 %v4859_v25, %v4858_v3 }
0x3fd3   :  { %v4848_v36 = vmul.f32 %v4834_v21, %v11577_v57  ;;  %v5169_v21 = vsub.f32 1.0, %v8832_v15 }
0x3fd5   :  { %v4861_v34 = vsel %vm106_vm1, %v4848_v36, 0.0  ;;  %v5170_v25 = vmul.f32 1e+30, %v5169_v21  ;;  %v12064_v21 = vld [vmem:[#allocation4 + $0x20] sm:$0xff] }
0x3fd6   :  { %v4841_v2 = vpop.permute.xlu0 %4840  ;;  %v4862_v51 = vadd.f32 %v4861_v34, %v4860_v52 }
0x3fd7   :  { %v4849_v35 = vmul.f32 %v4841_v2, %v11583_v53 }
0x3fd9   :  { %v4863_v5 = vsel %vm106_vm1, %v4849_v35, 0.0 }
0x3fda   :  { %v4864_v41 = vadd.f32 %v4863_v5, %v4862_v51  ;;  %v4946_v61 = vpop.permute.xlu0 %4945 }
0x3fdc   :  { %v4948_v43 = vsel %vm106_vm1, %v4864_v41, %v4946_v61 }
0x3fdd   :  { %9335 = vmatmul.mubr.msk.f32.vlgmr.msra.gmra.mxu1 %vm572_vm3, %v4948_v43 }
0x3fde   :  { %9338 = vmatpush3.msra.mxu1 %v11613_v44  ;;  %9353 = vmatprep.mubr.msk.f32.mxu1 %vm9837_vm2, %v13315_v4 }
0x3fdf   :  { %9339 = vmatprep.subr.mxu1 %v13315_v4 }
0x3fe0   :  { %9340 = vmatpush3.msra.mxu1 %v11621_v14 }
0x3fe1   :  { %9341 = vmatprep.subr.mxu1 %v13315_v4 }
0x3fe2   :  { %9342 = vmatpush3.msra.mxu1 %v11633_v38 }
0x3fe3   :  { %9343 = vmatprep.subr.mxu1 %v13315_v4 }
0x3fe4   :  { %9344 = vmatpush3.msra.mxu1 %v11641_v7 }
0x3fe5   :  { %9345 = vmatprep.subr.mxu1 %v13315_v4 }
0x3fe6   :  { %9346 = vmatpush3.msra.mxu1 %v11651_v33 }
0x3fe7   :  { %9347 = vmatprep.subr.mxu1 %v13315_v4 }
0x3fe8   :  { %9348 = vmatpush3.msra.mxu1 %v11659_v18 }
0x3fe9   :  { %9349 = vmatprep.subr.mxu1 %v13315_v4 }
0x3fea   :  { %9350 = vmatpush3.msra.mxu1 %v11669_v62 }
0x3feb   :  { %9351 = vmatprep.subr.mxu1 %v13315_v4 }
0x3fec   :  { %9352 = vmatpush3.msra.mxu1 %v11677_v22 }
0x3fed   :  { %9356 = vmatprep.subr.mxu1 %v13315_v4 }
0x409d   :  { %v5018_v57 = vpop.f32.mrf.mxu1 }
0x409e   :  { %5023 = vrot.lane.b32.xlu1 %v5018_v57, %s13319_s8 }
0x409f   :  { %v9336_v53 = vpop.f32.mrf.mxu1 }
0x40a0   :  { %v8833_v53 = vld [vmem:[%s13298_s9 + $0x10] sm:$0xff] }
0x4110   :  { %v5024_v44 = vpop.permute.xlu1 %5023 }
0x4111   :  { %v5026_v14 = vsel %vm106_vm1, %v11881_v6, %v5024_v44 }
0x4112   :  { %8829 = vmatmul.mubr.msk.f32.vlgmr.msra.gmra.mxu0 %vm572_vm3, %v5026_v14 }
0x4113   :  { %5520 = vmatpush1.msra.mxu0 %v11717_v1  ;;  %5567 = vmatprep.mubr.f32.mxu0 %v13315_v4 }
0x4114   :  { %5521 = vmatprep.subr.mxu0 %v11725_v24 }
0x4115   :  { %5522 = vmatpush1.msra.mxu0 %v11731_v47 }
0x4116   :  { %5523 = vmatprep.subr.mxu0 %v11737_v55 }
0x4117   :  { %5524 = vmatpush1.msra.mxu0 %v11744_v54 }
0x4118   :  { %5525 = vmatprep.subr.mxu0 %v11750_v8 }
0x4119   :  { %5526 = vmatpush1.msra.mxu0 %v11756_v40 }
0x411a   :  { %5527 = vmatprep.subr.mxu0 %v11762_v0  ;;  %v12017_v0 = vld [vmem:[#allocation3 + $0x10] sm:$0xff] }
0x411b   :  { %5528 = vmatpush1.msra.mxu0 %v11768_v17  ;;  %v5156_v17 = vmul.f32 %v11879_v39, %v12017_v0 }
0x411c   :  { %5529 = vmatprep.subr.mxu0 %v11774_v10 }
0x411d   :  { %5530 = vmatpush1.msra.mxu0 %v11780_v30  ;;  %v5157_v10 = vsel %vm106_vm1, %v5156_v17, 0.0 }
0x411e   :  { %5531 = vmatprep.subr.mxu0 %v11786_v59 }
0x411f   :  { %5532 = vmatpush1.msra.mxu0 %v11792_v13 }
0x4120   :  { %5533 = vmatprep.subr.mxu0 %v11798_v49 }
0x4121   :  { %5534 = vmatpush1.msra.mxu0 %v11804_v20 }
0x4122   :  { %5992 = vmatprep.subr.mxu0 %v11707_v11 }
0x41d2   :  { %v5096_v38 = vpop.f32.mrf.mxu0 }
0x41d3   :  { %v5097_v18 = vadd.f32 %v5096_v38, %v11849_v12 }
0x41d4   :  { %v5098_v7 = vpop.f32.mrf.mxu0 }
0x41d5   :  { %v5099_v33 = vadd.f32 %v5098_v7, %v11839_v16  ;;  %v8830_v62 = vmul.f32 -1.442695, %v5097_v18  ;;  %v13330_v18 = vld [vmem:[#allocation10_spill] sm:$0xff] }
0x41d7   :  { %5108 = vrot.lane.b32.xlu0 %v5099_v33, %s9839_s28  ;;  %9662 = vpow2.f32 %v8830_v62 }
0x41db   :  { %5128 = vrot.lane.b32.xlu0 %v11881_v6, %s9839_s28 }
0x41e4   :  { %v9663_v22 = vpop.eup %9662 }
0x41e5   :  { %v5104_v1 = vadd.f32 1.0, %v9663_v22  ;;  %v13331_v22 = vld [vmem:[#allocation9_spill] sm:$0xff] }
0x41e7   :  { %9664 = vrcp.f32 %v5104_v1 }
0x41f4   :  { %v9665_v24 = vpop.eup %9664 }
0x41f5   :  { %v5114_v30 = vsub.f32 1.0, %v9665_v24  ;;  %v5120_v9 = vmul.f32 %v9665_v24, %v5024_v44 }
0x4249   :  { %v5109_v47 = vpop.permute.xlu0 %5108 }
0x424a   :  { %v5111_v55 = vmul.f32 %v9665_v24, %v5109_v47 }
0x424c   :  { %v5112_v11 = vadd.f32 %v5111_v55, %v5099_v33  ;;  %v13333_v55 = vld [vmem:[#allocation13_spill] sm:$0xff] }
0x424d   :  { %v5129_v54 = vpop.permute.xlu0 %5128 }
0x424e   :  { %9666 = vtanh.f32 %v5112_v11  ;;  %v5131_v8 = vmul.f32 %v9665_v24, %v5129_v54  ;;  %v13332_v24 = vld [vmem:[#allocation11_spill] sm:$0xff] }
0x4250   :  { %5133 = vrot.lane.b32.xlu0 %v5131_v8, %s9840_s0 }
0x425b   :  { %v9667_v40 = vpop.eup %9666 }
0x425c   :  { %5116 = vrot.lane.b32.xlu1 %v9667_v40, %s13319_s8 }
0x426f   :  { %5158 = vadd.xlane.f32.xlu0 %v5157_v10 }
0x42c2   :  { %v5134_v49 = vpop.permute.xlu0 %5133 }
0x42ce   :  { %v5117_v59 = vpop.permute.xlu1 %5116 }
0x42cf   :  { %v5119_v13 = vmul.f32 %v5117_v59, %v5114_v30 }
0x42d1   :  { %5123 = vrot.lane.b32.xlu1 %v5119_v13, %s9840_s0  ;;  %v5121_v23 = vadd.f32 %v5120_v9, %v5119_v13 }
0x42f8   :  { %v5159_v20 = vpop.xlane.xlu0 %5158 }
0x42f9   :  { %v5160_v6 = vadd.f32 %v11888_v50, %v5159_v20 }
0x42fb   :  { %5164 = vperm.xlu0 %9566, %v5160_v6  }
0x4343   :  { %v5124_v60 = vpop.permute.xlu1 %5123 }
0x4344   :  { %v5126_v56 = vadd.f32 %v5124_v60, %v5121_v23 }
0x4346   :  { %v5136_v45 = vadd.f32 %v5134_v49, %v5126_v56 }
0x4348   :  { %v5143_v58 = vmul.f32 %v5136_v45, %v11872_v48  ;;  %5138 = vrot.lane.b32.xlu0 %v5136_v45, %s9839_s28 }
0x434a   :  { %5145 = vrot.lane.b32.xlu1 %v5143_v58, %s9839_s28 }
0x4376   :  { %v5165_v46 = vpop.permute.xlu0 %5164 }
0x43ba   :  { %v5139_v28 = vpop.permute.xlu0 %5138 }
0x43bb   :  { %5142 = vst.msk [vmem:[#allocation4 + $0x8] sm:$0xff] %vm106_vm1, %v5139_v28 }
0x43bc   :  { %v5146_v42 = vpop.permute.xlu1 %5145 }
0x43bd   :  { %v5148_v27 = vsel %vm106_vm1, %v5146_v42, 0.0 }
0x43be   :  { %5149 = vadd.xlane.f32.xlu1 %v5148_v27  ;;  %v12061_v27 = vld [vmem:[#allocation4 + $0x18] sm:$0xff] }
0x43c2   :  { %v12057_v58 = vld [vmem:[#allocation4 + $0x8] sm:$0xff] }
0x4447   :  { %v5150_v63 = vpop.xlane.xlu1 %5149 }
0x4448   :  { %5151 = vst.msk [vmem:[#allocation5] sm:$0xff] %vm1270_vm6, %v5150_v63  ;;  %vm13342_vm6 = vmmov %vm13341_vm5 }
0x444f   :  { %v5161_v36 = vld [vmem:[#allocation5] sm:$0xff] }
0x4450   :  { %v5167_v3 = vadd.f32 %v5165_v46, %v5161_v36  ;;  %v5253_v46 = vld [vmem:[#allocation4 + $0x10] sm:$0xff] }
0x4452   :  { %v5171_v34 = vsub.f32 %v5167_v3, %v5170_v25 }
0x4454   :  { %v5172_v52 = vsel %vm1294_vm7, %v5171_v34, -1e+37  ;;  %v12069_v34 = vld [vmem:[#allocation4 + $0x28] sm:$0xff] }
0x4455   :  { %v5173_v2 = vsel %vm290_vm0, %v5172_v52, -inf }
0x4456   :  { %5174 = vmax.xlane.f32.xlu1 %v5173_v2 }
0x44df   :  { %v5175_v35 = vpop.xlane.xlu1 %5174 }
0x44e0   :  { %v5176_v51 = vsub.f32 %v5172_v52, %v5175_v35 }
0x44e2   :  { %v5177_v5 = vmul.f32 1.442695, %v5176_v51 }
0x44e4   :  { %9668 = vpow2.f32 %v5177_v5  ;;  %v12074_v5 = vld [vmem:[#allocation4 + $0x30] sm:$0xff] }
0x44f1   :  { %v9669_v41 = vpop.eup %9668 }
0x44f2   :  { %v5179_v61 = vsel %vm290_vm0, %v9669_v41, 0.0 }
0x44f3   :  { %5180 = vadd.xlane.f32.xlu1 %v5179_v61 }
0x457c   :  { %v5181_v43 = vpop.xlane.xlu1 %5180 }
0x457d   :  { %9670 = vrcp.f32 %v5181_v43 }
0x458a   :  { %v9671_v57 = vpop.eup %9670 }
0x458b   :  { %v5183_v44 = vmul.f32 %v9671_v57, %v9669_v41 }
0x458d   :  { %v5625_v14 = vsel %vm1294_vm7, %v5183_v44, 0.0  ;;  %v5185_v38 = vmul.f32 %v8833_v53, %v5183_v44  ;;  %v12079_v53 = vld [vmem:[#allocation4 + $0x38] sm:$0xff] }
0x458e   :  { %8837 = vst.msk [vmem:[%s13231_s27 + $0x10] sm:$0xff] %vm290_vm0, %v5625_v14 }
0x458f   :  { %v5186_v7 = vsub.f32 %v5183_v44, %v5185_v38 }
0x4591   :  { %5219 = vxpose.xlu1.b32.start.end [1/1] (short) (narrow) %v5186_v7, 8 }
0x460d   :  { %v5235_v33 = vpop.trf.xlu1 }
0x460e   :  { %v5341_v62 = vrot.slane %v5235_v33, %v13330_v18  ;;  %v5348_v1 = vrot.slane %v5235_v33, %v13331_v22  ;;  %v5355_v47 = vrot.slane %v5235_v33, %v13332_v24  ;;  %v5362_v11 = vrot.slane %v5235_v33, %v13333_v55 }
0x460f   :  { %v5369_v54 = vrot.slane %v5235_v33, %v13327_v37  ;;  %v5376_v8 = vrot.slane %v5235_v33, %v10044_v29  ;;  %v5383_v40 = vrot.slane %v5235_v33, %v10040_v26  ;;  %v5390_v17 = vrot.slane %v5235_v33, %v10047_v31 }
0x4610   :  { %5343 = vbcast.lane.b32.xlu0 %v5341_v62, 256 }
0x4614   :  { %5350 = vbcast.lane.b32.xlu0 %v5348_v1, 256 }
0x4618   :  { %5357 = vbcast.lane.b32.xlu0 %v5355_v47, 256 }
0x461c   :  { %5364 = vbcast.lane.b32.xlu0 %v5362_v11, 256 }
0x4620   :  { %5371 = vbcast.lane.b32.xlu0 %v5369_v54, 256 }
0x4624   :  { %5378 = vbcast.lane.b32.xlu0 %v5376_v8, 256 }
0x4628   :  { %5385 = vbcast.lane.b32.xlu0 %v5383_v40, 256 }
0x462c   :  { %5392 = vbcast.lane.b32.xlu0 %v5390_v17, 256 }
0x464a   :  { %5187 = vxpose.xlu0.b32.start.end [1/1] (short) (narrow) %v5185_v38, 8 }
0x4682   :  { %v5344_v10 = vpop.permute.xlu0 %5343 }
0x4683   :  { %v5394_v63 = vmul.f32 %v5344_v10, %v11931_v19 }
0x4685   :  { %v5402_v52 = vsel %vm106_vm1, %v5394_v63, 0.0 }
0x4686   :  { %v5351_v30 = vpop.permute.xlu0 %5350 }
0x4687   :  { %v5395_v42 = vmul.f32 %v5351_v30, %v12057_v58 }
0x4689   :  { %v5403_v36 = vsel %vm106_vm1, %v5395_v42, 0.0 }
0x468a   :  { %v5358_v59 = vpop.permute.xlu0 %5357  ;;  %v5404_v51 = vadd.f32 %v5403_v36, %v5402_v52 }
0x468b   :  { %v5396_v15 = vmul.f32 %v5358_v59, %v5253_v46 }
0x468d   :  { %v5405_v2 = vsel %vm106_vm1, %v5396_v15, 0.0 }
0x468e   :  { %v5365_v13 = vpop.permute.xlu0 %5364  ;;  %v5406_v57 = vadd.f32 %v5405_v2, %v5404_v51 }
0x468f   :  { %v5397_v3 = vmul.f32 %v5365_v13, %v12061_v27 }
0x4691   :  { %v5407_v61 = vsel %vm106_vm1, %v5397_v3, 0.0 }
0x4692   :  { %v5372_v49 = vpop.permute.xlu0 %5371  ;;  %v5408_v38 = vadd.f32 %v5407_v61, %v5406_v57 }
0x4693   :  { %v5398_v35 = vmul.f32 %v5372_v49, %v12064_v21 }
0x4695   :  { %v5409_v44 = vsel %vm106_vm1, %v5398_v35, 0.0 }
0x4696   :  { %v5379_v20 = vpop.permute.xlu0 %5378  ;;  %v5410_v1 = vadd.f32 %v5409_v44, %v5408_v38 }
0x4697   :  { %v5399_v43 = vmul.f32 %v5379_v20, %v12069_v34 }
0x4699   :  { %v5411_v33 = vsel %vm106_vm1, %v5399_v43, 0.0 }
0x469a   :  { %v5386_v6 = vpop.permute.xlu0 %5385  ;;  %v5412_v11 = vadd.f32 %v5411_v33, %v5410_v1  ;;  %v12119_v1 = vld [vmem:[%s13225_s14 + $0x30] sm:$0xff] }
0x469b   :  { %v5400_v14 = vmul.f32 %v5386_v6, %v12074_v5 }
0x469d   :  { %v5413_v47 = vsel %vm106_vm1, %v5400_v14, 0.0 }
0x469e   :  { %v5393_v9 = vpop.permute.xlu0 %5392  ;;  %v5414_v40 = vadd.f32 %v5413_v47, %v5412_v11  ;;  %v12126_v47 = vld [vmem:[%s13225_s14 + $0x28] sm:$0xff]  ;;  %v12133_v11 = vld [vmem:[%s13225_s14 + $0x20] sm:$0xff] }
0x469f   :  { %v5401_v62 = vmul.f32 %v5393_v9, %v12079_v53 }
0x46a1   :  { %v5415_v8 = vsel %vm106_vm1, %v5401_v62, 0.0  ;;  %v12110_v62 = vld [vmem:[%s13225_s14 + $0x38] sm:$0xff] }
0x46a2   :  { %v5416_v17 = vadd.f32 %v5415_v8, %v5414_v40  ;;  %v12147_v8 = vld [vmem:[%s13225_s14 + $0x10] sm:$0xff]  ;;  %v12154_v40 = vld [vmem:[%s13225_s14 + $0x8] sm:$0xff] }
0x46c6   :  { %v5203_v23 = vpop.trf.xlu0 }
0x46c7   :  { %v5269_v60 = vrot.slane %v5203_v23, %v13331_v22  ;;  %v5262_v56 = vrot.slane %v5203_v23, %v13330_v18  ;;  %v5276_v45 = vrot.slane %v5203_v23, %v13332_v24  ;;  %v5283_v28 = vrot.slane %v5203_v23, %v13333_v55 }
0x46c8   :  { %v5290_v25 = vrot.slane %v5203_v23, %v13327_v37  ;;  %v5297_v41 = vrot.slane %v5203_v23, %v10044_v29  ;;  %v5304_v7 = vrot.slane %v5203_v23, %v10040_v26  ;;  %v5311_v54 = vrot.slane %v5203_v23, %v10047_v31 }
0x46c9   :  { %5271 = vbcast.lane.b32.xlu0 %v5269_v60, 256  ;;  %5264 = vbcast.lane.b32.xlu1 %v5262_v56, 256 }
0x46cd   :  { %5278 = vbcast.lane.b32.xlu1 %v5276_v45, 256 }
0x46d1   :  { %5285 = vbcast.lane.b32.xlu1 %v5283_v28, 256 }
0x46d5   :  { %5292 = vbcast.lane.b32.xlu1 %v5290_v25, 256 }
0x46d9   :  { %5299 = vbcast.lane.b32.xlu1 %v5297_v41, 256 }
0x46dd   :  { %5306 = vbcast.lane.b32.xlu1 %v5304_v7, 256 }
0x46e1   :  { %5313 = vbcast.lane.b32.xlu1 %v5311_v54, 256  ;;  %v12140_v54 = vld [vmem:[%s13225_s14 + $0x18] sm:$0xff] }
0x46e5   :  { %5418 = vrot.lane.b32.xlu1 %v5416_v17, %s13319_s8  ;;  %v12161_v17 = vld [vmem:[%s13225_s14] sm:$0xff] }
0x473b   :  { %v5265_v10 = vpop.permute.xlu1 %5264  ;;  %v5272_v59 = vpop.permute.xlu0 %5271 }
0x473c   :  { %v5316_v49 = vmul.f32 %v5272_v59, %v12057_v58  ;;  %v5315_v20 = vmul.f32 %v5265_v10, %v11931_v19 }
0x473e   :  { %v5324_v60 = vsel %vm106_vm1, %v5316_v49, 0.0  ;;  %v5323_v23 = vsel %vm106_vm1, %v5315_v20, 0.0  ;;  %v12175_v49 = vld [vmem:[%s13226_s15 + $0x70] sm:$0xff]  ;;  %v12182_v20 = vld [vmem:[%s13226_s15 + $0x68] sm:$0xff] }
0x473f   :  { %v5279_v30 = vpop.permute.xlu1 %5278  ;;  %v5325_v42 = vadd.f32 %v5324_v60, %v5323_v23  ;;  %v12200_v60 = vld [vmem:[%s13226_s15 + $0x50] sm:$0xff]  ;;  %v12206_v23 = vld [vmem:[%s13226_s15 + $0x48] sm:$0xff] }
0x4740   :  { %v5317_v6 = vmul.f32 %v5279_v30, %v5253_v46 }
0x4742   :  { %v5326_v45 = vsel %vm106_vm1, %v5317_v6, 0.0  ;;  %v12188_v6 = vld [vmem:[%s13226_s15 + $0x60] sm:$0xff] }
0x4743   :  { %v5286_v13 = vpop.permute.xlu1 %5285  ;;  %v5327_v36 = vadd.f32 %v5326_v45, %v5325_v42  ;;  %v12218_v45 = vld [vmem:[%s13226_s15 + $0x38] sm:$0xff]  ;;  %v12230_v42 = vld [vmem:[%s13226_s15 + $0x28] sm:$0xff] }
0x4744   :  { %v5318_v56 = vmul.f32 %v5286_v13, %v12061_v27 }
0x4746   :  { %v5328_v15 = vsel %vm106_vm1, %v5318_v56, 0.0  ;;  %v12212_v56 = vld [vmem:[%s13226_s15 + $0x40] sm:$0xff] }
0x4747   :  { %v5293_v9 = vpop.permute.xlu1 %5292  ;;  %v5329_v3 = vadd.f32 %v5328_v15, %v5327_v36  ;;  %v12242_v15 = vld [vmem:[%s13226_s15 + $0x18] sm:$0xff]  ;;  %v12254_v36 = vld [vmem:[%s13226_s15 + $0x8] sm:$0xff] }
0x4748   :  { %v5319_v28 = vmul.f32 %v5293_v9, %v12064_v21  ;;  %v12194_v9 = vld [vmem:[%s13226_s15 + $0x58] sm:$0xff] }
0x474a   :  { %v5330_v46 = vsel %vm106_vm1, %v5319_v28, 0.0  ;;  %v12224_v28 = vld [vmem:[%s13226_s15 + $0x30] sm:$0xff] }
0x474b   :  { %v5300_v63 = vpop.permute.xlu1 %5299  ;;  %v5331_v51 = vadd.f32 %v5330_v46, %v5329_v3  ;;  %v12260_v46 = vld [vmem:[%s13226_s15] sm:$0xff]  ;;  %v12266_v3 = vld [vmem:[%s13226_s15 + $0x78] sm:$0xff] }
0x474c   :  { %v5320_v25 = vmul.f32 %v5300_v63, %v12069_v34  ;;  %v12236_v63 = vld [vmem:[%s13226_s15 + $0x20] sm:$0xff] }
0x474e   :  { %v5332_v2 = vsel %vm106_vm1, %v5320_v25, 0.0  ;;  %v12248_v25 = vld [vmem:[%s13226_s15 + $0x10] sm:$0xff] }
0x474f   :  { %v5307_v52 = vpop.permute.xlu1 %5306  ;;  %v5333_v61 = vadd.f32 %v5332_v2, %v5331_v51 }
0x4750   :  { %v5321_v35 = vmul.f32 %v5307_v52, %v12074_v5 }
0x4752   :  { %v5334_v41 = vsel %vm106_vm1, %v5321_v35, 0.0 }
0x4753   :  { %v5314_v43 = vpop.permute.xlu1 %5313  ;;  %v5335_v44 = vadd.f32 %v5334_v41, %v5333_v61 }
0x4754   :  { %v5322_v57 = vmul.f32 %v5314_v43, %v12079_v53 }
0x4756   :  { %v5336_v14 = vsel %vm106_vm1, %v5322_v57, 0.0 }
0x4757   :  { %v5337_v38 = vadd.f32 %v5336_v14, %v5335_v44  ;;  %v5419_v7 = vpop.permute.xlu1 %5418 }
0x4759   :  { %v5421_v33 = vsel %vm106_vm1, %v5337_v38, %v5419_v7 }
0x475a   :  { %9354 = vmatmul.mubr.msk.f32.vlgmr.msra.gmra.mxu1 %vm572_vm3, %v5421_v33 }
0x475b   :  { %9357 = vmatpush3.msra.mxu1 %v12110_v62  ;;  %9372 = vmatprep.mubr.msk.f32.mxu1 %vm9837_vm2, %v13315_v4 }
0x475c   :  { %9358 = vmatprep.subr.mxu1 %v13315_v4 }
0x475d   :  { %9359 = vmatpush3.msra.mxu1 %v12119_v1 }
0x475e   :  { %9360 = vmatprep.subr.mxu1 %v13315_v4 }
0x475f   :  { %9361 = vmatpush3.msra.mxu1 %v12126_v47 }
0x4760   :  { %9362 = vmatprep.subr.mxu1 %v13315_v4 }
0x4761   :  { %9363 = vmatpush3.msra.mxu1 %v12133_v11 }
0x4762   :  { %9364 = vmatprep.subr.mxu1 %v13315_v4 }
0x4763   :  { %9365 = vmatpush3.msra.mxu1 %v12140_v54 }
0x4764   :  { %9366 = vmatprep.subr.mxu1 %v13315_v4 }
0x4765   :  { %9367 = vmatpush3.msra.mxu1 %v12147_v8 }
0x4766   :  { %9368 = vmatprep.subr.mxu1 %v13315_v4 }
0x4767   :  { %9369 = vmatpush3.msra.mxu1 %v12154_v40 }
0x4768   :  { %9370 = vmatprep.subr.mxu1 %v13315_v4 }
0x4769   :  { %9371 = vmatpush3.msra.mxu1 %v12161_v17 }
0x476a   :  { %9375 = vmatprep.subr.mxu1 %v13315_v4 }
0x481a   :  { %v5491_v10 = vpop.f32.mrf.mxu1 }
0x481b   :  { %5496 = vrot.lane.b32.xlu1 %v5491_v10, %s13319_s8 }
0x481c   :  { %v9355_v30 = vpop.f32.mrf.mxu1 }
0x488d   :  { %v12166_v59 = vpop.permute.xlu1 %5496 }
0x488e   :  { %v5499_v13 = vsel %vm106_vm1, %v12017_v0, %v12166_v59 }
0x488f   :  { %8835 = vmatmul.mubr.msk.f32.vlgmr.msra.gmra.mxu0 %vm572_vm3, %v5499_v13 }
0x4890   :  { %5993 = vmatpush1.msra.mxu0 %v12175_v49  ;;  %6040 = vmatprep.mubr.f32.mxu0 %v13315_v4 }
0x4891   :  { %5994 = vmatprep.subr.mxu0 %v12182_v20 }
0x4892   :  { %5995 = vmatpush1.msra.mxu0 %v12188_v6 }
0x4893   :  { %5996 = vmatprep.subr.mxu0 %v12194_v9 }
0x4894   :  { %5997 = vmatpush1.msra.mxu0 %v12200_v60 }
0x4895   :  { %5998 = vmatprep.subr.mxu0 %v12206_v23 }
0x4896   :  { %5999 = vmatpush1.msra.mxu0 %v12212_v56 }
0x4897   :  { %6000 = vmatprep.subr.mxu0 %v12218_v45 }
0x4898   :  { %6001 = vmatpush1.msra.mxu0 %v12224_v28 }
0x4899   :  { %6002 = vmatprep.subr.mxu0 %v12230_v42 }
0x489a   :  { %6003 = vmatpush1.msra.mxu0 %v12236_v63 }
0x489b   :  { %6004 = vmatprep.subr.mxu0 %v12242_v15 }
0x489c   :  { %6005 = vmatpush1.msra.mxu0 %v12248_v25 }
0x489d   :  { %6006 = vmatprep.subr.mxu0 %v12254_v36 }
0x489e   :  { %6007 = vmatpush1.msra.mxu0 %v12260_v46 }
0x489f   :  { %6465 = vmatprep.subr.mxu0 %v12266_v3 }
0x494f   :  { %v5569_v52 = vpop.f32.mrf.mxu0 }
0x4950   :  { %v5570_v51 = vadd.f32 %v5569_v52, %v11849_v12 }
0x4951   :  { %v5571_v2 = vpop.f32.mrf.mxu0 }
0x4952   :  { %v5572_v35 = vadd.f32 %v5571_v2, %v11839_v16  ;;  %v8836_v41 = vmul.f32 -1.442695, %v5570_v51 }
0x4954   :  { %5581 = vrot.lane.b32.xlu0 %v5572_v35, %s9839_s28  ;;  %9672 = vpow2.f32 %v8836_v41 }
0x4958   :  { %5601 = vrot.lane.b32.xlu0 %v12017_v0, %s9839_s28  ;;  %v12276_v0 = vld [vmem:[#allocation3 + $0x18] sm:$0xff] }
0x4959   :  { %v5629_v30 = vmul.f32 %v11879_v39, %v12276_v0 }
0x495b   :  { %v5630_v13 = vsel %vm106_vm1, %v5629_v30, 0.0 }
0x4961   :  { %v9673_v61 = vpop.eup %9672 }
0x4962   :  { %v5577_v43 = vadd.f32 1.0, %v9673_v61 }
0x4964   :  { %9674 = vrcp.f32 %v5577_v43 }
0x4971   :  { %v9675_v57 = vpop.eup %9674 }
0x4972   :  { %v5587_v52 = vsub.f32 1.0, %v9675_v57  ;;  %v5593_v43 = vmul.f32 %v9675_v57, %v12166_v59  ;;  %v8838_v59 = vld [vmem:[%s13313_s10 + $0x18] sm:$0xff] }
0x49c6   :  { %v5582_v44 = vpop.permute.xlu0 %5581 }
0x49c7   :  { %v5584_v14 = vmul.f32 %v9675_v57, %v5582_v44 }
0x49c9   :  { %v5585_v38 = vadd.f32 %v5584_v14, %v5572_v35 }
0x49ca   :  { %v5602_v7 = vpop.permute.xlu0 %5601 }
0x49cb   :  { %9676 = vtanh.f32 %v5585_v38  ;;  %v5604_v33 = vmul.f32 %v9675_v57, %v5602_v7  ;;  %v5642_v57 = vsub.f32 1.0, %v8838_v59 }
0x49cd   :  { %5606 = vrot.lane.b32.xlu0 %v5604_v33, %s9840_s0 }
0x49d8   :  { %v9677_v10 = vpop.eup %9676 }
0x49d9   :  { %5589 = vrot.lane.b32.xlu1 %v9677_v10, %s13319_s8 }
0x49ec   :  { %5631 = vadd.xlane.f32.xlu0 %v5630_v13 }
0x4a3f   :  { %v5607_v35 = vpop.permute.xlu0 %5606 }
0x4a4b   :  { %v5590_v2 = vpop.permute.xlu1 %5589 }
0x4a4c   :  { %v5592_v51 = vmul.f32 %v5590_v2, %v5587_v52  ;;  %v5643_v52 = vmul.f32 1e+30, %v5642_v57 }
0x4a4e   :  { %5596 = vrot.lane.b32.xlu1 %v5592_v51, %s9840_s0  ;;  %v5594_v44 = vadd.f32 %v5593_v43, %v5592_v51 }
0x4a75   :  { %v5632_v41 = vpop.xlane.xlu0 %5631 }
0x4a76   :  { %v5633_v61 = vadd.f32 %v11888_v50, %v5632_v41 }
0x4a78   :  { %5637 = vperm.xlu0 %9566, %v5633_v61  }
0x4ac0   :  { %v5597_v14 = vpop.permute.xlu1 %5596 }
0x4ac1   :  { %v5599_v38 = vadd.f32 %v5597_v14, %v5594_v44 }
0x4ac3   :  { %v5609_v7 = vadd.f32 %v5607_v35, %v5599_v38 }
0x4ac5   :  { %v5616_v39 = vmul.f32 %v5609_v7, %v11872_v48  ;;  %5611 = vrot.lane.b32.xlu0 %v5609_v7, %s9839_s28 }
0x4ac7   :  { %5618 = vrot.lane.b32.xlu1 %v5616_v39, %s9839_s28 }
0x4af3   :  { %v5638_v33 = vpop.permute.xlu0 %5637 }
0x4b37   :  { %v5612_v10 = vpop.permute.xlu0 %5611 }
0x4b38   :  { %5615 = vst.msk [vmem:[#allocation4 + $0x10] sm:$0xff] %vm106_vm1, %v5612_v10 }
0x4b39   :  { %v5619_v30 = vpop.permute.xlu1 %5618 }
0x4b3a   :  { %v5621_v50 = vsel %vm106_vm1, %v5619_v30, 0.0 }
0x4b3b   :  { %5622 = vadd.xlane.f32.xlu1 %v5621_v50 }
0x4bc4   :  { %v5623_v13 = vpop.xlane.xlu1 %5622 }
0x4bc5   :  { %5624 = vst.msk [vmem:[#allocation5] sm:$0xff] %vm1748_vm8, %v5623_v13 }
0x4bcc   :  { %v5634_v2 = vld [vmem:[#allocation5] sm:$0xff] }
0x4bcd   :  { %v5640_v51 = vadd.f32 %v5638_v33, %v5634_v2  ;;  %v8839_v33 = vld [vmem:[%s13298_s9 + $0x18] sm:$0xff] }
0x4bcf   :  { %v5644_v35 = vsub.f32 %v5640_v51, %v5643_v52 }
0x4bd1   :  { %v5645_v41 = vsel %vm1772_vm9, %v5644_v35, -1e+37 }
0x4bd2   :  { %v5646_v61 = vsel %vm290_vm0, %v5645_v41, -inf }
0x4bd3   :  { %5647 = vmax.xlane.f32.xlu1 %v5646_v61 }
0x4c5c   :  { %v5648_v43 = vpop.xlane.xlu1 %5647 }
0x4c5d   :  { %v5649_v44 = vsub.f32 %v5645_v41, %v5648_v43 }
0x4c5f   :  { %v5650_v14 = vmul.f32 1.442695, %v5649_v44 }
0x4c61   :  { %9678 = vpow2.f32 %v5650_v14 }
0x4c6e   :  { %v9679_v38 = vpop.eup %9678 }
0x4c6f   :  { %v5652_v7 = vsel %vm290_vm0, %v9679_v38, 0.0 }
0x4c70   :  { %5653 = vadd.xlane.f32.xlu1 %v5652_v7 }
0x4cf9   :  { %v5654_v39 = vpop.xlane.xlu1 %5653 }
0x4cfa   :  { %9680 = vrcp.f32 %v5654_v39 }
0x4d07   :  { %v9681_v10 = vpop.eup %9680 }
0x4d08   :  { %v5656_v30 = vmul.f32 %v9681_v10, %v9679_v38 }
0x4d0a   :  { %v6098_v50 = vsel %vm1772_vm9, %v5656_v30, 0.0  ;;  %v5658_v13 = vmul.f32 %v8839_v33, %v5656_v30 }
0x4d0b   :  { %8843 = vst.msk [vmem:[%s13231_s27 + $0x18] sm:$0xff] %vm290_vm0, %v6098_v50 }
0x4d0c   :  { %v5659_v59 = vsub.f32 %v5656_v30, %v5658_v13 }
0x4d0e   :  { %5692 = vxpose.xlu1.b32.start.end [1/1] (short) (narrow) %v5659_v59, 8 }
0x4d8a   :  { %v5708_v57 = vpop.trf.xlu1 }
0x4d8b   :  { %v5814_v52 = vrot.slane %v5708_v57, %v13330_v18  ;;  %v5821_v2 = vrot.slane %v5708_v57, %v13331_v22  ;;  %v5828_v51 = vrot.slane %v5708_v57, %v13332_v24  ;;  %v5835_v35 = vrot.slane %v5708_v57, %v13333_v55 }
0x4d8c   :  { %v5842_v41 = vrot.slane %v5708_v57, %v13327_v37  ;;  %v5849_v61 = vrot.slane %v5708_v57, %v10044_v29  ;;  %v5856_v43 = vrot.slane %v5708_v57, %v10040_v26  ;;  %v5863_v44 = vrot.slane %v5708_v57, %v10047_v31 }
0x4d8d   :  { %5816 = vbcast.lane.b32.xlu0 %v5814_v52, 256 }
0x4d91   :  { %5823 = vbcast.lane.b32.xlu0 %v5821_v2, 256 }
0x4d95   :  { %5830 = vbcast.lane.b32.xlu0 %v5828_v51, 256 }
0x4d99   :  { %5837 = vbcast.lane.b32.xlu0 %v5835_v35, 256  ;;  %v12319_v35 = vld [vmem:[#allocation4 + $0x10] sm:$0xff] }
0x4d9d   :  { %5844 = vbcast.lane.b32.xlu0 %v5842_v41, 256 }
0x4da1   :  { %5851 = vbcast.lane.b32.xlu0 %v5849_v61, 256 }
0x4da5   :  { %5858 = vbcast.lane.b32.xlu0 %v5856_v43, 256 }
0x4da9   :  { %5865 = vbcast.lane.b32.xlu0 %v5863_v44, 256 }
0x4dc7   :  { %5660 = vxpose.xlu0.b32.start.end [1/1] (short) (narrow) %v5658_v13, 8 }
0x4dff   :  { %v5817_v14 = vpop.permute.xlu0 %5816 }
0x4e00   :  { %v5867_v41 = vmul.f32 %v5817_v14, %v11931_v19 }
0x4e03   :  { %v5824_v38 = vpop.permute.xlu0 %5823 }
0x4e04   :  { %v5868_v57 = vmul.f32 %v5824_v38, %v12057_v58 }
0x4e06   :  { %v5876_v44 = vsel %vm106_vm1, %v5868_v57, 0.0 }
0x4e07   :  { %v5831_v7 = vpop.permute.xlu0 %5830 }
0x4e08   :  { %v5869_v61 = vmul.f32 %v5831_v7, %v12319_v35 }
0x4e0b   :  { %v5838_v39 = vpop.permute.xlu0 %5837 }
0x4e0f   :  { %v5845_v10 = vpop.permute.xlu0 %5844 }
0x4e10   :  { %v5871_v38 = vmul.f32 %v5845_v10, %v12064_v21 }
0x4e12   :  { %v5882_v57 = vsel %vm106_vm1, %v5871_v38, 0.0 }
0x4e13   :  { %v5852_v33 = vpop.permute.xlu0 %5851 }
0x4e14   :  { %v5872_v7 = vmul.f32 %v5852_v33, %v12069_v34 }
0x4e17   :  { %v5859_v30 = vpop.permute.xlu0 %5858 }
0x4e1b   :  { %v5866_v50 = vpop.permute.xlu0 %5865 }
0x4e1c   :  { %v5874_v10 = vmul.f32 %v5866_v50, %v12079_v53 }
0x4e43   :  { %v5676_v59 = vpop.trf.xlu0 }
0x4e44   :  { %v5742_v52 = vrot.slane %v5676_v59, %v13331_v22  ;;  %v5735_v2 = vrot.slane %v5676_v59, %v13330_v18  ;;  %v5749_v51 = vrot.slane %v5676_v59, %v13332_v24  ;;  %v5756_v13 = vrot.slane %v5676_v59, %v13333_v55 }
0x4e45   :  { %v5763_v43 = vrot.slane %v5676_v59, %v13327_v37  ;;  %v5784_v33 = vrot.slane %v5676_v59, %v10047_v31 }
0x4e46   :  { %5744 = vbcast.lane.b32.xlu0 %v5742_v52, 256  ;;  %5737 = vbcast.lane.b32.xlu1 %v5735_v2, 256  ;;  %v5870_v52 = vmul.f32 %v5838_v39, %v12061_v27  ;;  %v5875_v2 = vsel %vm106_vm1, %v5867_v41, 0.0  ;;  %v5873_v39 = vmul.f32 %v5859_v30, %v12074_v5  ;;  %v5777_v41 = vrot.slane %v5676_v59, %v10040_v26 }
0x4e47   :  { %v5877_v55 = vadd.f32 %v5876_v44, %v5875_v2 }
0x4e48   :  { %v5880_v14 = vsel %vm106_vm1, %v5870_v52, 0.0  ;;  %v5886_v2 = vsel %vm106_vm1, %v5873_v39, 0.0 }
0x4e4a   :  { %5751 = vbcast.lane.b32.xlu1 %v5749_v51, 256  ;;  %v5878_v51 = vsel %vm106_vm1, %v5869_v61, 0.0  ;;  %v5884_v61 = vsel %vm106_vm1, %v5872_v7, 0.0 }
0x4e4b   :  { %v5879_v24 = vadd.f32 %v5878_v51, %v5877_v55  ;;  %v5888_v55 = vsel %vm106_vm1, %v5874_v10, 0.0 }
0x4e4e   :  { %5758 = vbcast.lane.b32.xlu1 %v5756_v13, 256  ;;  %v5770_v13 = vrot.slane %v5676_v59, %v10044_v29 }
0x4e52   :  { %5765 = vbcast.lane.b32.xlu1 %v5763_v43, 256  ;;  %v5881_v43 = vadd.f32 %v5880_v14, %v5879_v24 }
0x4e54   :  { %v5883_v44 = vadd.f32 %v5882_v57, %v5881_v43 }
0x4e56   :  { %5772 = vbcast.lane.b32.xlu1 %v5770_v13, 256  ;;  %v5885_v52 = vadd.f32 %v5884_v61, %v5883_v44 }
0x4e58   :  { %v5887_v51 = vadd.f32 %v5886_v2, %v5885_v52 }
0x4e5a   :  { %5779 = vbcast.lane.b32.xlu1 %v5777_v41, 256  ;;  %v5889_v38 = vadd.f32 %v5888_v55, %v5887_v51 }
0x4e5e   :  { %5786 = vbcast.lane.b32.xlu1 %v5784_v33, 256 }
0x4e62   :  { %5891 = vrot.lane.b32.xlu1 %v5889_v38, %s13319_s8 }
0x4eb8   :  { %v5738_v24 = vpop.permute.xlu1 %5737  ;;  %v5745_v13 = vpop.permute.xlu0 %5744 }
0x4eb9   :  { %v5789_v50 = vmul.f32 %v5745_v13, %v12057_v58  ;;  %v5788_v7 = vmul.f32 %v5738_v24, %v11931_v19 }
0x4ebb   :  { %v5797_v59 = vsel %vm106_vm1, %v5789_v50, 0.0  ;;  %v5796_v43 = vsel %vm106_vm1, %v5788_v7, 0.0 }
0x4ebc   :  { %v5752_v30 = vpop.permute.xlu1 %5751  ;;  %v5798_v44 = vadd.f32 %v5797_v59, %v5796_v43 }
0x4ebd   :  { %v5790_v57 = vmul.f32 %v5752_v30, %v12319_v35 }
0x4ebf   :  { %v5799_v61 = vsel %vm106_vm1, %v5790_v57, 0.0 }
0x4ec0   :  { %v5759_v14 = vpop.permute.xlu1 %5758  ;;  %v5800_v19 = vadd.f32 %v5799_v61, %v5798_v44 }
0x4ec1   :  { %v5791_v41 = vmul.f32 %v5759_v14, %v12061_v27 }
0x4ec3   :  { %v5801_v52 = vsel %vm106_vm1, %v5791_v41, 0.0 }
0x4ec4   :  { %v5766_v39 = vpop.permute.xlu1 %5765  ;;  %v5802_v51 = vadd.f32 %v5801_v52, %v5800_v19 }
0x4ec5   :  { %v5792_v10 = vmul.f32 %v5766_v39, %v12064_v21 }
0x4ec7   :  { %v5803_v55 = vsel %vm106_vm1, %v5792_v10, 0.0 }
0x4ec8   :  { %v5773_v2 = vpop.permute.xlu1 %5772  ;;  %v5804_v27 = vadd.f32 %v5803_v55, %v5802_v51 }
0x4ec9   :  { %v5793_v33 = vmul.f32 %v5773_v2, %v12069_v34 }
0x4ecb   :  { %v5805_v24 = vsel %vm106_vm1, %v5793_v33, 0.0 }
0x4ecc   :  { %v5780_v38 = vpop.permute.xlu1 %5779  ;;  %v5806_v14 = vadd.f32 %v5805_v24, %v5804_v27 }
0x4ecd   :  { %v5794_v30 = vmul.f32 %v5780_v38, %v12074_v5 }
0x4ecf   :  { %v5807_v13 = vsel %vm106_vm1, %v5794_v30, 0.0 }
0x4ed0   :  { %v5787_v50 = vpop.permute.xlu1 %5786  ;;  %v5808_v57 = vadd.f32 %v5807_v13, %v5806_v14 }
0x4ed1   :  { %v5795_v7 = vmul.f32 %v5787_v50, %v12079_v53 }
0x4ed3   :  { %v5809_v39 = vsel %vm106_vm1, %v5795_v7, 0.0 }
0x4ed4   :  { %v5810_v59 = vadd.f32 %v5809_v39, %v5808_v57  ;;  %v5892_v43 = vpop.permute.xlu1 %5891  ;;  %v12410_v39 = vld [vmem:[%s13230_s11] ss:$0 sm:$0xff] }
0x4ed6   :  { %v5894_v41 = vsel %vm106_vm1, %v5810_v59, %v5892_v43 }
0x4ed7   :  { %9373 = vmatmul.mubr.msk.f32.vlgmr.msra.gmra.mxu1 %vm572_vm3, %v5894_v41 }
0x4ed8   :  { %9376 = vmatpush3.msra.mxu1 %v12110_v62  ;;  %9391 = vmatprep.mubr.msk.f32.mxu1 %vm9837_vm2, %v13315_v4 }
0x4ed9   :  { %9377 = vmatprep.subr.mxu1 %v13315_v4 }
0x4eda   :  { %9378 = vmatpush3.msra.mxu1 %v12119_v1 }
0x4edb   :  { %9379 = vmatprep.subr.mxu1 %v13315_v4 }
0x4edc   :  { %9380 = vmatpush3.msra.mxu1 %v12126_v47 }
0x4edd   :  { %9381 = vmatprep.subr.mxu1 %v13315_v4 }
0x4ede   :  { %9382 = vmatpush3.msra.mxu1 %v12133_v11 }
0x4edf   :  { %9383 = vmatprep.subr.mxu1 %v13315_v4 }
0x4ee0   :  { %9384 = vmatpush3.msra.mxu1 %v12140_v54 }
0x4ee1   :  { %9385 = vmatprep.subr.mxu1 %v13315_v4 }
0x4ee2   :  { %9386 = vmatpush3.msra.mxu1 %v12147_v8 }
0x4ee3   :  { %9387 = vmatprep.subr.mxu1 %v13315_v4 }
0x4ee4   :  { %9388 = vmatpush3.msra.mxu1 %v12154_v40 }
0x4ee5   :  { %9389 = vmatprep.subr.mxu1 %v13315_v4 }
0x4ee6   :  { %9390 = vmatpush3.msra.mxu1 %v12161_v17 }
0x4ee7   :  { %9394 = vmatprep.subr.mxu1 %v13315_v4 }
0x4f97   :  { %v5964_v61 = vpop.f32.mrf.mxu1 }
0x4f98   :  { %5969 = vrot.lane.b32.xlu1 %v5964_v61, %s13319_s8 }
0x4f99   :  { %v9374_v10 = vpop.f32.mrf.mxu1 }
0x500a   :  { %v5970_v44 = vpop.permute.xlu1 %5969 }
0x500b   :  { %v5972_v2 = vsel %vm106_vm1, %v12276_v0, %v5970_v44 }
0x500c   :  { %8841 = vmatmul.mubr.msk.f32.vlgmr.msra.gmra.mxu0 %vm572_vm3, %v5972_v2 }
0x500d   :  { %6466 = vmatpush1.msra.mxu0 %v12175_v49  ;;  %6513 = vmatprep.mubr.f32.mxu0 %v13315_v4 }
0x500e   :  { %6467 = vmatprep.subr.mxu0 %v12182_v20 }
0x500f   :  { %6468 = vmatpush1.msra.mxu0 %v12188_v6 }
0x5010   :  { %6469 = vmatprep.subr.mxu0 %v12194_v9 }
0x5011   :  { %6470 = vmatpush1.msra.mxu0 %v12200_v60 }
0x5012   :  { %6471 = vmatprep.subr.mxu0 %v12206_v23 }
0x5013   :  { %6472 = vmatpush1.msra.mxu0 %v12212_v56 }
0x5014   :  { %6473 = vmatprep.subr.mxu0 %v12218_v45 }
0x5015   :  { %6474 = vmatpush1.msra.mxu0 %v12224_v28 }
0x5016   :  { %6475 = vmatprep.subr.mxu0 %v12230_v42 }
0x5017   :  { %6476 = vmatpush1.msra.mxu0 %v12236_v63 }
0x5018   :  { %6477 = vmatprep.subr.mxu0 %v12242_v15 }
0x5019   :  { %6478 = vmatpush1.msra.mxu0 %v12248_v25 }
0x501a   :  { %6479 = vmatprep.subr.mxu0 %v12254_v36 }
0x501b   :  { %6480 = vmatpush1.msra.mxu0 %v12260_v46 }
0x501c   :  { %6938 = vmatprep.subr.mxu0 %v12266_v3 }
0x50cc   :  { %v6042_v52 = vpop.f32.mrf.mxu0 }
0x50cd   :  { %v6043_v55 = vadd.f32 %v6042_v52, %v11849_v12 }
0x50ce   :  { %v6044_v33 = vpop.f32.mrf.mxu0 }
0x50cf   :  { %v6045_v19 = vadd.f32 %v6044_v33, %v11839_v16  ;;  %v8842_v51 = vmul.f32 -1.442695, %v6043_v55 }
0x50d1   :  { %6054 = vrot.lane.b32.xlu1 %v6045_v19, %s9839_s28  ;;  %9682 = vpow2.f32 %v8842_v51 }
0x50d5   :  { %6074 = vrot.lane.b32.xlu1 %v12276_v0, %s9839_s28  ;;  %v12405_v0 = vld [vmem:[#allocation3 + $0x20] sm:$0xff] }
0x50d6   :  { %v6102_v59 = vmul.f32 %v12410_v39, %v12405_v0 }
0x50d8   :  { %v6103_v43 = vsel %vm106_vm1, %v6102_v59, 0.0 }
0x50de   :  { %v9683_v38 = vpop.eup %9682 }
0x50df   :  { %v6050_v24 = vadd.f32 1.0, %v9683_v38 }
0x50e1   :  { %9684 = vrcp.f32 %v6050_v24 }
0x50ee   :  { %v9685_v30 = vpop.eup %9684 }
0x50ef   :  { %v6060_v41 = vsub.f32 1.0, %v9685_v30  ;;  %v6066_v2 = vmul.f32 %v9685_v30, %v5970_v44 }
0x5143   :  { %v6055_v27 = vpop.permute.xlu1 %6054 }
0x5144   :  { %v6057_v13 = vmul.f32 %v9685_v30, %v6055_v27 }
0x5146   :  { %v6058_v14 = vadd.f32 %v6057_v13, %v6045_v19 }
0x5147   :  { %v6075_v50 = vpop.permute.xlu1 %6074 }
0x5148   :  { %9686 = vtanh.f32 %v6058_v14  ;;  %v6077_v7 = vmul.f32 %v9685_v30, %v6075_v50  ;;  %v12419_v14 = vld [vmem:[#allocation7] ss:$0 sm:$0xff]  ;;  %v8844_v30 = vld [vmem:[%s13313_s10 + $0x20] sm:$0xff] }
0x514a   :  { %6079 = vrot.lane.b32.xlu1 %v6077_v7, %s9840_s0  ;;  %v6115_v7 = vsub.f32 1.0, %v8844_v30 }
0x5155   :  { %v9687_v57 = vpop.eup %9686 }
0x5156   :  { %6062 = vrot.lane.b32.xlu0 %v9687_v57, %s13319_s8  ;;  %v6116_v57 = vmul.f32 1e+30, %v6115_v7 }
0x516e   :  { %6104 = vadd.xlane.f32.xlu1 %v6103_v43 }
0x51bc   :  { %v6080_v55 = vpop.permute.xlu1 %6079 }
0x51c8   :  { %v6063_v61 = vpop.permute.xlu0 %6062 }
0x51c9   :  { %v6065_v10 = vmul.f32 %v6063_v61, %v6060_v41 }
0x51cb   :  { %6069 = vrot.lane.b32.xlu0 %v6065_v10, %s9840_s0  ;;  %v6067_v52 = vadd.f32 %v6066_v2, %v6065_v10 }
0x51f7   :  { %v6105_v13 = vpop.xlane.xlu1 %6104 }
0x51f8   :  { %v6106_v50 = vadd.f32 %v12419_v14, %v6105_v13  ;;  %v8845_v13 = vld [vmem:[%s13298_s9 + $0x20] sm:$0xff] }
0x523d   :  { %v6070_v33 = vpop.permute.xlu0 %6069 }
0x523e   :  { %v6072_v19 = vadd.f32 %v6070_v33, %v6067_v52 }
0x5240   :  { %v6082_v51 = vadd.f32 %v6080_v55, %v6072_v19 }
0x5242   :  { %v6089_v38 = vmul.f32 %v6082_v51, %v11872_v48 }
0x5244   :  { %6091 = vrot.lane.b32.xlu0 %v6089_v38, %s9839_s28 }
0x52b6   :  { %v6092_v24 = vpop.permute.xlu0 %6091 }
0x52b7   :  { %v6094_v27 = vsel %vm106_vm1, %v6092_v24, 0.0 }
0x52b8   :  { %6095 = vadd.xlane.f32.xlu0 %v6094_v27 }
0x52ce   :  { %6110 = vperm.xlu0 %9566, %v6106_v50  }
0x52d2   :  { %6084 = vrot.lane.b32.xlu0 %v6082_v51, %s9839_s28 }
0x5341   :  { %v6096_v44 = vpop.xlane.xlu0 %6095 }
0x5342   :  { %6097 = vst.msk [vmem:[#allocation5] sm:$0xff] %vm2226_vm10, %v6096_v44 }
0x5349   :  { %v6107_v59 = vld [vmem:[#allocation5] sm:$0xff]  ;;  %v6111_v43 = vpop.permute.xlu0 %6110 }
0x534a   :  { %v6113_v41 = vadd.f32 %v6111_v43, %v6107_v59 }
0x534c   :  { %v6117_v61 = vsub.f32 %v6113_v41, %v6116_v57  ;;  %v13334_v41 = vld [vmem:[#allocation11_spill] sm:$0xff] }
0x534d   :  { %v6085_v10 = vpop.permute.xlu0 %6084 }
0x534e   :  { %6088 = vst.msk [vmem:[#allocation4 + $0x18] sm:$0xff] %vm106_vm1, %v6085_v10  ;;  %v6118_v2 = vsel %vm2250_vm11, %v6117_v61, -1e+37  ;;  %v13335_v10 = vld [vmem:[#allocation13_spill] sm:$0xff] }
0x534f   :  { %v6119_v52 = vsel %vm290_vm0, %v6118_v2, -inf }
0x5350   :  { %6120 = vmax.xlane.f32.xlu1 %v6119_v52 }
0x53d9   :  { %v6121_v33 = vpop.xlane.xlu1 %6120 }
0x53da   :  { %v6122_v19 = vsub.f32 %v6118_v2, %v6121_v33 }
0x53dc   :  { %v6123_v55 = vmul.f32 1.442695, %v6122_v19 }
0x53de   :  { %9688 = vpow2.f32 %v6123_v55 }
0x53eb   :  { %v9689_v51 = vpop.eup %9688 }
0x53ec   :  { %v6125_v38 = vsel %vm290_vm0, %v9689_v51, 0.0 }
0x53ed   :  { %6126 = vadd.xlane.f32.xlu1 %v6125_v38 }
0x5476   :  { %v6127_v24 = vpop.xlane.xlu1 %6126 }
0x5477   :  { %9690 = vrcp.f32 %v6127_v24 }
0x5484   :  { %v9691_v27 = vpop.eup %9690 }
0x5485   :  { %v6129_v50 = vmul.f32 %v9691_v27, %v9689_v51 }
0x5487   :  { %v6571_v44 = vsel %vm2250_vm11, %v6129_v50, 0.0  ;;  %v6131_v30 = vmul.f32 %v8845_v13, %v6129_v50 }
0x5488   :  { %8849 = vst.msk [vmem:[%s13231_s27 + $0x20] sm:$0xff] %vm290_vm0, %v6571_v44 }
0x5489   :  { %v6132_v7 = vsub.f32 %v6129_v50, %v6131_v30 }
0x548b   :  { %6165 = vxpose.xlu1.b32.start.end [1/1] (short) (narrow) %v6132_v7, 8 }
0x5507   :  { %v6181_v57 = vpop.trf.xlu1 }
0x5508   :  { %v6287_v59 = vrot.slane %v6181_v57, %v13330_v18  ;;  %v6294_v43 = vrot.slane %v6181_v57, %v13331_v22  ;;  %v6301_v61 = vrot.slane %v6181_v57, %v13334_v41  ;;  %v6308_v2 = vrot.slane %v6181_v57, %v13335_v10 }
0x5509   :  { %v6315_v52 = vrot.slane %v6181_v57, %v13327_v37  ;;  %v6322_v33 = vrot.slane %v6181_v57, %v10044_v29  ;;  %v6329_v19 = vrot.slane %v6181_v57, %v10040_v26  ;;  %v6336_v55 = vrot.slane %v6181_v57, %v10047_v31 }
0x550a   :  { %6289 = vbcast.lane.b32.xlu0 %v6287_v59, 256 }
0x550e   :  { %6296 = vbcast.lane.b32.xlu0 %v6294_v43, 256 }
0x5512   :  { %6303 = vbcast.lane.b32.xlu0 %v6301_v61, 256 }
0x5516   :  { %6310 = vbcast.lane.b32.xlu0 %v6308_v2, 256 }
0x551a   :  { %6317 = vbcast.lane.b32.xlu0 %v6315_v52, 256  ;;  %v12456_v52 = vld [vmem:[#allocation4] sm:$0xff] }
0x551e   :  { %6324 = vbcast.lane.b32.xlu0 %v6322_v33, 256 }
0x5522   :  { %6331 = vbcast.lane.b32.xlu0 %v6329_v19, 256 }
0x5526   :  { %6338 = vbcast.lane.b32.xlu0 %v6336_v55, 256  ;;  %v12460_v55 = vld [vmem:[#allocation4 + $0x18] sm:$0xff] }
0x5544   :  { %6133 = vxpose.xlu0.b32.start.end [1/1] (short) (narrow) %v6131_v30, 8 }
0x557c   :  { %v6290_v51 = vpop.permute.xlu0 %6289 }
0x557d   :  { %v6340_v33 = vmul.f32 %v6290_v51, %v12456_v52 }
0x5580   :  { %v6297_v38 = vpop.permute.xlu0 %6296 }
0x5581   :  { %v6341_v57 = vmul.f32 %v6297_v38, %v12057_v58 }
0x5584   :  { %v6304_v24 = vpop.permute.xlu0 %6303 }
0x5585   :  { %v6342_v19 = vmul.f32 %v6304_v24, %v12319_v35 }
0x5587   :  { %v6351_v38 = vsel %vm106_vm1, %v6342_v19, 0.0 }
0x5588   :  { %v6311_v27 = vpop.permute.xlu0 %6310 }
0x558c   :  { %v6318_v13 = vpop.permute.xlu0 %6317 }
0x5590   :  { %v6325_v50 = vpop.permute.xlu0 %6324 }
0x5594   :  { %v6332_v44 = vpop.permute.xlu0 %6331 }
0x5598   :  { %v6339_v7 = vpop.permute.xlu0 %6338 }
0x55c0   :  { %v6149_v59 = vpop.trf.xlu0 }
0x55c1   :  { %v6215_v43 = vrot.slane %v6149_v59, %v13331_v22  ;;  %v6208_v61 = vrot.slane %v6149_v59, %v13330_v18  ;;  %v6222_v2 = vrot.slane %v6149_v59, %v13334_v41  ;;  %v6229_v30 = vrot.slane %v6149_v59, %v13335_v10 }
0x55c2   :  { %v6343_v41 = vmul.f32 %v6311_v27, %v12460_v55  ;;  %v6344_v10 = vmul.f32 %v6318_v13, %v12064_v21  ;;  %v6243_v51 = vrot.slane %v6149_v59, %v10044_v29  ;;  %v6345_v22 = vmul.f32 %v6325_v50, %v12069_v34 }
0x55c3   :  { %6217 = vbcast.lane.b32.xlu0 %v6215_v43, 256  ;;  %6210 = vbcast.lane.b32.xlu1 %v6208_v61, 256  ;;  %v6236_v43 = vrot.slane %v6149_v59, %v13327_v37  ;;  %v6349_v61 = vsel %vm106_vm1, %v6341_v57, 0.0  ;;  %v6346_v27 = vmul.f32 %v6332_v44, %v12074_v5  ;;  %v6347_v13 = vmul.f32 %v6339_v7, %v12079_v53 }
0x55c4   :  { %v6353_v24 = vsel %vm106_vm1, %v6343_v41, 0.0  ;;  %v6355_v57 = vsel %vm106_vm1, %v6344_v10, 0.0  ;;  %v6357_v19 = vsel %vm106_vm1, %v6345_v22, 0.0  ;;  %v6257_v50 = vrot.slane %v6149_v59, %v10047_v31 }
0x55c7   :  { %6547 = vrot.lane.b32.xlu0 %v12405_v0, %s9839_s28  ;;  %6224 = vbcast.lane.b32.xlu1 %v6222_v2, 256  ;;  %v6348_v2 = vsel %vm106_vm1, %v6340_v33, 0.0  ;;  %v6250_v33 = vrot.slane %v6149_v59, %v10040_v26 }
0x55cb   :  { %6231 = vbcast.lane.b32.xlu1 %v6229_v30, 256  ;;  %v6350_v30 = vadd.f32 %v6349_v61, %v6348_v2  ;;  %v6359_v2 = vsel %vm106_vm1, %v6346_v27, 0.0 }
0x55cd   :  { %v6352_v18 = vadd.f32 %v6351_v38, %v6350_v30  ;;  %v6361_v38 = vsel %vm106_vm1, %v6347_v13, 0.0 }
0x55cf   :  { %6238 = vbcast.lane.b32.xlu1 %v6236_v43, 256  ;;  %v6354_v43 = vadd.f32 %v6353_v24, %v6352_v18 }
0x55d1   :  { %v6356_v61 = vadd.f32 %v6355_v57, %v6354_v43 }
0x55d3   :  { %6245 = vbcast.lane.b32.xlu1 %v6243_v51, 256  ;;  %v6358_v41 = vadd.f32 %v6357_v19, %v6356_v61 }
0x55d5   :  { %v6360_v30 = vadd.f32 %v6359_v2, %v6358_v41 }
0x55d7   :  { %6252 = vbcast.lane.b32.xlu1 %v6250_v33, 256  ;;  %v6362_v10 = vadd.f32 %v6361_v38, %v6360_v30 }
0x55db   :  { %6259 = vbcast.lane.b32.xlu1 %v6257_v50, 256 }
0x55df   :  { %6364 = vrot.lane.b32.xlu1 %v6362_v10, %s13319_s8 }
0x5635   :  { %v6211_v18 = vpop.permute.xlu1 %6210  ;;  %v6218_v51 = vpop.permute.xlu0 %6217 }
0x5636   :  { %v6262_v7 = vmul.f32 %v6218_v51, %v12057_v58  ;;  %v6261_v24 = vmul.f32 %v6211_v18, %v12456_v52 }
0x5638   :  { %v6270_v59 = vsel %vm106_vm1, %v6262_v7, 0.0  ;;  %v6269_v43 = vsel %vm106_vm1, %v6261_v24, 0.0 }
0x5639   :  { %v6225_v44 = vpop.permute.xlu1 %6224  ;;  %v6271_v61 = vadd.f32 %v6270_v59, %v6269_v43 }
0x563a   :  { %v6263_v57 = vmul.f32 %v6225_v44, %v12319_v35 }
0x563c   :  { %v6272_v19 = vsel %vm106_vm1, %v6263_v57, 0.0 }
0x563d   :  { %v6232_v22 = vpop.permute.xlu1 %6231  ;;  %v6273_v50 = vadd.f32 %v6272_v19, %v6271_v61 }
0x563e   :  { %v6264_v33 = vmul.f32 %v6232_v22, %v12460_v55 }
0x5640   :  { %v6274_v41 = vsel %vm106_vm1, %v6264_v33, 0.0 }
0x5641   :  { %v6239_v27 = vpop.permute.xlu1 %6238  ;;  %v6275_v30 = vadd.f32 %v6274_v41, %v6273_v50 }
0x5642   :  { %v6265_v13 = vmul.f32 %v6239_v27, %v12064_v21 }
0x5644   :  { %v6276_v38 = vsel %vm106_vm1, %v6265_v13, 0.0 }
0x5645   :  { %v6246_v2 = vpop.permute.xlu1 %6245  ;;  %v6277_v51 = vadd.f32 %v6276_v38, %v6275_v30 }
0x5646   :  { %v6266_v58 = vmul.f32 %v6246_v2, %v12069_v34 }
0x5648   :  { %v6278_v18 = vsel %vm106_vm1, %v6266_v58, 0.0 }
0x5649   :  { %v6253_v10 = vpop.permute.xlu1 %6252  ;;  %v6279_v7 = vadd.f32 %v6278_v18, %v6277_v51  ;;  %v8850_v18 = vld [vmem:[%s13313_s10 + $0x28] sm:$0xff] }
0x564a   :  { %v6267_v44 = vmul.f32 %v6253_v10, %v12074_v5 }
0x564c   :  { %v6280_v22 = vsel %vm106_vm1, %v6267_v44, 0.0  ;;  %v6588_v44 = vsub.f32 1.0, %v8850_v18 }
0x564d   :  { %v6260_v21 = vpop.permute.xlu1 %6259  ;;  %v6281_v57 = vadd.f32 %v6280_v22, %v6279_v7 }
0x564e   :  { %v6268_v24 = vmul.f32 %v6260_v21, %v12079_v53  ;;  %v6589_v51 = vmul.f32 1e+30, %v6588_v44 }
0x5650   :  { %v6282_v27 = vsel %vm106_vm1, %v6268_v24, 0.0 }
0x5651   :  { %v6283_v34 = vadd.f32 %v6282_v27, %v6281_v57  ;;  %v6365_v59 = vpop.permute.xlu1 %6364 }
0x5653   :  { %v6367_v43 = vsel %vm106_vm1, %v6283_v34, %v6365_v59 }
0x5654   :  { %9392 = vmatmul.mubr.msk.f32.vlgmr.msra.gmra.mxu1 %vm572_vm3, %v6367_v43 }
0x5655   :  { %9395 = vmatpush3.msra.mxu1 %v12110_v62  ;;  %9410 = vmatprep.mubr.msk.f32.mxu1 %vm9837_vm2, %v13315_v4 }
0x5656   :  { %9396 = vmatprep.subr.mxu1 %v13315_v4 }
0x5657   :  { %9397 = vmatpush3.msra.mxu1 %v12119_v1 }
0x5658   :  { %9398 = vmatprep.subr.mxu1 %v13315_v4 }
0x5659   :  { %9399 = vmatpush3.msra.mxu1 %v12126_v47 }
0x565a   :  { %9400 = vmatprep.subr.mxu1 %v13315_v4 }
0x565b   :  { %9401 = vmatpush3.msra.mxu1 %v12133_v11 }
0x565c   :  { %9402 = vmatprep.subr.mxu1 %v13315_v4 }
0x565d   :  { %9403 = vmatpush3.msra.mxu1 %v12140_v54 }
0x565e   :  { %9404 = vmatprep.subr.mxu1 %v13315_v4 }
0x565f   :  { %9405 = vmatpush3.msra.mxu1 %v12147_v8 }
0x5660   :  { %9406 = vmatprep.subr.mxu1 %v13315_v4 }
0x5661   :  { %9407 = vmatpush3.msra.mxu1 %v12154_v40 }
0x5662   :  { %9408 = vmatprep.subr.mxu1 %v13315_v4 }
0x5663   :  { %9409 = vmatpush3.msra.mxu1 %v12161_v17 }
0x5664   :  { %9413 = vmatprep.subr.mxu1 %v13315_v4 }
0x5714   :  { %v6437_v5 = vpop.f32.mrf.mxu1 }
0x5715   :  { %6442 = vrot.lane.b32.xlu1 %v6437_v5, %s13319_s8 }
0x5716   :  { %v9393_v53 = vpop.f32.mrf.mxu1 }
0x5787   :  { %v6443_v62 = vpop.permute.xlu1 %6442 }
0x5788   :  { %v6445_v1 = vsel %vm106_vm1, %v12405_v0, %v6443_v62 }
0x5789   :  { %8847 = vmatmul.mubr.msk.f32.vlgmr.msra.gmra.mxu0 %vm572_vm3, %v6445_v1  ;;  %v8851_v1 = vld [vmem:[%s13298_s9 + $0x28] sm:$0xff] }
0x578a   :  { %6939 = vmatpush1.msra.mxu0 %v12175_v49  ;;  %6986 = vmatprep.mubr.f32.mxu0 %v13315_v4 }
0x578b   :  { %6940 = vmatprep.subr.mxu0 %v12182_v20 }
0x578c   :  { %6941 = vmatpush1.msra.mxu0 %v12188_v6  ;;  %v6548_v6 = vpop.permute.xlu0 %6547 }
0x578d   :  { %6942 = vmatprep.subr.mxu0 %v12194_v9 }
0x578e   :  { %6943 = vmatpush1.msra.mxu0 %v12200_v60  ;;  %v12541_v60 = vld [vmem:[#allocation3 + $0x28] sm:$0xff] }
0x578f   :  { %6944 = vmatprep.subr.mxu0 %v12206_v23  ;;  %v6575_v23 = vmul.f32 %v12410_v39, %v12541_v60 }
0x5790   :  { %6945 = vmatpush1.msra.mxu0 %v12212_v56 }
0x5791   :  { %6946 = vmatprep.subr.mxu0 %v12218_v45  ;;  %v6576_v56 = vsel %vm106_vm1, %v6575_v23, 0.0 }
0x5792   :  { %6947 = vmatpush1.msra.mxu0 %v12224_v28 }
0x5793   :  { %6948 = vmatprep.subr.mxu0 %v12230_v42 }
0x5794   :  { %6949 = vmatpush1.msra.mxu0 %v12236_v63 }
0x5795   :  { %6950 = vmatprep.subr.mxu0 %v12242_v15 }
0x5796   :  { %6951 = vmatpush1.msra.mxu0 %v12248_v25 }
0x5797   :  { %6952 = vmatprep.subr.mxu0 %v12254_v36 }
0x5798   :  { %6953 = vmatpush1.msra.mxu0 %v12260_v46 }
0x5799   :  { %7411 = vmatprep.subr.mxu0 %v12266_v3 }
0x5849   :  { %v6515_v47 = vpop.f32.mrf.mxu0 }
0x584a   :  { %v6516_v11 = vadd.f32 %v6515_v47, %v11849_v12 }
0x584b   :  { %v6517_v54 = vpop.f32.mrf.mxu0 }
0x584c   :  { %v8848_v8 = vmul.f32 -1.442695, %v6516_v11  ;;  %v6518_v40 = vadd.f32 %v6517_v54, %v11839_v16 }
0x584e   :  { %9692 = vpow2.f32 %v8848_v8  ;;  %6527 = vrot.lane.b32.xlu1 %v6518_v40, %s9839_s28 }
0x585b   :  { %v9693_v17 = vpop.eup %9692 }
0x585c   :  { %v6523_v49 = vadd.f32 1.0, %v9693_v17  ;;  %v13336_v17 = vld [vmem:[#allocation10_spill] sm:$0xff] }
0x585e   :  { %9694 = vrcp.f32 %v6523_v49 }
0x586b   :  { %v9695_v20 = vpop.eup %9694 }
0x586c   :  { %v6550_v9 = vmul.f32 %v9695_v20, %v6548_v6  ;;  %v6533_v46 = vsub.f32 1.0, %v9695_v20  ;;  %v6539_v33 = vmul.f32 %v9695_v20, %v6443_v62 }
0x586e   :  { %6552 = vrot.lane.b32.xlu0 %v6550_v9, %s9840_s0  ;;  %v13338_v9 = vld [vmem:[#allocation11_spill] sm:$0xff] }
0x588d   :  { %6577 = vadd.xlane.f32.xlu0 %v6576_v56  ;;  %v13339_v56 = vld [vmem:[#allocation13_spill] sm:$0xff] }
0x58c0   :  { %v6528_v45 = vpop.permute.xlu1 %6527 }
0x58c1   :  { %v6530_v28 = vmul.f32 %v9695_v20, %v6528_v45  ;;  %v13337_v20 = vld [vmem:[#allocation9_spill] sm:$0xff] }
0x58c3   :  { %v6531_v42 = vadd.f32 %v6530_v28, %v6518_v40 }
0x58c5   :  { %9696 = vtanh.f32 %v6531_v42 }
0x58d2   :  { %v9697_v63 = vpop.eup %9696 }
0x58d3   :  { %6535 = vrot.lane.b32.xlu1 %v9697_v63, %s13319_s8 }
0x58e0   :  { %v6553_v15 = vpop.permute.xlu0 %6552 }
0x5916   :  { %v6578_v25 = vpop.xlane.xlu0 %6577 }
0x5917   :  { %v6579_v36 = vadd.f32 %v12419_v14, %v6578_v25 }
0x5919   :  { %6583 = vperm.xlu0 %9566, %v6579_v36  }
0x5945   :  { %v6536_v3 = vpop.permute.xlu1 %6535 }
0x5946   :  { %v6538_v0 = vmul.f32 %v6536_v3, %v6533_v46 }
0x5948   :  { %6542 = vrot.lane.b32.xlu1 %v6538_v0, %s9840_s0  ;;  %v6540_v19 = vadd.f32 %v6539_v33, %v6538_v0 }
0x5994   :  { %v6584_v58 = vpop.permute.xlu0 %6583 }
0x59ba   :  { %v6543_v13 = vpop.permute.xlu1 %6542 }
0x59bb   :  { %v6545_v61 = vadd.f32 %v6543_v13, %v6540_v19 }
0x59bd   :  { %v6555_v2 = vadd.f32 %v6553_v15, %v6545_v61 }
0x59bf   :  { %v6562_v41 = vmul.f32 %v6555_v2, %v11872_v48  ;;  %6557 = vrot.lane.b32.xlu0 %v6555_v2, %s9839_s28 }
0x59c1   :  { %6564 = vrot.lane.b32.xlu1 %v6562_v41, %s9839_s28 }
0x5a31   :  { %v6558_v50 = vpop.permute.xlu0 %6557 }
0x5a32   :  { %6561 = vst.msk [vmem:[#allocation4 + $0x20] sm:$0xff] %vm106_vm1, %v6558_v50  ;;  %v12582_v50 = vld [vmem:[#allocation4 + $0x8] sm:$0xff] }
0x5a33   :  { %v6565_v38 = vpop.permute.xlu1 %6564 }
0x5a34   :  { %v6567_v30 = vsel %vm106_vm1, %v6565_v38, 0.0 }
0x5a35   :  { %6568 = vadd.xlane.f32.xlu1 %v6567_v30 }
0x5abe   :  { %v6569_v10 = vpop.xlane.xlu1 %6568 }
0x5abf   :  { %6570 = vst.msk [vmem:[#allocation5] sm:$0xff] %vm2704_vm12, %v6569_v10 }
0x5ac6   :  { %v6580_v22 = vld [vmem:[#allocation5] sm:$0xff] }
0x5ac7   :  { %v6586_v7 = vadd.f32 %v6584_v58, %v6580_v22 }
0x5ac9   :  { %v6590_v21 = vsub.f32 %v6586_v7, %v6589_v51  ;;  %v12591_v7 = vld [vmem:[#allocation4 + $0x20] sm:$0xff] }
0x5acb   :  { %v6591_v24 = vsel %vm2728_vm13, %v6590_v21, -1e+37  ;;  %v6675_v21 = vld [vmem:[#allocation4 + $0x28] sm:$0xff] }
0x5acc   :  { %v6592_v57 = vsel %vm290_vm0, %v6591_v24, -inf }
0x5acd   :  { %6593 = vmax.xlane.f32.xlu1 %v6592_v57 }
0x5b56   :  { %v6594_v27 = vpop.xlane.xlu1 %6593 }
0x5b57   :  { %v6595_v34 = vsub.f32 %v6591_v24, %v6594_v27 }
0x5b59   :  { %v6596_v59 = vmul.f32 1.442695, %v6595_v34 }
0x5b5b   :  { %9698 = vpow2.f32 %v6596_v59  ;;  %v12596_v59 = vld [vmem:[#allocation4 + $0x30] sm:$0xff] }
0x5b68   :  { %v9699_v43 = vpop.eup %9698 }
0x5b69   :  { %v6598_v5 = vsel %vm290_vm0, %v9699_v43, 0.0 }
0x5b6a   :  { %6599 = vadd.xlane.f32.xlu1 %v6598_v5 }
0x5bf3   :  { %v6600_v53 = vpop.xlane.xlu1 %6599 }
0x5bf4   :  { %9700 = vrcp.f32 %v6600_v53 }
0x5c01   :  { %v9701_v62 = vpop.eup %9700 }
0x5c02   :  { %v6602_v47 = vmul.f32 %v9701_v62, %v9699_v43 }
0x5c04   :  { %v7044_v11 = vsel %vm2728_vm13, %v6602_v47, 0.0  ;;  %v6604_v54 = vmul.f32 %v8851_v1, %v6602_v47  ;;  %v12600_v1 = vld [vmem:[#allocation4 + $0x38] sm:$0xff] }
0x5c05   :  { %8855 = vst.msk [vmem:[%s13231_s27 + $0x28] sm:$0xff] %vm290_vm0, %v7044_v11 }
0x5c06   :  { %v6605_v8 = vsub.f32 %v6602_v47, %v6604_v54 }
0x5c08   :  { %6638 = vxpose.xlu1.b32.start.end [1/1] (short) (narrow) %v6605_v8, 8 }
0x5c84   :  { %v6654_v40 = vpop.trf.xlu1 }
0x5c85   :  { %v6760_v49 = vrot.slane %v6654_v40, %v13336_v17  ;;  %v6767_v6 = vrot.slane %v6654_v40, %v13337_v20  ;;  %v6774_v23 = vrot.slane %v6654_v40, %v13338_v9  ;;  %v6781_v45 = vrot.slane %v6654_v40, %v13339_v56 }
0x5c86   :  { %v6788_v28 = vrot.slane %v6654_v40, %v13327_v37  ;;  %v6795_v42 = vrot.slane %v6654_v40, %v10044_v29  ;;  %v6802_v63 = vrot.slane %v6654_v40, %v10040_v26  ;;  %v6809_v15 = vrot.slane %v6654_v40, %v10047_v31 }
0x5c87   :  { %6762 = vbcast.lane.b32.xlu0 %v6760_v49, 256 }
0x5c8b   :  { %6769 = vbcast.lane.b32.xlu0 %v6767_v6, 256 }
0x5c8f   :  { %6776 = vbcast.lane.b32.xlu0 %v6774_v23, 256 }
0x5c93   :  { %6783 = vbcast.lane.b32.xlu0 %v6781_v45, 256 }
0x5c97   :  { %6790 = vbcast.lane.b32.xlu0 %v6788_v28, 256 }
0x5c9b   :  { %6797 = vbcast.lane.b32.xlu0 %v6795_v42, 256 }
0x5c9f   :  { %6804 = vbcast.lane.b32.xlu0 %v6802_v63, 256 }
0x5ca3   :  { %6811 = vbcast.lane.b32.xlu0 %v6809_v15, 256 }
0x5cc1   :  { %6606 = vxpose.xlu0.b32.start.end [1/1] (short) (narrow) %v6604_v54, 8 }
0x5cf9   :  { %v6763_v25 = vpop.permute.xlu0 %6762 }
0x5cfa   :  { %v6813_v10 = vmul.f32 %v6763_v25, %v12456_v52 }
0x5cfc   :  { %v6821_v24 = vsel %vm106_vm1, %v6813_v10, 0.0 }
0x5cfd   :  { %v6770_v36 = vpop.permute.xlu0 %6769 }
0x5cfe   :  { %v6814_v30 = vmul.f32 %v6770_v36, %v12582_v50 }
0x5d00   :  { %v6822_v51 = vsel %vm106_vm1, %v6814_v30, 0.0 }
0x5d01   :  { %v6777_v46 = vpop.permute.xlu0 %6776  ;;  %v6823_v34 = vadd.f32 %v6822_v51, %v6821_v24 }
0x5d02   :  { %v6815_v18 = vmul.f32 %v6777_v46, %v12319_v35 }
0x5d04   :  { %v6824_v57 = vsel %vm106_vm1, %v6815_v18, 0.0 }
0x5d05   :  { %v6784_v3 = vpop.permute.xlu0 %6783  ;;  %v6825_v62 = vadd.f32 %v6824_v57, %v6823_v34 }
0x5d06   :  { %v6816_v22 = vmul.f32 %v6784_v3, %v12460_v55 }
0x5d08   :  { %v6826_v5 = vsel %vm106_vm1, %v6816_v22, 0.0 }
0x5d09   :  { %v6791_v0 = vpop.permute.xlu0 %6790  ;;  %v6827_v54 = vadd.f32 %v6826_v5, %v6825_v62 }
0x5d0a   :  { %v6817_v27 = vmul.f32 %v6791_v0, %v12591_v7 }
0x5d0c   :  { %v6828_v47 = vsel %vm106_vm1, %v6817_v27, 0.0 }
0x5d0d   :  { %v6798_v33 = vpop.permute.xlu0 %6797  ;;  %v6829_v6 = vadd.f32 %v6828_v47, %v6827_v54 }
0x5d0e   :  { %v6818_v53 = vmul.f32 %v6798_v33, %v6675_v21 }
0x5d10   :  { %v6830_v40 = vsel %vm106_vm1, %v6818_v53, 0.0 }
0x5d11   :  { %v6805_v19 = vpop.permute.xlu0 %6804  ;;  %v6831_v45 = vadd.f32 %v6830_v40, %v6829_v6  ;;  %v12631_v40 = vld [vmem:[%s13225_s14 + $0x38] sm:$0xff]  ;;  %v12647_v6 = vld [vmem:[%s13225_s14 + $0x28] sm:$0xff] }
0x5d12   :  { %v6819_v11 = vmul.f32 %v6805_v19, %v12596_v59 }
0x5d14   :  { %v6832_v23 = vsel %vm106_vm1, %v6819_v11, 0.0 }
0x5d15   :  { %v6812_v13 = vpop.permute.xlu0 %6811  ;;  %v6833_v63 = vadd.f32 %v6832_v23, %v6831_v45  ;;  %v12654_v23 = vld [vmem:[%s13225_s14 + $0x20] sm:$0xff]  ;;  %v12661_v45 = vld [vmem:[%s13225_s14 + $0x18] sm:$0xff] }
0x5d16   :  { %v6820_v49 = vmul.f32 %v6812_v13, %v12600_v1 }
0x5d18   :  { %v6834_v42 = vsel %vm106_vm1, %v6820_v49, 0.0  ;;  %v12640_v49 = vld [vmem:[%s13225_s14 + $0x30] sm:$0xff] }
0x5d19   :  { %v6835_v15 = vadd.f32 %v6834_v42, %v6833_v63  ;;  %v12675_v42 = vld [vmem:[%s13225_s14 + $0x8] sm:$0xff]  ;;  %v12682_v63 = vld [vmem:[%s13225_s14] sm:$0xff] }
0x5d3d   :  { %v6622_v61 = vpop.trf.xlu0 }
0x5d3e   :  { %v6688_v2 = vrot.slane %v6622_v61, %v13337_v20  ;;  %v6681_v41 = vrot.slane %v6622_v61, %v13336_v17  ;;  %v6695_v58 = vrot.slane %v6622_v61, %v13338_v9  ;;  %v6702_v38 = vrot.slane %v6622_v61, %v13339_v56 }
0x5d3f   :  { %v6709_v44 = vrot.slane %v6622_v61, %v13327_v37  ;;  %v6716_v43 = vrot.slane %v6622_v61, %v10044_v29  ;;  %v6723_v8 = vrot.slane %v6622_v61, %v10040_v26  ;;  %v6730_v28 = vrot.slane %v6622_v61, %v10047_v31 }
0x5d40   :  { %6690 = vbcast.lane.b32.xlu0 %v6688_v2, 256  ;;  %6683 = vbcast.lane.b32.xlu1 %v6681_v41, 256 }
0x5d44   :  { %6697 = vbcast.lane.b32.xlu1 %v6695_v58, 256 }
0x5d48   :  { %6704 = vbcast.lane.b32.xlu1 %v6702_v38, 256 }
0x5d4c   :  { %6711 = vbcast.lane.b32.xlu1 %v6709_v44, 256 }
0x5d50   :  { %6718 = vbcast.lane.b32.xlu1 %v6716_v43, 256 }
0x5d54   :  { %6725 = vbcast.lane.b32.xlu1 %v6723_v8, 256 }
0x5d58   :  { %6732 = vbcast.lane.b32.xlu1 %v6730_v28, 256  ;;  %v12668_v28 = vld [vmem:[%s13225_s14 + $0x10] sm:$0xff] }
0x5d5c   :  { %6837 = vrot.lane.b32.xlu1 %v6835_v15, %s13319_s8 }
0x5db2   :  { %v6684_v25 = vpop.permute.xlu1 %6683  ;;  %v6691_v46 = vpop.permute.xlu0 %6690 }
0x5db3   :  { %v6735_v0 = vmul.f32 %v6691_v46, %v12582_v50  ;;  %v6734_v33 = vmul.f32 %v6684_v25, %v12456_v52 }
0x5db5   :  { %v6743_v61 = vsel %vm106_vm1, %v6735_v0, 0.0  ;;  %v6742_v2 = vsel %vm106_vm1, %v6734_v33, 0.0  ;;  %v12703_v0 = vld [vmem:[%s13226_s15 + $0x68] sm:$0xff]  ;;  %v12709_v33 = vld [vmem:[%s13226_s15 + $0x60] sm:$0xff] }
0x5db6   :  { %v6698_v36 = vpop.permute.xlu1 %6697  ;;  %v6744_v30 = vadd.f32 %v6743_v61, %v6742_v2  ;;  %v12727_v61 = vld [vmem:[%s13226_s15 + $0x48] sm:$0xff]  ;;  %v12733_v2 = vld [vmem:[%s13226_s15 + $0x40] sm:$0xff] }
0x5db7   :  { %v6736_v19 = vmul.f32 %v6698_v36, %v12319_v35 }
0x5db9   :  { %v6745_v58 = vsel %vm106_vm1, %v6736_v19, 0.0  ;;  %v12715_v19 = vld [vmem:[%s13226_s15 + $0x58] sm:$0xff] }
0x5dba   :  { %v6705_v3 = vpop.permute.xlu1 %6704  ;;  %v6746_v51 = vadd.f32 %v6745_v58, %v6744_v30  ;;  %v12745_v58 = vld [vmem:[%s13226_s15 + $0x30] sm:$0xff]  ;;  %v12757_v30 = vld [vmem:[%s13226_s15 + $0x20] sm:$0xff] }
0x5dbb   :  { %v6737_v41 = vmul.f32 %v6705_v3, %v12460_v55  ;;  %v12696_v3 = vld [vmem:[%s13226_s15 + $0x70] sm:$0xff] }
0x5dbd   :  { %v6747_v18 = vsel %vm106_vm1, %v6737_v41, 0.0  ;;  %v12739_v41 = vld [vmem:[%s13226_s15 + $0x38] sm:$0xff] }
0x5dbe   :  { %v6712_v13 = vpop.permute.xlu1 %6711  ;;  %v6748_v35 = vadd.f32 %v6747_v18, %v6746_v51  ;;  %v12769_v18 = vld [vmem:[%s13226_s15 + $0x10] sm:$0xff]  ;;  %v12781_v51 = vld [vmem:[%s13226_s15] sm:$0xff] }
0x5dbf   :  { %v6738_v38 = vmul.f32 %v6712_v13, %v12591_v7  ;;  %v12721_v13 = vld [vmem:[%s13226_s15 + $0x50] sm:$0xff] }
0x5dc1   :  { %v6749_v22 = vsel %vm106_vm1, %v6738_v38, 0.0  ;;  %v12751_v38 = vld [vmem:[%s13226_s15 + $0x28] sm:$0xff] }
0x5dc2   :  { %v6719_v10 = vpop.permute.xlu1 %6718  ;;  %v6750_v34 = vadd.f32 %v6749_v22, %v6748_v35  ;;  %v9832_v22 = vld [vmem:[%s13226_s15 + $0x78] sm:$0xff] }
0x5dc3   :  { %v6739_v44 = vmul.f32 %v6719_v10, %v6675_v21  ;;  %v12763_v10 = vld [vmem:[%s13226_s15 + $0x18] sm:$0xff] }
0x5dc5   :  { %v6751_v57 = vsel %vm106_vm1, %v6739_v44, 0.0  ;;  %v12775_v44 = vld [vmem:[%s13226_s15 + $0x8] sm:$0xff] }
0x5dc6   :  { %v6726_v24 = vpop.permute.xlu1 %6725  ;;  %v6752_v5 = vadd.f32 %v6751_v57, %v6750_v34 }
0x5dc7   :  { %v6740_v27 = vmul.f32 %v6726_v24, %v12596_v59 }
0x5dc9   :  { %v6753_v43 = vsel %vm106_vm1, %v6740_v27, 0.0 }
0x5dca   :  { %v6733_v53 = vpop.permute.xlu1 %6732  ;;  %v6754_v47 = vadd.f32 %v6753_v43, %v6752_v5 }
0x5dcb   :  { %v6741_v62 = vmul.f32 %v6733_v53, %v12600_v1 }
0x5dcd   :  { %v6755_v11 = vsel %vm106_vm1, %v6741_v62, 0.0 }
0x5dce   :  { %v6756_v21 = vadd.f32 %v6755_v11, %v6754_v47  ;;  %v6838_v54 = vpop.permute.xlu1 %6837 }
0x5dd0   :  { %v6840_v8 = vsel %vm106_vm1, %v6756_v21, %v6838_v54 }
0x5dd1   :  { %9411 = vmatmul.mubr.msk.f32.vlgmr.msra.gmra.mxu1 %vm572_vm3, %v6840_v8 }
0x5dd2   :  { %9414 = vmatpush3.msra.mxu1 %v12631_v40  ;;  %9429 = vmatprep.mubr.msk.f32.mxu1 %vm9837_vm2, %v13315_v4 }
0x5dd3   :  { %9415 = vmatprep.subr.mxu1 %v13315_v4 }
0x5dd4   :  { %9416 = vmatpush3.msra.mxu1 %v12640_v49 }
0x5dd5   :  { %9417 = vmatprep.subr.mxu1 %v13315_v4 }
0x5dd6   :  { %9418 = vmatpush3.msra.mxu1 %v12647_v6 }
0x5dd7   :  { %9419 = vmatprep.subr.mxu1 %v13315_v4 }
0x5dd8   :  { %9420 = vmatpush3.msra.mxu1 %v12654_v23 }
0x5dd9   :  { %9421 = vmatprep.subr.mxu1 %v13315_v4 }
0x5dda   :  { %9422 = vmatpush3.msra.mxu1 %v12661_v45 }
0x5ddb   :  { %9423 = vmatprep.subr.mxu1 %v13315_v4 }
0x5ddc   :  { %9424 = vmatpush3.msra.mxu1 %v12668_v28 }
0x5ddd   :  { %9425 = vmatprep.subr.mxu1 %v13315_v4 }
0x5dde   :  { %9426 = vmatpush3.msra.mxu1 %v12675_v42 }
0x5ddf   :  { %9427 = vmatprep.subr.mxu1 %v13315_v4 }
0x5de0   :  { %9428 = vmatpush3.msra.mxu1 %v12682_v63 }
0x5de1   :  { %9432 = vmatprep.subr.mxu1 %v13315_v4 }
0x5e91   :  { %v6910_v15 = vpop.f32.mrf.mxu1 }
0x5e92   :  { %6915 = vrot.lane.b32.xlu1 %v6910_v15, %s13319_s8 }
0x5e93   :  { %v9412_v25 = vpop.f32.mrf.mxu1 }
0x5f04   :  { %v12687_v36 = vpop.permute.xlu1 %6915 }
0x5f05   :  { %v6918_v46 = vsel %vm106_vm1, %v12541_v60, %v12687_v36 }
0x5f06   :  { %8853 = vmatmul.mubr.msk.f32.vlgmr.msra.gmra.mxu0 %vm572_vm3, %v6918_v46 }
0x5f07   :  { %7412 = vmatpush1.msra.mxu0 %v12696_v3  ;;  %7459 = vmatprep.mubr.f32.mxu0 %v13315_v4 }
0x5f08   :  { %7413 = vmatprep.subr.mxu0 %v12703_v0 }
0x5f09   :  { %7414 = vmatpush1.msra.mxu0 %v12709_v33 }
0x5f0a   :  { %7415 = vmatprep.subr.mxu0 %v12715_v19 }
0x5f0b   :  { %7416 = vmatpush1.msra.mxu0 %v12721_v13 }
0x5f0c   :  { %7417 = vmatprep.subr.mxu0 %v12727_v61 }
0x5f0d   :  { %7418 = vmatpush1.msra.mxu0 %v12733_v2 }
0x5f0e   :  { %7419 = vmatprep.subr.mxu0 %v12739_v41 }
0x5f0f   :  { %7420 = vmatpush1.msra.mxu0 %v12745_v58 }
0x5f10   :  { %7421 = vmatprep.subr.mxu0 %v12751_v38 }
0x5f11   :  { %7422 = vmatpush1.msra.mxu0 %v12757_v30 }
0x5f12   :  { %7423 = vmatprep.subr.mxu0 %v12763_v10 }
0x5f13   :  { %7424 = vmatpush1.msra.mxu0 %v12769_v18 }
0x5f14   :  { %7425 = vmatprep.subr.mxu0 %v12775_v44 }
0x5f15   :  { %7426 = vmatpush1.msra.mxu0 %v12781_v51 }
0x5f16   :  { %7884 = vmatprep.subr.mxu0 %v9832_v22 }
0x5fc6   :  { %v6988_v35 = vpop.f32.mrf.mxu0 }
0x5fc7   :  { %v6989_v27 = vadd.f32 %v6988_v35, %v11849_v12 }
0x5fc8   :  { %v6990_v24 = vpop.f32.mrf.mxu0 }
0x5fc9   :  { %v6991_v57 = vadd.f32 %v6990_v24, %v11839_v16  ;;  %v8854_v34 = vmul.f32 -1.442695, %v6989_v27 }
0x5fcb   :  { %7000 = vrot.lane.b32.xlu1 %v6991_v57, %s9839_s28  ;;  %9702 = vpow2.f32 %v8854_v34 }
0x5fcf   :  { %7020 = vrot.lane.b32.xlu1 %v12541_v60, %s9839_s28  ;;  %v12794_v60 = vld [vmem:[#allocation3 + $0x30] sm:$0xff] }
0x5fd0   :  { %v7048_v15 = vmul.f32 %v12410_v39, %v12794_v60 }
0x5fd2   :  { %v7049_v25 = vsel %vm106_vm1, %v7048_v15, 0.0 }
0x5fd8   :  { %v9703_v43 = vpop.eup %9702 }
0x5fd9   :  { %v6996_v5 = vadd.f32 1.0, %v9703_v43 }
0x5fdb   :  { %9704 = vrcp.f32 %v6996_v5 }
0x5fe8   :  { %v9705_v53 = vpop.eup %9704 }
0x5fe9   :  { %v7006_v46 = vsub.f32 1.0, %v9705_v53  ;;  %v7012_v24 = vmul.f32 %v9705_v53, %v12687_v36 }
0x603d   :  { %v7001_v62 = vpop.permute.xlu1 %7000 }
0x603e   :  { %v7003_v47 = vmul.f32 %v9705_v53, %v7001_v62 }
0x6040   :  { %v7004_v11 = vadd.f32 %v7003_v47, %v6991_v57 }
0x6041   :  { %v7021_v21 = vpop.permute.xlu1 %7020 }
0x6042   :  { %9706 = vtanh.f32 %v7004_v11  ;;  %v7023_v54 = vmul.f32 %v9705_v53, %v7021_v21  ;;  %v8856_v53 = vld [vmem:[%s13313_s10 + $0x30] sm:$0xff] }
0x6044   :  { %7025 = vrot.lane.b32.xlu1 %v7023_v54, %s9840_s0  ;;  %v7061_v54 = vsub.f32 1.0, %v8856_v53 }
0x604f   :  { %v9707_v8 = vpop.eup %9706 }
0x6050   :  { %7008 = vrot.lane.b32.xlu0 %v9707_v8, %s13319_s8  ;;  %v7062_v8 = vmul.f32 1e+30, %v7061_v54 }
0x6068   :  { %7050 = vadd.xlane.f32.xlu1 %v7049_v25 }
0x60b6   :  { %v7026_v43 = vpop.permute.xlu1 %7025 }
0x60c2   :  { %v7009_v22 = vpop.permute.xlu0 %7008 }
0x60c3   :  { %v7011_v35 = vmul.f32 %v7009_v22, %v7006_v46 }
0x60c5   :  { %7015 = vrot.lane.b32.xlu0 %v7011_v35, %s9840_s0  ;;  %v7013_v57 = vadd.f32 %v7012_v24, %v7011_v35 }
0x60f1   :  { %v7051_v11 = vpop.xlane.xlu1 %7050 }
0x60f2   :  { %v7052_v21 = vadd.f32 %v12419_v14, %v7051_v11 }
0x6137   :  { %v7016_v27 = vpop.permute.xlu0 %7015 }
0x6138   :  { %v7018_v34 = vadd.f32 %v7016_v27, %v7013_v57 }
0x613a   :  { %v7028_v5 = vadd.f32 %v7026_v43, %v7018_v34 }
0x613c   :  { %v7035_v62 = vmul.f32 %v7028_v5, %v11872_v48 }
0x613e   :  { %7037 = vrot.lane.b32.xlu0 %v7035_v62, %s9839_s28 }
0x61b0   :  { %v7038_v39 = vpop.permute.xlu0 %7037 }
0x61b1   :  { %v7040_v47 = vsel %vm106_vm1, %v7038_v39, 0.0 }
0x61b2   :  { %7041 = vadd.xlane.f32.xlu0 %v7040_v47  ;;  %v8857_v47 = vld [vmem:[%s13298_s9 + $0x30] sm:$0xff] }
0x61c8   :  { %7056 = vperm.xlu0 %9566, %v7052_v21  }
0x61cc   :  { %7030 = vrot.lane.b32.xlu0 %v7028_v5, %s9839_s28 }
0x623b   :  { %v7042_v36 = vpop.xlane.xlu0 %7041 }
0x623c   :  { %7043 = vst.msk [vmem:[#allocation5] sm:$0xff] %vm13340_vm4, %v7042_v36 }
0x6243   :  { %v7053_v15 = vld [vmem:[#allocation5] sm:$0xff]  ;;  %v7057_v25 = vpop.permute.xlu0 %7056 }
0x6244   :  { %v7059_v46 = vadd.f32 %v7057_v25, %v7053_v15 }
0x6246   :  { %v7063_v22 = vsub.f32 %v7059_v46, %v7062_v8 }
0x6247   :  { %v7031_v35 = vpop.permute.xlu0 %7030 }
0x6248   :  { %7034 = vst.msk [vmem:[#allocation4 + $0x28] sm:$0xff] %vm106_vm1, %v7031_v35  ;;  %v7064_v14 = vsel %vm13341_vm5, %v7063_v22, -1e+37 }
0x6249   :  { %v7065_v24 = vsel %vm290_vm0, %v7064_v14, -inf }
0x624a   :  { %7066 = vmax.xlane.f32.xlu1 %v7065_v24 }
0x62d3   :  { %v7067_v57 = vpop.xlane.xlu1 %7066 }
0x62d4   :  { %v7068_v27 = vsub.f32 %v7064_v14, %v7067_v57 }
0x62d6   :  { %v7069_v34 = vmul.f32 1.442695, %v7068_v27 }
0x62d8   :  { %9708 = vpow2.f32 %v7069_v34 }
0x62e5   :  { %v9709_v43 = vpop.eup %9708 }
0x62e6   :  { %v7071_v5 = vsel %vm290_vm0, %v9709_v43, 0.0 }
0x62e7   :  { %7072 = vadd.xlane.f32.xlu1 %v7071_v5 }
0x6370   :  { %v7073_v62 = vpop.xlane.xlu1 %7072 }
0x6371   :  { %9710 = vrcp.f32 %v7073_v62 }
0x637e   :  { %v9711_v39 = vpop.eup %9710 }
0x637f   :  { %v7075_v11 = vmul.f32 %v9711_v39, %v9709_v43 }
0x6381   :  { %v7517_v21 = vsel %vm13342_vm6, %v7075_v11, 0.0  ;;  %v7077_v36 = vmul.f32 %v8857_v47, %v7075_v11 }
0x6382   :  { %8861 = vst.msk [vmem:[%s13231_s27 + $0x30] sm:$0xff] %vm290_vm0, %v7517_v21 }
0x6383   :  { %v7078_v53 = vsub.f32 %v7075_v11, %v7077_v36 }
0x6385   :  { %7111 = vxpose.xlu1.b32.start.end [1/1] (short) (narrow) %v7078_v53, 8 }
0x6401   :  { %v7127_v54 = vpop.trf.xlu1 }
0x6402   :  { %v7233_v8 = vrot.slane %v7127_v54, %v13336_v17  ;;  %v7240_v15 = vrot.slane %v7127_v54, %v13337_v20  ;;  %v7247_v25 = vrot.slane %v7127_v54, %v13338_v9  ;;  %v7254_v46 = vrot.slane %v7127_v54, %v13339_v56 }
0x6403   :  { %v7261_v22 = vrot.slane %v7127_v54, %v13327_v37  ;;  %v7268_v35 = vrot.slane %v7127_v54, %v10044_v29  ;;  %v7275_v14 = vrot.slane %v7127_v54, %v10040_v26  ;;  %v7282_v24 = vrot.slane %v7127_v54, %v10047_v31 }
0x6404   :  { %7235 = vbcast.lane.b32.xlu0 %v7233_v8, 256 }
0x6408   :  { %7242 = vbcast.lane.b32.xlu0 %v7240_v15, 256  ;;  %v12837_v15 = vld [vmem:[#allocation4 + $0x10] sm:$0xff] }
0x640c   :  { %7249 = vbcast.lane.b32.xlu0 %v7247_v25, 256 }
0x6410   :  { %7256 = vbcast.lane.b32.xlu0 %v7254_v46, 256 }
0x6414   :  { %7263 = vbcast.lane.b32.xlu0 %v7261_v22, 256 }
0x6418   :  { %7270 = vbcast.lane.b32.xlu0 %v7268_v35, 256 }
0x641c   :  { %7277 = vbcast.lane.b32.xlu0 %v7275_v14, 256 }
0x6420   :  { %7284 = vbcast.lane.b32.xlu0 %v7282_v24, 256 }
0x643e   :  { %7079 = vxpose.xlu0.b32.start.end [1/1] (short) (narrow) %v7077_v36, 8 }
0x6476   :  { %v7236_v57 = vpop.permute.xlu0 %7235 }
0x6477   :  { %v7286_v25 = vmul.f32 %v7236_v57, %v12456_v52 }
0x6479   :  { %v7294_v24 = vsel %vm106_vm1, %v7286_v25, 0.0 }
0x647a   :  { %v7243_v27 = vpop.permute.xlu0 %7242 }
0x647b   :  { %v7287_v54 = vmul.f32 %v7243_v27, %v12582_v50 }
0x647d   :  { %v7295_v35 = vsel %vm106_vm1, %v7287_v54, 0.0 }
0x647e   :  { %v7250_v34 = vpop.permute.xlu0 %7249 }
0x647f   :  { %v7288_v46 = vmul.f32 %v7250_v34, %v12837_v15 }
0x6482   :  { %v7257_v43 = vpop.permute.xlu0 %7256 }
0x6483   :  { %v7289_v14 = vmul.f32 %v7257_v43, %v12460_v55 }
0x6485   :  { %v7299_v34 = vsel %vm106_vm1, %v7289_v14, 0.0 }
0x6486   :  { %v7264_v5 = vpop.permute.xlu0 %7263 }
0x6487   :  { %v7290_v27 = vmul.f32 %v7264_v5, %v12591_v7 }
0x6489   :  { %v7301_v43 = vsel %vm106_vm1, %v7290_v27, 0.0 }
0x648a   :  { %v7271_v62 = vpop.permute.xlu0 %7270 }
0x648e   :  { %v7278_v39 = vpop.permute.xlu0 %7277 }
0x648f   :  { %v7292_v54 = vmul.f32 %v7278_v39, %v12596_v59 }
0x6492   :  { %v7285_v47 = vpop.permute.xlu0 %7284 }
0x64ba   :  { %v7095_v11 = vpop.trf.xlu0 }
0x64bb   :  { %v7161_v21 = vrot.slane %v7095_v11, %v13337_v20  ;;  %v7154_v53 = vrot.slane %v7095_v11, %v13336_v17  ;;  %v7168_v8 = vrot.slane %v7095_v11, %v13338_v9  ;;  %v7175_v36 = vrot.slane %v7095_v11, %v13339_v56 }
0x64bc   :  { %v7182_v22 = vrot.slane %v7095_v11, %v13327_v37  ;;  %v7189_v57 = vrot.slane %v7095_v11, %v10044_v29 }
0x64bd   :  { %7163 = vbcast.lane.b32.xlu0 %v7161_v21, 256  ;;  %7156 = vbcast.lane.b32.xlu1 %v7154_v53, 256  ;;  %v7297_v21 = vsel %vm106_vm1, %v7288_v46, 0.0  ;;  %v7296_v53 = vadd.f32 %v7295_v35, %v7294_v24  ;;  %v7196_v46 = vrot.slane %v7095_v11, %v10040_v26  ;;  %v7305_v24 = vsel %vm106_vm1, %v7292_v54, 0.0 }
0x64bf   :  { %v7298_v37 = vadd.f32 %v7297_v21, %v7296_v53 }
0x64c1   :  { %7170 = vbcast.lane.b32.xlu1 %v7168_v8, 256  ;;  %v12847_v8 = vld [vmem:[#allocation4 + $0x28] sm:$0xff]  ;;  %v7300_v25 = vadd.f32 %v7299_v34, %v7298_v37 }
0x64c3   :  { %v7302_v35 = vadd.f32 %v7301_v43, %v7300_v25 }
0x64c5   :  { %7177 = vbcast.lane.b32.xlu1 %v7175_v36, 256  ;;  %v7291_v36 = vmul.f32 %v7271_v62, %v12847_v8  ;;  %v7203_v62 = vrot.slane %v7095_v11, %v10047_v31 }
0x64c7   :  { %v7303_v5 = vsel %vm106_vm1, %v7291_v36, 0.0 }
0x64c8   :  { %v7304_v14 = vadd.f32 %v7303_v5, %v7302_v35 }
0x64c9   :  { %7184 = vbcast.lane.b32.xlu1 %v7182_v22, 256  ;;  %v7293_v22 = vmul.f32 %v7285_v47, %v12600_v1 }
0x64ca   :  { %v7306_v53 = vadd.f32 %v7305_v24, %v7304_v14 }
0x64cb   :  { %v7307_v21 = vsel %vm106_vm1, %v7293_v22, 0.0 }
0x64cc   :  { %v7308_v27 = vadd.f32 %v7307_v21, %v7306_v53 }
0x64cd   :  { %7191 = vbcast.lane.b32.xlu1 %v7189_v57, 256 }
0x64d1   :  { %7198 = vbcast.lane.b32.xlu1 %v7196_v46, 256 }
0x64d5   :  { %7205 = vbcast.lane.b32.xlu1 %v7203_v62, 256 }
0x64d9   :  { %7310 = vrot.lane.b32.xlu1 %v7308_v27, %s13319_s8 }
0x652f   :  { %v7157_v37 = vpop.permute.xlu1 %7156  ;;  %v7164_v57 = vpop.permute.xlu0 %7163 }
0x6530   :  { %v7208_v47 = vmul.f32 %v7164_v57, %v12582_v50  ;;  %v7207_v36 = vmul.f32 %v7157_v37, %v12456_v52 }
0x6532   :  { %v7216_v11 = vsel %vm106_vm1, %v7208_v47, 0.0  ;;  %v7215_v25 = vsel %vm106_vm1, %v7207_v36, 0.0 }
0x6533   :  { %v7171_v39 = vpop.permute.xlu1 %7170  ;;  %v7217_v35 = vadd.f32 %v7216_v11, %v7215_v25 }
0x6534   :  { %v7209_v43 = vmul.f32 %v7171_v39, %v12837_v15 }
0x6536   :  { %v7218_v5 = vsel %vm106_vm1, %v7209_v43, 0.0 }
0x6537   :  { %v7178_v34 = vpop.permute.xlu1 %7177  ;;  %v7219_v52 = vadd.f32 %v7218_v5, %v7217_v35 }
0x6538   :  { %v7210_v46 = vmul.f32 %v7178_v34, %v12460_v55 }
0x653a   :  { %v7220_v14 = vsel %vm106_vm1, %v7210_v46, 0.0 }
0x653b   :  { %v7185_v54 = vpop.permute.xlu1 %7184  ;;  %v7221_v53 = vadd.f32 %v7220_v14, %v7219_v52 }
0x653c   :  { %v7211_v22 = vmul.f32 %v7185_v54, %v12591_v7 }
0x653e   :  { %v7222_v21 = vsel %vm106_vm1, %v7211_v22, 0.0 }
0x653f   :  { %v7192_v24 = vpop.permute.xlu1 %7191  ;;  %v7223_v55 = vadd.f32 %v7222_v21, %v7221_v53 }
0x6540   :  { %v7212_v62 = vmul.f32 %v7192_v24, %v12847_v8 }
0x6542   :  { %v7224_v37 = vsel %vm106_vm1, %v7212_v62, 0.0 }
0x6543   :  { %v7199_v27 = vpop.permute.xlu1 %7198  ;;  %v7225_v34 = vadd.f32 %v7224_v37, %v7223_v55 }
0x6544   :  { %v7213_v39 = vmul.f32 %v7199_v27, %v12596_v59  ;;  %v9834_v27 = vld [vmem:[#allocation7] ss:$0 sm:$0xff] }
0x6546   :  { %v7226_v57 = vsel %vm106_vm1, %v7213_v39, 0.0 }
0x6547   :  { %v7206_v47 = vpop.permute.xlu1 %7205  ;;  %v7227_v43 = vadd.f32 %v7226_v57, %v7225_v34 }
0x6548   :  { %v7214_v36 = vmul.f32 %v7206_v47, %v12600_v1 }
0x654a   :  { %v7228_v54 = vsel %vm106_vm1, %v7214_v36, 0.0  ;;  %v8862_v36 = vld [vmem:[%s13313_s10 + $0x38] sm:$0xff] }
0x654b   :  { %v7229_v11 = vadd.f32 %v7228_v54, %v7227_v43  ;;  %v7311_v25 = vpop.permute.xlu1 %7310  ;;  %v7534_v43 = vsub.f32 1.0, %v8862_v36 }
0x654d   :  { %v7313_v46 = vsel %vm106_vm1, %v7229_v11, %v7311_v25  ;;  %v7535_v54 = vmul.f32 1e+30, %v7534_v43 }
0x654e   :  { %9430 = vmatmul.mubr.msk.f32.vlgmr.msra.gmra.mxu1 %vm572_vm3, %v7313_v46 }
0x654f   :  { %9433 = vmatpush3.msra.mxu1 %v12631_v40  ;;  %9448 = vmatprep.mubr.msk.f32.mxu1 %vm9837_vm2, %v13315_v4  ;;  %vm13344_vm2 = vcmp.lt.s32.totalorder %v10419_v32, 7 }
0x6550   :  { %9434 = vmatprep.subr.mxu1 %v13315_v4  ;;  %vm13345_vm7 = vmmov %vm13344_vm2 }
0x6551   :  { %9435 = vmatpush3.msra.mxu1 %v12640_v49 }
0x6552   :  { %9436 = vmatprep.subr.mxu1 %v13315_v4 }
0x6553   :  { %9437 = vmatpush3.msra.mxu1 %v12647_v6 }
0x6554   :  { %9438 = vmatprep.subr.mxu1 %v13315_v4 }
0x6555   :  { %9439 = vmatpush3.msra.mxu1 %v12654_v23 }
0x6556   :  { %9440 = vmatprep.subr.mxu1 %v13315_v4 }
0x6557   :  { %9441 = vmatpush3.msra.mxu1 %v12661_v45 }
0x6558   :  { %9442 = vmatprep.subr.mxu1 %v13315_v4 }
0x6559   :  { %9443 = vmatpush3.msra.mxu1 %v12668_v28 }
0x655a   :  { %9444 = vmatprep.subr.mxu1 %v13315_v4 }
0x655b   :  { %9445 = vmatpush3.msra.mxu1 %v12675_v42 }
0x655c   :  { %9446 = vmatprep.subr.mxu1 %v13315_v4 }
0x655d   :  { %9447 = vmatpush3.msra.mxu1 %v12682_v63 }
0x660e   :  { %v7383_v59 = vpop.f32.mrf.mxu1 }
0x660f   :  { %7388 = vrot.lane.b32.xlu1 %v7383_v59, %s13319_s8 }
0x6610   :  { %v9431_v40 = vpop.f32.mrf.mxu1 }
0x6681   :  { %v7389_v49 = vpop.permute.xlu1 %7388 }
0x6682   :  { %v7391_v6 = vsel %vm106_vm1, %v12794_v60, %v7389_v49 }
0x6683   :  { %8859 = vmatmul.mubr.msk.f32.vlgmr.msra.gmra.mxu0 %vm572_vm3, %v7391_v6 }
0x6684   :  { %7885 = vmatpush1.msra.mxu0 %v12696_v3  ;;  %7932 = vmatprep.mubr.f32.mxu0 %v13315_v4 }
0x6685   :  { %7886 = vmatprep.subr.mxu0 %v12703_v0 }
0x6686   :  { %7887 = vmatpush1.msra.mxu0 %v12709_v33 }
0x6687   :  { %7888 = vmatprep.subr.mxu0 %v12715_v19 }
0x6688   :  { %7889 = vmatpush1.msra.mxu0 %v12721_v13 }
0x6689   :  { %7890 = vmatprep.subr.mxu0 %v12727_v61 }
0x668a   :  { %7891 = vmatpush1.msra.mxu0 %v12733_v2 }
0x668b   :  { %7892 = vmatprep.subr.mxu0 %v12739_v41  ;;  %v13343_v41 = vld [vmem:[#allocation8_spill] sm:$0xff] }
0x668c   :  { %7893 = vmatpush1.msra.mxu0 %v12745_v58 }
0x668d   :  { %7894 = vmatprep.subr.mxu0 %v12751_v38 }
0x668e   :  { %7895 = vmatpush1.msra.mxu0 %v12757_v30 }
0x668f   :  { %7896 = vmatprep.subr.mxu0 %v12763_v10 }
0x6690   :  { %7897 = vmatpush1.msra.mxu0 %v12769_v18 }
0x6691   :  { %7898 = vmatprep.subr.mxu0 %v12775_v44 }
0x6692   :  { %7899 = vmatpush1.msra.mxu0 %v12781_v51  ;;  %v9833_v51 = vld [vmem:[%s13230_s11] ss:$0 sm:$0xff] }
0x6743   :  { %v7461_v4 = vpop.f32.mrf.mxu0 }
0x6744   :  { %v7462_v28 = vadd.f32 %v7461_v4, %v11849_v12 }
0x6745   :  { %v7463_v23 = vpop.f32.mrf.mxu0 }
0x6746   :  { %v7464_v45 = vadd.f32 %v7463_v23, %v11839_v16  ;;  %v8860_v42 = vmul.f32 -1.442695, %v7462_v28 }
0x6748   :  { %7473 = vrot.lane.b32.xlu1 %v7464_v45, %s9839_s28  ;;  %9712 = vpow2.f32 %v8860_v42 }
0x674c   :  { %7493 = vrot.lane.b32.xlu1 %v12794_v60, %s9839_s28 }
0x6755   :  { %v9713_v63 = vpop.eup %9712 }
0x6756   :  { %v7469_v3 = vadd.f32 1.0, %v9713_v63  ;;  %v8863_v63 = vld [vmem:[%s13298_s9 + $0x38] sm:$0xff] }
0x6758   :  { %9714 = vrcp.f32 %v7469_v3 }
0x6765   :  { %v9715_v0 = vpop.eup %9714 }
0x6766   :  { %v7479_v38 = vsub.f32 1.0, %v9715_v0  ;;  %v7485_v22 = vmul.f32 %v9715_v0, %v7389_v49 }
0x67ba   :  { %v7474_v33 = vpop.permute.xlu1 %7473 }
0x67bb   :  { %v7476_v19 = vmul.f32 %v9715_v0, %v7474_v33 }
0x67bd   :  { %v7477_v13 = vadd.f32 %v7476_v19, %v7464_v45 }
0x67be   :  { %v7494_v2 = vpop.permute.xlu1 %7493 }
0x67bf   :  { %9716 = vtanh.f32 %v7477_v13  ;;  %v7496_v58 = vmul.f32 %v9715_v0, %v7494_v2 }
0x67cc   :  { %v9717_v61 = vpop.eup %9716 }
0x67cd   :  { %7481 = vrot.lane.b32.xlu0 %v9717_v61, %s13319_s8 }
0x67d1   :  { %4125 = vrot.lane.b32.xlu0 %v13343_v41, %s9839_s28 }
0x67d5   :  { %7498 = vrot.lane.b32.xlu0 %v7496_v58, %s9840_s0  ;;  %v13346_v58 = vld [vmem:[#allocation12_spill] sm:$0xff] }
0x683f   :  { %v7482_v30 = vpop.permute.xlu0 %7481 }
0x6840   :  { %v7484_v10 = vmul.f32 %v7482_v30, %v7479_v38 }
0x6842   :  { %7488 = vrot.lane.b32.xlu1 %v7484_v10, %s9840_s0  ;;  %v7486_v35 = vadd.f32 %v7485_v22, %v7484_v10 }
0x6843   :  { %v4126_v18 = vpop.permute.xlu0 %4125 }
0x6844   :  { %4129 = vst.msk [vmem:[#allocation3 + $0x38] sm:$0xff] %vm106_vm1, %v4126_v18 }
0x6847   :  { %v7499_v62 = vpop.permute.xlu0 %7498 }
0x684b   :  { %v12927_v44 = vld [vmem:[#allocation3 + $0x38] sm:$0xff] }
0x684c   :  { %v7521_v60 = vmul.f32 %v9833_v51, %v12927_v44 }
0x684e   :  { %v7522_v5 = vsel %vm106_vm1, %v7521_v60, 0.0 }
0x684f   :  { %7523 = vadd.xlane.f32.xlu0 %v7522_v5 }
0x68b4   :  { %v7489_v24 = vpop.permute.xlu1 %7488 }
0x68b5   :  { %v7491_v14 = vadd.f32 %v7489_v24, %v7486_v35 }
0x68b7   :  { %v7501_v52 = vadd.f32 %v7499_v62, %v7491_v14 }
0x68b9   :  { %v7508_v21 = vmul.f32 %v7501_v52, %v11872_v48 }
0x68bb   :  { %7510 = vrot.lane.b32.xlu1 %v7508_v21, %s9839_s28 }
0x68d8   :  { %v7524_v53 = vpop.xlane.xlu0 %7523 }
0x68d9   :  { %v7525_v37 = vadd.f32 %v9834_v27, %v7524_v53 }
0x68db   :  { %7529 = vperm.xlu0 %9566, %v7525_v37  }
0x68df   :  { %7503 = vrot.lane.b32.xlu0 %v7501_v52, %s9839_s28 }
0x692d   :  { %v7511_v39 = vpop.permute.xlu1 %7510 }
0x692e   :  { %v7513_v55 = vsel %vm106_vm1, %v7511_v39, 0.0 }
0x692f   :  { %7514 = vadd.xlane.f32.xlu1 %v7513_v55  ;;  %v12969_v55 = vld [vmem:[#allocation4] sm:$0xff] }
0x6956   :  { %v7530_v57 = vpop.permute.xlu0 %7529 }
0x695a   :  { %v7504_v34 = vpop.permute.xlu0 %7503 }
0x695b   :  { %7507 = vst.msk [vmem:[#allocation4 + $0x30] sm:$0xff] %vm106_vm1, %v7504_v34 }
0x69b8   :  { %v7515_v47 = vpop.xlane.xlu1 %7514 }
0x69b9   :  { %7516 = vst.msk [vmem:[#allocation5] sm:$0xff] %vm3660_vm15, %v7515_v47  ;;  %v12973_v47 = vld [vmem:[#allocation4 + $0x18] sm:$0xff] }
0x69c0   :  { %v7526_v11 = vld [vmem:[#allocation5] sm:$0xff] }
0x69c1   :  { %v7532_v25 = vadd.f32 %v7530_v57, %v7526_v11 }
0x69c3   :  { %v7536_v46 = vsub.f32 %v7532_v25, %v7535_v54 }
0x69c5   :  { %v7537_v59 = vsel %vm13344_vm2, %v7536_v46, -1e+37 }
0x69c6   :  { %v7538_v40 = vsel %vm290_vm0, %v7537_v59, -inf }
0x69c7   :  { %7539 = vmax.xlane.f32.xlu1 %v7538_v40  ;;  %v12984_v40 = vld [vmem:[#allocation4 + $0x30] sm:$0xff] }
0x6a50   :  { %v7540_v49 = vpop.xlane.xlu1 %7539 }
0x6a51   :  { %v7541_v6 = vsub.f32 %v7537_v59, %v7540_v49  ;;  %v8005_v49 = vld [vmem:[%s13232_s17 + $0x18] sm:$0xff] }
0x6a52   :  { %9451 = vmatprep.subr.mxu1 %v8005_v49 }
0x6a53   :  { %v7542_v4 = vmul.f32 1.442695, %v7541_v6 }
0x6a55   :  { %9718 = vpow2.f32 %v7542_v4 }
0x6a62   :  { %v9719_v23 = vpop.eup %9718 }
0x6a63   :  { %v7544_v45 = vsel %vm290_vm0, %v9719_v23, 0.0 }
0x6a64   :  { %7545 = vadd.xlane.f32.xlu1 %v7544_v45 }
0x6aed   :  { %v7546_v28 = vpop.xlane.xlu1 %7545 }
0x6aee   :  { %9720 = vrcp.f32 %v7546_v28 }
0x6afb   :  { %v9721_v42 = vpop.eup %9720 }
0x6afc   :  { %v7548_v3 = vmul.f32 %v9721_v42, %v9719_v23 }
0x6afe   :  { %v7990_v0 = vsel %vm13345_vm7, %v7548_v3, 0.0  ;;  %v7550_v33 = vmul.f32 %v8863_v63, %v7548_v3 }
0x6aff   :  { %8867 = vst.msk [vmem:[%s13231_s27 + $0x38] sm:$0xff] %vm290_vm0, %v7990_v0 }
0x6b00   :  { %v7551_v19 = vsub.f32 %v7548_v3, %v7550_v33 }
0x6b02   :  { %7584 = vxpose.xlu1.b32.start.end [1/1] (short) (narrow) %v7551_v19, 8 }
0x6b7e   :  { %v7600_v13 = vpop.trf.xlu1 }
0x6b7f   :  { %v7706_v61 = vrot.slane %v7600_v13, %v13336_v17  ;;  %v7713_v2 = vrot.slane %v7600_v13, %v13337_v20  ;;  %v7720_v41 = vrot.slane %v7600_v13, %v13338_v9  ;;  %v7727_v32 = vrot.slane %v7600_v13, %v13339_v56 }
0x6b80   :  { %v7734_v38 = vrot.slane %v7600_v13, %v13346_v58  ;;  %v7741_v30 = vrot.slane %v7600_v13, %v10044_v29  ;;  %v7748_v10 = vrot.slane %v7600_v13, %v10040_v26  ;;  %v7755_v18 = vrot.slane %v7600_v13, %v10047_v31 }
0x6b81   :  { %7708 = vbcast.lane.b32.xlu0 %v7706_v61, 256 }
0x6b85   :  { %7715 = vbcast.lane.b32.xlu0 %v7713_v2, 256 }
0x6b89   :  { %7722 = vbcast.lane.b32.xlu0 %v7720_v41, 256 }
0x6b8d   :  { %7729 = vbcast.lane.b32.xlu0 %v7727_v32, 256 }
0x6b91   :  { %7736 = vbcast.lane.b32.xlu0 %v7734_v38, 256 }
0x6b95   :  { %7743 = vbcast.lane.b32.xlu0 %v7741_v30, 256 }
0x6b99   :  { %7750 = vbcast.lane.b32.xlu0 %v7748_v10, 256 }
0x6b9d   :  { %7757 = vbcast.lane.b32.xlu0 %v7755_v18, 256 }
0x6bbb   :  { %7552 = vxpose.xlu0.b32.start.end [1/1] (short) (narrow) %v7550_v33, 8 }
0x6bf3   :  { %v7709_v51 = vpop.permute.xlu0 %7708 }
0x6bf4   :  { %v7759_v57 = vmul.f32 %v7709_v51, %v12969_v55 }
0x6bf7   :  { %v7716_v60 = vpop.permute.xlu0 %7715 }
0x6bf8   :  { %v7760_v39 = vmul.f32 %v7716_v60, %v12582_v50 }
0x6bfb   :  { %v7723_v5 = vpop.permute.xlu0 %7722 }
0x6bfc   :  { %v7761_v34 = vmul.f32 %v7723_v5, %v12837_v15 }
0x6bfe   :  { %v7770_v36 = vsel %vm106_vm1, %v7761_v34, 0.0 }
0x6bff   :  { %v7730_v22 = vpop.permute.xlu0 %7729 }
0x6c03   :  { %v7737_v35 = vpop.permute.xlu0 %7736 }
0x6c04   :  { %v7763_v43 = vmul.f32 %v7737_v35, %v12591_v7 }
0x6c06   :  { %v7774_v6 = vsel %vm106_vm1, %v7763_v43, 0.0  ;;  %v7994_v43 = vld [vmem:[#allocation2] sm:$0xff] }
0x6c07   :  { %v7744_v24 = vpop.permute.xlu0 %7743 }
0x6c08   :  { %v7764_v46 = vmul.f32 %v7744_v24, %v12847_v8 }
0x6c0a   :  { %v7776_v45 = vsel %vm106_vm1, %v7764_v46, 0.0  ;;  %v8308_v46 = vld [vmem:[%s13233_s19 + $0x10] sm:$0xff] }
0x6c0b   :  { %v7751_v14 = vpop.permute.xlu0 %7750 }
0x6c0c   :  { %v7765_v4 = vmul.f32 %v7751_v14, %v12984_v40 }
0x6c0e   :  { %v7778_v63 = vsel %vm106_vm1, %v7765_v4, 0.0  ;;  %v8306_v4 = vld [vmem:[%s13233_s19] sm:$0xff] }
0x6c0f   :  { %v7758_v62 = vpop.permute.xlu0 %7757 }
0x6c10   :  { %v7766_v28 = vmul.f32 %v7758_v62, %v12600_v1 }
0x6c12   :  { %v7780_v33 = vsel %vm106_vm1, %v7766_v28, 0.0  ;;  %v8001_v28 = vld [vmem:[#allocation2 + $0x38] sm:$0xff] }
0x6c37   :  { %v7568_v52 = vpop.trf.xlu0 }
0x6c38   :  { %v7634_v21 = vrot.slane %v7568_v52, %v13337_v20  ;;  %v7627_v53 = vrot.slane %v7568_v52, %v13336_v17  ;;  %v7641_v27 = vrot.slane %v7568_v52, %v13338_v9  ;;  %v7648_v37 = vrot.slane %v7568_v52, %v13339_v56 }
0x6c39   :  { %v7655_v17 = vrot.slane %v7568_v52, %v13346_v58  ;;  %v7768_v20 = vsel %vm106_vm1, %v7760_v39, 0.0  ;;  %v7762_v9 = vmul.f32 %v7730_v22, %v12973_v47  ;;  %v7767_v56 = vsel %vm106_vm1, %v7759_v57, 0.0 }
0x6c3a   :  { %7636 = vbcast.lane.b32.xlu0 %v7634_v21, 256  ;;  %7629 = vbcast.lane.b32.xlu1 %v7627_v53, 256  ;;  %v7769_v54 = vadd.f32 %v7768_v20, %v7767_v56  ;;  %v7662_v11 = vrot.slane %v7568_v52, %v10044_v29  ;;  %v7669_v29 = vrot.slane %v7568_v52, %v10040_v26 }
0x6c3b   :  { %v7772_v25 = vsel %vm106_vm1, %v7762_v9, 0.0  ;;  %v7676_v0 = vrot.slane %v7568_v52, %v10047_v31 }
0x6c3c   :  { %v7771_v59 = vadd.f32 %v7770_v36, %v7769_v54  ;;  %v8004_v36 = vld [vmem:[%s13232_s17 + $0x10] sm:$0xff]  ;;  %v8002_v54 = vld [vmem:[%s13232_s17] sm:$0xff] }
0x6c3e   :  { %7643 = vbcast.lane.b32.xlu1 %v7641_v27, 256  ;;  %v7773_v23 = vadd.f32 %v7772_v25, %v7771_v59  ;;  %v7995_v25 = vld [vmem:[#allocation2 + $0x8] sm:$0xff]  ;;  %v7996_v59 = vld [vmem:[#allocation2 + $0x10] sm:$0xff] }
0x6c40   :  { %v7775_v42 = vadd.f32 %v7774_v6, %v7773_v23  ;;  %v7997_v6 = vld [vmem:[#allocation2 + $0x18] sm:$0xff]  ;;  %v7998_v23 = vld [vmem:[#allocation2 + $0x20] sm:$0xff] }
0x6c42   :  { %7650 = vbcast.lane.b32.xlu1 %v7648_v37, 256  ;;  %v7777_v3 = vadd.f32 %v7776_v45, %v7775_v42  ;;  %v8000_v45 = vld [vmem:[#allocation2 + $0x30] sm:$0xff]  ;;  %v8299_v42 = vld [vmem:[#allocation4 + $0x8] sm:$0xff] }
0x6c44   :  { %v7779_v19 = vadd.f32 %v7778_v63, %v7777_v3  ;;  %v8302_v63 = vld [vmem:[#allocation4 + $0x20] sm:$0xff] }
0x6c46   :  { %7657 = vbcast.lane.b32.xlu1 %v7655_v17, 256  ;;  %v7781_v13 = vadd.f32 %v7780_v33, %v7779_v19 }
0x6c4a   :  { %7664 = vbcast.lane.b32.xlu1 %v7662_v11, 256  ;;  %v8309_v11 = vld [vmem:[%s13233_s19 + $0x18] sm:$0xff] }
0x6c4e   :  { %7671 = vbcast.lane.b32.xlu1 %v7669_v29, 256  ;;  %v7999_v29 = vld [vmem:[#allocation2 + $0x28] sm:$0xff] }
0x6c52   :  { %7678 = vbcast.lane.b32.xlu1 %v7676_v0, 256 }
0x6c56   :  { %7783 = vrot.lane.b32.xlu1 %v7781_v13, %s13319_s8 }
0x6cac   :  { %v7630_v61 = vpop.permute.xlu1 %7629  ;;  %v7637_v2 = vpop.permute.xlu0 %7636 }
0x6cad   :  { %v7681_v32 = vmul.f32 %v7637_v2, %v12582_v50  ;;  %v7680_v58 = vmul.f32 %v7630_v61, %v12969_v55 }
0x6caf   :  { %v7689_v31 = vsel %vm106_vm1, %v7681_v32, 0.0  ;;  %v7688_v10 = vsel %vm106_vm1, %v7680_v58, 0.0 }
0x6cb0   :  { %v7644_v26 = vpop.permute.xlu1 %7643  ;;  %v7690_v5 = vadd.f32 %v7689_v31, %v7688_v10  ;;  %v8158_v31 = vld [vmem:[%s13234_s18 + $0x8] sm:$0xff]  ;;  %v8157_v10 = vld [vmem:[%s13234_s18] sm:$0xff] }
0x6cb1   :  { %v7682_v38 = vmul.f32 %v7644_v26, %v12837_v15 }
0x6cb3   :  { %v7691_v51 = vsel %vm106_vm1, %v7682_v38, 0.0  ;;  %v8159_v38 = vld [vmem:[%s13234_s18 + $0x10] sm:$0xff] }
0x6cb4   :  { %v7651_v41 = vpop.permute.xlu1 %7650  ;;  %v7692_v24 = vadd.f32 %v7691_v51, %v7690_v5  ;;  %v8151_v51 = vld [vmem:[#allocation3 + $0x10] sm:$0xff]  ;;  %v8153_v5 = vld [vmem:[#allocation3 + $0x20] sm:$0xff] }
0x6cb5   :  { %v7683_v18 = vmul.f32 %v7651_v41, %v12973_v47 }
0x6cb7   :  { %v7693_v35 = vsel %vm106_vm1, %v7683_v18, 0.0  ;;  %v8150_v18 = vld [vmem:[#allocation3 + $0x8] sm:$0xff] }
0x6cb8   :  { %v7658_v30 = vpop.permute.xlu1 %7657  ;;  %v7694_v62 = vadd.f32 %v7693_v35, %v7692_v24  ;;  %v8155_v35 = vld [vmem:[#allocation3 + $0x30] sm:$0xff] }
0x6cb9   :  { %v7684_v60 = vmul.f32 %v7658_v30, %v12591_v7  ;;  %v8149_v30 = vld [vmem:[#allocation3] sm:$0xff]  ;;  %v8457_v24 = vld [vmem:[%s13236_s21 + $0x10] sm:$0xff] }
0x6cbb   :  { %v7695_v14 = vsel %vm106_vm1, %v7684_v60, 0.0  ;;  %v8152_v60 = vld [vmem:[#allocation3 + $0x18] sm:$0xff] }
0x6cbc   :  { %v7665_v22 = vpop.permute.xlu1 %7664  ;;  %v7696_v27 = vadd.f32 %v7695_v14, %v7694_v62  ;;  %v8456_v14 = vld [vmem:[%s13236_s21 + $0x8] sm:$0xff]  ;;  %v8455_v62 = vld [vmem:[%s13236_s21] sm:$0xff] }
0x6cbd   :  { %v7685_v50 = vmul.f32 %v7665_v22, %v12847_v8  ;;  %v8154_v22 = vld [vmem:[#allocation3 + $0x28] sm:$0xff] }
0x6cbf   :  { %v7697_v21 = vsel %vm106_vm1, %v7685_v50, 0.0  ;;  %v8458_v50 = vld [vmem:[%s13236_s21 + $0x18] sm:$0xff] }
0x6cc0   :  { %v7672_v52 = vpop.permute.xlu1 %7671  ;;  %v7698_v39 = vadd.f32 %v7697_v21, %v7696_v27 }
0x6cc1   :  { %v7686_v53 = vmul.f32 %v7672_v52, %v12984_v40 }
0x6cc3   :  { %v7699_v37 = vsel %vm106_vm1, %v7686_v53, 0.0 }
0x6cc4   :  { %v7679_v7 = vpop.permute.xlu1 %7678  ;;  %v7700_v34 = vadd.f32 %v7699_v37, %v7698_v39 }
0x6cc5   :  { %v7687_v57 = vmul.f32 %v7679_v7, %v12600_v1  ;;  %v8003_v1 = vld [vmem:[%s13232_s17 + $0x8] sm:$0xff] }
0x6cc7   :  { %v7701_v17 = vsel %vm106_vm1, %v7687_v57, 0.0 }
0x6cc8   :  { %v7702_v20 = vadd.f32 %v7701_v17, %v7700_v34  ;;  %v7784_v9 = vpop.permute.xlu1 %7783 }
0x6cca   :  { %v7786_v56 = vsel %vm106_vm1, %v7702_v20, %v7784_v9 }
0x6ccb   :  { %9449 = vmatmul.mubr.msk.f32.vlgmr.msra.gmra.mxu1 %vm572_vm3, %v7786_v56 }
0x6ccc   :  { %9452 = vmatpush3.msra.mxu1 %v8005_v49  ;;  %9459 = vmatprep.mubr.msk.f32.mxu1 %vm106_vm1, %v7994_v43  ;;  %v8307_v49 = vld [vmem:[%s13233_s19 + $0x8] sm:$0xff] }
0x6ccd   :  { %9453 = vmatprep.subr.mxu1 %v8004_v36 }
0x6cce   :  { %9454 = vmatpush3.msra.mxu1 %v8004_v36 }
0x6ccf   :  { %9455 = vmatprep.subr.mxu1 %v8003_v1 }
0x6cd0   :  { %9456 = vmatpush3.msra.mxu1 %v8003_v1 }
0x6cd1   :  { %9457 = vmatprep.subr.mxu1 %v8002_v54 }
0x6cd2   :  { %9458 = vmatpush3.msra.mxu1 %v8002_v54 }
0x6cd3   :  { %9460 = vmatmul.mubr.msk.f32.vlgmr.msra.gmra.mxu1 %vm106_vm1, %v7995_v25  ;;  %9491 = vmatprep.subr.mxu1 %v8309_v11 }
0x6cd4   :  { %9462 = vmatprep.mubr.msk.f32.mxu1 %vm106_vm1, %v7996_v59  ;;  %9492 = vmatpush3.msra.mxu1 %v8309_v11 }
0x6cd5   :  { %9493 = vmatprep.subr.mxu1 %v8308_v46 }
0x6cd6   :  { %9494 = vmatpush3.msra.mxu1 %v8308_v46 }
0x6cd7   :  { %9463 = vmatmul.mubr.msk.f32.gmra.mxu1 %vm106_vm1, %v7997_v6  ;;  %9495 = vmatprep.subr.mxu1 %v8307_v49 }
0x6cd8   :  { %9465 = vmatprep.mubr.msk.f32.mxu1 %vm106_vm1, %v7998_v23  ;;  %9496 = vmatpush3.msra.mxu1 %v8307_v49 }
0x6cd9   :  { %9497 = vmatprep.subr.mxu1 %v8306_v4 }
0x6cda   :  { %9498 = vmatpush3.msra.mxu1 %v8306_v4 }
0x6cdb   :  { %9466 = vmatmul.mubr.msk.f32.gmra.mxu1 %vm106_vm1, %v7999_v29 }
0x6cdc   :  { %9468 = vmatprep.mubr.msk.f32.mxu1 %vm106_vm1, %v8000_v45 }
0x6cdf   :  { %9469 = vmatmul.mubr.msk.f32.gmra.mxu1 %vm106_vm1, %v8001_v28 }
0x6ce0   :  { %9499 = vmatprep.mubr.msk.f32.mxu1 %vm106_vm1, %v12969_v55  ;;  %v8160_v55 = vld [vmem:[%s13234_s18 + $0x18] sm:$0xff] }
0x6ce1   :  { %9471 = vmatprep.subr.mxu0 %v8160_v55 }
0x6ce3   :  { %9500 = vmatmul.mubr.msk.f32.vlgmr.msra.gmra.mxu1 %vm106_vm1, %v8299_v42 }
0x6ce4   :  { %9502 = vmatprep.mubr.msk.f32.mxu1 %vm106_vm1, %v12837_v15 }
0x6ce7   :  { %9503 = vmatmul.mubr.msk.f32.gmra.mxu1 %vm106_vm1, %v12973_v47 }
0x6ce8   :  { %9505 = vmatprep.mubr.msk.f32.mxu1 %vm106_vm1, %v8302_v63 }
0x6ceb   :  { %9506 = vmatmul.mubr.msk.f32.gmra.mxu1 %vm106_vm1, %v12847_v8 }
0x6cec   :  { %9508 = vmatprep.mubr.msk.f32.mxu1 %vm106_vm1, %v12984_v40  ;;  %v13072_v40 = vld [vmem:[%s13235_s20] ss:$0 sm:$0xff] }
0x6d8b   :  { %v7856_v3 = vpop.f32.mrf.mxu1 }
0x6d8c   :  { %7861 = vrot.lane.b32.xlu1 %v7856_v3, %s13319_s8 }
0x6d8d   :  { %v9450_v15 = vpop.f32.mrf.mxu1 }
0x6d93   :  { %v9461_v0 = vpop.f32.mrf.mxu1 }
0x6d94   :  { %v8142_v39 = vadd.f32 %v9461_v0, %v13072_v40 }
0x6d95   :  { %v8096_v47 = vpop.f32.mrf.mxu1 }
0x6d96   :  { %v8141_v34 = vadd.f32 %v13072_v40, %v8096_v47 }
0x6d97   :  { %v13061_v33 = vpop.f32.mrf.mxu1 }
0x6d98   :  { %v8144_v9 = vadd.f32 %v13061_v33, %v13072_v40 }
0x6d99   :  { %v13063_v19 = vpop.f32.mrf.mxu1 }
0x6d9a   :  { %v8143_v1 = vadd.f32 %v13072_v40, %v13063_v19 }
0x6d9b   :  { %v13065_v13 = vpop.f32.mrf.mxu1 }
0x6d9c   :  { %v8146_v46 = vadd.f32 %v13065_v13, %v13072_v40 }
0x6d9d   :  { %v13067_v8 = vpop.f32.mrf.mxu1 }
0x6d9e   :  { %v8145_v29 = vadd.f32 %v13072_v40, %v13067_v8 }
0x6d9f   :  { %v9470_v61 = vpop.f32.mrf.mxu1 }
0x6da0   :  { %v13075_v26 = vadd.f32 %v9470_v61, %v13072_v40 }
0x6da1   :  { %v8126_v2 = vpop.f32.mrf.mxu1 }
0x6da2   :  { %v13078_v41 = vadd.f32 %v13072_v40, %v8126_v2 }
0x6da3   :  { %v9501_v52 = vpop.f32.mrf.mxu1 }
0x6da5   :  { %v8400_v37 = vpop.f32.mrf.mxu1 }
0x6da7   :  { %v9504_v7 = vpop.f32.mrf.mxu1 }
0x6da9   :  { %v8410_v36 = vpop.f32.mrf.mxu1 }
0x6dfe   :  { %v13080_v32 = vpop.permute.xlu1 %7861 }
0x6dff   :  { %v7864_v58 = vsel %vm106_vm1, %v12927_v44, %v13080_v32 }
0x6e00   :  { %8865 = vmatmul.mubr.msk.f32.vlgmr.msra.gmra.mxu0 %vm572_vm3, %v7864_v58 }
0x6e01   :  { %9472 = vmatpush3.msra.mxu0 %v8160_v55  ;;  %9479 = vmatprep.mubr.msk.f32.mxu0 %vm106_vm1, %v8149_v30 }
0x6e02   :  { %9473 = vmatprep.subr.mxu0 %v8159_v38 }
0x6e03   :  { %9474 = vmatpush3.msra.mxu0 %v8159_v38 }
0x6e04   :  { %9475 = vmatprep.subr.mxu0 %v8158_v31 }
0x6e05   :  { %9476 = vmatpush3.msra.mxu0 %v8158_v31 }
0x6e06   :  { %9477 = vmatprep.subr.mxu0 %v8157_v10 }
0x6e07   :  { %9478 = vmatpush3.msra.mxu0 %v8157_v10 }
0x6e08   :  { %9480 = vmatmul.mubr.msk.f32.vlgmr.msra.gmra.mxu0 %vm106_vm1, %v8150_v18  ;;  %9511 = vmatprep.subr.mxu0 %v8458_v50 }
0x6e09   :  { %9482 = vmatprep.mubr.msk.f32.mxu0 %vm106_vm1, %v8151_v51  ;;  %9512 = vmatpush3.msra.mxu0 %v8458_v50 }
0x6e0a   :  { %9513 = vmatprep.subr.mxu0 %v8457_v24 }
0x6e0b   :  { %9514 = vmatpush3.msra.mxu0 %v8457_v24 }
0x6e0c   :  { %9483 = vmatmul.mubr.msk.f32.gmra.mxu0 %vm106_vm1, %v8152_v60  ;;  %9515 = vmatprep.subr.mxu0 %v8456_v14 }
0x6e0d   :  { %9485 = vmatprep.mubr.msk.f32.mxu0 %vm106_vm1, %v8153_v5  ;;  %9516 = vmatpush3.msra.mxu0 %v8456_v14 }
0x6e0e   :  { %9517 = vmatprep.subr.mxu0 %v8455_v62 }
0x6e0f   :  { %9518 = vmatpush3.msra.mxu0 %v8455_v62  ;;  %v8604_v62 = vld [vmem:[%s13237_s23 + $0x8] sm:$0xff] }
0x6e10   :  { %9486 = vmatmul.mubr.msk.f32.gmra.mxu0 %vm106_vm1, %v8154_v22  ;;  %v8606_v22 = vld [vmem:[%s13237_s23 + $0x18] sm:$0xff] }
0x6e11   :  { %9488 = vmatprep.mubr.msk.f32.mxu0 %vm106_vm1, %v8155_v35  ;;  %v8605_v35 = vld [vmem:[%s13237_s23 + $0x10] sm:$0xff]  ;;  %9551 = vmatprep.subr.mxu1 %v8606_v22 }
0x6e12   :  { %9531 = vmatprep.subr.mxu0 %v8606_v22  ;;  %9555 = vmatpush3.msra.mxu1 %v8606_v22 }
0x6e13   :  { %9552 = vmatprep.subr.mxu1 %v8605_v35 }
0x6e14   :  { %9489 = vmatmul.mubr.msk.f32.gmra.mxu0 %vm106_vm1, %v12927_v44  ;;  %9556 = vmatpush3.msra.mxu1 %v8605_v35 }
0x6e15   :  { %9553 = vmatprep.subr.mxu1 %v8604_v62 }
0x6e16   :  { %9557 = vmatpush3.msra.mxu1 %v8604_v62 }
0x6ec0   :  { %v7934_v21 = vpop.f32.mrf.mxu0 }
0x6ec1   :  { %v7935_v40 = vadd.f32 %v7934_v21, %v11849_v12 }
0x6ec2   :  { %v7936_v53 = vpop.f32.mrf.mxu0 }
0x6ec3   :  { %v7937_v27 = vadd.f32 %v7936_v53, %v11839_v16  ;;  %v8866_v61 = vmul.f32 -1.442695, %v7935_v40 }
0x6ec5   :  { %7946 = vrot.lane.b32.xlu1 %v7937_v27, %s9839_s28  ;;  %9722 = vpow2.f32 %v8866_v61 }
0x6ec8   :  { %v9481_v57 = vpop.f32.mrf.mxu0 }
0x6ec9   :  { %v8291_v17 = vadd.f32 %v9481_v57, %v8142_v39  ;;  %7966 = vrot.lane.b32.xlu1 %v12927_v44, %s9839_s28  ;;  %v9507_v44 = vpop.f32.mrf.mxu1 }
0x6eca   :  { %v8251_v20 = vpop.f32.mrf.mxu0 }
0x6ecb   :  { %v8290_v56 = vadd.f32 %v8251_v20, %v8141_v34  ;;  %v8440_v16 = vadd.f32 %v9501_v52, %v8291_v17  ;;  %v8420_v3 = vpop.f32.mrf.mxu1 }
0x6ecc   :  { %v9484_v43 = vpop.f32.mrf.mxu0 }
0x6ecd   :  { %v8439_v54 = vadd.f32 %v8400_v37, %v8290_v56  ;;  %v8293_v11 = vadd.f32 %v9484_v43, %v8144_v9  ;;  %v8448_v6 = vmax.f32 %v8440_v16, 0.0  ;;  %v8893_v56 = vld [vmem:[%s13238_s22] ss:$0 sm:$0xff] }
0x6ece   :  { %v8261_v25 = vpop.f32.mrf.mxu0 }
0x6ecf   :  { %v8447_v59 = vmax.f32 %v8439_v54, 0.0  ;;  %v8292_v49 = vadd.f32 %v8261_v25, %v8143_v1  ;;  %v8442_v4 = vadd.f32 %v9504_v7, %v8293_v11 }
0x6ed0   :  { %v9487_v23 = vpop.f32.mrf.mxu0 }
0x6ed1   :  { %v8441_v45 = vadd.f32 %v8410_v36, %v8292_v49  ;;  %v8295_v28 = vadd.f32 %v9487_v23, %v8146_v46  ;;  %9519 = vmatprep.mubr.msk.f32.mxu0 %vm106_vm1, %v8447_v59  ;;  %v8450_v15 = vmax.f32 %v8442_v4, 0.0 }
0x6ed2   :  { %v8271_v42 = vpop.f32.mrf.mxu0  ;;  %9520 = vmatmul.mubr.msk.f32.vlgmr.msra.gmra.mxu0 %vm106_vm1, %v8448_v6  ;;  %v9723_v2 = vpop.eup %9722 }
0x6ed3   :  { %v8449_v63 = vmax.f32 %v8441_v45, 0.0  ;;  %v8294_v55 = vadd.f32 %v8271_v42, %v8145_v29  ;;  %v8444_v0 = vadd.f32 %v9507_v44, %v8295_v28  ;;  %v7942_v58 = vadd.f32 1.0, %v9723_v2  ;;  %9532 = vmatpush3.msra.mxu0 %v8606_v22  ;;  %v8902_v45 = vld [vmem:[%s13239_s24] ss:$0 sm:$0xff] }
0x6ed4   :  { %v9490_v47 = vpop.f32.mrf.mxu0  ;;  %9533 = vmatprep.subr.mxu0 %v8605_v35 }
0x6ed5   :  { %v8443_v33 = vadd.f32 %v8420_v3, %v8294_v55  ;;  %v13133_v19 = vadd.f32 %v9490_v47, %v13075_v26  ;;  %9522 = vmatprep.mubr.msk.f32.mxu0 %vm106_vm1, %v8449_v63  ;;  %v8452_v8 = vmax.f32 %v8444_v0, 0.0  ;;  %9724 = vrcp.f32 %v7942_v58  ;;  %9534 = vmatpush3.msra.mxu0 %v8605_v35 }
0x6ed6   :  { %9523 = vmatmul.mubr.msk.f32.gmra.mxu0 %vm106_vm1, %v8450_v15  ;;  %9535 = vmatprep.subr.mxu0 %v8604_v62  ;;  %v8281_v37 = vpop.f32.mrf.mxu0 }
0x6ed7   :  { %v8451_v13 = vmax.f32 %v8443_v33, 0.0  ;;  %9536 = vmatpush3.msra.mxu0 %v8604_v62  ;;  %v8296_v4 = vadd.f32 %v8281_v37, %v13078_v41 }
0x6ed9   :  { %9525 = vmatprep.mubr.msk.f32.mxu0 %vm106_vm1, %v8451_v13 }
0x6eda   :  { %9526 = vmatmul.mubr.msk.f32.gmra.mxu0 %vm106_vm1, %v8452_v8 }
0x6ee2   :  { %v9725_v38 = vpop.eup %9724 }
0x6ee3   :  { %v7952_v60 = vsub.f32 1.0, %v9725_v38  ;;  %v7958_v50 = vmul.f32 %v9725_v38, %v13080_v32  ;;  %v8603_v32 = vld [vmem:[%s13237_s23] sm:$0xff] }
0x6ee4   :  { %9554 = vmatprep.subr.mxu1 %v8603_v32  ;;  %9537 = vmatprep.subr.mxu0 %v8603_v32 }
0x6ee5   :  { %9558 = vmatpush3.msra.mxu1 %v8603_v32  ;;  %9538 = vmatpush3.msra.mxu0 %v8603_v32 }
0x6f37   :  { %v7947_v26 = vpop.permute.xlu1 %7946 }
0x6f38   :  { %v7949_v30 = vmul.f32 %v9725_v38, %v7947_v26 }
0x6f3a   :  { %v7950_v31 = vadd.f32 %v7949_v30, %v7937_v27 }
0x6f3b   :  { %v7967_v10 = vpop.permute.xlu1 %7966 }
0x6f3c   :  { %9726 = vtanh.f32 %v7950_v31  ;;  %v7969_v18 = vmul.f32 %v9725_v38, %v7967_v10 }
0x6f3e   :  { %7971 = vrot.lane.b32.xlu1 %v7969_v18, %s9840_s0 }
0x6f49   :  { %v9727_v51 = vpop.eup %9726 }
0x6f4a   :  { %7954 = vrot.lane.b32.xlu0 %v9727_v51, %s13319_s8 }
0x6f92   :  { %v9521_v39 = vpop.f32.mrf.mxu0 }
0x6f93   :  { %v8562_v15 = vadd.f32 %v9521_v39, %v8893_v56 }
0x6f94   :  { %v8556_v7 = vpop.f32.mrf.mxu0 }
0x6f95   :  { %v8557_v28 = vadd.f32 %v8893_v56, %v8556_v7  ;;  %v8596_v8 = vmax.f32 %v8562_v15, 0.0 }
0x6f96   :  { %v9524_v57 = vpop.f32.mrf.mxu0 }
0x6f97   :  { %v8572_v43 = vadd.f32 %v9524_v57, %v8893_v56  ;;  %v8595_v33 = vmax.f32 %v8557_v28, 0.0 }
0x6f98   :  { %v8566_v34 = vpop.f32.mrf.mxu0 }
0x6f99   :  { %v8567_v36 = vadd.f32 %v8893_v56, %v8566_v34  ;;  %v8598_v25 = vmax.f32 %v8572_v43, 0.0 }
0x6f9a   :  { %v9527_v20 = vpop.f32.mrf.mxu0 }
0x6f9b   :  { %v8597_v1 = vmax.f32 %v8567_v36, 0.0  ;;  %v8582_v46 = vadd.f32 %v9527_v20, %v8893_v56 }
0x6f9c   :  { %v8576_v16 = vpop.f32.mrf.mxu0 }
0x6f9d   :  { %v8577_v54 = vadd.f32 %v8893_v56, %v8576_v16  ;;  %v8600_v49 = vmax.f32 %v8582_v46, 0.0 }
0x6f9f   :  { %v8599_v59 = vmax.f32 %v8577_v54, 0.0 }
0x6fb0   :  { %v7972_v21 = vpop.permute.xlu1 %7971 }
0x6fbc   :  { %v7955_v5 = vpop.permute.xlu0 %7954 }
0x6fbd   :  { %v7957_v12 = vmul.f32 %v7955_v5, %v7952_v60 }
0x6fbf   :  { %7961 = vrot.lane.b32.xlu0 %v7957_v12, %s9840_s0  ;;  %v7959_v24 = vadd.f32 %v7958_v50, %v7957_v12 }
0x7031   :  { %v7962_v14 = vpop.permute.xlu0 %7961 }
0x7032   :  { %v7964_v52 = vadd.f32 %v7962_v14, %v7959_v24 }
0x7034   :  { %v7974_v53 = vadd.f32 %v7972_v21, %v7964_v52 }
0x7036   :  { %v7981_v27 = vmul.f32 %v7974_v53, %v11872_v48  ;;  %7976 = vrot.lane.b32.xlu0 %v7974_v53, %s9839_s28 }
0x7038   :  { %7983 = vrot.lane.b32.xlu1 %v7981_v27, %s9839_s28 }
0x70a8   :  { %v7977_v17 = vpop.permute.xlu0 %7976 }
0x70a9   :  { %7980 = vst.msk [vmem:[#allocation4 + $0x38] sm:$0xff] %vm106_vm1, %v7977_v17 }
0x70aa   :  { %v7984_v9 = vpop.permute.xlu1 %7983 }
0x70ab   :  { %v7986_v48 = vsel %vm106_vm1, %v7984_v9, 0.0 }
0x70ac   :  { %7987 = vadd.xlane.f32.xlu0 %v7986_v48 }
0x70b0   :  { %v8305_v11 = vld [vmem:[#allocation4 + $0x38] sm:$0xff] }
0x70b1   :  { %9509 = vmatmul.mubr.msk.f32.gmra.mxu1 %vm106_vm1, %v8305_v11 }
0x70b2   :  { %9542 = vmatprep.mubr.msk.f32.mxu1 %vm106_vm1, %v8597_v1 }
0x70b5   :  { %9543 = vmatmul.mubr.msk.f32.vlgmr.msra.gmra.mxu1 %vm106_vm1, %v8598_v25 }
0x70b6   :  { %9545 = vmatprep.mubr.msk.f32.mxu1 %vm106_vm1, %v8599_v59 }
0x70b9   :  { %9546 = vmatmul.mubr.msk.f32.gmra.mxu1 %vm106_vm1, %v8600_v49 }
0x7135   :  { %v7988_v44 = vpop.xlane.xlu0 %7987 }
0x7136   :  { %7989 = vst.msk [vmem:[#allocation5] sm:$0xff] %vm4138_vm14, %v7988_v44 }
0x7171   :  { %v9510_v6 = vpop.f32.mrf.mxu1 }
0x7172   :  { %v8446_v23 = vadd.f32 %v9510_v6, %v13133_v19 }
0x7173   :  { %v8430_v29 = vpop.f32.mrf.mxu1 }
0x7174   :  { %v8445_v42 = vadd.f32 %v8430_v29, %v8296_v4  ;;  %v8454_v0 = vmax.f32 %v8446_v23, 0.0 }
0x7175   :  { %v9544_v63 = vpop.f32.mrf.mxu1 }
0x7176   :  { %v8453_v55 = vmax.f32 %v8445_v42, 0.0  ;;  %v8720_v3 = vadd.f32 %v9544_v63, %v8902_v45 }
0x7177   :  { %v8714_v47 = vpop.f32.mrf.mxu1 }
0x7178   :  { %8746 = vst.msk [vmem:[%s13240_s25 + $0x18] sm:$0xff] %vm106_vm1, %v8720_v3  ;;  %v8715_v41 = vadd.f32 %v8902_v45, %v8714_v47  ;;  %9528 = vmatprep.mubr.msk.f32.mxu0 %vm106_vm1, %v8453_v55 }
0x7179   :  { %9529 = vmatmul.mubr.msk.f32.gmra.mxu0 %vm106_vm1, %v8454_v0  ;;  %v9547_v19 = vpop.f32.mrf.mxu1 }
0x717a   :  { %8745 = vst.msk [vmem:[%s13240_s25 + $0x10] sm:$0xff] %vm106_vm1, %v8715_v41  ;;  %v8730_v13 = vadd.f32 %v9547_v19, %v8902_v45  ;;  %9539 = vmatprep.mubr.msk.f32.mxu0 %vm106_vm1, %v8595_v33 }
0x717b   :  { %v8724_v40 = vpop.f32.mrf.mxu1 }
0x717c   :  { %8748 = vst.msk [vmem:[%s13240_s25 + $0x28] sm:$0xff] %vm106_vm1, %v8730_v13  ;;  %v8725_v61 = vadd.f32 %v8902_v45, %v8724_v40 }
0x717d   :  { %9540 = vmatmul.mubr.msk.f32.vlgmr.msra.gmra.mxu0 %vm106_vm1, %v8596_v8 }
0x717e   :  { %8747 = vst.msk [vmem:[%s13240_s25 + $0x20] sm:$0xff] %vm106_vm1, %v8725_v61 }
0x7239   :  { %v9530_v2 = vpop.f32.mrf.mxu0 }
0x723a   :  { %v8592_v58 = vadd.f32 %v9530_v2, %v8893_v56 }
0x723b   :  { %v8586_v38 = vpop.f32.mrf.mxu0 }
0x723c   :  { %v8587_v26 = vadd.f32 %v8893_v56, %v8586_v38  ;;  %v8602_v18 = vmax.f32 %v8592_v58, 0.0 }
0x723d   :  { %v9541_v30 = vpop.f32.mrf.mxu0 }
0x723e   :  { %v8601_v31 = vmax.f32 %v8587_v26, 0.0  ;;  %v8710_v10 = vadd.f32 %v9541_v30, %v8902_v45 }
0x723f   :  { %v8704_v51 = vpop.f32.mrf.mxu0 }
0x7240   :  { %8744 = vst.msk [vmem:[%s13240_s25 + $0x8] sm:$0xff] %vm106_vm1, %v8710_v10  ;;  %v8705_v60 = vadd.f32 %v8902_v45, %v8704_v51  ;;  %9548 = vmatprep.mubr.msk.f32.mxu1 %vm106_vm1, %v8601_v31 }
0x7241   :  { %9549 = vmatmul.mubr.msk.f32.gmra.mxu1 %vm106_vm1, %v8602_v18 }
0x7242   :  { %8743 = vst.msk [vmem:[%s13240_s25] sm:$0xff] %vm106_vm1, %v8705_v60 }
0x7301   :  { %v9550_v5 = vpop.f32.mrf.mxu1 }
0x7302   :  { %v8740_v12 = vadd.f32 %v9550_v5, %v8902_v45 }
0x7303   :  { %v8734_v22 = vpop.f32.mrf.mxu1 }
0x7304   :  { %8750 = vst.msk [vmem:[%s13240_s25 + $0x38] sm:$0xff] %vm106_vm1, %v8740_v12  ;;  %v8735_v35 = vadd.f32 %v8902_v45, %v8734_v22 }
0x7306   :  { %8749 = vst.msk [vmem:[%s13240_s25 + $0x30] sm:$0xff] %vm106_vm1, %v8735_v35 }

</bundles_post_ra>
